<compile_context>
chip_gen: v5e
topology: v5e:2x2
jax: 0.10.0
libtpu: 0.0.40
codegen_flags: <defaults>
</compile_context>

<pallas_src>
import functools

import jax
import jax.numpy as jnp
import numpy as np
from jax.experimental import pallas as pl
from jax.experimental.pallas import tpu as pltpu

STEM_W = 16
STAGE_W = (32, 64, 96, 128)   # widths of layer1..layer4 outputs
C_PAD = 128                   # every channel dim padded to one full lane group
K_STEM = 32                   # stem im2col K (3*3*3 = 27) padded to 32
IN_H = IN_W = 32              # spatial size of the network input (NCHW: 32x32)


# ----------------------------- Pallas kernel --------------------------------
def _encoder_kernel(*refs):
    """Whole encoder for B images per grid step, fully VMEM-resident.

    refs = (a_stem, w_stem, b_stem, [wap, wb, wc, bias, sel] * n_blocks, out)
      a_stem : [1, B*Ho*Wo, 32]  im2col'd stem input (K padded to 32)
      w_stem : [32, 128]         stem weight, BN scale folded
      b_stem : [1, 128]          stem folded-BN bias
      wap    : [128, 256]        conv-a | proj 1x1 weights packed along N
      wb     : [1152, 128]       3x3 conv weights, 9 taps stacked along K
      wc     : [128, 128]        1x1 expand weight
      bias   : [4, 128]          (a, b, c, proj) folded-BN biases
      sel    : [9, Mo, Mi]       0/1 tap row-selection matrices (per image)
      out    : [1, B, 128]
    """
    a_ref, wst_ref, bst_ref = refs[0], refs[1], refs[2]
    out_ref = refs[-1]
    blk_refs = refs[3:-1]
    n_blocks = len(blk_refs) // 5
    B = out_ref.shape[1]                      # images per grid step (static)

    # ---- stem: 3x3 s2 conv (im2col'd outside) + folded BN + ReLU ----
    x = jnp.dot(a_ref[0], wst_ref[...], preferred_element_type=jnp.float32)
    x = jnp.maximum(x + bst_ref[...], 0.0).astype(jnp.bfloat16)   # [B*256, 128]

    # ---- residual bottleneck blocks ----
    for i in range(n_blocks):
        wap_ref, wb_ref, wc_ref, bias_ref, sel_ref = blk_refs[5 * i: 5 * i + 5]
        n_taps, mo, mi = sel_ref.shape
        ba = bias_ref[0:1, :]
        bb = bias_ref[1:2, :]
        bc = bias_ref[2:3, :]
        bp = bias_ref[3:4, :]

        # 1x1 reduce (wa) and 1x1 projection (wp) packed to N=256: one matmul
        # on the whole batched activation.  BN folded; proj bias added later.
        y = jnp.dot(x, wap_ref[...], preferred_element_type=jnp.float32)  # [B*mi, 256]
        h = jnp.maximum(y[:, :C_PAD] + ba, 0.0).astype(jnp.bfloat16)
        p = y[:, C_PAD:].astype(jnp.bfloat16)        # proj at full resolution

        sels = [sel_ref[t] for t in range(n_taps)]   # each [mo, mi] bf16 0/1

        # Spatial gather (stride-2 taps / shortcut subsample) per image; the
        # 9 gathered taps are concatenated along lanes so conv-b becomes a
        # single K=1152 matmul over the whole batch.
        g_rows, sc_rows = [], []
        for b in range(B):
            h_b = h[b * mi:(b + 1) * mi]
            p_b = p[b * mi:(b + 1) * mi]
            taps = [
                jnp.dot(sels[t], h_b, preferred_element_type=jnp.float32)
                .astype(jnp.bfloat16)
                for t in range(n_taps)
            ]
            g_rows.append(jnp.concatenate(taps, axis=-1))          # [mo, 1152]
            sc_rows.append(                                        # centre tap
                jnp.dot(sels[4], p_b, preferred_element_type=jnp.float32))
        g = jnp.concatenate(g_rows, axis=0)                        # [B*mo, 1152]
        shortcut = jnp.concatenate(sc_rows, axis=0) + bp           # [B*mo, 128]

        # 3x3 stride-2 conv: one matmul, f32 accumulation inside the MXU.
        hb = jnp.dot(g, wb_ref[...], preferred_element_type=jnp.float32)
        hb = jnp.maximum(hb + bb, 0.0).astype(jnp.bfloat16)        # [B*mo, 128]

        # 1x1 expand + BN + residual add + ReLU (fused epilogue), bf16 carry.
        x = jnp.maximum(
            jnp.dot(hb, wc_ref[...], preferred_element_type=jnp.float32)
            + bc + shortcut, 0.0).astype(jnp.bfloat16)             # [B*mo, 128]
        # TODO(synk): Squeeze-Excitation branch (present in regnet_y_*) omitted.

    out_ref[0] = x.astype(out_ref.dtype)          # final x is [B, 128]


# --------------------- ahead-of-time parameter fusion ------------------------
def _fold_1x1(p):
    _, _, cin, cout = p["w"].shape
    w = p["w"].reshape(cin, cout) * p["scale"][None, :]
    w = jnp.pad(w, ((0, C_PAD - cin), (0, C_PAD - cout)))
    b = jnp.pad(p["bias"], (0, C_PAD - cout))
    return w.astype(jnp.bfloat16), b.astype(jnp.float32)


def _fold_3x3_stacked(p):
    """3x3 weights with BN folded, 9 taps stacked along K -> [1152, 128]."""
    kh, kw, cin, cout = p["w"].shape
    w = (p["w"] * p["scale"][None, None, None, :]).reshape(kh * kw, cin, cout)
    w = jnp.pad(w, ((0, 0), (0, C_PAD - cin), (0, C_PAD - cout)))
    w = w.reshape(kh * kw * C_PAD, C_PAD)
    b = jnp.pad(p["bias"], (0, C_PAD - cout))
    return w.astype(jnp.bfloat16), b.astype(jnp.float32)


def _fold_stem(p):
    kh, kw, cin, cout = p["w"].shape
    w = (p["w"] * p["scale"][None, None, None, :]).reshape(kh * kw * cin, cout)
    w = jnp.pad(w, ((0, K_STEM - kh * kw * cin), (0, C_PAD - cout)))
    b = jnp.pad(p["bias"], (0, C_PAD - cout)).reshape(1, C_PAD)
    return w.astype(jnp.bfloat16), b.astype(jnp.float32)


def _selection_matrices(h_in, w_in, stride=2):
    """0/1 row-gather matrices for the 9 taps of a 3x3 stride-2 pad-1 conv
    (single image, rows ordered i*W + j).  All-zero rows = zero padding."""
    ho, wo = h_in // stride, w_in // stride
    s = np.zeros((9, ho * wo, h_in * w_in), np.float32)
    for di in range(3):
        for dj in range(3):
            t = di * 3 + dj
            for io in range(ho):
                ii = stride * io + di - 1
                if not (0 <= ii < h_in):
                    continue
                for jo in range(wo):
                    jj = stride * jo + dj - 1
                    if 0 <= jj < w_in:
                        s[t, io * wo + jo, ii * w_in + jj] = 1.0
    return jnp.asarray(s, jnp.bfloat16)


def fuse_encoder_params(params):
    """Fold BN into bf16 weights, pad channels to 128 lanes, pack wa|wp along
    N, stack 3x3 tap weights along K, and build tap selection matrices."""
    w_stem, b_stem = _fold_stem(params["stem"])
    fused = {"w_stem": w_stem, "b_stem": b_stem, "blocks": []}
    h = IN_H // 2                       # stem halves the spatial size
    for i in range(len(STAGE_W)):
        blk = params[f"block{i + 1}"]
        wa, ba = _fold_1x1(blk["a"])
        wc, bc = _fold_1x1(blk["c"])
        wp, bp = _fold_1x1(blk["proj"])
        wb, bb = _fold_3x3_stacked(blk["b"])
        fused["blocks"].append({
            "wap": jnp.concatenate([wa, wp], axis=1),   # [128, 256] bf16
            "wb": wb,                                   # [1152, 128] bf16
            "wc": wc,                                   # [128, 128] bf16
            "bias": jnp.stack([ba, bb, bc, bp]),        # [4, 128] f32
            "sel": _selection_matrices(h, h),           # [9, Mo, Mi] bf16
        })
        h //= 2
    return fused


# --------------------------- parameter initialization ------------------------
def _init_conv_bn(key, kh, kw, cin, cout):
    k1, k2, k3 = jax.random.split(key, 3)
    fan_in = kh * kw * cin
    w = jax.random.normal(k1, (kh, kw, cin, cout), jnp.float32) * (2.0 / fan_in) ** 0.5
    # inference-mode BatchNorm folded to per-channel affine: y = scale*conv + bias
    scale = 1.0 + 0.1 * jax.random.normal(k2, (cout,), jnp.float32)
    bias = 0.1 * jax.random.normal(k3, (cout,), jnp.float32)
    return {"w": w, "scale": scale, "bias": bias}


def _init_block(key, w_in, w_out):
    ka, kb, kc, kp = jax.random.split(key, 4)
    return {
        "a": _init_conv_bn(ka, 1, 1, w_in, w_out),
        # TODO(synk): RegNet group conv (group width) simplified to groups=1.
        "b": _init_conv_bn(kb, 3, 3, w_out, w_out),
        "c": _init_conv_bn(kc, 1, 1, w_out, w_out),
        "proj": _init_conv_bn(kp, 1, 1, w_in, w_out),
    }


def init_encoder_params(key):
    keys = jax.random.split(key, 1 + len(STAGE_W))
    params = {"stem": _init_conv_bn(keys[0], 3, 3, 3, STEM_W)}
    w_in = STEM_W
    for i, w_out in enumerate(STAGE_W):
        params[f"block{i + 1}"] = _init_block(keys[i + 1], w_in, w_out)
        w_in = w_out
    return params


# ------------------------------ encoder forward -------------------------------
def _im2col_stem(x_nhwc, ksize=3, stride=2, pad=1):
    """Tiny im2col of the raw 3-channel input (per image rows)."""
    n, h, w, c = x_nhwc.shape
    x_p = jnp.pad(x_nhwc, ((0, 0), (pad, pad), (pad, pad), (0, 0)))
    ho = (h + 2 * pad - ksize) // stride + 1
    wo = (w + 2 * pad - ksize) // stride + 1
    cols = []
    for di in range(ksize):
        for dj in range(ksize):
            cols.append(x_p[:, di:di + (ho - 1) * stride + 1:stride,
                               dj:dj + (wo - 1) * stride + 1:stride, :])
    patches = jnp.stack(cols, axis=3)                    # [N, Ho, Wo, 9, C]
    return patches.reshape(n, ho * wo, ksize * ksize * c), (ho, wo)


@functools.partial(jax.jit, static_argnames=("imgs_per_step",))
def encoder_forward(fused, x_nchw, imgs_per_step=2):
    x = jnp.transpose(x_nchw, (0, 2, 3, 1))              # NCHW -> NHWC
    n = x.shape[0]
    B = imgs_per_step
    n_pad = ((n + B - 1) // B) * B
    if n_pad != n:
        x = jnp.pad(x, ((0, n_pad - n), (0, 0), (0, 0), (0, 0)))
    steps = n_pad // B

    a, (ho, wo) = _im2col_stem(x)                        # [n_pad, Ho*Wo, 27]
    k = a.shape[-1]
    a = jnp.pad(a, ((0, 0), (0, 0), (0, K_STEM - k))).astype(jnp.bfloat16)
    a = a.reshape(steps, B * ho * wo, K_STEM)            # B images per step

    args = [a, fused["w_stem"], fused["b_stem"]]
    in_specs = [
        pl.BlockSpec((1, B * ho * wo, K_STEM), lambda i: (i, 0, 0)),
        pl.BlockSpec((K_STEM, C_PAD), lambda i: (0, 0)),
        pl.BlockSpec((1, C_PAD), lambda i: (0, 0)),
    ]
    for blk in fused["blocks"]:
        for name in ("wap", "wb", "wc", "bias", "sel"):
            arr = blk[name]
            args.append(arr)
            in_specs.append(
                pl.BlockSpec(arr.shape, lambda i, _nd=arr.ndim: (0,) * _nd))

    out = pl.pallas_call(
        _encoder_kernel,
        out_shape=jax.ShapeDtypeStruct((steps, B, C_PAD), jnp.float32),
        grid=(steps,),
        in_specs=in_specs,
        out_specs=pl.BlockSpec((1, B, C_PAD), lambda i: (i, 0, 0)),
        compiler_params=pltpu.CompilerParams(
            dimension_semantics=("parallel",),           # batch steps over TCs
            vmem_limit_bytes=32 * 1024 * 1024),
    )(*args)

    c_out = STAGE_W[-1]
    out = out.reshape(n_pad, C_PAD)[:n, :c_out]
    return out.reshape(n, c_out, 1, 1)                   # NCHW [N, 128, 1, 1]


# ----------------------------------- main -------------------------------------
if __name__ == "__main__":
    key = jax.random.PRNGKey(0)
    k_param, k_input = jax.random.split(key)
    params = init_encoder_params(k_param)
    fused = fuse_encoder_params(params)      # BN fold + pack + tap matrices, once
    x = jax.random.normal(k_input, (4, 3, IN_H, IN_W), jnp.float32)  # NCHW input
    y = encoder_forward(fused, x, imgs_per_step=2)   # grid=(2,), 2 images/step
    jax.block_until_ready(y)
    assert y.shape == (4, STAGE_W[-1], 1, 1), y.shape
    print("KERNEL_OK")
</pallas_src>

<mosaic_0001>
module attributes {stable_mosaic.version = 11 : i64} {
  func.func @_encoder_kernel(%arg0: i32, %arg1: memref<1x512x32xbf16, #tpu.memory_space<vmem>>, %arg2: memref<32x128xbf16, #tpu.memory_space<vmem>>, %arg3: memref<1x128xf32, #tpu.memory_space<vmem>>, %arg4: memref<128x256xbf16, #tpu.memory_space<vmem>>, %arg5: memref<1152x128xbf16, #tpu.memory_space<vmem>>, %arg6: memref<128x128xbf16, #tpu.memory_space<vmem>>, %arg7: memref<4x128xf32, #tpu.memory_space<vmem>>, %arg8: memref<9x64x256xbf16, #tpu.memory_space<vmem>>, %arg9: memref<128x256xbf16, #tpu.memory_space<vmem>>, %arg10: memref<1152x128xbf16, #tpu.memory_space<vmem>>, %arg11: memref<128x128xbf16, #tpu.memory_space<vmem>>, %arg12: memref<4x128xf32, #tpu.memory_space<vmem>>, %arg13: memref<9x16x64xbf16, #tpu.memory_space<vmem>>, %arg14: memref<128x256xbf16, #tpu.memory_space<vmem>>, %arg15: memref<1152x128xbf16, #tpu.memory_space<vmem>>, %arg16: memref<128x128xbf16, #tpu.memory_space<vmem>>, %arg17: memref<4x128xf32, #tpu.memory_space<vmem>>, %arg18: memref<9x4x16xbf16, #tpu.memory_space<vmem>>, %arg19: memref<128x256xbf16, #tpu.memory_space<vmem>>, %arg20: memref<1152x128xbf16, #tpu.memory_space<vmem>>, %arg21: memref<128x128xbf16, #tpu.memory_space<vmem>>, %arg22: memref<4x128xf32, #tpu.memory_space<vmem>>, %arg23: memref<9x1x4xbf16, #tpu.memory_space<vmem>>, %arg24: memref<1x2x128xf32, #tpu.memory_space<vmem>>) attributes {dimension_semantics = [#tpu.dimension_semantics<parallel>], iteration_bounds = array<i64: 2>, scalar_prefetch = 0 : i64, scratch_operands = 0 : i64, tpu.core_type = #tpu.core_type<tc>, window_params = [{transform_indices = @transform_0, window_bounds = array<i64: 1, 512, 32>}, {pipeline_mode = #tpu.pipeline_mode<synchronous>, transform_indices = @transform_1, window_bounds = array<i64: 32, 128>}, {pipeline_mode = #tpu.pipeline_mode<synchronous>, transform_indices = @transform_2, window_bounds = array<i64: 1, 128>}, {pipeline_mode = #tpu.pipeline_mode<synchronous>, transform_indices = @transform_3, window_bounds = array<i64: 128, 256>}, {pipeline_mode = #tpu.pipeline_mode<synchronous>, transform_indices = @transform_4, window_bounds = array<i64: 1152, 128>}, {pipeline_mode = #tpu.pipeline_mode<synchronous>, transform_indices = @transform_5, window_bounds = array<i64: 128, 128>}, {pipeline_mode = #tpu.pipeline_mode<synchronous>, transform_indices = @transform_6, window_bounds = array<i64: 4, 128>}, {pipeline_mode = #tpu.pipeline_mode<synchronous>, transform_indices = @transform_7, window_bounds = array<i64: 9, 64, 256>}, {pipeline_mode = #tpu.pipeline_mode<synchronous>, transform_indices = @transform_8, window_bounds = array<i64: 128, 256>}, {pipeline_mode = #tpu.pipeline_mode<synchronous>, transform_indices = @transform_9, window_bounds = array<i64: 1152, 128>}, {pipeline_mode = #tpu.pipeline_mode<synchronous>, transform_indices = @transform_10, window_bounds = array<i64: 128, 128>}, {pipeline_mode = #tpu.pipeline_mode<synchronous>, transform_indices = @transform_11, window_bounds = array<i64: 4, 128>}, {pipeline_mode = #tpu.pipeline_mode<synchronous>, transform_indices = @transform_12, window_bounds = array<i64: 9, 16, 64>}, {pipeline_mode = #tpu.pipeline_mode<synchronous>, transform_indices = @transform_13, window_bounds = array<i64: 128, 256>}, {pipeline_mode = #tpu.pipeline_mode<synchronous>, transform_indices = @transform_14, window_bounds = array<i64: 1152, 128>}, {pipeline_mode = #tpu.pipeline_mode<synchronous>, transform_indices = @transform_15, window_bounds = array<i64: 128, 128>}, {pipeline_mode = #tpu.pipeline_mode<synchronous>, transform_indices = @transform_16, window_bounds = array<i64: 4, 128>}, {pipeline_mode = #tpu.pipeline_mode<synchronous>, transform_indices = @transform_17, window_bounds = array<i64: 9, 4, 16>}, {pipeline_mode = #tpu.pipeline_mode<synchronous>, transform_indices = @transform_18, window_bounds = array<i64: 128, 256>}, {pipeline_mode = #tpu.pipeline_mode<synchronous>, transform_indices = @transform_19, window_bounds = array<i64: 1152, 128>}, {pipeline_mode = #tpu.pipeline_mode<synchronous>, transform_indices = @transform_20, window_bounds = array<i64: 128, 128>}, {pipeline_mode = #tpu.pipeline_mode<synchronous>, transform_indices = @transform_21, window_bounds = array<i64: 4, 128>}, {pipeline_mode = #tpu.pipeline_mode<synchronous>, transform_indices = @transform_22, window_bounds = array<i64: 9, 1, 4>}, {transform_indices = @transform_23, window_bounds = array<i64: 1, 2, 128>}]} {
    %c0 = arith.constant 0 : index
    %c0_0 = arith.constant 0 : index
    %c0_1 = arith.constant 0 : index
    %0 = vector.load %arg1[%c0, %c0_0, %c0_1] : memref<1x512x32xbf16, #tpu.memory_space<vmem>>, vector<1x512x32xbf16>
    %1 = vector.shape_cast %0 : vector<1x512x32xbf16> to vector<512x32xbf16>
    %c0_2 = arith.constant 0 : index
    %c0_3 = arith.constant 0 : index
    %2 = vector.load %arg2[%c0_2, %c0_3] : memref<32x128xbf16, #tpu.memory_space<vmem>>, vector<32x128xbf16>
    %cst = arith.constant dense<0.000000e+00> : vector<512x128xf32>
    %3 = tpu.matmul %1, %2, %cst {dimension_numbers = #tpu.dot_dimension_numbers<[1], [0], [0], [1], [0, 0, 1, 1], [], []>} : vector<512x32xbf16>, vector<32x128xbf16>, vector<512x128xf32> -> vector<512x128xf32>
    %c0_4 = arith.constant 0 : index
    %c0_5 = arith.constant 0 : index
    %4 = vector.load %arg3[%c0_4, %c0_5] : memref<1x128xf32, #tpu.memory_space<vmem>>, vector<1x128xf32>
    %5 = vector.broadcast %4 : vector<1x128xf32> to vector<512x128xf32>
    %6 = arith.addf %3, %5 : vector<512x128xf32>
    %cst_6 = arith.constant 0.000000e+00 : f32
    %7 = vector.broadcast %cst_6 : f32 to vector<512x128xf32>
    %8 = arith.maximumf %6, %7 : vector<512x128xf32>
    %9 = arith.truncf %8 : vector<512x128xf32> to vector<512x128xbf16>
    %c0_7 = arith.constant 0 : index
    %c0_8 = arith.constant 0 : index
    %10 = vector.load %arg7[%c0_7, %c0_8] : memref<4x128xf32, #tpu.memory_space<vmem>>, vector<1x128xf32>
    %c1 = arith.constant 1 : index
    %c0_9 = arith.constant 0 : index
    %11 = vector.load %arg7[%c1, %c0_9] : memref<4x128xf32, #tpu.memory_space<vmem>>, vector<1x128xf32>
    %c2 = arith.constant 2 : index
    %c0_10 = arith.constant 0 : index
    %12 = vector.load %arg7[%c2, %c0_10] : memref<4x128xf32, #tpu.memory_space<vmem>>, vector<1x128xf32>
    %c3 = arith.constant 3 : index
    %c0_11 = arith.constant 0 : index
    %13 = vector.load %arg7[%c3, %c0_11] : memref<4x128xf32, #tpu.memory_space<vmem>>, vector<1x128xf32>
    %c0_12 = arith.constant 0 : index
    %c0_13 = arith.constant 0 : index
    %14 = vector.load %arg4[%c0_12, %c0_13] : memref<128x256xbf16, #tpu.memory_space<vmem>>, vector<128x256xbf16>
    %cst_14 = arith.constant dense<0.000000e+00> : vector<512x256xf32>
    %15 = tpu.matmul %9, %14, %cst_14 {dimension_numbers = #tpu.dot_dimension_numbers<[1], [0], [0], [1], [0, 0, 1, 1], [], []>} : vector<512x128xbf16>, vector<128x256xbf16>, vector<512x256xf32> -> vector<512x256xf32>
    %16 = vector.extract_strided_slice %15 {offsets = [0, 0], sizes = [512, 128], strides = [1, 1]} : vector<512x256xf32> to vector<512x128xf32>
    %17 = vector.broadcast %10 : vector<1x128xf32> to vector<512x128xf32>
    %18 = arith.addf %16, %17 : vector<512x128xf32>
    %cst_15 = arith.constant 0.000000e+00 : f32
    %19 = vector.broadcast %cst_15 : f32 to vector<512x128xf32>
    %20 = arith.maximumf %18, %19 : vector<512x128xf32>
    %21 = arith.truncf %20 : vector<512x128xf32> to vector<512x128xbf16>
    %22 = vector.extract_strided_slice %15 {offsets = [0, 128], sizes = [512, 128], strides = [1, 1]} : vector<512x256xf32> to vector<512x128xf32>
    %23 = arith.truncf %22 : vector<512x128xf32> to vector<512x128xbf16>
    %c0_16 = arith.constant 0 : index
    %c0_17 = arith.constant 0 : index
    %c0_18 = arith.constant 0 : index
    %24 = vector.load %arg8[%c0_16, %c0_17, %c0_18] : memref<9x64x256xbf16, #tpu.memory_space<vmem>>, vector<1x64x256xbf16>
    %25 = vector.shape_cast %24 : vector<1x64x256xbf16> to vector<64x256xbf16>
    %c1_19 = arith.constant 1 : index
    %c0_20 = arith.constant 0 : index
    %c0_21 = arith.constant 0 : index
    %26 = vector.load %arg8[%c1_19, %c0_20, %c0_21] : memref<9x64x256xbf16, #tpu.memory_space<vmem>>, vector<1x64x256xbf16>
    %27 = vector.shape_cast %26 : vector<1x64x256xbf16> to vector<64x256xbf16>
    %c2_22 = arith.constant 2 : index
    %c0_23 = arith.constant 0 : index
    %c0_24 = arith.constant 0 : index
    %28 = vector.load %arg8[%c2_22, %c0_23, %c0_24] : memref<9x64x256xbf16, #tpu.memory_space<vmem>>, vector<1x64x256xbf16>
    %29 = vector.shape_cast %28 : vector<1x64x256xbf16> to vector<64x256xbf16>
    %c3_25 = arith.constant 3 : index
    %c0_26 = arith.constant 0 : index
    %c0_27 = arith.constant 0 : index
    %30 = vector.load %arg8[%c3_25, %c0_26, %c0_27] : memref<9x64x256xbf16, #tpu.memory_space<vmem>>, vector<1x64x256xbf16>
    %31 = vector.shape_cast %30 : vector<1x64x256xbf16> to vector<64x256xbf16>
    %c4 = arith.constant 4 : index
    %c0_28 = arith.constant 0 : index
    %c0_29 = arith.constant 0 : index
    %32 = vector.load %arg8[%c4, %c0_28, %c0_29] : memref<9x64x256xbf16, #tpu.memory_space<vmem>>, vector<1x64x256xbf16>
    %33 = vector.shape_cast %32 : vector<1x64x256xbf16> to vector<64x256xbf16>
    %c5 = arith.constant 5 : index
    %c0_30 = arith.constant 0 : index
    %c0_31 = arith.constant 0 : index
    %34 = vector.load %arg8[%c5, %c0_30, %c0_31] : memref<9x64x256xbf16, #tpu.memory_space<vmem>>, vector<1x64x256xbf16>
    %35 = vector.shape_cast %34 : vector<1x64x256xbf16> to vector<64x256xbf16>
    %c6 = arith.constant 6 : index
    %c0_32 = arith.constant 0 : index
    %c0_33 = arith.constant 0 : index
    %36 = vector.load %arg8[%c6, %c0_32, %c0_33] : memref<9x64x256xbf16, #tpu.memory_space<vmem>>, vector<1x64x256xbf16>
    %37 = vector.shape_cast %36 : vector<1x64x256xbf16> to vector<64x256xbf16>
    %c7 = arith.constant 7 : index
    %c0_34 = arith.constant 0 : index
    %c0_35 = arith.constant 0 : index
    %38 = vector.load %arg8[%c7, %c0_34, %c0_35] : memref<9x64x256xbf16, #tpu.memory_space<vmem>>, vector<1x64x256xbf16>
    %39 = vector.shape_cast %38 : vector<1x64x256xbf16> to vector<64x256xbf16>
    %c8 = arith.constant 8 : index
    %c0_36 = arith.constant 0 : index
    %c0_37 = arith.constant 0 : index
    %40 = vector.load %arg8[%c8, %c0_36, %c0_37] : memref<9x64x256xbf16, #tpu.memory_space<vmem>>, vector<1x64x256xbf16>
    %41 = vector.shape_cast %40 : vector<1x64x256xbf16> to vector<64x256xbf16>
    %42 = vector.extract_strided_slice %21 {offsets = [0, 0], sizes = [256, 128], strides = [1, 1]} : vector<512x128xbf16> to vector<256x128xbf16>
    %43 = vector.extract_strided_slice %23 {offsets = [0, 0], sizes = [256, 128], strides = [1, 1]} : vector<512x128xbf16> to vector<256x128xbf16>
    %cst_38 = arith.constant dense<0.000000e+00> : vector<64x128xf32>
    %44 = tpu.matmul %25, %42, %cst_38 {dimension_numbers = #tpu.dot_dimension_numbers<[1], [0], [0], [1], [0, 0, 1, 1], [], []>} : vector<64x256xbf16>, vector<256x128xbf16>, vector<64x128xf32> -> vector<64x128xf32>
    %45 = arith.truncf %44 : vector<64x128xf32> to vector<64x128xbf16>
    %cst_39 = arith.constant dense<0.000000e+00> : vector<64x128xf32>
    %46 = tpu.matmul %27, %42, %cst_39 {dimension_numbers = #tpu.dot_dimension_numbers<[1], [0], [0], [1], [0, 0, 1, 1], [], []>} : vector<64x256xbf16>, vector<256x128xbf16>, vector<64x128xf32> -> vector<64x128xf32>
    %47 = arith.truncf %46 : vector<64x128xf32> to vector<64x128xbf16>
    %cst_40 = arith.constant dense<0.000000e+00> : vector<64x128xf32>
    %48 = tpu.matmul %29, %42, %cst_40 {dimension_numbers = #tpu.dot_dimension_numbers<[1], [0], [0], [1], [0, 0, 1, 1], [], []>} : vector<64x256xbf16>, vector<256x128xbf16>, vector<64x128xf32> -> vector<64x128xf32>
    %49 = arith.truncf %48 : vector<64x128xf32> to vector<64x128xbf16>
    %cst_41 = arith.constant dense<0.000000e+00> : vector<64x128xf32>
    %50 = tpu.matmul %31, %42, %cst_41 {dimension_numbers = #tpu.dot_dimension_numbers<[1], [0], [0], [1], [0, 0, 1, 1], [], []>} : vector<64x256xbf16>, vector<256x128xbf16>, vector<64x128xf32> -> vector<64x128xf32>
    %51 = arith.truncf %50 : vector<64x128xf32> to vector<64x128xbf16>
    %cst_42 = arith.constant dense<0.000000e+00> : vector<64x128xf32>
    %52 = tpu.matmul %33, %42, %cst_42 {dimension_numbers = #tpu.dot_dimension_numbers<[1], [0], [0], [1], [0, 0, 1, 1], [], []>} : vector<64x256xbf16>, vector<256x128xbf16>, vector<64x128xf32> -> vector<64x128xf32>
    %53 = arith.truncf %52 : vector<64x128xf32> to vector<64x128xbf16>
    %cst_43 = arith.constant dense<0.000000e+00> : vector<64x128xf32>
    %54 = tpu.matmul %35, %42, %cst_43 {dimension_numbers = #tpu.dot_dimension_numbers<[1], [0], [0], [1], [0, 0, 1, 1], [], []>} : vector<64x256xbf16>, vector<256x128xbf16>, vector<64x128xf32> -> vector<64x128xf32>
    %55 = arith.truncf %54 : vector<64x128xf32> to vector<64x128xbf16>
    %cst_44 = arith.constant dense<0.000000e+00> : vector<64x128xf32>
    %56 = tpu.matmul %37, %42, %cst_44 {dimension_numbers = #tpu.dot_dimension_numbers<[1], [0], [0], [1], [0, 0, 1, 1], [], []>} : vector<64x256xbf16>, vector<256x128xbf16>, vector<64x128xf32> -> vector<64x128xf32>
    %57 = arith.truncf %56 : vector<64x128xf32> to vector<64x128xbf16>
    %cst_45 = arith.constant dense<0.000000e+00> : vector<64x128xf32>
    %58 = tpu.matmul %39, %42, %cst_45 {dimension_numbers = #tpu.dot_dimension_numbers<[1], [0], [0], [1], [0, 0, 1, 1], [], []>} : vector<64x256xbf16>, vector<256x128xbf16>, vector<64x128xf32> -> vector<64x128xf32>
    %59 = arith.truncf %58 : vector<64x128xf32> to vector<64x128xbf16>
    %cst_46 = arith.constant dense<0.000000e+00> : vector<64x128xf32>
    %60 = tpu.matmul %41, %42, %cst_46 {dimension_numbers = #tpu.dot_dimension_numbers<[1], [0], [0], [1], [0, 0, 1, 1], [], []>} : vector<64x256xbf16>, vector<256x128xbf16>, vector<64x128xf32> -> vector<64x128xf32>
    %61 = arith.truncf %60 : vector<64x128xf32> to vector<64x128xbf16>
    %62 = tpu.concatenate %45, %47, %49, %51, %53, %55, %57, %59, %61 in 1 : vector<64x128xbf16>, vector<64x128xbf16>, vector<64x128xbf16>, vector<64x128xbf16>, vector<64x128xbf16>, vector<64x128xbf16>, vector<64x128xbf16>, vector<64x128xbf16>, vector<64x128xbf16> -> vector<64x1152xbf16>
    %cst_47 = arith.constant dense<0.000000e+00> : vector<64x128xf32>
    %63 = tpu.matmul %33, %43, %cst_47 {dimension_numbers = #tpu.dot_dimension_numbers<[1], [0], [0], [1], [0, 0, 1, 1], [], []>} : vector<64x256xbf16>, vector<256x128xbf16>, vector<64x128xf32> -> vector<64x128xf32>
    %64 = vector.extract_strided_slice %21 {offsets = [256, 0], sizes = [256, 128], strides = [1, 1]} : vector<512x128xbf16> to vector<256x128xbf16>
    %65 = vector.extract_strided_slice %23 {offsets = [256, 0], sizes = [256, 128], strides = [1, 1]} : vector<512x128xbf16> to vector<256x128xbf16>
    %cst_48 = arith.constant dense<0.000000e+00> : vector<64x128xf32>
    %66 = tpu.matmul %25, %64, %cst_48 {dimension_numbers = #tpu.dot_dimension_numbers<[1], [0], [0], [1], [0, 0, 1, 1], [], []>} : vector<64x256xbf16>, vector<256x128xbf16>, vector<64x128xf32> -> vector<64x128xf32>
    %67 = arith.truncf %66 : vector<64x128xf32> to vector<64x128xbf16>
    %cst_49 = arith.constant dense<0.000000e+00> : vector<64x128xf32>
    %68 = tpu.matmul %27, %64, %cst_49 {dimension_numbers = #tpu.dot_dimension_numbers<[1], [0], [0], [1], [0, 0, 1, 1], [], []>} : vector<64x256xbf16>, vector<256x128xbf16>, vector<64x128xf32> -> vector<64x128xf32>
    %69 = arith.truncf %68 : vector<64x128xf32> to vector<64x128xbf16>
    %cst_50 = arith.constant dense<0.000000e+00> : vector<64x128xf32>
    %70 = tpu.matmul %29, %64, %cst_50 {dimension_numbers = #tpu.dot_dimension_numbers<[1], [0], [0], [1], [0, 0, 1, 1], [], []>} : vector<64x256xbf16>, vector<256x128xbf16>, vector<64x128xf32> -> vector<64x128xf32>
    %71 = arith.truncf %70 : vector<64x128xf32> to vector<64x128xbf16>
    %cst_51 = arith.constant dense<0.000000e+00> : vector<64x128xf32>
    %72 = tpu.matmul %31, %64, %cst_51 {dimension_numbers = #tpu.dot_dimension_numbers<[1], [0], [0], [1], [0, 0, 1, 1], [], []>} : vector<64x256xbf16>, vector<256x128xbf16>, vector<64x128xf32> -> vector<64x128xf32>
    %73 = arith.truncf %72 : vector<64x128xf32> to vector<64x128xbf16>
    %cst_52 = arith.constant dense<0.000000e+00> : vector<64x128xf32>
    %74 = tpu.matmul %33, %64, %cst_52 {dimension_numbers = #tpu.dot_dimension_numbers<[1], [0], [0], [1], [0, 0, 1, 1], [], []>} : vector<64x256xbf16>, vector<256x128xbf16>, vector<64x128xf32> -> vector<64x128xf32>
    %75 = arith.truncf %74 : vector<64x128xf32> to vector<64x128xbf16>
    %cst_53 = arith.constant dense<0.000000e+00> : vector<64x128xf32>
    %76 = tpu.matmul %35, %64, %cst_53 {dimension_numbers = #tpu.dot_dimension_numbers<[1], [0], [0], [1], [0, 0, 1, 1], [], []>} : vector<64x256xbf16>, vector<256x128xbf16>, vector<64x128xf32> -> vector<64x128xf32>
    %77 = arith.truncf %76 : vector<64x128xf32> to vector<64x128xbf16>
    %cst_54 = arith.constant dense<0.000000e+00> : vector<64x128xf32>
    %78 = tpu.matmul %37, %64, %cst_54 {dimension_numbers = #tpu.dot_dimension_numbers<[1], [0], [0], [1], [0, 0, 1, 1], [], []>} : vector<64x256xbf16>, vector<256x128xbf16>, vector<64x128xf32> -> vector<64x128xf32>
    %79 = arith.truncf %78 : vector<64x128xf32> to vector<64x128xbf16>
    %cst_55 = arith.constant dense<0.000000e+00> : vector<64x128xf32>
    %80 = tpu.matmul %39, %64, %cst_55 {dimension_numbers = #tpu.dot_dimension_numbers<[1], [0], [0], [1], [0, 0, 1, 1], [], []>} : vector<64x256xbf16>, vector<256x128xbf16>, vector<64x128xf32> -> vector<64x128xf32>
    %81 = arith.truncf %80 : vector<64x128xf32> to vector<64x128xbf16>
    %cst_56 = arith.constant dense<0.000000e+00> : vector<64x128xf32>
    %82 = tpu.matmul %41, %64, %cst_56 {dimension_numbers = #tpu.dot_dimension_numbers<[1], [0], [0], [1], [0, 0, 1, 1], [], []>} : vector<64x256xbf16>, vector<256x128xbf16>, vector<64x128xf32> -> vector<64x128xf32>
    %83 = arith.truncf %82 : vector<64x128xf32> to vector<64x128xbf16>
    %84 = tpu.concatenate %67, %69, %71, %73, %75, %77, %79, %81, %83 in 1 : vector<64x128xbf16>, vector<64x128xbf16>, vector<64x128xbf16>, vector<64x128xbf16>, vector<64x128xbf16>, vector<64x128xbf16>, vector<64x128xbf16>, vector<64x128xbf16>, vector<64x128xbf16> -> vector<64x1152xbf16>
    %cst_57 = arith.constant dense<0.000000e+00> : vector<64x128xf32>
    %85 = tpu.matmul %33, %65, %cst_57 {dimension_numbers = #tpu.dot_dimension_numbers<[1], [0], [0], [1], [0, 0, 1, 1], [], []>} : vector<64x256xbf16>, vector<256x128xbf16>, vector<64x128xf32> -> vector<64x128xf32>
    %86 = tpu.concatenate %62, %84 in 0 : vector<64x1152xbf16>, vector<64x1152xbf16> -> vector<128x1152xbf16>
    %87 = tpu.concatenate %63, %85 in 0 : vector<64x128xf32>, vector<64x128xf32> -> vector<128x128xf32>
    %88 = vector.broadcast %13 : vector<1x128xf32> to vector<128x128xf32>
    %89 = arith.addf %87, %88 : vector<128x128xf32>
    %c0_58 = arith.constant 0 : index
    %c0_59 = arith.constant 0 : index
    %90 = vector.load %arg5[%c0_58, %c0_59] : memref<1152x128xbf16, #tpu.memory_space<vmem>>, vector<1152x128xbf16>
    %cst_60 = arith.constant dense<0.000000e+00> : vector<128x128xf32>
    %91 = tpu.matmul %86, %90, %cst_60 {dimension_numbers = #tpu.dot_dimension_numbers<[1], [0], [0], [1], [0, 0, 1, 1], [], []>} : vector<128x1152xbf16>, vector<1152x128xbf16>, vector<128x128xf32> -> vector<128x128xf32>
    %92 = vector.broadcast %11 : vector<1x128xf32> to vector<128x128xf32>
    %93 = arith.addf %91, %92 : vector<128x128xf32>
    %cst_61 = arith.constant 0.000000e+00 : f32
    %94 = vector.broadcast %cst_61 : f32 to vector<128x128xf32>
    %95 = arith.maximumf %93, %94 : vector<128x128xf32>
    %96 = arith.truncf %95 : vector<128x128xf32> to vector<128x128xbf16>
    %c0_62 = arith.constant 0 : index
    %c0_63 = arith.constant 0 : index
    %97 = vector.load %arg6[%c0_62, %c0_63] : memref<128x128xbf16, #tpu.memory_space<vmem>>, vector<128x128xbf16>
    %cst_64 = arith.constant dense<0.000000e+00> : vector<128x128xf32>
    %98 = tpu.matmul %96, %97, %cst_64 {dimension_numbers = #tpu.dot_dimension_numbers<[1], [0], [0], [1], [0, 0, 1, 1], [], []>} : vector<128x128xbf16>, vector<128x128xbf16>, vector<128x128xf32> -> vector<128x128xf32>
    %99 = vector.broadcast %12 : vector<1x128xf32> to vector<128x128xf32>
    %100 = arith.addf %98, %99 : vector<128x128xf32>
    %101 = arith.addf %100, %89 : vector<128x128xf32>
    %cst_65 = arith.constant 0.000000e+00 : f32
    %102 = vector.broadcast %cst_65 : f32 to vector<128x128xf32>
    %103 = arith.maximumf %101, %102 : vector<128x128xf32>
    %104 = arith.truncf %103 : vector<128x128xf32> to vector<128x128xbf16>
    %c0_66 = arith.constant 0 : index
    %c0_67 = arith.constant 0 : index
    %105 = vector.load %arg12[%c0_66, %c0_67] : memref<4x128xf32, #tpu.memory_space<vmem>>, vector<1x128xf32>
    %c1_68 = arith.constant 1 : index
    %c0_69 = arith.constant 0 : index
    %106 = vector.load %arg12[%c1_68, %c0_69] : memref<4x128xf32, #tpu.memory_space<vmem>>, vector<1x128xf32>
    %c2_70 = arith.constant 2 : index
    %c0_71 = arith.constant 0 : index
    %107 = vector.load %arg12[%c2_70, %c0_71] : memref<4x128xf32, #tpu.memory_space<vmem>>, vector<1x128xf32>
    %c3_72 = arith.constant 3 : index
    %c0_73 = arith.constant 0 : index
    %108 = vector.load %arg12[%c3_72, %c0_73] : memref<4x128xf32, #tpu.memory_space<vmem>>, vector<1x128xf32>
    %c0_74 = arith.constant 0 : index
    %c0_75 = arith.constant 0 : index
    %109 = vector.load %arg9[%c0_74, %c0_75] : memref<128x256xbf16, #tpu.memory_space<vmem>>, vector<128x256xbf16>
    %cst_76 = arith.constant dense<0.000000e+00> : vector<128x256xf32>
    %110 = tpu.matmul %104, %109, %cst_76 {dimension_numbers = #tpu.dot_dimension_numbers<[1], [0], [0], [1], [0, 0, 1, 1], [], []>} : vector<128x128xbf16>, vector<128x256xbf16>, vector<128x256xf32> -> vector<128x256xf32>
    %111 = vector.extract_strided_slice %110 {offsets = [0, 0], sizes = [128, 128], strides = [1, 1]} : vector<128x256xf32> to vector<128x128xf32>
    %112 = vector.broadcast %105 : vector<1x128xf32> to vector<128x128xf32>
    %113 = arith.addf %111, %112 : vector<128x128xf32>
    %cst_77 = arith.constant 0.000000e+00 : f32
    %114 = vector.broadcast %cst_77 : f32 to vector<128x128xf32>
    %115 = arith.maximumf %113, %114 : vector<128x128xf32>
    %116 = arith.truncf %115 : vector<128x128xf32> to vector<128x128xbf16>
    %117 = vector.extract_strided_slice %110 {offsets = [0, 128], sizes = [128, 128], strides = [1, 1]} : vector<128x256xf32> to vector<128x128xf32>
    %118 = arith.truncf %117 : vector<128x128xf32> to vector<128x128xbf16>
    %c0_78 = arith.constant 0 : index
    %c0_79 = arith.constant 0 : index
    %c0_80 = arith.constant 0 : index
    %119 = vector.load %arg13[%c0_78, %c0_79, %c0_80] : memref<9x16x64xbf16, #tpu.memory_space<vmem>>, vector<1x16x64xbf16>
    %120 = vector.shape_cast %119 : vector<1x16x64xbf16> to vector<16x64xbf16>
    %c1_81 = arith.constant 1 : index
    %c0_82 = arith.constant 0 : index
    %c0_83 = arith.constant 0 : index
    %121 = vector.load %arg13[%c1_81, %c0_82, %c0_83] : memref<9x16x64xbf16, #tpu.memory_space<vmem>>, vector<1x16x64xbf16>
    %122 = vector.shape_cast %121 : vector<1x16x64xbf16> to vector<16x64xbf16>
    %c2_84 = arith.constant 2 : index
    %c0_85 = arith.constant 0 : index
    %c0_86 = arith.constant 0 : index
    %123 = vector.load %arg13[%c2_84, %c0_85, %c0_86] : memref<9x16x64xbf16, #tpu.memory_space<vmem>>, vector<1x16x64xbf16>
    %124 = vector.shape_cast %123 : vector<1x16x64xbf16> to vector<16x64xbf16>
    %c3_87 = arith.constant 3 : index
    %c0_88 = arith.constant 0 : index
    %c0_89 = arith.constant 0 : index
    %125 = vector.load %arg13[%c3_87, %c0_88, %c0_89] : memref<9x16x64xbf16, #tpu.memory_space<vmem>>, vector<1x16x64xbf16>
    %126 = vector.shape_cast %125 : vector<1x16x64xbf16> to vector<16x64xbf16>
    %c4_90 = arith.constant 4 : index
    %c0_91 = arith.constant 0 : index
    %c0_92 = arith.constant 0 : index
    %127 = vector.load %arg13[%c4_90, %c0_91, %c0_92] : memref<9x16x64xbf16, #tpu.memory_space<vmem>>, vector<1x16x64xbf16>
    %128 = vector.shape_cast %127 : vector<1x16x64xbf16> to vector<16x64xbf16>
    %c5_93 = arith.constant 5 : index
    %c0_94 = arith.constant 0 : index
    %c0_95 = arith.constant 0 : index
    %129 = vector.load %arg13[%c5_93, %c0_94, %c0_95] : memref<9x16x64xbf16, #tpu.memory_space<vmem>>, vector<1x16x64xbf16>
    %130 = vector.shape_cast %129 : vector<1x16x64xbf16> to vector<16x64xbf16>
    %c6_96 = arith.constant 6 : index
    %c0_97 = arith.constant 0 : index
    %c0_98 = arith.constant 0 : index
    %131 = vector.load %arg13[%c6_96, %c0_97, %c0_98] : memref<9x16x64xbf16, #tpu.memory_space<vmem>>, vector<1x16x64xbf16>
    %132 = vector.shape_cast %131 : vector<1x16x64xbf16> to vector<16x64xbf16>
    %c7_99 = arith.constant 7 : index
    %c0_100 = arith.constant 0 : index
    %c0_101 = arith.constant 0 : index
    %133 = vector.load %arg13[%c7_99, %c0_100, %c0_101] : memref<9x16x64xbf16, #tpu.memory_space<vmem>>, vector<1x16x64xbf16>
    %134 = vector.shape_cast %133 : vector<1x16x64xbf16> to vector<16x64xbf16>
    %c8_102 = arith.constant 8 : index
    %c0_103 = arith.constant 0 : index
    %c0_104 = arith.constant 0 : index
    %135 = vector.load %arg13[%c8_102, %c0_103, %c0_104] : memref<9x16x64xbf16, #tpu.memory_space<vmem>>, vector<1x16x64xbf16>
    %136 = vector.shape_cast %135 : vector<1x16x64xbf16> to vector<16x64xbf16>
    %137 = vector.extract_strided_slice %116 {offsets = [0, 0], sizes = [64, 128], strides = [1, 1]} : vector<128x128xbf16> to vector<64x128xbf16>
    %138 = vector.extract_strided_slice %118 {offsets = [0, 0], sizes = [64, 128], strides = [1, 1]} : vector<128x128xbf16> to vector<64x128xbf16>
    %cst_105 = arith.constant dense<0.000000e+00> : vector<16x128xf32>
    %139 = tpu.matmul %120, %137, %cst_105 {dimension_numbers = #tpu.dot_dimension_numbers<[1], [0], [0], [1], [0, 0, 1, 1], [], []>} : vector<16x64xbf16>, vector<64x128xbf16>, vector<16x128xf32> -> vector<16x128xf32>
    %140 = arith.truncf %139 : vector<16x128xf32> to vector<16x128xbf16>
    %cst_106 = arith.constant dense<0.000000e+00> : vector<16x128xf32>
    %141 = tpu.matmul %122, %137, %cst_106 {dimension_numbers = #tpu.dot_dimension_numbers<[1], [0], [0], [1], [0, 0, 1, 1], [], []>} : vector<16x64xbf16>, vector<64x128xbf16>, vector<16x128xf32> -> vector<16x128xf32>
    %142 = arith.truncf %141 : vector<16x128xf32> to vector<16x128xbf16>
    %cst_107 = arith.constant dense<0.000000e+00> : vector<16x128xf32>
    %143 = tpu.matmul %124, %137, %cst_107 {dimension_numbers = #tpu.dot_dimension_numbers<[1], [0], [0], [1], [0, 0, 1, 1], [], []>} : vector<16x64xbf16>, vector<64x128xbf16>, vector<16x128xf32> -> vector<16x128xf32>
    %144 = arith.truncf %143 : vector<16x128xf32> to vector<16x128xbf16>
    %cst_108 = arith.constant dense<0.000000e+00> : vector<16x128xf32>
    %145 = tpu.matmul %126, %137, %cst_108 {dimension_numbers = #tpu.dot_dimension_numbers<[1], [0], [0], [1], [0, 0, 1, 1], [], []>} : vector<16x64xbf16>, vector<64x128xbf16>, vector<16x128xf32> -> vector<16x128xf32>
    %146 = arith.truncf %145 : vector<16x128xf32> to vector<16x128xbf16>
    %cst_109 = arith.constant dense<0.000000e+00> : vector<16x128xf32>
    %147 = tpu.matmul %128, %137, %cst_109 {dimension_numbers = #tpu.dot_dimension_numbers<[1], [0], [0], [1], [0, 0, 1, 1], [], []>} : vector<16x64xbf16>, vector<64x128xbf16>, vector<16x128xf32> -> vector<16x128xf32>
    %148 = arith.truncf %147 : vector<16x128xf32> to vector<16x128xbf16>
    %cst_110 = arith.constant dense<0.000000e+00> : vector<16x128xf32>
    %149 = tpu.matmul %130, %137, %cst_110 {dimension_numbers = #tpu.dot_dimension_numbers<[1], [0], [0], [1], [0, 0, 1, 1], [], []>} : vector<16x64xbf16>, vector<64x128xbf16>, vector<16x128xf32> -> vector<16x128xf32>
    %150 = arith.truncf %149 : vector<16x128xf32> to vector<16x128xbf16>
    %cst_111 = arith.constant dense<0.000000e+00> : vector<16x128xf32>
    %151 = tpu.matmul %132, %137, %cst_111 {dimension_numbers = #tpu.dot_dimension_numbers<[1], [0], [0], [1], [0, 0, 1, 1], [], []>} : vector<16x64xbf16>, vector<64x128xbf16>, vector<16x128xf32> -> vector<16x128xf32>
    %152 = arith.truncf %151 : vector<16x128xf32> to vector<16x128xbf16>
    %cst_112 = arith.constant dense<0.000000e+00> : vector<16x128xf32>
    %153 = tpu.matmul %134, %137, %cst_112 {dimension_numbers = #tpu.dot_dimension_numbers<[1], [0], [0], [1], [0, 0, 1, 1], [], []>} : vector<16x64xbf16>, vector<64x128xbf16>, vector<16x128xf32> -> vector<16x128xf32>
    %154 = arith.truncf %153 : vector<16x128xf32> to vector<16x128xbf16>
    %cst_113 = arith.constant dense<0.000000e+00> : vector<16x128xf32>
    %155 = tpu.matmul %136, %137, %cst_113 {dimension_numbers = #tpu.dot_dimension_numbers<[1], [0], [0], [1], [0, 0, 1, 1], [], []>} : vector<16x64xbf16>, vector<64x128xbf16>, vector<16x128xf32> -> vector<16x128xf32>
    %156 = arith.truncf %155 : vector<16x128xf32> to vector<16x128xbf16>
    %157 = tpu.concatenate %140, %142, %144, %146, %148, %150, %152, %154, %156 in 1 : vector<16x128xbf16>, vector<16x128xbf16>, vector<16x128xbf16>, vector<16x128xbf16>, vector<16x128xbf16>, vector<16x128xbf16>, vector<16x128xbf16>, vector<16x128xbf16>, vector<16x128xbf16> -> vector<16x1152xbf16>
    %cst_114 = arith.constant dense<0.000000e+00> : vector<16x128xf32>
    %158 = tpu.matmul %128, %138, %cst_114 {dimension_numbers = #tpu.dot_dimension_numbers<[1], [0], [0], [1], [0, 0, 1, 1], [], []>} : vector<16x64xbf16>, vector<64x128xbf16>, vector<16x128xf32> -> vector<16x128xf32>
    %159 = vector.extract_strided_slice %116 {offsets = [64, 0], sizes = [64, 128], strides = [1, 1]} : vector<128x128xbf16> to vector<64x128xbf16>
    %160 = vector.extract_strided_slice %118 {offsets = [64, 0], sizes = [64, 128], strides = [1, 1]} : vector<128x128xbf16> to vector<64x128xbf16>
    %cst_115 = arith.constant dense<0.000000e+00> : vector<16x128xf32>
    %161 = tpu.matmul %120, %159, %cst_115 {dimension_numbers = #tpu.dot_dimension_numbers<[1], [0], [0], [1], [0, 0, 1, 1], [], []>} : vector<16x64xbf16>, vector<64x128xbf16>, vector<16x128xf32> -> vector<16x128xf32>
    %162 = arith.truncf %161 : vector<16x128xf32> to vector<16x128xbf16>
    %cst_116 = arith.constant dense<0.000000e+00> : vector<16x128xf32>
    %163 = tpu.matmul %122, %159, %cst_116 {dimension_numbers = #tpu.dot_dimension_numbers<[1], [0], [0], [1], [0, 0, 1, 1], [], []>} : vector<16x64xbf16>, vector<64x128xbf16>, vector<16x128xf32> -> vector<16x128xf32>
    %164 = arith.truncf %163 : vector<16x128xf32> to vector<16x128xbf16>
    %cst_117 = arith.constant dense<0.000000e+00> : vector<16x128xf32>
    %165 = tpu.matmul %124, %159, %cst_117 {dimension_numbers = #tpu.dot_dimension_numbers<[1], [0], [0], [1], [0, 0, 1, 1], [], []>} : vector<16x64xbf16>, vector<64x128xbf16>, vector<16x128xf32> -> vector<16x128xf32>
    %166 = arith.truncf %165 : vector<16x128xf32> to vector<16x128xbf16>
    %cst_118 = arith.constant dense<0.000000e+00> : vector<16x128xf32>
    %167 = tpu.matmul %126, %159, %cst_118 {dimension_numbers = #tpu.dot_dimension_numbers<[1], [0], [0], [1], [0, 0, 1, 1], [], []>} : vector<16x64xbf16>, vector<64x128xbf16>, vector<16x128xf32> -> vector<16x128xf32>
    %168 = arith.truncf %167 : vector<16x128xf32> to vector<16x128xbf16>
    %cst_119 = arith.constant dense<0.000000e+00> : vector<16x128xf32>
    %169 = tpu.matmul %128, %159, %cst_119 {dimension_numbers = #tpu.dot_dimension_numbers<[1], [0], [0], [1], [0, 0, 1, 1], [], []>} : vector<16x64xbf16>, vector<64x128xbf16>, vector<16x128xf32> -> vector<16x128xf32>
    %170 = arith.truncf %169 : vector<16x128xf32> to vector<16x128xbf16>
    %cst_120 = arith.constant dense<0.000000e+00> : vector<16x128xf32>
    %171 = tpu.matmul %130, %159, %cst_120 {dimension_numbers = #tpu.dot_dimension_numbers<[1], [0], [0], [1], [0, 0, 1, 1], [], []>} : vector<16x64xbf16>, vector<64x128xbf16>, vector<16x128xf32> -> vector<16x128xf32>
    %172 = arith.truncf %171 : vector<16x128xf32> to vector<16x128xbf16>
    %cst_121 = arith.constant dense<0.000000e+00> : vector<16x128xf32>
    %173 = tpu.matmul %132, %159, %cst_121 {dimension_numbers = #tpu.dot_dimension_numbers<[1], [0], [0], [1], [0, 0, 1, 1], [], []>} : vector<16x64xbf16>, vector<64x128xbf16>, vector<16x128xf32> -> vector<16x128xf32>
    %174 = arith.truncf %173 : vector<16x128xf32> to vector<16x128xbf16>
    %cst_122 = arith.constant dense<0.000000e+00> : vector<16x128xf32>
    %175 = tpu.matmul %134, %159, %cst_122 {dimension_numbers = #tpu.dot_dimension_numbers<[1], [0], [0], [1], [0, 0, 1, 1], [], []>} : vector<16x64xbf16>, vector<64x128xbf16>, vector<16x128xf32> -> vector<16x128xf32>
    %176 = arith.truncf %175 : vector<16x128xf32> to vector<16x128xbf16>
    %cst_123 = arith.constant dense<0.000000e+00> : vector<16x128xf32>
    %177 = tpu.matmul %136, %159, %cst_123 {dimension_numbers = #tpu.dot_dimension_numbers<[1], [0], [0], [1], [0, 0, 1, 1], [], []>} : vector<16x64xbf16>, vector<64x128xbf16>, vector<16x128xf32> -> vector<16x128xf32>
    %178 = arith.truncf %177 : vector<16x128xf32> to vector<16x128xbf16>
    %179 = tpu.concatenate %162, %164, %166, %168, %170, %172, %174, %176, %178 in 1 : vector<16x128xbf16>, vector<16x128xbf16>, vector<16x128xbf16>, vector<16x128xbf16>, vector<16x128xbf16>, vector<16x128xbf16>, vector<16x128xbf16>, vector<16x128xbf16>, vector<16x128xbf16> -> vector<16x1152xbf16>
    %cst_124 = arith.constant dense<0.000000e+00> : vector<16x128xf32>
    %180 = tpu.matmul %128, %160, %cst_124 {dimension_numbers = #tpu.dot_dimension_numbers<[1], [0], [0], [1], [0, 0, 1, 1], [], []>} : vector<16x64xbf16>, vector<64x128xbf16>, vector<16x128xf32> -> vector<16x128xf32>
    %181 = tpu.concatenate %157, %179 in 0 : vector<16x1152xbf16>, vector<16x1152xbf16> -> vector<32x1152xbf16>
    %182 = tpu.concatenate %158, %180 in 0 : vector<16x128xf32>, vector<16x128xf32> -> vector<32x128xf32>
    %183 = vector.broadcast %108 : vector<1x128xf32> to vector<32x128xf32>
    %184 = arith.addf %182, %183 : vector<32x128xf32>
    %c0_125 = arith.constant 0 : index
    %c0_126 = arith.constant 0 : index
    %185 = vector.load %arg10[%c0_125, %c0_126] : memref<1152x128xbf16, #tpu.memory_space<vmem>>, vector<1152x128xbf16>
    %cst_127 = arith.constant dense<0.000000e+00> : vector<32x128xf32>
    %186 = tpu.matmul %181, %185, %cst_127 {dimension_numbers = #tpu.dot_dimension_numbers<[1], [0], [0], [1], [0, 0, 1, 1], [], []>} : vector<32x1152xbf16>, vector<1152x128xbf16>, vector<32x128xf32> -> vector<32x128xf32>
    %187 = vector.broadcast %106 : vector<1x128xf32> to vector<32x128xf32>
    %188 = arith.addf %186, %187 : vector<32x128xf32>
    %cst_128 = arith.constant 0.000000e+00 : f32
    %189 = vector.broadcast %cst_128 : f32 to vector<32x128xf32>
    %190 = arith.maximumf %188, %189 : vector<32x128xf32>
    %191 = arith.truncf %190 : vector<32x128xf32> to vector<32x128xbf16>
    %c0_129 = arith.constant 0 : index
    %c0_130 = arith.constant 0 : index
    %192 = vector.load %arg11[%c0_129, %c0_130] : memref<128x128xbf16, #tpu.memory_space<vmem>>, vector<128x128xbf16>
    %cst_131 = arith.constant dense<0.000000e+00> : vector<32x128xf32>
    %193 = tpu.matmul %191, %192, %cst_131 {dimension_numbers = #tpu.dot_dimension_numbers<[1], [0], [0], [1], [0, 0, 1, 1], [], []>} : vector<32x128xbf16>, vector<128x128xbf16>, vector<32x128xf32> -> vector<32x128xf32>
    %194 = vector.broadcast %107 : vector<1x128xf32> to vector<32x128xf32>
    %195 = arith.addf %193, %194 : vector<32x128xf32>
    %196 = arith.addf %195, %184 : vector<32x128xf32>
    %cst_132 = arith.constant 0.000000e+00 : f32
    %197 = vector.broadcast %cst_132 : f32 to vector<32x128xf32>
    %198 = arith.maximumf %196, %197 : vector<32x128xf32>
    %199 = arith.truncf %198 : vector<32x128xf32> to vector<32x128xbf16>
    %c0_133 = arith.constant 0 : index
    %c0_134 = arith.constant 0 : index
    %200 = vector.load %arg17[%c0_133, %c0_134] : memref<4x128xf32, #tpu.memory_space<vmem>>, vector<1x128xf32>
    %c1_135 = arith.constant 1 : index
    %c0_136 = arith.constant 0 : index
    %201 = vector.load %arg17[%c1_135, %c0_136] : memref<4x128xf32, #tpu.memory_space<vmem>>, vector<1x128xf32>
    %c2_137 = arith.constant 2 : index
    %c0_138 = arith.constant 0 : index
    %202 = vector.load %arg17[%c2_137, %c0_138] : memref<4x128xf32, #tpu.memory_space<vmem>>, vector<1x128xf32>
    %c3_139 = arith.constant 3 : index
    %c0_140 = arith.constant 0 : index
    %203 = vector.load %arg17[%c3_139, %c0_140] : memref<4x128xf32, #tpu.memory_space<vmem>>, vector<1x128xf32>
    %c0_141 = arith.constant 0 : index
    %c0_142 = arith.constant 0 : index
    %204 = vector.load %arg14[%c0_141, %c0_142] : memref<128x256xbf16, #tpu.memory_space<vmem>>, vector<128x256xbf16>
    %cst_143 = arith.constant dense<0.000000e+00> : vector<32x256xf32>
    %205 = tpu.matmul %199, %204, %cst_143 {dimension_numbers = #tpu.dot_dimension_numbers<[1], [0], [0], [1], [0, 0, 1, 1], [], []>} : vector<32x128xbf16>, vector<128x256xbf16>, vector<32x256xf32> -> vector<32x256xf32>
    %206 = vector.extract_strided_slice %205 {offsets = [0, 0], sizes = [32, 128], strides = [1, 1]} : vector<32x256xf32> to vector<32x128xf32>
    %207 = vector.broadcast %200 : vector<1x128xf32> to vector<32x128xf32>
    %208 = arith.addf %206, %207 : vector<32x128xf32>
    %cst_144 = arith.constant 0.000000e+00 : f32
    %209 = vector.broadcast %cst_144 : f32 to vector<32x128xf32>
    %210 = arith.maximumf %208, %209 : vector<32x128xf32>
    %211 = arith.truncf %210 : vector<32x128xf32> to vector<32x128xbf16>
    %212 = vector.extract_strided_slice %205 {offsets = [0, 128], sizes = [32, 128], strides = [1, 1]} : vector<32x256xf32> to vector<32x128xf32>
    %213 = arith.truncf %212 : vector<32x128xf32> to vector<32x128xbf16>
    %c0_145 = arith.constant 0 : index
    %c0_146 = arith.constant 0 : index
    %c0_147 = arith.constant 0 : index
    %214 = vector.load %arg18[%c0_145, %c0_146, %c0_147] : memref<9x4x16xbf16, #tpu.memory_space<vmem>>, vector<1x4x16xbf16>
    %215 = vector.shape_cast %214 : vector<1x4x16xbf16> to vector<4x16xbf16>
    %c1_148 = arith.constant 1 : index
    %c0_149 = arith.constant 0 : index
    %c0_150 = arith.constant 0 : index
    %216 = vector.load %arg18[%c1_148, %c0_149, %c0_150] : memref<9x4x16xbf16, #tpu.memory_space<vmem>>, vector<1x4x16xbf16>
    %217 = vector.shape_cast %216 : vector<1x4x16xbf16> to vector<4x16xbf16>
    %c2_151 = arith.constant 2 : index
    %c0_152 = arith.constant 0 : index
    %c0_153 = arith.constant 0 : index
    %218 = vector.load %arg18[%c2_151, %c0_152, %c0_153] : memref<9x4x16xbf16, #tpu.memory_space<vmem>>, vector<1x4x16xbf16>
    %219 = vector.shape_cast %218 : vector<1x4x16xbf16> to vector<4x16xbf16>
    %c3_154 = arith.constant 3 : index
    %c0_155 = arith.constant 0 : index
    %c0_156 = arith.constant 0 : index
    %220 = vector.load %arg18[%c3_154, %c0_155, %c0_156] : memref<9x4x16xbf16, #tpu.memory_space<vmem>>, vector<1x4x16xbf16>
    %221 = vector.shape_cast %220 : vector<1x4x16xbf16> to vector<4x16xbf16>
    %c4_157 = arith.constant 4 : index
    %c0_158 = arith.constant 0 : index
    %c0_159 = arith.constant 0 : index
    %222 = vector.load %arg18[%c4_157, %c0_158, %c0_159] : memref<9x4x16xbf16, #tpu.memory_space<vmem>>, vector<1x4x16xbf16>
    %223 = vector.shape_cast %222 : vector<1x4x16xbf16> to vector<4x16xbf16>
    %c5_160 = arith.constant 5 : index
    %c0_161 = arith.constant 0 : index
    %c0_162 = arith.constant 0 : index
    %224 = vector.load %arg18[%c5_160, %c0_161, %c0_162] : memref<9x4x16xbf16, #tpu.memory_space<vmem>>, vector<1x4x16xbf16>
    %225 = vector.shape_cast %224 : vector<1x4x16xbf16> to vector<4x16xbf16>
    %c6_163 = arith.constant 6 : index
    %c0_164 = arith.constant 0 : index
    %c0_165 = arith.constant 0 : index
    %226 = vector.load %arg18[%c6_163, %c0_164, %c0_165] : memref<9x4x16xbf16, #tpu.memory_space<vmem>>, vector<1x4x16xbf16>
    %227 = vector.shape_cast %226 : vector<1x4x16xbf16> to vector<4x16xbf16>
    %c7_166 = arith.constant 7 : index
    %c0_167 = arith.constant 0 : index
    %c0_168 = arith.constant 0 : index
    %228 = vector.load %arg18[%c7_166, %c0_167, %c0_168] : memref<9x4x16xbf16, #tpu.memory_space<vmem>>, vector<1x4x16xbf16>
    %229 = vector.shape_cast %228 : vector<1x4x16xbf16> to vector<4x16xbf16>
    %c8_169 = arith.constant 8 : index
    %c0_170 = arith.constant 0 : index
    %c0_171 = arith.constant 0 : index
    %230 = vector.load %arg18[%c8_169, %c0_170, %c0_171] : memref<9x4x16xbf16, #tpu.memory_space<vmem>>, vector<1x4x16xbf16>
    %231 = vector.shape_cast %230 : vector<1x4x16xbf16> to vector<4x16xbf16>
    %232 = vector.extract_strided_slice %211 {offsets = [0, 0], sizes = [16, 128], strides = [1, 1]} : vector<32x128xbf16> to vector<16x128xbf16>
    %233 = vector.extract_strided_slice %213 {offsets = [0, 0], sizes = [16, 128], strides = [1, 1]} : vector<32x128xbf16> to vector<16x128xbf16>
    %cst_172 = arith.constant dense<0.000000e+00> : vector<4x128xf32>
    %234 = tpu.matmul %215, %232, %cst_172 {dimension_numbers = #tpu.dot_dimension_numbers<[1], [0], [0], [1], [0, 0, 1, 1], [], []>} : vector<4x16xbf16>, vector<16x128xbf16>, vector<4x128xf32> -> vector<4x128xf32>
    %235 = arith.truncf %234 : vector<4x128xf32> to vector<4x128xbf16>
    %cst_173 = arith.constant dense<0.000000e+00> : vector<4x128xf32>
    %236 = tpu.matmul %217, %232, %cst_173 {dimension_numbers = #tpu.dot_dimension_numbers<[1], [0], [0], [1], [0, 0, 1, 1], [], []>} : vector<4x16xbf16>, vector<16x128xbf16>, vector<4x128xf32> -> vector<4x128xf32>
    %237 = arith.truncf %236 : vector<4x128xf32> to vector<4x128xbf16>
    %cst_174 = arith.constant dense<0.000000e+00> : vector<4x128xf32>
    %238 = tpu.matmul %219, %232, %cst_174 {dimension_numbers = #tpu.dot_dimension_numbers<[1], [0], [0], [1], [0, 0, 1, 1], [], []>} : vector<4x16xbf16>, vector<16x128xbf16>, vector<4x128xf32> -> vector<4x128xf32>
    %239 = arith.truncf %238 : vector<4x128xf32> to vector<4x128xbf16>
    %cst_175 = arith.constant dense<0.000000e+00> : vector<4x128xf32>
    %240 = tpu.matmul %221, %232, %cst_175 {dimension_numbers = #tpu.dot_dimension_numbers<[1], [0], [0], [1], [0, 0, 1, 1], [], []>} : vector<4x16xbf16>, vector<16x128xbf16>, vector<4x128xf32> -> vector<4x128xf32>
    %241 = arith.truncf %240 : vector<4x128xf32> to vector<4x128xbf16>
    %cst_176 = arith.constant dense<0.000000e+00> : vector<4x128xf32>
    %242 = tpu.matmul %223, %232, %cst_176 {dimension_numbers = #tpu.dot_dimension_numbers<[1], [0], [0], [1], [0, 0, 1, 1], [], []>} : vector<4x16xbf16>, vector<16x128xbf16>, vector<4x128xf32> -> vector<4x128xf32>
    %243 = arith.truncf %242 : vector<4x128xf32> to vector<4x128xbf16>
    %cst_177 = arith.constant dense<0.000000e+00> : vector<4x128xf32>
    %244 = tpu.matmul %225, %232, %cst_177 {dimension_numbers = #tpu.dot_dimension_numbers<[1], [0], [0], [1], [0, 0, 1, 1], [], []>} : vector<4x16xbf16>, vector<16x128xbf16>, vector<4x128xf32> -> vector<4x128xf32>
    %245 = arith.truncf %244 : vector<4x128xf32> to vector<4x128xbf16>
    %cst_178 = arith.constant dense<0.000000e+00> : vector<4x128xf32>
    %246 = tpu.matmul %227, %232, %cst_178 {dimension_numbers = #tpu.dot_dimension_numbers<[1], [0], [0], [1], [0, 0, 1, 1], [], []>} : vector<4x16xbf16>, vector<16x128xbf16>, vector<4x128xf32> -> vector<4x128xf32>
    %247 = arith.truncf %246 : vector<4x128xf32> to vector<4x128xbf16>
    %cst_179 = arith.constant dense<0.000000e+00> : vector<4x128xf32>
    %248 = tpu.matmul %229, %232, %cst_179 {dimension_numbers = #tpu.dot_dimension_numbers<[1], [0], [0], [1], [0, 0, 1, 1], [], []>} : vector<4x16xbf16>, vector<16x128xbf16>, vector<4x128xf32> -> vector<4x128xf32>
    %249 = arith.truncf %248 : vector<4x128xf32> to vector<4x128xbf16>
    %cst_180 = arith.constant dense<0.000000e+00> : vector<4x128xf32>
    %250 = tpu.matmul %231, %232, %cst_180 {dimension_numbers = #tpu.dot_dimension_numbers<[1], [0], [0], [1], [0, 0, 1, 1], [], []>} : vector<4x16xbf16>, vector<16x128xbf16>, vector<4x128xf32> -> vector<4x128xf32>
    %251 = arith.truncf %250 : vector<4x128xf32> to vector<4x128xbf16>
    %252 = tpu.concatenate %235, %237, %239, %241, %243, %245, %247, %249, %251 in 1 : vector<4x128xbf16>, vector<4x128xbf16>, vector<4x128xbf16>, vector<4x128xbf16>, vector<4x128xbf16>, vector<4x128xbf16>, vector<4x128xbf16>, vector<4x128xbf16>, vector<4x128xbf16> -> vector<4x1152xbf16>
    %cst_181 = arith.constant dense<0.000000e+00> : vector<4x128xf32>
    %253 = tpu.matmul %223, %233, %cst_181 {dimension_numbers = #tpu.dot_dimension_numbers<[1], [0], [0], [1], [0, 0, 1, 1], [], []>} : vector<4x16xbf16>, vector<16x128xbf16>, vector<4x128xf32> -> vector<4x128xf32>
    %254 = vector.extract_strided_slice %211 {offsets = [16, 0], sizes = [16, 128], strides = [1, 1]} : vector<32x128xbf16> to vector<16x128xbf16>
    %255 = vector.extract_strided_slice %213 {offsets = [16, 0], sizes = [16, 128], strides = [1, 1]} : vector<32x128xbf16> to vector<16x128xbf16>
    %cst_182 = arith.constant dense<0.000000e+00> : vector<4x128xf32>
    %256 = tpu.matmul %215, %254, %cst_182 {dimension_numbers = #tpu.dot_dimension_numbers<[1], [0], [0], [1], [0, 0, 1, 1], [], []>} : vector<4x16xbf16>, vector<16x128xbf16>, vector<4x128xf32> -> vector<4x128xf32>
    %257 = arith.truncf %256 : vector<4x128xf32> to vector<4x128xbf16>
    %cst_183 = arith.constant dense<0.000000e+00> : vector<4x128xf32>
    %258 = tpu.matmul %217, %254, %cst_183 {dimension_numbers = #tpu.dot_dimension_numbers<[1], [0], [0], [1], [0, 0, 1, 1], [], []>} : vector<4x16xbf16>, vector<16x128xbf16>, vector<4x128xf32> -> vector<4x128xf32>
    %259 = arith.truncf %258 : vector<4x128xf32> to vector<4x128xbf16>
    %cst_184 = arith.constant dense<0.000000e+00> : vector<4x128xf32>
    %260 = tpu.matmul %219, %254, %cst_184 {dimension_numbers = #tpu.dot_dimension_numbers<[1], [0], [0], [1], [0, 0, 1, 1], [], []>} : vector<4x16xbf16>, vector<16x128xbf16>, vector<4x128xf32> -> vector<4x128xf32>
    %261 = arith.truncf %260 : vector<4x128xf32> to vector<4x128xbf16>
    %cst_185 = arith.constant dense<0.000000e+00> : vector<4x128xf32>
    %262 = tpu.matmul %221, %254, %cst_185 {dimension_numbers = #tpu.dot_dimension_numbers<[1], [0], [0], [1], [0, 0, 1, 1], [], []>} : vector<4x16xbf16>, vector<16x128xbf16>, vector<4x128xf32> -> vector<4x128xf32>
    %263 = arith.truncf %262 : vector<4x128xf32> to vector<4x128xbf16>
    %cst_186 = arith.constant dense<0.000000e+00> : vector<4x128xf32>
    %264 = tpu.matmul %223, %254, %cst_186 {dimension_numbers = #tpu.dot_dimension_numbers<[1], [0], [0], [1], [0, 0, 1, 1], [], []>} : vector<4x16xbf16>, vector<16x128xbf16>, vector<4x128xf32> -> vector<4x128xf32>
    %265 = arith.truncf %264 : vector<4x128xf32> to vector<4x128xbf16>
    %cst_187 = arith.constant dense<0.000000e+00> : vector<4x128xf32>
    %266 = tpu.matmul %225, %254, %cst_187 {dimension_numbers = #tpu.dot_dimension_numbers<[1], [0], [0], [1], [0, 0, 1, 1], [], []>} : vector<4x16xbf16>, vector<16x128xbf16>, vector<4x128xf32> -> vector<4x128xf32>
    %267 = arith.truncf %266 : vector<4x128xf32> to vector<4x128xbf16>
    %cst_188 = arith.constant dense<0.000000e+00> : vector<4x128xf32>
    %268 = tpu.matmul %227, %254, %cst_188 {dimension_numbers = #tpu.dot_dimension_numbers<[1], [0], [0], [1], [0, 0, 1, 1], [], []>} : vector<4x16xbf16>, vector<16x128xbf16>, vector<4x128xf32> -> vector<4x128xf32>
    %269 = arith.truncf %268 : vector<4x128xf32> to vector<4x128xbf16>
    %cst_189 = arith.constant dense<0.000000e+00> : vector<4x128xf32>
    %270 = tpu.matmul %229, %254, %cst_189 {dimension_numbers = #tpu.dot_dimension_numbers<[1], [0], [0], [1], [0, 0, 1, 1], [], []>} : vector<4x16xbf16>, vector<16x128xbf16>, vector<4x128xf32> -> vector<4x128xf32>
    %271 = arith.truncf %270 : vector<4x128xf32> to vector<4x128xbf16>
    %cst_190 = arith.constant dense<0.000000e+00> : vector<4x128xf32>
    %272 = tpu.matmul %231, %254, %cst_190 {dimension_numbers = #tpu.dot_dimension_numbers<[1], [0], [0], [1], [0, 0, 1, 1], [], []>} : vector<4x16xbf16>, vector<16x128xbf16>, vector<4x128xf32> -> vector<4x128xf32>
    %273 = arith.truncf %272 : vector<4x128xf32> to vector<4x128xbf16>
    %274 = tpu.concatenate %257, %259, %261, %263, %265, %267, %269, %271, %273 in 1 : vector<4x128xbf16>, vector<4x128xbf16>, vector<4x128xbf16>, vector<4x128xbf16>, vector<4x128xbf16>, vector<4x128xbf16>, vector<4x128xbf16>, vector<4x128xbf16>, vector<4x128xbf16> -> vector<4x1152xbf16>
    %cst_191 = arith.constant dense<0.000000e+00> : vector<4x128xf32>
    %275 = tpu.matmul %223, %255, %cst_191 {dimension_numbers = #tpu.dot_dimension_numbers<[1], [0], [0], [1], [0, 0, 1, 1], [], []>} : vector<4x16xbf16>, vector<16x128xbf16>, vector<4x128xf32> -> vector<4x128xf32>
    %276 = tpu.concatenate %252, %274 in 0 : vector<4x1152xbf16>, vector<4x1152xbf16> -> vector<8x1152xbf16>
    %277 = tpu.concatenate %253, %275 in 0 : vector<4x128xf32>, vector<4x128xf32> -> vector<8x128xf32>
    %278 = vector.broadcast %203 : vector<1x128xf32> to vector<8x128xf32>
    %279 = arith.addf %277, %278 : vector<8x128xf32>
    %c0_192 = arith.constant 0 : index
    %c0_193 = arith.constant 0 : index
    %280 = vector.load %arg15[%c0_192, %c0_193] : memref<1152x128xbf16, #tpu.memory_space<vmem>>, vector<1152x128xbf16>
    %cst_194 = arith.constant dense<0.000000e+00> : vector<8x128xf32>
    %281 = tpu.matmul %276, %280, %cst_194 {dimension_numbers = #tpu.dot_dimension_numbers<[1], [0], [0], [1], [0, 0, 1, 1], [], []>} : vector<8x1152xbf16>, vector<1152x128xbf16>, vector<8x128xf32> -> vector<8x128xf32>
    %282 = vector.broadcast %201 : vector<1x128xf32> to vector<8x128xf32>
    %283 = arith.addf %281, %282 : vector<8x128xf32>
    %cst_195 = arith.constant 0.000000e+00 : f32
    %284 = vector.broadcast %cst_195 : f32 to vector<8x128xf32>
    %285 = arith.maximumf %283, %284 : vector<8x128xf32>
    %286 = arith.truncf %285 : vector<8x128xf32> to vector<8x128xbf16>
    %c0_196 = arith.constant 0 : index
    %c0_197 = arith.constant 0 : index
    %287 = vector.load %arg16[%c0_196, %c0_197] : memref<128x128xbf16, #tpu.memory_space<vmem>>, vector<128x128xbf16>
    %cst_198 = arith.constant dense<0.000000e+00> : vector<8x128xf32>
    %288 = tpu.matmul %286, %287, %cst_198 {dimension_numbers = #tpu.dot_dimension_numbers<[1], [0], [0], [1], [0, 0, 1, 1], [], []>} : vector<8x128xbf16>, vector<128x128xbf16>, vector<8x128xf32> -> vector<8x128xf32>
    %289 = vector.broadcast %202 : vector<1x128xf32> to vector<8x128xf32>
    %290 = arith.addf %288, %289 : vector<8x128xf32>
    %291 = arith.addf %290, %279 : vector<8x128xf32>
    %cst_199 = arith.constant 0.000000e+00 : f32
    %292 = vector.broadcast %cst_199 : f32 to vector<8x128xf32>
    %293 = arith.maximumf %291, %292 : vector<8x128xf32>
    %294 = arith.truncf %293 : vector<8x128xf32> to vector<8x128xbf16>
    %c0_200 = arith.constant 0 : index
    %c0_201 = arith.constant 0 : index
    %295 = vector.load %arg22[%c0_200, %c0_201] : memref<4x128xf32, #tpu.memory_space<vmem>>, vector<1x128xf32>
    %c1_202 = arith.constant 1 : index
    %c0_203 = arith.constant 0 : index
    %296 = vector.load %arg22[%c1_202, %c0_203] : memref<4x128xf32, #tpu.memory_space<vmem>>, vector<1x128xf32>
    %c2_204 = arith.constant 2 : index
    %c0_205 = arith.constant 0 : index
    %297 = vector.load %arg22[%c2_204, %c0_205] : memref<4x128xf32, #tpu.memory_space<vmem>>, vector<1x128xf32>
    %c3_206 = arith.constant 3 : index
    %c0_207 = arith.constant 0 : index
    %298 = vector.load %arg22[%c3_206, %c0_207] : memref<4x128xf32, #tpu.memory_space<vmem>>, vector<1x128xf32>
    %c0_208 = arith.constant 0 : index
    %c0_209 = arith.constant 0 : index
    %299 = vector.load %arg19[%c0_208, %c0_209] : memref<128x256xbf16, #tpu.memory_space<vmem>>, vector<128x256xbf16>
    %cst_210 = arith.constant dense<0.000000e+00> : vector<8x256xf32>
    %300 = tpu.matmul %294, %299, %cst_210 {dimension_numbers = #tpu.dot_dimension_numbers<[1], [0], [0], [1], [0, 0, 1, 1], [], []>} : vector<8x128xbf16>, vector<128x256xbf16>, vector<8x256xf32> -> vector<8x256xf32>
    %301 = vector.extract_strided_slice %300 {offsets = [0, 0], sizes = [8, 128], strides = [1, 1]} : vector<8x256xf32> to vector<8x128xf32>
    %302 = vector.broadcast %295 : vector<1x128xf32> to vector<8x128xf32>
    %303 = arith.addf %301, %302 : vector<8x128xf32>
    %cst_211 = arith.constant 0.000000e+00 : f32
    %304 = vector.broadcast %cst_211 : f32 to vector<8x128xf32>
    %305 = arith.maximumf %303, %304 : vector<8x128xf32>
    %306 = arith.truncf %305 : vector<8x128xf32> to vector<8x128xbf16>
    %307 = vector.extract_strided_slice %300 {offsets = [0, 128], sizes = [8, 128], strides = [1, 1]} : vector<8x256xf32> to vector<8x128xf32>
    %308 = arith.truncf %307 : vector<8x128xf32> to vector<8x128xbf16>
    %c0_212 = arith.constant 0 : index
    %c0_213 = arith.constant 0 : index
    %c0_214 = arith.constant 0 : index
    %309 = vector.load %arg23[%c0_212, %c0_213, %c0_214] : memref<9x1x4xbf16, #tpu.memory_space<vmem>>, vector<1x1x4xbf16>
    %310 = vector.shape_cast %309 : vector<1x1x4xbf16> to vector<1x4xbf16>
    %c1_215 = arith.constant 1 : index
    %c0_216 = arith.constant 0 : index
    %c0_217 = arith.constant 0 : index
    %311 = vector.load %arg23[%c1_215, %c0_216, %c0_217] : memref<9x1x4xbf16, #tpu.memory_space<vmem>>, vector<1x1x4xbf16>
    %312 = vector.shape_cast %311 : vector<1x1x4xbf16> to vector<1x4xbf16>
    %c2_218 = arith.constant 2 : index
    %c0_219 = arith.constant 0 : index
    %c0_220 = arith.constant 0 : index
    %313 = vector.load %arg23[%c2_218, %c0_219, %c0_220] : memref<9x1x4xbf16, #tpu.memory_space<vmem>>, vector<1x1x4xbf16>
    %314 = vector.shape_cast %313 : vector<1x1x4xbf16> to vector<1x4xbf16>
    %c3_221 = arith.constant 3 : index
    %c0_222 = arith.constant 0 : index
    %c0_223 = arith.constant 0 : index
    %315 = vector.load %arg23[%c3_221, %c0_222, %c0_223] : memref<9x1x4xbf16, #tpu.memory_space<vmem>>, vector<1x1x4xbf16>
    %316 = vector.shape_cast %315 : vector<1x1x4xbf16> to vector<1x4xbf16>
    %c4_224 = arith.constant 4 : index
    %c0_225 = arith.constant 0 : index
    %c0_226 = arith.constant 0 : index
    %317 = vector.load %arg23[%c4_224, %c0_225, %c0_226] : memref<9x1x4xbf16, #tpu.memory_space<vmem>>, vector<1x1x4xbf16>
    %318 = vector.shape_cast %317 : vector<1x1x4xbf16> to vector<1x4xbf16>
    %c5_227 = arith.constant 5 : index
    %c0_228 = arith.constant 0 : index
    %c0_229 = arith.constant 0 : index
    %319 = vector.load %arg23[%c5_227, %c0_228, %c0_229] : memref<9x1x4xbf16, #tpu.memory_space<vmem>>, vector<1x1x4xbf16>
    %320 = vector.shape_cast %319 : vector<1x1x4xbf16> to vector<1x4xbf16>
    %c6_230 = arith.constant 6 : index
    %c0_231 = arith.constant 0 : index
    %c0_232 = arith.constant 0 : index
    %321 = vector.load %arg23[%c6_230, %c0_231, %c0_232] : memref<9x1x4xbf16, #tpu.memory_space<vmem>>, vector<1x1x4xbf16>
    %322 = vector.shape_cast %321 : vector<1x1x4xbf16> to vector<1x4xbf16>
    %c7_233 = arith.constant 7 : index
    %c0_234 = arith.constant 0 : index
    %c0_235 = arith.constant 0 : index
    %323 = vector.load %arg23[%c7_233, %c0_234, %c0_235] : memref<9x1x4xbf16, #tpu.memory_space<vmem>>, vector<1x1x4xbf16>
    %324 = vector.shape_cast %323 : vector<1x1x4xbf16> to vector<1x4xbf16>
    %c8_236 = arith.constant 8 : index
    %c0_237 = arith.constant 0 : index
    %c0_238 = arith.constant 0 : index
    %325 = vector.load %arg23[%c8_236, %c0_237, %c0_238] : memref<9x1x4xbf16, #tpu.memory_space<vmem>>, vector<1x1x4xbf16>
    %326 = vector.shape_cast %325 : vector<1x1x4xbf16> to vector<1x4xbf16>
    %327 = vector.extract_strided_slice %306 {offsets = [0, 0], sizes = [4, 128], strides = [1, 1]} : vector<8x128xbf16> to vector<4x128xbf16>
    %328 = vector.extract_strided_slice %308 {offsets = [0, 0], sizes = [4, 128], strides = [1, 1]} : vector<8x128xbf16> to vector<4x128xbf16>
    %cst_239 = arith.constant dense<0.000000e+00> : vector<1x128xf32>
    %329 = tpu.matmul %310, %327, %cst_239 {dimension_numbers = #tpu.dot_dimension_numbers<[1], [0], [0], [1], [0, 0, 1, 1], [], []>} : vector<1x4xbf16>, vector<4x128xbf16>, vector<1x128xf32> -> vector<1x128xf32>
    %330 = arith.truncf %329 : vector<1x128xf32> to vector<1x128xbf16>
    %cst_240 = arith.constant dense<0.000000e+00> : vector<1x128xf32>
    %331 = tpu.matmul %312, %327, %cst_240 {dimension_numbers = #tpu.dot_dimension_numbers<[1], [0], [0], [1], [0, 0, 1, 1], [], []>} : vector<1x4xbf16>, vector<4x128xbf16>, vector<1x128xf32> -> vector<1x128xf32>
    %332 = arith.truncf %331 : vector<1x128xf32> to vector<1x128xbf16>
    %cst_241 = arith.constant dense<0.000000e+00> : vector<1x128xf32>
    %333 = tpu.matmul %314, %327, %cst_241 {dimension_numbers = #tpu.dot_dimension_numbers<[1], [0], [0], [1], [0, 0, 1, 1], [], []>} : vector<1x4xbf16>, vector<4x128xbf16>, vector<1x128xf32> -> vector<1x128xf32>
    %334 = arith.truncf %333 : vector<1x128xf32> to vector<1x128xbf16>
    %cst_242 = arith.constant dense<0.000000e+00> : vector<1x128xf32>
    %335 = tpu.matmul %316, %327, %cst_242 {dimension_numbers = #tpu.dot_dimension_numbers<[1], [0], [0], [1], [0, 0, 1, 1], [], []>} : vector<1x4xbf16>, vector<4x128xbf16>, vector<1x128xf32> -> vector<1x128xf32>
    %336 = arith.truncf %335 : vector<1x128xf32> to vector<1x128xbf16>
    %cst_243 = arith.constant dense<0.000000e+00> : vector<1x128xf32>
    %337 = tpu.matmul %318, %327, %cst_243 {dimension_numbers = #tpu.dot_dimension_numbers<[1], [0], [0], [1], [0, 0, 1, 1], [], []>} : vector<1x4xbf16>, vector<4x128xbf16>, vector<1x128xf32> -> vector<1x128xf32>
    %338 = arith.truncf %337 : vector<1x128xf32> to vector<1x128xbf16>
    %cst_244 = arith.constant dense<0.000000e+00> : vector<1x128xf32>
    %339 = tpu.matmul %320, %327, %cst_244 {dimension_numbers = #tpu.dot_dimension_numbers<[1], [0], [0], [1], [0, 0, 1, 1], [], []>} : vector<1x4xbf16>, vector<4x128xbf16>, vector<1x128xf32> -> vector<1x128xf32>
    %340 = arith.truncf %339 : vector<1x128xf32> to vector<1x128xbf16>
    %cst_245 = arith.constant dense<0.000000e+00> : vector<1x128xf32>
    %341 = tpu.matmul %322, %327, %cst_245 {dimension_numbers = #tpu.dot_dimension_numbers<[1], [0], [0], [1], [0, 0, 1, 1], [], []>} : vector<1x4xbf16>, vector<4x128xbf16>, vector<1x128xf32> -> vector<1x128xf32>
    %342 = arith.truncf %341 : vector<1x128xf32> to vector<1x128xbf16>
    %cst_246 = arith.constant dense<0.000000e+00> : vector<1x128xf32>
    %343 = tpu.matmul %324, %327, %cst_246 {dimension_numbers = #tpu.dot_dimension_numbers<[1], [0], [0], [1], [0, 0, 1, 1], [], []>} : vector<1x4xbf16>, vector<4x128xbf16>, vector<1x128xf32> -> vector<1x128xf32>
    %344 = arith.truncf %343 : vector<1x128xf32> to vector<1x128xbf16>
    %cst_247 = arith.constant dense<0.000000e+00> : vector<1x128xf32>
    %345 = tpu.matmul %326, %327, %cst_247 {dimension_numbers = #tpu.dot_dimension_numbers<[1], [0], [0], [1], [0, 0, 1, 1], [], []>} : vector<1x4xbf16>, vector<4x128xbf16>, vector<1x128xf32> -> vector<1x128xf32>
    %346 = arith.truncf %345 : vector<1x128xf32> to vector<1x128xbf16>
    %347 = tpu.concatenate %330, %332, %334, %336, %338, %340, %342, %344, %346 in 1 : vector<1x128xbf16>, vector<1x128xbf16>, vector<1x128xbf16>, vector<1x128xbf16>, vector<1x128xbf16>, vector<1x128xbf16>, vector<1x128xbf16>, vector<1x128xbf16>, vector<1x128xbf16> -> vector<1x1152xbf16>
    %cst_248 = arith.constant dense<0.000000e+00> : vector<1x128xf32>
    %348 = tpu.matmul %318, %328, %cst_248 {dimension_numbers = #tpu.dot_dimension_numbers<[1], [0], [0], [1], [0, 0, 1, 1], [], []>} : vector<1x4xbf16>, vector<4x128xbf16>, vector<1x128xf32> -> vector<1x128xf32>
    %349 = vector.extract_strided_slice %306 {offsets = [4, 0], sizes = [4, 128], strides = [1, 1]} : vector<8x128xbf16> to vector<4x128xbf16>
    %350 = vector.extract_strided_slice %308 {offsets = [4, 0], sizes = [4, 128], strides = [1, 1]} : vector<8x128xbf16> to vector<4x128xbf16>
    %cst_249 = arith.constant dense<0.000000e+00> : vector<1x128xf32>
    %351 = tpu.matmul %310, %349, %cst_249 {dimension_numbers = #tpu.dot_dimension_numbers<[1], [0], [0], [1], [0, 0, 1, 1], [], []>} : vector<1x4xbf16>, vector<4x128xbf16>, vector<1x128xf32> -> vector<1x128xf32>
    %352 = arith.truncf %351 : vector<1x128xf32> to vector<1x128xbf16>
    %cst_250 = arith.constant dense<0.000000e+00> : vector<1x128xf32>
    %353 = tpu.matmul %312, %349, %cst_250 {dimension_numbers = #tpu.dot_dimension_numbers<[1], [0], [0], [1], [0, 0, 1, 1], [], []>} : vector<1x4xbf16>, vector<4x128xbf16>, vector<1x128xf32> -> vector<1x128xf32>
    %354 = arith.truncf %353 : vector<1x128xf32> to vector<1x128xbf16>
    %cst_251 = arith.constant dense<0.000000e+00> : vector<1x128xf32>
    %355 = tpu.matmul %314, %349, %cst_251 {dimension_numbers = #tpu.dot_dimension_numbers<[1], [0], [0], [1], [0, 0, 1, 1], [], []>} : vector<1x4xbf16>, vector<4x128xbf16>, vector<1x128xf32> -> vector<1x128xf32>
    %356 = arith.truncf %355 : vector<1x128xf32> to vector<1x128xbf16>
    %cst_252 = arith.constant dense<0.000000e+00> : vector<1x128xf32>
    %357 = tpu.matmul %316, %349, %cst_252 {dimension_numbers = #tpu.dot_dimension_numbers<[1], [0], [0], [1], [0, 0, 1, 1], [], []>} : vector<1x4xbf16>, vector<4x128xbf16>, vector<1x128xf32> -> vector<1x128xf32>
    %358 = arith.truncf %357 : vector<1x128xf32> to vector<1x128xbf16>
    %cst_253 = arith.constant dense<0.000000e+00> : vector<1x128xf32>
    %359 = tpu.matmul %318, %349, %cst_253 {dimension_numbers = #tpu.dot_dimension_numbers<[1], [0], [0], [1], [0, 0, 1, 1], [], []>} : vector<1x4xbf16>, vector<4x128xbf16>, vector<1x128xf32> -> vector<1x128xf32>
    %360 = arith.truncf %359 : vector<1x128xf32> to vector<1x128xbf16>
    %cst_254 = arith.constant dense<0.000000e+00> : vector<1x128xf32>
    %361 = tpu.matmul %320, %349, %cst_254 {dimension_numbers = #tpu.dot_dimension_numbers<[1], [0], [0], [1], [0, 0, 1, 1], [], []>} : vector<1x4xbf16>, vector<4x128xbf16>, vector<1x128xf32> -> vector<1x128xf32>
    %362 = arith.truncf %361 : vector<1x128xf32> to vector<1x128xbf16>
    %cst_255 = arith.constant dense<0.000000e+00> : vector<1x128xf32>
    %363 = tpu.matmul %322, %349, %cst_255 {dimension_numbers = #tpu.dot_dimension_numbers<[1], [0], [0], [1], [0, 0, 1, 1], [], []>} : vector<1x4xbf16>, vector<4x128xbf16>, vector<1x128xf32> -> vector<1x128xf32>
    %364 = arith.truncf %363 : vector<1x128xf32> to vector<1x128xbf16>
    %cst_256 = arith.constant dense<0.000000e+00> : vector<1x128xf32>
    %365 = tpu.matmul %324, %349, %cst_256 {dimension_numbers = #tpu.dot_dimension_numbers<[1], [0], [0], [1], [0, 0, 1, 1], [], []>} : vector<1x4xbf16>, vector<4x128xbf16>, vector<1x128xf32> -> vector<1x128xf32>
    %366 = arith.truncf %365 : vector<1x128xf32> to vector<1x128xbf16>
    %cst_257 = arith.constant dense<0.000000e+00> : vector<1x128xf32>
    %367 = tpu.matmul %326, %349, %cst_257 {dimension_numbers = #tpu.dot_dimension_numbers<[1], [0], [0], [1], [0, 0, 1, 1], [], []>} : vector<1x4xbf16>, vector<4x128xbf16>, vector<1x128xf32> -> vector<1x128xf32>
    %368 = arith.truncf %367 : vector<1x128xf32> to vector<1x128xbf16>
    %369 = tpu.concatenate %352, %354, %356, %358, %360, %362, %364, %366, %368 in 1 : vector<1x128xbf16>, vector<1x128xbf16>, vector<1x128xbf16>, vector<1x128xbf16>, vector<1x128xbf16>, vector<1x128xbf16>, vector<1x128xbf16>, vector<1x128xbf16>, vector<1x128xbf16> -> vector<1x1152xbf16>
    %cst_258 = arith.constant dense<0.000000e+00> : vector<1x128xf32>
    %370 = tpu.matmul %318, %350, %cst_258 {dimension_numbers = #tpu.dot_dimension_numbers<[1], [0], [0], [1], [0, 0, 1, 1], [], []>} : vector<1x4xbf16>, vector<4x128xbf16>, vector<1x128xf32> -> vector<1x128xf32>
    %371 = tpu.concatenate %347, %369 in 0 : vector<1x1152xbf16>, vector<1x1152xbf16> -> vector<2x1152xbf16>
    %372 = tpu.concatenate %348, %370 in 0 : vector<1x128xf32>, vector<1x128xf32> -> vector<2x128xf32>
    %373 = vector.broadcast %298 : vector<1x128xf32> to vector<2x128xf32>
    %374 = arith.addf %372, %373 : vector<2x128xf32>
    %c0_259 = arith.constant 0 : index
    %c0_260 = arith.constant 0 : index
    %375 = vector.load %arg20[%c0_259, %c0_260] : memref<1152x128xbf16, #tpu.memory_space<vmem>>, vector<1152x128xbf16>
    %cst_261 = arith.constant dense<0.000000e+00> : vector<2x128xf32>
    %376 = tpu.matmul %371, %375, %cst_261 {dimension_numbers = #tpu.dot_dimension_numbers<[1], [0], [0], [1], [0, 0, 1, 1], [], []>} : vector<2x1152xbf16>, vector<1152x128xbf16>, vector<2x128xf32> -> vector<2x128xf32>
    %377 = vector.broadcast %296 : vector<1x128xf32> to vector<2x128xf32>
    %378 = arith.addf %376, %377 : vector<2x128xf32>
    %cst_262 = arith.constant 0.000000e+00 : f32
    %379 = vector.broadcast %cst_262 : f32 to vector<2x128xf32>
    %380 = arith.maximumf %378, %379 : vector<2x128xf32>
    %381 = arith.truncf %380 : vector<2x128xf32> to vector<2x128xbf16>
    %c0_263 = arith.constant 0 : index
    %c0_264 = arith.constant 0 : index
    %382 = vector.load %arg21[%c0_263, %c0_264] : memref<128x128xbf16, #tpu.memory_space<vmem>>, vector<128x128xbf16>
    %cst_265 = arith.constant dense<0.000000e+00> : vector<2x128xf32>
    %383 = tpu.matmul %381, %382, %cst_265 {dimension_numbers = #tpu.dot_dimension_numbers<[1], [0], [0], [1], [0, 0, 1, 1], [], []>} : vector<2x128xbf16>, vector<128x128xbf16>, vector<2x128xf32> -> vector<2x128xf32>
    %384 = vector.broadcast %297 : vector<1x128xf32> to vector<2x128xf32>
    %385 = arith.addf %383, %384 : vector<2x128xf32>
    %386 = arith.addf %385, %374 : vector<2x128xf32>
    %cst_266 = arith.constant 0.000000e+00 : f32
    %387 = vector.broadcast %cst_266 : f32 to vector<2x128xf32>
    %388 = arith.maximumf %386, %387 : vector<2x128xf32>
    %389 = arith.truncf %388 : vector<2x128xf32> to vector<2x128xbf16>
    %390 = arith.extf %389 : vector<2x128xbf16> to vector<2x128xf32>
    %c0_267 = arith.constant 0 : index
    %c0_268 = arith.constant 0 : index
    %c0_269 = arith.constant 0 : index
    %391 = vector.load %arg24[%c0_267, %c0_268, %c0_269] : memref<1x2x128xf32, #tpu.memory_space<vmem>>, vector<1x2x128xf32>
    %392 = vector.shape_cast %391 : vector<1x2x128xf32> to vector<2x128xf32>
    %393 = vector.shape_cast %390 : vector<2x128xf32> to vector<1x2x128xf32>
    tpu.vector_store %arg24[%c0_267, %c0_268, %c0_269], %393 {strides = array<i32>} : memref<1x2x128xf32, #tpu.memory_space<vmem>>, vector<1x2x128xf32>,
    return
  }
  func.func @transform_0(%arg0: i32) -> (i32, i32, i32) {
    %c0_i32 = arith.constant 0 : i32
    %c0_i32_0 = arith.constant 0 : i32
    %c0_i32_1 = arith.constant 0 : i32
    return %arg0, %c0_i32, %c0_i32_0 : i32, i32, i32
  }
  func.func @transform_1(%arg0: i32) -> (i32, i32) {
    %c0_i32 = arith.constant 0 : i32
    %c0_i32_0 = arith.constant 0 : i32
    %c0_i32_1 = arith.constant 0 : i32
    return %c0_i32, %c0_i32_0 : i32, i32
  }
  func.func @transform_2(%arg0: i32) -> (i32, i32) {
    %c0_i32 = arith.constant 0 : i32
    %c0_i32_0 = arith.constant 0 : i32
    %c0_i32_1 = arith.constant 0 : i32
    return %c0_i32, %c0_i32_0 : i32, i32
  }
  func.func @transform_3(%arg0: i32) -> (i32, i32) {
    %c0_i32 = arith.constant 0 : i32
    %c0_i32_0 = arith.constant 0 : i32
    %c0_i32_1 = arith.constant 0 : i32
    return %c0_i32, %c0_i32_0 : i32, i32
  }
  func.func @transform_4(%arg0: i32) -> (i32, i32) {
    %c0_i32 = arith.constant 0 : i32
    %c0_i32_0 = arith.constant 0 : i32
    %c0_i32_1 = arith.constant 0 : i32
    return %c0_i32, %c0_i32_0 : i32, i32
  }
  func.func @transform_5(%arg0: i32) -> (i32, i32) {
    %c0_i32 = arith.constant 0 : i32
    %c0_i32_0 = arith.constant 0 : i32
    %c0_i32_1 = arith.constant 0 : i32
    return %c0_i32, %c0_i32_0 : i32, i32
  }
  func.func @transform_6(%arg0: i32) -> (i32, i32) {
    %c0_i32 = arith.constant 0 : i32
    %c0_i32_0 = arith.constant 0 : i32
    %c0_i32_1 = arith.constant 0 : i32
    return %c0_i32, %c0_i32_0 : i32, i32
  }
  func.func @transform_7(%arg0: i32) -> (i32, i32, i32) {
    %c0_i32 = arith.constant 0 : i32
    %c0_i32_0 = arith.constant 0 : i32
    %c0_i32_1 = arith.constant 0 : i32
    %c0_i32_2 = arith.constant 0 : i32
    return %c0_i32, %c0_i32_0, %c0_i32_1 : i32, i32, i32
  }
  func.func @transform_8(%arg0: i32) -> (i32, i32) {
    %c0_i32 = arith.constant 0 : i32
    %c0_i32_0 = arith.constant 0 : i32
    %c0_i32_1 = arith.constant 0 : i32
    return %c0_i32, %c0_i32_0 : i32, i32
  }
  func.func @transform_9(%arg0: i32) -> (i32, i32) {
    %c0_i32 = arith.constant 0 : i32
    %c0_i32_0 = arith.constant 0 : i32
    %c0_i32_1 = arith.constant 0 : i32
    return %c0_i32, %c0_i32_0 : i32, i32
  }
  func.func @transform_10(%arg0: i32) -> (i32, i32) {
    %c0_i32 = arith.constant 0 : i32
    %c0_i32_0 = arith.constant 0 : i32
    %c0_i32_1 = arith.constant 0 : i32
    return %c0_i32, %c0_i32_0 : i32, i32
  }
  func.func @transform_11(%arg0: i32) -> (i32, i32) {
    %c0_i32 = arith.constant 0 : i32
    %c0_i32_0 = arith.constant 0 : i32
    %c0_i32_1 = arith.constant 0 : i32
    return %c0_i32, %c0_i32_0 : i32, i32
  }
  func.func @transform_12(%arg0: i32) -> (i32, i32, i32) {
    %c0_i32 = arith.constant 0 : i32
    %c0_i32_0 = arith.constant 0 : i32
    %c0_i32_1 = arith.constant 0 : i32
    %c0_i32_2 = arith.constant 0 : i32
    return %c0_i32, %c0_i32_0, %c0_i32_1 : i32, i32, i32
  }
  func.func @transform_13(%arg0: i32) -> (i32, i32) {
    %c0_i32 = arith.constant 0 : i32
    %c0_i32_0 = arith.constant 0 : i32
    %c0_i32_1 = arith.constant 0 : i32
    return %c0_i32, %c0_i32_0 : i32, i32
  }
  func.func @transform_14(%arg0: i32) -> (i32, i32) {
    %c0_i32 = arith.constant 0 : i32
    %c0_i32_0 = arith.constant 0 : i32
    %c0_i32_1 = arith.constant 0 : i32
    return %c0_i32, %c0_i32_0 : i32, i32
  }
  func.func @transform_15(%arg0: i32) -> (i32, i32) {
    %c0_i32 = arith.constant 0 : i32
    %c0_i32_0 = arith.constant 0 : i32
    %c0_i32_1 = arith.constant 0 : i32
    return %c0_i32, %c0_i32_0 : i32, i32
  }
  func.func @transform_16(%arg0: i32) -> (i32, i32) {
    %c0_i32 = arith.constant 0 : i32
    %c0_i32_0 = arith.constant 0 : i32
    %c0_i32_1 = arith.constant 0 : i32
    return %c0_i32, %c0_i32_0 : i32, i32
  }
  func.func @transform_17(%arg0: i32) -> (i32, i32, i32) {
    %c0_i32 = arith.constant 0 : i32
    %c0_i32_0 = arith.constant 0 : i32
    %c0_i32_1 = arith.constant 0 : i32
    %c0_i32_2 = arith.constant 0 : i32
    return %c0_i32, %c0_i32_0, %c0_i32_1 : i32, i32, i32
  }
  func.func @transform_18(%arg0: i32) -> (i32, i32) {
    %c0_i32 = arith.constant 0 : i32
    %c0_i32_0 = arith.constant 0 : i32
    %c0_i32_1 = arith.constant 0 : i32
    return %c0_i32, %c0_i32_0 : i32, i32
  }
  func.func @transform_19(%arg0: i32) -> (i32, i32) {
    %c0_i32 = arith.constant 0 : i32
    %c0_i32_0 = arith.constant 0 : i32
    %c0_i32_1 = arith.constant 0 : i32
    return %c0_i32, %c0_i32_0 : i32, i32
  }
  func.func @transform_20(%arg0: i32) -> (i32, i32) {
    %c0_i32 = arith.constant 0 : i32
    %c0_i32_0 = arith.constant 0 : i32
    %c0_i32_1 = arith.constant 0 : i32
    return %c0_i32, %c0_i32_0 : i32, i32
  }
  func.func @transform_21(%arg0: i32) -> (i32, i32) {
    %c0_i32 = arith.constant 0 : i32
    %c0_i32_0 = arith.constant 0 : i32
    %c0_i32_1 = arith.constant 0 : i32
    return %c0_i32, %c0_i32_0 : i32, i32
  }
  func.func @transform_22(%arg0: i32) -> (i32, i32, i32) {
    %c0_i32 = arith.constant 0 : i32
    %c0_i32_0 = arith.constant 0 : i32
    %c0_i32_1 = arith.constant 0 : i32
    %c0_i32_2 = arith.constant 0 : i32
    return %c0_i32, %c0_i32_0, %c0_i32_1 : i32, i32, i32
  }
  func.func @transform_23(%arg0: i32) -> (i32, i32, i32) {
    %c0_i32 = arith.constant 0 : i32
    %c0_i32_0 = arith.constant 0 : i32
    %c0_i32_1 = arith.constant 0 : i32
    return %arg0, %c0_i32, %c0_i32_0 : i32, i32, i32
  }
}

</mosaic_0001>

<bundles_post_ra>
// kernel: encoder_forward.1
= control target key start
LH: loop header
LB: loop body
LE: loop exit
PB: predicated region body
PF: predicated region fallthrough
CT: control target
= control target key end

     0   :  { %s18255_s0 = inlined_call_operand.vmem [shape: bf16[2,512,32], index: 0, kind: input, shape index: {}]   ;;  %s18256_s1 = inlined_call_operand.vmem [shape: bf16[32,128], index: 1, kind: input, shape index: {}]   ;;  %s18257_s2 = inlined_call_operand.vmem [shape: f32[1,128], index: 2, kind: input, shape index: {}]   ;;  %s18258_s3 = inlined_call_operand.vmem [shape: bf16[128,256], index: 3, kind: input, shape index: {}]   ;;  %s18259_s4 = inlined_call_operand.vmem [shape: bf16[1152,128], index: 4, kind: input, shape index: {}]   ;;  %s18260_s5 = inlined_call_operand.vmem [shape: bf16[128,128], index: 5, kind: input, shape index: {}]   ;;  %s18261_s6 = inlined_call_operand.vmem [shape: f32[4,128], index: 6, kind: input, shape index: {}]   ;;  %s18262_s7 = inlined_call_operand.vmem [shape: bf16[9,64,256], index: 7, kind: input, shape index: {}]   ;;  %s18263_s8 = inlined_call_operand.vmem [shape: bf16[128,256], index: 8, kind: input, shape index: {}]   ;;  %s18264_s9 = inlined_call_operand.vmem [shape: bf16[1152,128], index: 9, kind: input, shape index: {}]   ;;  %s18265_s10 = inlined_call_operand.vmem [shape: bf16[128,128], index: 10, kind: input, shape index: {}]   ;;  %s18266_s11 = inlined_call_operand.vmem [shape: f32[4,128], index: 11, kind: input, shape index: {}]   ;;  %s18267_s12 = inlined_call_operand.vmem [shape: bf16[9,16,64], index: 12, kind: input, shape index: {}]   ;;  %s18268_s13 = inlined_call_operand.vmem [shape: bf16[128,256], index: 13, kind: input, shape index: {}]   ;;  %s18269_s14 = inlined_call_operand.vmem [shape: bf16[1152,128], index: 14, kind: input, shape index: {}]   ;;  %s18270_s15 = inlined_call_operand.vmem [shape: bf16[128,128], index: 15, kind: input, shape index: {}]   ;;  %s18271_s16 = inlined_call_operand.vmem [shape: f32[4,128], index: 16, kind: input, shape index: {}]   ;;  %s18272_s17 = inlined_call_operand.vmem [shape: bf16[9,4,16], index: 17, kind: input, shape index: {}]   ;;  %s18273_s18 = inlined_call_operand.vmem [shape: bf16[128,256], index: 18, kind: input, shape index: {}]   ;;  %s18274_s19 = inlined_call_operand.vmem [shape: bf16[1152,128], index: 19, kind: input, shape index: {}]   ;;  %s18275_s20 = inlined_call_operand.vmem [shape: bf16[128,128], index: 20, kind: input, shape index: {}]   ;;  %s18276_s21 = inlined_call_operand.vmem [shape: f32[4,128], index: 21, kind: input, shape index: {}]   ;;  %s18277_s22 = inlined_call_operand.vmem [shape: bf16[9,1,4], index: 22, kind: input, shape index: {}]   ;;  %s18278_s23 = inlined_call_operand.hbm [shape: f32[2,2,128], index: 23, kind: output, shape index: {}]  }
   0x1   :  { %18455 = sst [smem:[#allocation175_spill]] %s18255_s0 }
   0x2   :  { %18456 = sst [smem:[#allocation176_spill]] %s18256_s1 }
   0x3   :  { %18457 = sst [smem:[#allocation177_spill]] %s18257_s2 }
   0x4   :  { %18458 = sst [smem:[#allocation178_spill]] %s18258_s3 }
   0x5   :  { %18459 = sst [smem:[#allocation179_spill]] %s18259_s4 }
   0x6   :  { %18460 = sst [smem:[#allocation180_spill]] %s18260_s5 }
   0x7   :  { %18461 = sst [smem:[#allocation181_spill]] %s18261_s6 }
   0x8   :  { %18462 = sst [smem:[#allocation182_spill]] %s18262_s7 }
   0x9   :  { %18463 = sst [smem:[#allocation183_spill]] %s18263_s8 }
   0xa   :  { %18464 = sst [smem:[#allocation184_spill]] %s18264_s9 }
   0xb   :  { %18465 = sst [smem:[#allocation185_spill]] %s18265_s10 }
   0xc   :  { %28 = vsyncpa [#allocation3], 0 }
   0xd   :  { %30 = vsyncpa [#allocation3 + $0x1], 0  ;;  %s13182_s4 = smov 0   ;;  %s13184_s30 = smov 0  }
   0xe   :  { %s13186_s24 = smov 0   ;;  %s13188_s25 = smov 0  }
   0xf LB: > { %18466 = sst [smem:[#allocation5_spill]] %s13048_s4  ;;  %s13203_s5 = sadd.s32 4294967295, %s13060_s25   ;;  %s13060_s25 = sphi %s13188_s25, %s19229_s25   ;;  %s13056_s24 = sphi %s13186_s24, %s19231_s24   ;;  %s13052_s30 = sphi %s13184_s30, %s19233_s30   ;;  %s13048_s4 = sphi %s13182_s4, %s19232_s4  }
  0x10   : > { %18467 = sst [smem:[#allocation6_spill]] %s13056_s24  ;;  %s10243_s1 = sadd.s32 4294967294, %s13060_s25  }
  0x11   : > { %18468 = sst [smem:[#allocation7_spill]] %s13060_s25  ;;  %s13207_s26 = sadd.s32 1, %s13060_s25  }
  0x12   : > { %18469 = sst [smem:[#allocation8_spill]] %s13207_s26  ;;  %s531_s2 = sadd.s32 1, %s13056_s24 }
  0x13   : > { %s528_s6 = ssub.s32 %s13060_s25, %s13207_s26  ;;  %p541_p0 = scmp.ne.s32.totalorder %s13056_s24, %s13052_s30 }
  0x14   : > { %p529_p1 = scmp.eq.s32.totalorder %s528_s6, 0  ;;  %p542_p2 = scmp.eq.s32.totalorder %s13203_s5, 1 }
  0x15   : > { %p547_p3 = scmp.ne.s32.totalorder %s13052_s30, %s13048_s4  ;;  %p548_p4 = scmp.eq.s32.totalorder %s10243_s1, 1 }
  0x16   : > { %s13218_s27 = scalar_select %p529_p1, %s13056_s24, %s531_s2  }
  0x17   : > { %p13220_p5 = por %p542_p2, %p541_p0  ;;  %p13224_p6 = por %p548_p4, %p547_p3 }
  0x18   : > { %18470 = sst [smem:[#allocation9_spill]] %s13218_s27  ;;  %p10246_p7 = scmp.ge.s32.totalorder %s13060_s25, 1 }
  0x19   : > { %s18471_s7 = scalar_select %p13220_p5, 1, 0 }
  0x1a   : > { %s18473_s28 = scalar_select %p13224_p6, 1, 0 }
  0x1b   : > { %18472 = sst [smem:[#allocation10_spill]] %s18471_s7  ;;  %p640_p8 = scmp.lt.s32.totalorder %s13060_s25, 3 }
  0x1c   : > { %18474 = sst [smem:[#allocation11_spill]] %s18473_s28 }
  0x1d   : > { %p641_p9 = pnand %p10246_p7, %p640_p8 }
  0x1f   : > { %644 = sbr.rel (%p641_p9) target bundleno = 3967 (0xf7f), region = 112 }
  0x24   : > { %s18475_s0 = sld [smem:[#allocation176_spill]]  ;;  %p704_p10 = scmp.lt.s32.totalorder %s13203_s5, 1  ;;  %vm954_vm0 = vcmask 261120   ;;  %vm6102_vm1 = vcmask 523264   ;;  %vm7697_vm2 = vcmask 130048   ;;  %vm8039_vm3 = vcmask 1041408  }
  0x25   : > { %s18476_s28 = sld [smem:[#allocation175_spill]]  ;;  %vm8079_vm4 = vcmask 1043456   ;;  %vm9008_vm5 = vcmask 31744   ;;  %vm9370_vm6 = vcmask 1040384   ;;  %vm9371_vm7 = vsmask.f32 256 }
  0x26   : > { %s705_s6 = scalar_select %p704_p10, %s13203_s5, 1  ;;  %vm18113_vm8 = vmand %vm9370_vm6, %vm9371_vm7 }
  0x27   : > { %s18478_s25 = sld [smem:[#allocation177_spill]]  ;;  %s701_s1 = sand.u32 1, %s13052_s30  }
  0x28   : > { %s12438_s27 = sshll.u32 %s705_s6, 8  ;;  %s18480_s26 = sld [smem:[#allocation181_spill]] }
  0x29   : > { %s18494_s3 = sld [smem:[#allocation182_spill]]  ;;  %s10247_s2 = sshll.u32 %s701_s1, 1 }
  0x2a   : > { %v12472_v0 = vld [vmem:[%s18475_s0 + $0x8] sm:$0xff]  ;;  %v12471_v1 = vld [vmem:[%s18475_s0] sm:$0xff]  ;;  %s19173_s29 = sld [smem:[#allocation180_spill]]  ;;  %s10169_s24 = scalar_lea.sflag [#allocation3], %s701_s1 }
  0x2b   : > { %1057 = vmatpush.bf16.msra.mxu0 %v12472_v0  ;;  %s13241_s4 = scalar_lea.vmem %s18476_s28, %s12438_s27  ;;  %s18477_s27 = sld [smem:[#allocation178_spill]] }
  0x2c   : > { %v12439_v2 = vld [vmem:[%s13241_s4] sm:$0xff]  ;;  %v12440_v3 = vld [vmem:[%s13241_s4 + $0x8] sm:$0xff]  ;;  %v12441_v4 = vld [vmem:[%s13241_s4 + $0x10] sm:$0xff]  ;;  %s19181_s8 = sld [smem:[#allocation183_spill]] }
  0x2d   : > { %v12442_v5 = vld [vmem:[%s13241_s4 + $0x18] sm:$0xff]  ;;  %v12443_v6 = vld [vmem:[%s13241_s4 + $0x20] sm:$0xff]  ;;  %v12444_v13 = vld [vmem:[%s13241_s4 + $0x28] sm:$0xff]  ;;  %s18479_s6 = smov %s18478_s25  ;;  %s19221_s9 = sld [smem:[#allocation184_spill]] }
  0x2e   : > { %v12445_v37 = vld [vmem:[%s13241_s4 + $0x30] sm:$0xff]  ;;  %v12446_v57 = vld [vmem:[%s13241_s4 + $0x38] sm:$0xff]  ;;  %v12447_v58 = vld [vmem:[%s13241_s4 + $0x40] sm:$0xff]  ;;  %s19222_s10 = sld [smem:[#allocation185_spill]] }
  0x2f   : > { %1058 = vmatpush.bf16.msra.mxu0 %v12471_v1  ;;  %v13359_v60 = vld [vmem:[%s18478_s25] ss:$0 sm:$0xff] }
  0x31   : > { %v10476_v7 = vld [vmem:[%s18477_s27 + $0x70] sm:$0xf]  ;;  %v12488_v8 = vld [vmem:[%s18477_s27 + $0x74] sm:$0xf0]  ;;  %v12487_v9 = vld [vmem:[%s18477_s27 + $0x74] sm:$0xf] }
  0x32   : > { %10386 = vmatmul.msk.bf16.vlgmr.msra.gmra.mxu0 %vm954_vm0, %v12439_v2  ;;  %v10477_v10 = vor.u32 %v12488_v8, %v10476_v7  ;;  %v10478_v11 = vld [vmem:[%s18477_s27 + $0x78] sm:$0xf0]  ;;  %v10468_v14 = vld [vmem:[%s18477_s27 + $0x60] sm:$0xf]  ;;  %v12486_v15 = vld [vmem:[%s18477_s27 + $0x64] sm:$0xf0] }
  0x33   : > { %v10481_v12 = vor.u32 %v12487_v9, %v10478_v11  ;;  %v12485_v16 = vld [vmem:[%s18477_s27 + $0x64] sm:$0xf]  ;;  %v10469_v17 = vor.u32 %v12486_v15, %v10468_v14  ;;  %v10470_v18 = vld [vmem:[%s18477_s27 + $0x68] sm:$0xf0]  ;;  %v10460_v20 = vld [vmem:[%s18477_s27 + $0x50] sm:$0xf] }
  0x34   : > { %1416 = vmatpush.bf16.msra.mxu1 %v10477_v10  ;;  %v10473_v19 = vor.u32 %v12485_v16, %v10470_v18  ;;  %v12484_v21 = vld [vmem:[%s18477_s27 + $0x54] sm:$0xf0]  ;;  %v12483_v22 = vld [vmem:[%s18477_s27 + $0x54] sm:$0xf]  ;;  %v10462_v24 = vld [vmem:[%s18477_s27 + $0x58] sm:$0xf0] }
  0x35   : > { %1585 = vmatpush.bf16.msra.mxu2 %v10481_v12  ;;  %v10461_v23 = vor.u32 %v12484_v21, %v10460_v20  ;;  %v10465_v25 = vor.u32 %v12483_v22, %v10462_v24  ;;  %v10452_v26 = vld [vmem:[%s18477_s27 + $0x40] sm:$0xf]  ;;  %v12482_v27 = vld [vmem:[%s18477_s27 + $0x44] sm:$0xf0]  ;;  %v12481_v28 = vld [vmem:[%s18477_s27 + $0x44] sm:$0xf] }
  0x36   : > { %v10454_v29 = vld [vmem:[%s18477_s27 + $0x48] sm:$0xf0]  ;;  %v10453_v30 = vor.u32 %v12482_v27, %v10452_v26  ;;  %v10444_v32 = vld [vmem:[%s18477_s27 + $0x30] sm:$0xf]  ;;  %v12480_v33 = vld [vmem:[%s18477_s27 + $0x34] sm:$0xf0] }
  0x37   : > { %v10457_v31 = vor.u32 %v12481_v28, %v10454_v29  ;;  %v12479_v34 = vld [vmem:[%s18477_s27 + $0x34] sm:$0xf]  ;;  %v10445_v35 = vor.u32 %v12480_v33, %v10444_v32  ;;  %v10446_v36 = vld [vmem:[%s18477_s27 + $0x38] sm:$0xf0]  ;;  %v10436_v39 = vld [vmem:[%s18477_s27 + $0x20] sm:$0xf] }
  0x38   : > { %1417 = vmatpush.bf16.msra.mxu1 %v10469_v17  ;;  %v10449_v38 = vor.u32 %v12479_v34, %v10446_v36  ;;  %v12478_v40 = vld [vmem:[%s18477_s27 + $0x24] sm:$0xf0]  ;;  %v12477_v42 = vld [vmem:[%s18477_s27 + $0x24] sm:$0xf]  ;;  %v10438_v43 = vld [vmem:[%s18477_s27 + $0x28] sm:$0xf0] }
  0x39   : > { %1586 = vmatpush.bf16.msra.mxu2 %v10473_v19  ;;  %v10437_v41 = vor.u32 %v12478_v40, %v10436_v39  ;;  %v10441_v44 = vor.u32 %v12477_v42, %v10438_v43  ;;  %v10428_v45 = vld [vmem:[%s18477_s27 + $0x10] sm:$0xf]  ;;  %v12476_v46 = vld [vmem:[%s18477_s27 + $0x14] sm:$0xf0]  ;;  %v12475_v47 = vld [vmem:[%s18477_s27 + $0x14] sm:$0xf] }
  0x3a   : > { %v10429_v48 = vor.u32 %v12476_v46, %v10428_v45  ;;  %v10430_v49 = vld [vmem:[%s18477_s27 + $0x18] sm:$0xf0]  ;;  %v10420_v51 = vld [vmem:[%s18477_s27] sm:$0xf]  ;;  %v12474_v52 = vld [vmem:[%s18477_s27 + $0x4] sm:$0xf0] }
  0x3b   : > { %v10433_v50 = vor.u32 %v12475_v47, %v10430_v49  ;;  %v12473_v53 = vld [vmem:[%s18477_s27 + $0x4] sm:$0xf]  ;;  %v10421_v54 = vor.u32 %v12474_v52, %v10420_v51  ;;  %v10422_v55 = vld [vmem:[%s18477_s27 + $0x8] sm:$0xf0]  ;;  %v12449_v11 = vld [vmem:[%s13241_s4 + $0x50] sm:$0xff]  ;;  %s12435_s27 = sshll.u32 %s13203_s5, 1 }
  0x3c   : > { %1418 = vmatpush.bf16.msra.mxu1 %v10461_v23  ;;  %v10425_v56 = vor.u32 %v12473_v53, %v10422_v55  ;;  %v12450_v19 = vld [vmem:[%s13241_s4 + $0x58] sm:$0xff]  ;;  %v12451_v27 = vld [vmem:[%s13241_s4 + $0x60] sm:$0xff]  ;;  %v12453_v43 = vld [vmem:[%s13241_s4 + $0x70] sm:$0xff] }
  0x3d   : > { %1587 = vmatpush.bf16.msra.mxu2 %v10465_v25  ;;  %v12454_v51 = vld [vmem:[%s13241_s4 + $0x78] sm:$0xff] }
  0x40   : > { %1419 = vmatpush.bf16.msra.mxu1 %v10453_v30 }
  0x41   : > { %1588 = vmatpush.bf16.msra.mxu2 %v10457_v31 }
  0x42   : > { %10387 = vmatmul.msk.bf16.gmra.mxu0 %vm954_vm0, %v12440_v3  ;;  %v12448_v3 = vld [vmem:[%s13241_s4 + $0x48] sm:$0xff] }
  0x44   : > { %1420 = vmatpush.bf16.msra.mxu1 %v10445_v35  ;;  %v12452_v35 = vld [vmem:[%s13241_s4 + $0x68] sm:$0xff] }
  0x45   : > { %1589 = vmatpush.bf16.msra.mxu2 %v10449_v38 }
  0x48   : > { %1421 = vmatpush.bf16.msra.mxu1 %v10437_v41 }
  0x49   : > { %1590 = vmatpush.bf16.msra.mxu2 %v10441_v44 }
  0x4c   : > { %1422 = vmatpush.bf16.msra.mxu1 %v10429_v48 }
  0x4d   : > { %1591 = vmatpush.bf16.msra.mxu2 %v10433_v50 }
  0x50   : > { %1423 = vmatpush.bf16.msra.mxu1 %v10421_v54 }
  0x51   : > { %1592 = vmatpush.bf16.msra.mxu2 %v10425_v56 }
  0x52   : > { %10388 = vmatmul.msk.bf16.gmra.mxu0 %vm954_vm0, %v12441_v4 }
  0x62   : > { %10389 = vmatmul.msk.bf16.gmra.mxu0 %vm954_vm0, %v12442_v5 }
  0x72   : > { %10390 = vmatmul.msk.bf16.gmra.mxu0 %vm954_vm0, %v12443_v6 }
  0x82   : > { %10391 = vmatmul.msk.bf16.gmra.mxu0 %vm954_vm0, %v12444_v13 }
  0x92   : > { %10392 = vmatmul.msk.bf16.gmra.mxu0 %vm954_vm0, %v12445_v37 }
  0xa2   : > { %10393 = vmatmul.msk.bf16.gmra.mxu0 %vm954_vm0, %v12446_v57 }
  0xaf   : > { %v1060_v59 = vpop.f32.mrf.mxu0 }
  0xb0   : > { %v1061_v61 = vadd.f32 %v13359_v60, %v1060_v59  ;;  %v12455_v59 = vld [vmem:[%s13241_s4 + $0x80] sm:$0xff] }
  0xb2   : > { %10394 = vmatmul.msk.bf16.gmra.mxu0 %vm954_vm0, %v12447_v58  ;;  %v1220_v0 = vmax.f32 %v1061_v61, 0.0 }
  0xb7   : > { %v1062_v62 = vpop.f32.mrf.mxu0 }
  0xb8   : > { %v1063_v63 = vadd.f32 %v13359_v60, %v1062_v62 }
  0xba   : > { %v1221_v1 = vmax.f32 %v1063_v63, 0.0 }
  0xbc   : > { %v1284_v2 = vpack.c.bf16 %v1221_v1, %v1220_v0  ;;  %v13399_v1 = vld [vmem:[%s18480_s26] ss:$0 sm:$0xff] }
  0xbe   : > { %1424 = vmatmul.bf16.vlgmr.msra.gmra.mxu1 %v1284_v2  ;;  %1593 = vmatmul.bf16.vlgmr.msra.gmra.mxu2 %v1284_v2 }
  0xbf   : > { %v1065_v4 = vpop.f32.mrf.mxu0 }
  0xc0   : > { %v1066_v5 = vadd.f32 %v13359_v60, %v1065_v4 }
  0xc2   : > { %10395 = vmatmul.msk.bf16.gmra.mxu0 %vm954_vm0, %v12448_v3  ;;  %v1222_v8 = vmax.f32 %v1066_v5, 0.0 }
  0xc7   : > { %v1067_v6 = vpop.f32.mrf.mxu0 }
  0xc8   : > { %v1068_v7 = vadd.f32 %v13359_v60, %v1067_v6 }
  0xca   : > { %v1223_v9 = vmax.f32 %v1068_v7, 0.0  ;;  %v12456_v7 = vld [vmem:[%s13241_s4 + $0x88] sm:$0xff] }
  0xcc   : > { %v1285_v10 = vpack.c.bf16 %v1223_v9, %v1222_v8 }
  0xce   : > { %1429 = vmatmul.bf16.gmra.mxu1 %v1285_v10  ;;  %1598 = vmatmul.bf16.gmra.mxu2 %v1285_v10 }
  0xcf   : > { %v1070_v12 = vpop.f32.mrf.mxu0 }
  0xd0   : > { %v1071_v13 = vadd.f32 %v13359_v60, %v1070_v12 }
  0xd2   : > { %10396 = vmatmul.msk.bf16.gmra.mxu0 %vm954_vm0, %v12449_v11  ;;  %v1224_v16 = vmax.f32 %v1071_v13, 0.0 }
  0xd7   : > { %v1072_v14 = vpop.f32.mrf.mxu0 }
  0xd8   : > { %v1073_v15 = vadd.f32 %v13359_v60, %v1072_v14 }
  0xda   : > { %v1225_v17 = vmax.f32 %v1073_v15, 0.0 }
  0xdc   : > { %v1286_v18 = vpack.c.bf16 %v1225_v17, %v1224_v16 }
  0xde   : > { %1434 = vmatmul.bf16.gmra.mxu1 %v1286_v18  ;;  %1603 = vmatmul.bf16.gmra.mxu2 %v1286_v18 }
  0xdf   : > { %v1075_v20 = vpop.f32.mrf.mxu0 }
  0xe0   : > { %v1076_v21 = vadd.f32 %v13359_v60, %v1075_v20 }
  0xe2   : > { %10397 = vmatmul.msk.bf16.gmra.mxu0 %vm954_vm0, %v12450_v19  ;;  %v1226_v24 = vmax.f32 %v1076_v21, 0.0 }
  0xe7   : > { %v1077_v22 = vpop.f32.mrf.mxu0 }
  0xe8   : > { %v1078_v23 = vadd.f32 %v13359_v60, %v1077_v22 }
  0xea   : > { %v1227_v25 = vmax.f32 %v1078_v23, 0.0 }
  0xec   : > { %v1287_v26 = vpack.c.bf16 %v1227_v25, %v1226_v24 }
  0xee   : > { %1439 = vmatmul.bf16.gmra.mxu1 %v1287_v26  ;;  %1608 = vmatmul.bf16.gmra.mxu2 %v1287_v26 }
  0xef   : > { %v1080_v28 = vpop.f32.mrf.mxu0 }
  0xf0   : > { %v1081_v29 = vadd.f32 %v13359_v60, %v1080_v28 }
  0xf2   : > { %10398 = vmatmul.msk.bf16.gmra.mxu0 %vm954_vm0, %v12451_v27  ;;  %v1228_v32 = vmax.f32 %v1081_v29, 0.0 }
  0xf7   : > { %v1082_v30 = vpop.f32.mrf.mxu0 }
  0xf8   : > { %v1083_v31 = vadd.f32 %v13359_v60, %v1082_v30 }
  0xfa   : > { %v1229_v33 = vmax.f32 %v1083_v31, 0.0 }
  0xfc   : > { %v1288_v34 = vpack.c.bf16 %v1229_v33, %v1228_v32  ;;  %v12457_v32 = vld [vmem:[%s13241_s4 + $0x90] sm:$0xff] }
  0xfe   : > { %1444 = vmatmul.bf16.gmra.mxu1 %v1288_v34  ;;  %1613 = vmatmul.bf16.gmra.mxu2 %v1288_v34 }
  0xff   : > { %v1085_v36 = vpop.f32.mrf.mxu0 }
 0x100   : > { %v1086_v37 = vadd.f32 %v13359_v60, %v1085_v36 }
 0x102   : > { %10399 = vmatmul.msk.bf16.gmra.mxu0 %vm954_vm0, %v12452_v35  ;;  %v1230_v40 = vmax.f32 %v1086_v37, 0.0 }
 0x107   : > { %v1087_v38 = vpop.f32.mrf.mxu0 }
 0x108   : > { %v1088_v39 = vadd.f32 %v13359_v60, %v1087_v38 }
 0x10a   : > { %v1231_v41 = vmax.f32 %v1088_v39, 0.0 }
 0x10c   : > { %v1289_v42 = vpack.c.bf16 %v1231_v41, %v1230_v40 }
 0x10e   : > { %1449 = vmatmul.bf16.gmra.mxu1 %v1289_v42  ;;  %1618 = vmatmul.bf16.gmra.mxu2 %v1289_v42 }
 0x10f   : > { %v1090_v44 = vpop.f32.mrf.mxu0 }
 0x110   : > { %v1091_v45 = vadd.f32 %v13359_v60, %v1090_v44 }
 0x112   : > { %10400 = vmatmul.msk.bf16.gmra.mxu0 %vm954_vm0, %v12453_v43  ;;  %v1232_v48 = vmax.f32 %v1091_v45, 0.0 }
 0x117   : > { %v1092_v46 = vpop.f32.mrf.mxu0 }
 0x118   : > { %v1093_v47 = vadd.f32 %v13359_v60, %v1092_v46 }
 0x11a   : > { %v1233_v49 = vmax.f32 %v1093_v47, 0.0 }
 0x11c   : > { %v1290_v50 = vpack.c.bf16 %v1233_v49, %v1232_v48 }
 0x11e   : > { %1454 = vmatmul.bf16.gmra.mxu1 %v1290_v50  ;;  %1623 = vmatmul.bf16.gmra.mxu2 %v1290_v50 }
 0x11f   : > { %v1095_v52 = vpop.f32.mrf.mxu0 }
 0x120   : > { %v1096_v53 = vadd.f32 %v13359_v60, %v1095_v52 }
 0x122   : > { %10401 = vmatmul.msk.bf16.gmra.mxu0 %vm954_vm0, %v12454_v51  ;;  %v1234_v56 = vmax.f32 %v1096_v53, 0.0 }
 0x127   : > { %v1097_v54 = vpop.f32.mrf.mxu0 }
 0x128   : > { %v1098_v55 = vadd.f32 %v13359_v60, %v1097_v54 }
 0x12a   : > { %v1235_v57 = vmax.f32 %v1098_v55, 0.0 }
 0x12c   : > { %v1291_v58 = vpack.c.bf16 %v1235_v57, %v1234_v56 }
 0x12e   : > { %1459 = vmatmul.bf16.gmra.mxu1 %v1291_v58  ;;  %1628 = vmatmul.bf16.gmra.mxu2 %v1291_v58  ;;  %v12458_v58 = vld [vmem:[%s13241_s4 + $0x98] sm:$0xff] }
 0x12f   : > { %v1100_v61 = vpop.f32.mrf.mxu0 }
 0x130   : > { %v1101_v62 = vadd.f32 %v13359_v60, %v1100_v61 }
 0x132   : > { %10402 = vmatmul.msk.bf16.gmra.mxu0 %vm954_vm0, %v12455_v59  ;;  %v1236_v2 = vmax.f32 %v1101_v62, 0.0 }
 0x137   : > { %v1102_v63 = vpop.f32.mrf.mxu0 }
 0x138   : > { %v1103_v0 = vadd.f32 %v13359_v60, %v1102_v63 }
 0x13a   : > { %v1237_v3 = vmax.f32 %v1103_v0, 0.0 }
 0x13b   : > { %v1425_v4 = vpop.f32.mrf.mxu1 }
 0x13c   : > { %v1292_v5 = vpack.c.bf16 %v1237_v3, %v1236_v2  ;;  %v1755_v6 = vadd.f32 %v13399_v1, %v1425_v4 }
 0x13e   : > { %1464 = vmatmul.bf16.gmra.mxu1 %v1292_v5  ;;  %1633 = vmatmul.bf16.gmra.mxu2 %v1292_v5  ;;  %v1819_v9 = vmax.f32 %v1755_v6, 0.0 }
 0x13f   : > { %v1105_v8 = vpop.f32.mrf.mxu0 }
 0x140   : > { %v1883_v13 = vpack.c.bf16 %v1819_v9, %v1819_v9  ;;  %v1106_v14 = vadd.f32 %v13359_v60, %v1105_v8 }
 0x141   : > { %v1594_v10 = vpop.f32.mrf.mxu2 }
 0x142   : > { %10403 = vmatmul.msk.bf16.gmra.mxu0 %vm954_vm0, %v12456_v7  ;;  %v1947_v17 = vpack.c.bf16 %v1594_v10, %v1594_v10  ;;  %v2163_v20 = vunpack.c.l.b16 %v1883_v13  ;;  %v1238_v22 = vmax.f32 %v1106_v14, 0.0 }
 0x143   : > { %v1427_v11 = vpop.f32.mrf.mxu1 }
 0x144   : > { %v1756_v12 = vadd.f32 %v13399_v1, %v1427_v11  ;;  %v13407_v27 = vunpack.c.l.b16 %v1947_v17 }
 0x146   : > { %v1820_v15 = vmax.f32 %v1756_v12, 0.0 }
 0x147   : > { %v1107_v16 = vpop.f32.mrf.mxu0 }
 0x148   : > { %v1884_v18 = vpack.c.bf16 %v1820_v15, %v1820_v15  ;;  %v1108_v19 = vadd.f32 %v13359_v60, %v1107_v16 }
 0x149   : > { %v1596_v21 = vpop.f32.mrf.mxu2 }
 0x14a   : > { %v2164_v23 = vunpack.c.l.b16 %v1884_v18  ;;  %v1239_v24 = vmax.f32 %v1108_v19, 0.0  ;;  %v1948_v25 = vpack.c.bf16 %v1596_v21, %v1596_v21 }
 0x14b   : > { %v1430_v26 = vpop.f32.mrf.mxu1 }
 0x14c   : > { %v13409_v28 = vpack.c.b16 %v2164_v23, %v2163_v20  ;;  %v13411_v29 = vunpack.c.l.b16 %v1948_v25  ;;  %v1293_v30 = vpack.c.bf16 %v1239_v24, %v1238_v22  ;;  %v1757_v31 = vadd.f32 %v13399_v1, %v1430_v26  ;;  %v12459_v22 = vld [vmem:[%s13241_s4 + $0xa0] sm:$0xff] }
 0x14e   : > { %1469 = vmatmul.bf16.gmra.mxu1 %v1293_v30  ;;  %1638 = vmatmul.bf16.gmra.mxu2 %v1293_v30  ;;  %v1821_v35 = vmax.f32 %v1757_v31, 0.0 }
 0x14f   : > { %v1110_v34 = vpop.f32.mrf.mxu0 }
 0x150   : > { %v1885_v39 = vpack.c.bf16 %v1821_v35, %v1821_v35  ;;  %v1111_v40 = vadd.f32 %v13359_v60, %v1110_v34 }
 0x151   : > { %v1599_v36 = vpop.f32.mrf.mxu2 }
 0x152   : > { %10404 = vmatmul.msk.bf16.gmra.mxu0 %vm954_vm0, %v12457_v32  ;;  %v1949_v43 = vpack.c.bf16 %v1599_v36, %v1599_v36  ;;  %v2165_v46 = vunpack.c.l.b16 %v1885_v39  ;;  %v1240_v48 = vmax.f32 %v1111_v40, 0.0 }
 0x153   : > { %v1432_v37 = vpop.f32.mrf.mxu1 }
 0x154   : > { %v1758_v38 = vadd.f32 %v13399_v1, %v1432_v37  ;;  %v13421_v53 = vunpack.c.l.b16 %v1949_v43 }
 0x156   : > { %v1822_v41 = vmax.f32 %v1758_v38, 0.0 }
 0x157   : > { %v1112_v42 = vpop.f32.mrf.mxu0 }
 0x158   : > { %v1886_v44 = vpack.c.bf16 %v1822_v41, %v1822_v41  ;;  %v1113_v45 = vadd.f32 %v13359_v60, %v1112_v42 }
 0x159   : > { %v1601_v47 = vpop.f32.mrf.mxu2 }
 0x15a   : > { %v2166_v49 = vunpack.c.l.b16 %v1886_v44  ;;  %v1241_v50 = vmax.f32 %v1113_v45, 0.0  ;;  %v1950_v51 = vpack.c.bf16 %v1601_v47, %v1601_v47 }
 0x15b   : > { %v1435_v52 = vpop.f32.mrf.mxu1 }
 0x15c   : > { %v13423_v54 = vpack.c.b16 %v2166_v49, %v2165_v46  ;;  %v13425_v55 = vunpack.c.l.b16 %v1950_v51  ;;  %v1294_v56 = vpack.c.bf16 %v1241_v50, %v1240_v48  ;;  %v1759_v57 = vadd.f32 %v13399_v1, %v1435_v52  ;;  %v12460_v51 = vld [vmem:[%s13241_s4 + $0xa8] sm:$0xff] }
 0x15e   : > { %18481 = vst [vmem:[#allocation12_spill] sm:$0xff] %v13423_v54  ;;  %1474 = vmatmul.bf16.gmra.mxu1 %v1294_v56  ;;  %1643 = vmatmul.bf16.gmra.mxu2 %v1294_v56  ;;  %v1823_v62 = vmax.f32 %v1759_v57, 0.0 }
 0x15f   : > { %v1115_v61 = vpop.f32.mrf.mxu0 }
 0x160   : > { %v1887_v3 = vpack.c.bf16 %v1823_v62, %v1823_v62  ;;  %v1116_v4 = vadd.f32 %v13359_v60, %v1115_v61 }
 0x161   : > { %v1604_v63 = vpop.f32.mrf.mxu2 }
 0x162   : > { %10405 = vmatmul.msk.bf16.gmra.mxu0 %vm954_vm0, %v12458_v58  ;;  %v1951_v7 = vpack.c.bf16 %v1604_v63, %v1604_v63  ;;  %v2167_v10 = vunpack.c.l.b16 %v1887_v3  ;;  %v1242_v12 = vmax.f32 %v1116_v4, 0.0 }
 0x163   : > { %v1437_v0 = vpop.f32.mrf.mxu1 }
 0x164   : > { %v1760_v2 = vadd.f32 %v13399_v1, %v1437_v0  ;;  %v13435_v17 = vunpack.c.l.b16 %v1951_v7 }
 0x166   : > { %v1824_v5 = vmax.f32 %v1760_v2, 0.0 }
 0x167   : > { %v1117_v6 = vpop.f32.mrf.mxu0 }
 0x168   : > { %v1888_v8 = vpack.c.bf16 %v1824_v5, %v1824_v5  ;;  %v1118_v9 = vadd.f32 %v13359_v60, %v1117_v6 }
 0x169   : > { %v1606_v11 = vpop.f32.mrf.mxu2 }
 0x16a   : > { %v2168_v13 = vunpack.c.l.b16 %v1888_v8  ;;  %v1243_v14 = vmax.f32 %v1118_v9, 0.0  ;;  %v1952_v15 = vpack.c.bf16 %v1606_v11, %v1606_v11 }
 0x16b   : > { %v1440_v16 = vpop.f32.mrf.mxu1 }
 0x16c   : > { %v13437_v18 = vpack.c.b16 %v2168_v13, %v2167_v10  ;;  %v13439_v19 = vunpack.c.l.b16 %v1952_v15  ;;  %v1295_v20 = vpack.c.bf16 %v1243_v14, %v1242_v12  ;;  %v1761_v21 = vadd.f32 %v13399_v1, %v1440_v16  ;;  %v12461_v10 = vld [vmem:[%s13241_s4 + $0xb0] sm:$0xff] }
 0x16e   : > { %18482 = vst [vmem:[#allocation13_spill] sm:$0xff] %v13437_v18  ;;  %1479 = vmatmul.bf16.gmra.mxu1 %v1295_v20  ;;  %1648 = vmatmul.bf16.gmra.mxu2 %v1295_v20  ;;  %v1825_v25 = vmax.f32 %v1761_v21, 0.0 }
 0x16f   : > { %v1120_v24 = vpop.f32.mrf.mxu0 }
 0x170   : > { %v1889_v32 = vpack.c.bf16 %v1825_v25, %v1825_v25  ;;  %v1121_v34 = vadd.f32 %v13359_v60, %v1120_v24 }
 0x171   : > { %v1609_v26 = vpop.f32.mrf.mxu2 }
 0x172   : > { %10406 = vmatmul.msk.bf16.gmra.mxu0 %vm954_vm0, %v12459_v22  ;;  %v1953_v37 = vpack.c.bf16 %v1609_v26, %v1609_v26  ;;  %v2169_v40 = vunpack.c.l.b16 %v1889_v32  ;;  %v1244_v42 = vmax.f32 %v1121_v34, 0.0 }
 0x173   : > { %v1442_v30 = vpop.f32.mrf.mxu1 }
 0x174   : > { %v1762_v31 = vadd.f32 %v13399_v1, %v1442_v30  ;;  %v13451_v47 = vunpack.c.l.b16 %v1953_v37 }
 0x176   : > { %v1826_v35 = vmax.f32 %v1762_v31, 0.0 }
 0x177   : > { %v1122_v36 = vpop.f32.mrf.mxu0 }
 0x178   : > { %v1890_v38 = vpack.c.bf16 %v1826_v35, %v1826_v35  ;;  %v1123_v39 = vadd.f32 %v13359_v60, %v1122_v36  ;;  %v12462_v35 = vld [vmem:[%s13241_s4 + $0xb8] sm:$0xff] }
 0x179   : > { %v1611_v41 = vpop.f32.mrf.mxu2 }
 0x17a   : > { %v2170_v43 = vunpack.c.l.b16 %v1890_v38  ;;  %v1245_v44 = vmax.f32 %v1123_v39, 0.0  ;;  %v1954_v45 = vpack.c.bf16 %v1611_v41, %v1611_v41 }
 0x17b   : > { %v13449_v46 = vpop.f32.mrf.mxu1 }
 0x17c   : > { %v13453_v48 = vpack.c.b16 %v2170_v43, %v2169_v40  ;;  %v13455_v49 = vunpack.c.l.b16 %v1954_v45  ;;  %v1296_v50 = vpack.c.bf16 %v1245_v44, %v1244_v42 }
 0x17e   : > { %18483 = vst [vmem:[#allocation14_spill] sm:$0xff] %v13453_v48  ;;  %1484 = vmatmul.bf16.gmra.mxu1 %v1296_v50  ;;  %1653 = vmatmul.bf16.gmra.mxu2 %v1296_v50 }
 0x17f   : > { %v1125_v56 = vpop.f32.mrf.mxu0 }
 0x180   : > { %v1126_v61 = vadd.f32 %v13359_v60, %v1125_v56 }
 0x181   : > { %v1614_v57 = vpop.f32.mrf.mxu2 }
 0x182   : > { %10407 = vmatmul.msk.bf16.gmra.mxu0 %vm954_vm0, %v12460_v51  ;;  %v1955_v63 = vpack.c.bf16 %v1614_v57, %v1614_v57  ;;  %v1246_v3 = vmax.f32 %v1126_v61, 0.0 }
 0x183   : > { %v13461_v58 = vpop.f32.mrf.mxu1 }
 0x184   : > { %v13465_v7 = vunpack.c.l.b16 %v1955_v63 }
 0x187   : > { %v1127_v62 = vpop.f32.mrf.mxu0 }
 0x188   : > { %v1128_v0 = vadd.f32 %v13359_v60, %v1127_v62 }
 0x189   : > { %v1616_v2 = vpop.f32.mrf.mxu2 }
 0x18a   : > { %v1247_v4 = vmax.f32 %v1128_v0, 0.0  ;;  %v1956_v5 = vpack.c.bf16 %v1616_v2, %v1616_v2  ;;  %v12463_v0 = vld [vmem:[%s13241_s4 + $0xc0] sm:$0xff] }
 0x18b   : > { %v1450_v6 = vpop.f32.mrf.mxu1 }
 0x18c   : > { %v13467_v8 = vunpack.c.l.b16 %v1956_v5  ;;  %v1297_v9 = vpack.c.bf16 %v1247_v4, %v1246_v3 }
 0x18e   : > { %1489 = vmatmul.bf16.gmra.mxu1 %v1297_v9  ;;  %1658 = vmatmul.bf16.gmra.mxu2 %v1297_v9 }
 0x18f   : > { %v1130_v12 = vpop.f32.mrf.mxu0 }
 0x190   : > { %v1131_v15 = vadd.f32 %v13359_v60, %v1130_v12 }
 0x191   : > { %v1619_v13 = vpop.f32.mrf.mxu2 }
 0x192   : > { %10408 = vmatmul.msk.bf16.gmra.mxu0 %vm954_vm0, %v12461_v10  ;;  %v1957_v20 = vpack.c.bf16 %v1619_v13, %v1619_v13  ;;  %v1248_v24 = vmax.f32 %v1131_v15, 0.0 }
 0x193   : > { %v1452_v14 = vpop.f32.mrf.mxu1 }
 0x194   : > { %v13475_v31 = vunpack.c.l.b16 %v1957_v20 }
 0x197   : > { %v1132_v16 = vpop.f32.mrf.mxu0 }
 0x198   : > { %v1133_v21 = vadd.f32 %v13359_v60, %v1132_v16  ;;  %v1766_v16 = vadd.f32 %v13399_v1, %v1452_v14 }
 0x199   : > { %v1621_v22 = vpop.f32.mrf.mxu2 }
 0x19a   : > { %v1249_v25 = vmax.f32 %v1133_v21, 0.0  ;;  %v1958_v26 = vpack.c.bf16 %v1621_v22, %v1621_v22 }
 0x19b   : > { %v1455_v30 = vpop.f32.mrf.mxu1 }
 0x19c   : > { %v13477_v32 = vunpack.c.l.b16 %v1958_v26  ;;  %v1298_v34 = vpack.c.bf16 %v1249_v25, %v1248_v24  ;;  %v1767_v10 = vadd.f32 %v13399_v1, %v1455_v30  ;;  %v1765_v24 = vadd.f32 %v13399_v1, %v1450_v6 }
 0x19d   : > { %v1764_v30 = vadd.f32 %v13399_v1, %v13461_v58  ;;  %v1763_v6 = vadd.f32 %v13399_v1, %v13449_v46  ;;  %v12464_v46 = vld [vmem:[%s13241_s4 + $0xc8] sm:$0xff] }
 0x19e   : > { %1494 = vmatmul.bf16.gmra.mxu1 %v1298_v34  ;;  %1663 = vmatmul.bf16.gmra.mxu2 %v1298_v34  ;;  %v1831_v25 = vmax.f32 %v1767_v10, 0.0 }
 0x19f   : > { %v1135_v37 = vpop.f32.mrf.mxu0  ;;  %v1827_v10 = vmax.f32 %v1763_v6, 0.0 }
 0x1a0   : > { %v1136_v40 = vadd.f32 %v13359_v60, %v1135_v37 }
 0x1a1   : > { %v1624_v38 = vpop.f32.mrf.mxu2 }
 0x1a2   : > { %10409 = vmatmul.msk.bf16.gmra.mxu0 %vm954_vm0, %v12462_v35  ;;  %v1959_v42 = vpack.c.bf16 %v1624_v38, %v1624_v38  ;;  %v1250_v45 = vmax.f32 %v1136_v40, 0.0 }
 0x1a3   : > { %v1457_v39 = vpop.f32.mrf.mxu1 }
 0x1a4   : > { %v13485_v57 = vunpack.c.l.b16 %v1959_v42  ;;  %v1768_v4 = vadd.f32 %v13399_v1, %v1457_v39  ;;  %v1830_v39 = vmax.f32 %v1766_v16, 0.0 }
 0x1a6   : > { %v1832_v20 = vmax.f32 %v1768_v4, 0.0 }
 0x1a7   : > { %v1137_v41 = vpop.f32.mrf.mxu0 }
 0x1a8   : > { %v1138_v43 = vadd.f32 %v13359_v60, %v1137_v41  ;;  %v1896_v40 = vpack.c.bf16 %v1832_v20, %v1832_v20 }
 0x1a9   : > { %v1626_v44 = vpop.f32.mrf.mxu2 }
 0x1aa   : > { %v1251_v50 = vmax.f32 %v1138_v43, 0.0  ;;  %v1960_v51 = vpack.c.bf16 %v1626_v44, %v1626_v44  ;;  %v2176_v4 = vunpack.c.l.b16 %v1896_v40 }
 0x1ab   : > { %v1460_v56 = vpop.f32.mrf.mxu1 }
 0x1ac   : > { %v13487_v61 = vunpack.c.l.b16 %v1960_v51  ;;  %v1299_v62 = vpack.c.bf16 %v1251_v50, %v1250_v45  ;;  %v1769_v63 = vadd.f32 %v13399_v1, %v1460_v56  ;;  %v1829_v45 = vmax.f32 %v1765_v24, 0.0 }
 0x1ad   : > { %v1895_v50 = vpack.c.bf16 %v1831_v25, %v1831_v25  ;;  %v1891_v25 = vpack.c.bf16 %v1827_v10, %v1827_v10 }
 0x1ae   : > { %1499 = vmatmul.bf16.gmra.mxu1 %v1299_v62  ;;  %1668 = vmatmul.bf16.gmra.mxu2 %v1299_v62  ;;  %v1833_v9 = vmax.f32 %v1769_v63, 0.0 }
 0x1af   : > { %v1140_v3 = vpop.f32.mrf.mxu0 }
 0x1b0   : > { %v1141_v13 = vadd.f32 %v13359_v60, %v1140_v3  ;;  %v1897_v21 = vpack.c.bf16 %v1833_v9, %v1833_v9  ;;  %v1894_v3 = vpack.c.bf16 %v1830_v39, %v1830_v39 }
 0x1b1   : > { %v1629_v5 = vpop.f32.mrf.mxu2 }
 0x1b2   : > { %10410 = vmatmul.msk.bf16.gmra.mxu0 %vm954_vm0, %v12463_v0  ;;  %v1252_v34 = vmax.f32 %v1141_v13, 0.0  ;;  %v1961_v35 = vpack.c.bf16 %v1629_v5, %v1629_v5  ;;  %v2177_v42 = vunpack.c.l.b16 %v1897_v21  ;;  %v1828_v0 = vmax.f32 %v1764_v30, 0.0 }
 0x1b3   : > { %v1462_v12 = vpop.f32.mrf.mxu1  ;;  %v2175_v13 = vunpack.c.l.b16 %v1895_v50  ;;  %v2174_v20 = vunpack.c.l.b16 %v1894_v3 }
 0x1b4   : > { %v1770_v15 = vadd.f32 %v13399_v1, %v1462_v12  ;;  %v13505_v56 = vunpack.c.l.b16 %v1961_v35  ;;  %v1893_v12 = vpack.c.bf16 %v1829_v45, %v1829_v45  ;;  %v1892_v16 = vpack.c.bf16 %v1828_v0, %v1828_v0 }
 0x1b5   : > { %v13518_v21 = vpack.c.b16 %v2176_v4, %v2175_v13 }
 0x1b6   : > { %v1834_v22 = vmax.f32 %v1770_v15, 0.0 }
 0x1b7   : > { %v1142_v26 = vpop.f32.mrf.mxu0  ;;  %18485 = vst [vmem:[#allocation16_spill] sm:$0xff] %v13518_v21 }
 0x1b8   : > { %v1898_v37 = vpack.c.bf16 %v1834_v22, %v1834_v22  ;;  %v1143_v38 = vadd.f32 %v13359_v60, %v1142_v26  ;;  %v2173_v26 = vunpack.c.l.b16 %v1893_v12 }
 0x1b9   : > { %v1631_v41 = vpop.f32.mrf.mxu2 }
 0x1ba   : > { %v2178_v14 = vunpack.c.l.b16 %v1898_v37  ;;  %v1253_v43 = vmax.f32 %v1143_v38, 0.0  ;;  %v1962_v44 = vpack.c.bf16 %v1631_v41, %v1631_v41  ;;  %v2172_v38 = vunpack.c.l.b16 %v1892_v16 }
 0x1bb   : > { %v1465_v51 = vpop.f32.mrf.mxu1  ;;  %v13526_v30 = vpack.c.b16 %v2174_v20, %v2173_v26  ;;  %v2171_v41 = vunpack.c.l.b16 %v1891_v25 }
 0x1bc   : > { %v13507_v62 = vpack.c.b16 %v2178_v14, %v2177_v42  ;;  %v13509_v63 = vunpack.c.l.b16 %v1962_v44  ;;  %v1300_v58 = vpack.c.bf16 %v1253_v43, %v1252_v34  ;;  %v1771_v9 = vadd.f32 %v13399_v1, %v1465_v51 }
 0x1bd   : > { %18486 = vst [vmem:[#allocation17_spill] sm:$0xff] %v13526_v30  ;;  %v13532_v45 = vpack.c.b16 %v2172_v38, %v2171_v41 }
 0x1be   : > { %18484 = vst [vmem:[#allocation15_spill] sm:$0xff] %v13507_v62  ;;  %1504 = vmatmul.bf16.gmra.mxu1 %v1300_v58  ;;  %1673 = vmatmul.bf16.gmra.mxu2 %v1300_v58  ;;  %v1835_v24 = vmax.f32 %v1771_v9, 0.0 }
 0x1bf   : > { %2227 = vmatpush.bf16.msra.mxu3 %v13507_v62  ;;  %2651 = vmatpush.bf16.msrb.mxu0 %v13507_v62  ;;  %v1145_v15 = vpop.f32.mrf.mxu0  ;;  %18487 = vst [vmem:[#allocation18_spill] sm:$0xff] %v13532_v45 }
 0x1c0   : > { %2757 = vmatpush.bf16.msrb.mxu2 %v13507_v62  ;;  %v1146_v35 = vadd.f32 %v13359_v60, %v1145_v15  ;;  %v1899_v39 = vpack.c.bf16 %v1835_v24, %v1835_v24  ;;  %v12465_v15 = vld [vmem:[%s13241_s4 + $0xd0] sm:$0xff] }
 0x1c1   : > { %v1634_v22 = vpop.f32.mrf.mxu2 }
 0x1c2   : > { %10411 = vmatmul.msk.bf16.gmra.mxu0 %vm954_vm0, %v12464_v46  ;;  %v1254_v14 = vmax.f32 %v1146_v35, 0.0  ;;  %v1963_v43 = vpack.c.bf16 %v1634_v22, %v1634_v22  ;;  %v2179_v51 = vunpack.c.l.b16 %v1899_v39 }
 0x1c3   : > { %2228 = vmatpush.bf16.msra.mxu3 %v13518_v21  ;;  %2652 = vmatpush.bf16.msrb.mxu0 %v13518_v21  ;;  %v1467_v34 = vpop.f32.mrf.mxu1 }
 0x1c4   : > { %2758 = vmatpush.bf16.msrb.mxu2 %v13518_v21  ;;  %v1772_v37 = vadd.f32 %v13399_v1, %v1467_v34  ;;  %v13536_v9 = vunpack.c.l.b16 %v1963_v43 }
 0x1c6   : > { %v1836_v40 = vmax.f32 %v1772_v37, 0.0  ;;  %18488 = vst [vmem:[#allocation19_spill] sm:$0xff] %v13536_v9  ;;  %v10676_v9 = vld [vmem:[%s18494_s3 + $0x100] sm:$0xf] }
 0x1c7   : > { %2229 = vmatpush.bf16.msra.mxu3 %v13526_v30  ;;  %2653 = vmatpush.bf16.msrb.mxu0 %v13526_v30  ;;  %v1147_v42 = vpop.f32.mrf.mxu0 }
 0x1c8   : > { %v1900_v44 = vpack.c.bf16 %v1836_v40, %v1836_v40  ;;  %2759 = vmatpush.bf16.msrb.mxu2 %v13526_v30  ;;  %v1148_v6 = vadd.f32 %v13359_v60, %v1147_v42 }
 0x1c9   : > { %v1636_v50 = vpop.f32.mrf.mxu2 }
 0x1ca   : > { %v2180_v58 = vunpack.c.l.b16 %v1900_v44  ;;  %v1255_v0 = vmax.f32 %v1148_v6, 0.0  ;;  %v1964_v3 = vpack.c.bf16 %v1636_v50, %v1636_v50 }
 0x1cb   : > { %2230 = vmatpush.bf16.msra.mxu3 %v13532_v45  ;;  %2654 = vmatpush.bf16.msrb.mxu0 %v13532_v45  ;;  %v1470_v4 = vpop.f32.mrf.mxu1 }
 0x1cc   : > { %v13538_v46 = vpack.c.b16 %v2180_v58, %v2179_v51  ;;  %v13540_v10 = vunpack.c.l.b16 %v1964_v3  ;;  %2760 = vmatpush.bf16.msrb.mxu2 %v13532_v45  ;;  %v1301_v12 = vpack.c.bf16 %v1255_v0, %v1254_v14  ;;  %v1773_v13 = vadd.f32 %v13399_v1, %v1470_v4 }
 0x1ce   : > { %18489 = vst [vmem:[#allocation20_spill] sm:$0xff] %v13540_v10  ;;  %1509 = vmatmul.bf16.gmra.mxu1 %v1301_v12  ;;  %1678 = vmatmul.bf16.gmra.mxu2 %v1301_v12  ;;  %v1837_v24 = vmax.f32 %v1773_v13, 0.0  ;;  %v12466_v13 = vld [vmem:[%s13241_s4 + $0xd8] sm:$0xff] }
 0x1cf   : > { %2231 = vmatpush.bf16.msra.mxu3 %v13453_v48  ;;  %2655 = vmatpush.bf16.msrb.mxu0 %v13453_v48  ;;  %v1150_v20 = vpop.f32.mrf.mxu0 }
 0x1d0   : > { %2761 = vmatpush.bf16.msrb.mxu2 %v13453_v48  ;;  %v1151_v26 = vadd.f32 %v13359_v60, %v1150_v20  ;;  %v1901_v35 = vpack.c.bf16 %v1837_v24, %v1837_v24 }
 0x1d1   : > { %v1639_v22 = vpop.f32.mrf.mxu2 }
 0x1d2   : > { %10412 = vmatmul.msk.bf16.gmra.mxu0 %vm954_vm0, %v12465_v15  ;;  %v1256_v39 = vmax.f32 %v1151_v26, 0.0  ;;  %v1965_v40 = vpack.c.bf16 %v1639_v22, %v1639_v22  ;;  %v2181_v43 = vunpack.c.l.b16 %v1901_v35 }
 0x1d3   : > { %2232 = vmatpush.bf16.msra.mxu3 %v13437_v18  ;;  %2656 = vmatpush.bf16.msrb.mxu0 %v13437_v18  ;;  %v1472_v25 = vpop.f32.mrf.mxu1 }
 0x1d4   : > { %2762 = vmatpush.bf16.msrb.mxu2 %v13437_v18  ;;  %v1774_v34 = vadd.f32 %v13399_v1, %v1472_v25  ;;  %v13562_v58 = vunpack.c.l.b16 %v1965_v40 }
 0x1d6   : > { %v1838_v37 = vmax.f32 %v1774_v34, 0.0  ;;  %18490 = vst [vmem:[#allocation21_spill] sm:$0xff] %v13562_v58 }
 0x1d7   : > { %2233 = vmatpush.bf16.msra.mxu3 %v13423_v54  ;;  %2657 = vmatpush.bf16.msrb.mxu0 %v13423_v54  ;;  %v1152_v38 = vpop.f32.mrf.mxu0 }
 0x1d8   : > { %v1902_v41 = vpack.c.bf16 %v1838_v37, %v1838_v37  ;;  %2763 = vmatpush.bf16.msrb.mxu2 %v13423_v54  ;;  %v1153_v42 = vadd.f32 %v13359_v60, %v1152_v38 }
 0x1d9   : > { %v1641_v14 = vpop.f32.mrf.mxu2 }
 0x1da   : > { %v2182_v44 = vunpack.c.l.b16 %v1902_v41  ;;  %v1257_v6 = vmax.f32 %v1153_v42, 0.0  ;;  %v1966_v50 = vpack.c.bf16 %v1641_v14, %v1641_v14 }
 0x1db   : > { %2234 = vmatpush.bf16.msra.mxu3 %v13409_v28  ;;  %2658 = vmatpush.bf16.msrb.mxu0 %v13409_v28  ;;  %v1475_v51 = vpop.f32.mrf.mxu1 }
 0x1dc   : > { %v13564_v0 = vpack.c.b16 %v2182_v44, %v2181_v43  ;;  %v13566_v3 = vunpack.c.l.b16 %v1966_v50  ;;  %2764 = vmatpush.bf16.msrb.mxu2 %v13409_v28  ;;  %v1302_v4 = vpack.c.bf16 %v1257_v6, %v1256_v39  ;;  %v1775_v12 = vadd.f32 %v13399_v1, %v1475_v51 }
 0x1de   : > { %18491 = vst [vmem:[#allocation22_spill] sm:$0xff] %v13566_v3  ;;  %1514 = vmatmul.bf16.gmra.mxu1 %v1302_v4  ;;  %1683 = vmatmul.bf16.gmra.mxu2 %v1302_v4  ;;  %v1839_v24 = vmax.f32 %v1775_v12, 0.0 }
 0x1df   : > { %2863 = vmatpush.bf16.msra.mxu0 %v13507_v62  ;;  %v1155_v20 = vpop.f32.mrf.mxu0 }
 0x1e0   : > { %2969 = vmatpush.bf16.msra.mxu2 %v13507_v62  ;;  %v1156_v26 = vadd.f32 %v13359_v60, %v1155_v20  ;;  %v1903_v35 = vpack.c.bf16 %v1839_v24, %v1839_v24  ;;  %v12467_v24 = vld [vmem:[%s13241_s4 + $0xe0] sm:$0xff] }
 0x1e1   : > { %v1644_v22 = vpop.f32.mrf.mxu2 }
 0x1e2   : > { %10413 = vmatmul.msk.bf16.gmra.mxu0 %vm954_vm0, %v12466_v13  ;;  %v1258_v39 = vmax.f32 %v1156_v26, 0.0  ;;  %v1967_v40 = vpack.c.bf16 %v1644_v22, %v1644_v22  ;;  %v2183_v43 = vunpack.c.l.b16 %v1903_v35 }
 0x1e3   : > { %2864 = vmatpush.bf16.msra.mxu0 %v13518_v21  ;;  %v1477_v25 = vpop.f32.mrf.mxu1 }
 0x1e4   : > { %2970 = vmatpush.bf16.msra.mxu2 %v13518_v21  ;;  %v1776_v34 = vadd.f32 %v13399_v1, %v1477_v25  ;;  %v13585_v4 = vunpack.c.l.b16 %v1967_v40  ;;  %v10548_v40 = vld [vmem:[%s18494_s3] sm:$0xf] }
 0x1e6   : > { %v1840_v37 = vmax.f32 %v1776_v34, 0.0  ;;  %18492 = vst [vmem:[#allocation23_spill] sm:$0xff] %v13585_v4 }
 0x1e7   : > { %2865 = vmatpush.bf16.msra.mxu0 %v13526_v30  ;;  %v1157_v38 = vpop.f32.mrf.mxu0 }
 0x1e8   : > { %2971 = vmatpush.bf16.msra.mxu2 %v13526_v30  ;;  %v1904_v41 = vpack.c.bf16 %v1840_v37, %v1840_v37  ;;  %v1158_v42 = vadd.f32 %v13359_v60, %v1157_v38 }
 0x1e9   : > { %v1646_v14 = vpop.f32.mrf.mxu2 }
 0x1ea   : > { %v2184_v44 = vunpack.c.l.b16 %v1904_v41  ;;  %v1259_v6 = vmax.f32 %v1158_v42, 0.0  ;;  %v1968_v50 = vpack.c.bf16 %v1646_v14, %v1646_v14  ;;  %v12490_v41 = vld [vmem:[%s18494_s3 + $0x4] sm:$0xf0] }
 0x1eb   : > { %2866 = vmatpush.bf16.msra.mxu0 %v13532_v45  ;;  %v1480_v51 = vpop.f32.mrf.mxu1  ;;  %v13610_v42 = vor.u32 %v12490_v41, %v10548_v40 }
 0x1ec   : > { %2972 = vmatpush.bf16.msra.mxu2 %v13532_v45  ;;  %v13587_v12 = vpack.c.b16 %v2184_v44, %v2183_v43  ;;  %v13589_v13 = vunpack.c.l.b16 %v1968_v50  ;;  %v1303_v20 = vpack.c.bf16 %v1259_v6, %v1258_v39  ;;  %v1777_v22 = vadd.f32 %v13399_v1, %v1480_v51 }
 0x1ed   : > { %2235 = vmatmul.bf16.vlgmr.msra.gmra.mxu3 %v13610_v42 }
 0x1ee   : > { %18493 = vst [vmem:[#allocation24_spill] sm:$0xff] %v13589_v13  ;;  %1519 = vmatmul.bf16.gmra.mxu1 %v1303_v20  ;;  %1688 = vmatmul.bf16.gmra.mxu2 %v1303_v20  ;;  %v1841_v35 = vmax.f32 %v1777_v22, 0.0 }
 0x1ef   : > { %2867 = vmatpush.bf16.msra.mxu0 %v13453_v48  ;;  %v1160_v26 = vpop.f32.mrf.mxu0 }
 0x1f0   : > { %2973 = vmatpush.bf16.msra.mxu2 %v13453_v48  ;;  %v1161_v38 = vadd.f32 %v13359_v60, %v1160_v26  ;;  %v1905_v14 = vpack.c.bf16 %v1841_v35, %v1841_v35 }
 0x1f1   : > { %v1649_v34 = vpop.f32.mrf.mxu2 }
 0x1f2   : > { %10414 = vmatmul.msk.bf16.gmra.mxu0 %vm954_vm0, %v12467_v24  ;;  %v1260_v6 = vmax.f32 %v1161_v38, 0.0  ;;  %v1969_v50 = vpack.c.bf16 %v1649_v34, %v1649_v34  ;;  %v2185_v24 = vunpack.c.l.b16 %v1905_v14 }
 0x1f3   : > { %2868 = vmatpush.bf16.msra.mxu0 %v13437_v18  ;;  %v1482_v37 = vpop.f32.mrf.mxu1 }
 0x1f4   : > { %2974 = vmatpush.bf16.msra.mxu2 %v13437_v18  ;;  %v1778_v39 = vadd.f32 %v13399_v1, %v1482_v37 }
 0x1f6   : > { %v1842_v43 = vmax.f32 %v1778_v39, 0.0  ;;  %v13618_v39 = vunpack.c.l.b16 %v1969_v50 }
 0x1f7   : > { %2869 = vmatpush.bf16.msra.mxu0 %v13423_v54  ;;  %v1162_v44 = vpop.f32.mrf.mxu0 }
 0x1f8   : > { %2975 = vmatpush.bf16.msra.mxu2 %v13423_v54  ;;  %v1906_v51 = vpack.c.bf16 %v1842_v43, %v1842_v43  ;;  %v1163_v20 = vadd.f32 %v13359_v60, %v1162_v44  ;;  %18495 = vst [vmem:[#allocation25_spill] sm:$0xff] %v13618_v39  ;;  %v12468_v43 = vld [vmem:[%s13241_s4 + $0xe8] sm:$0xff] }
 0x1f9   : > { %v1651_v22 = vpop.f32.mrf.mxu2 }
 0x1fa   : > { %v2186_v26 = vunpack.c.l.b16 %v1906_v51  ;;  %v1261_v37 = vmax.f32 %v1163_v20, 0.0  ;;  %v1970_v40 = vpack.c.bf16 %v1651_v22, %v1651_v22  ;;  %v10556_v20 = vld [vmem:[%s18494_s3 + $0x10] sm:$0xf] }
 0x1fb   : > { %2870 = vmatpush.bf16.msra.mxu0 %v13409_v28  ;;  %v13616_v35 = vpop.f32.mrf.mxu1 }
 0x1fc   : > { %2976 = vmatpush.bf16.msra.mxu2 %v13409_v28  ;;  %v13620_v41 = vpack.c.b16 %v2186_v26, %v2185_v24  ;;  %v13622_v34 = vunpack.c.l.b16 %v1970_v40  ;;  %v1304_v38 = vpack.c.bf16 %v1261_v37, %v1260_v6  ;;  %v12492_v6 = vld [vmem:[%s18494_s3 + $0x14] sm:$0xf0] }
 0x1fd   : > { %v13637_v22 = vor.u32 %v12492_v6, %v10556_v20  ;;  %v12469_v20 = vld [vmem:[%s13241_s4 + $0xf0] sm:$0xff] }
 0x1fe   : > { %18496 = vst [vmem:[#allocation26_spill] sm:$0xff] %v13622_v34  ;;  %1524 = vmatmul.bf16.gmra.mxu1 %v1304_v38  ;;  %1693 = vmatmul.bf16.gmra.mxu2 %v1304_v38 }
 0x1ff   : > { %v1165_v16 = vpop.f32.mrf.mxu0  ;;  %18497 = vst [vmem:[#allocation27_spill] sm:$0xff] %v13637_v22  ;;  %2240 = vmatmul.bf16.gmra.mxu3 %v13637_v22 }
 0x200   : > { %v1166_v50 = vadd.f32 %v13359_v60, %v1165_v16 }
 0x201   : > { %v1654_v14 = vpop.f32.mrf.mxu2 }
 0x202   : > { %10415 = vmatmul.msk.bf16.gmra.mxu0 %vm954_vm0, %v12468_v43  ;;  %v1262_v26 = vmax.f32 %v1166_v50, 0.0  ;;  %v1971_v37 = vpack.c.bf16 %v1654_v14, %v1654_v14 }
 0x203   : > { %v13628_v51 = vpop.f32.mrf.mxu1 }
 0x204   : > { %v13643_v25 = vunpack.c.l.b16 %v1971_v37 }
 0x206   : > { %18498 = vst [vmem:[#allocation28_spill] sm:$0xff] %v13643_v25 }
 0x207   : > { %v1167_v24 = vpop.f32.mrf.mxu0 }
 0x208   : > { %v1168_v40 = vadd.f32 %v13359_v60, %v1167_v24  ;;  %v13654_v24 = vld [vmem:[%s18479_s6] ss:$0 sm:$0xff]  ;;  %s10179_s6 = scalar_lea.hbm %s18278_s23, %s12435_s27 }
 0x209   : > { %v1656_v38 = vpop.f32.mrf.mxu2  ;;  %s10183_s25 = sshll.u32 %s10179_s6, 4  ;;  %s10184_s25 = int_to_ptr.hbm [resolvable:$true] %s10183_s25 }
 0x20a   : > { %v1263_v16 = vmax.f32 %v1168_v40, 0.0  ;;  %v1972_v43 = vpack.c.bf16 %v1656_v38, %v1656_v38  ;;  %s13012_s5 = sshra.s32 %s10184_s25, 4  ;;  %s13013_s5 = int_to_ptr.hbm [resolvable:$true] %s13012_s5 }
 0x20b   : > { %v13641_v15 = vpop.f32.mrf.mxu1  ;;  %s13014_s28 = scalar_lea.hbm %s13013_s5, 2  ;;  %p13019_p0 = scmp.lt.s32.totalorder %s13013_s5, %s18278_s23 }
 0x20c   : > { %v13645_v44 = vunpack.c.l.b16 %v1972_v43  ;;  %v1305_v33 = vpack.c.bf16 %v1263_v16, %v1262_v26  ;;  %v12494_v26 = vld [vmem:[%s18494_s3 + $0x24] sm:$0xf0]  ;;  %p13015_p11 = scmp.ne.s32.totalorder %s13013_s5, %s13014_s28 }
 0x20e   : > { %18499 = vst [vmem:[#allocation29_spill] sm:$0xff] %v13645_v44  ;;  %1529 = vmatmul.bf16.gmra.mxu1 %v1305_v33  ;;  %1698 = vmatmul.bf16.gmra.mxu2 %v1305_v33  ;;  %v10564_v33 = vld [vmem:[%s18494_s3 + $0x20] sm:$0xf]  ;;  %p13016_p12 = pnand %p13015_p11, %p13220_p5 }
 0x20f   : > { %v1170_v50 = vpop.f32.mrf.mxu0  ;;  %v13663_v40 = vor.u32 %v12494_v26, %v10564_v33  ;;  %v12470_v33 = vld [vmem:[%s13241_s4 + $0xf8] sm:$0xff]  ;;  %s18720_s4 = sld [smem:[#allocation179_spill]] }
 0x210   : > { %v1171_v37 = vadd.f32 %v13654_v24, %v1170_v50  ;;  %p13017_p13 = pneg %p13016_p12 }
 0x211   : > { %v1659_v14 = vpop.f32.mrf.mxu2  ;;  %18500 = vst [vmem:[#allocation30_spill] sm:$0xff] %v13663_v40  ;;  %2245 = vmatmul.bf16.gmra.mxu3 %v13663_v40 }
 0x212   : > { %10416 = vmatmul.msk.bf16.gmra.mxu0 %vm954_vm0, %v12469_v20  ;;  %v1264_v16 = vmax.f32 %v1171_v37, 0.0  ;;  %v1973_v43 = vpack.c.bf16 %v1659_v14, %v1659_v14 }
 0x213   : > { %v1492_v60 = vpop.f32.mrf.mxu1 }
 0x214   : > { %v13667_v52 = vunpack.c.l.b16 %v1973_v43 }
 0x215   : > { %s18721_s0 = smov %s18720_s4 }
 0x216   : > { %18501 = vst [vmem:[#allocation31_spill] sm:$0xff] %v13667_v52 }
 0x217   : > { %v1172_v38 = vpop.f32.mrf.mxu0 }
 0x218   : > { %v1173_v20 = vadd.f32 %v13654_v24, %v1172_v38 }
 0x219   : > { %v1661_v6 = vpop.f32.mrf.mxu2 }
 0x21a   : > { %v1265_v50 = vmax.f32 %v1173_v20, 0.0  ;;  %v1974_v59 = vpack.c.bf16 %v1661_v6, %v1661_v6  ;;  %v10572_v6 = vld [vmem:[%s18494_s3 + $0x30] sm:$0xf] }
 0x21b   : > { %v1495_v23 = vpop.f32.mrf.mxu1 }
 0x21c   : > { %v13669_v11 = vunpack.c.l.b16 %v1974_v59  ;;  %v1306_v36 = vpack.c.bf16 %v1265_v50, %v1264_v16  ;;  %v12496_v59 = vld [vmem:[%s18494_s3 + $0x34] sm:$0xf0] }
 0x21e   : > { %18502 = vst [vmem:[#allocation32_spill] sm:$0xff] %v13669_v11  ;;  %1534 = vmatmul.bf16.gmra.mxu1 %v1306_v36  ;;  %1703 = vmatmul.bf16.gmra.mxu2 %v1306_v36  ;;  %v13682_v36 = vor.u32 %v12496_v59, %v10572_v6  ;;  %v12522_v6 = vld [vmem:[%s18494_s3 + $0x104] sm:$0xf0] }
 0x21f   : > { %v1175_v2 = vpop.f32.mrf.mxu0 }
 0x220   : > { %v1176_v38 = vadd.f32 %v13654_v24, %v1175_v2  ;;  %18503 = vst [vmem:[#allocation33_spill] sm:$0xff] %v13682_v36 }
 0x221   : > { %v1664_v37 = vpop.f32.mrf.mxu2  ;;  %2250 = vmatmul.bf16.gmra.mxu3 %v13682_v36 }
 0x222   : > { %10417 = vmatmul.msk.bf16.gmra.mxu0 %vm954_vm0, %v12470_v33  ;;  %v1266_v43 = vmax.f32 %v1176_v38, 0.0  ;;  %v1975_v20 = vpack.c.bf16 %v1664_v37, %v1664_v37 }
 0x223   : > { %v1497_v14 = vpop.f32.mrf.mxu1 }
 0x224   : > { %v13692_v59 = vunpack.c.l.b16 %v1975_v20  ;;  %v1784_v58 = vadd.f32 %v13399_v1, %v1497_v14  ;;  %v1783_v20 = vadd.f32 %v13399_v1, %v1495_v23  ;;  %v1781_v14 = vadd.f32 %v13399_v1, %v13641_v15 }
 0x226   : > { %18504 = vst [vmem:[#allocation34_spill] sm:$0xff] %v13692_v59  ;;  %v1845_v15 = vmax.f32 %v1781_v14, 0.0  ;;  %v10700_v59 = vld [vmem:[%s18494_s3 + $0x130] sm:$0xf] }
 0x227   : > { %v1177_v16 = vpop.f32.mrf.mxu0 }
 0x228   : > { %v1178_v50 = vadd.f32 %v13654_v24, %v1177_v16  ;;  %v13697_v16 = vor.u32 %v12522_v6, %v10676_v9 }
 0x229   : > { %v1666_v33 = vpop.f32.mrf.mxu2 }
 0x22a   : > { %v1267_v26 = vmax.f32 %v1178_v50, 0.0  ;;  %v1976_v2 = vpack.c.bf16 %v1666_v33, %v1666_v33  ;;  %18506 = vst [vmem:[#allocation36_spill] sm:$0xff] %v13697_v16 }
 0x22b   : > { %v1500_v5 = vpop.f32.mrf.mxu1 }
 0x22c   : > { %v13694_v10 = vunpack.c.l.b16 %v1976_v2  ;;  %v1307_v38 = vpack.c.bf16 %v1267_v26, %v1266_v43  ;;  %v1785_v37 = vadd.f32 %v13399_v1, %v1500_v5  ;;  %v1782_v43 = vadd.f32 %v13399_v1, %v1492_v60 }
 0x22d   : > { %v1848_v2 = vmax.f32 %v1784_v58, 0.0 }
 0x22e   : > { %18505 = vst [vmem:[#allocation35_spill] sm:$0xff] %v13694_v10  ;;  %1539 = vmatmul.bf16.gmra.mxu1 %v1307_v38  ;;  %1708 = vmatmul.bf16.gmra.mxu2 %v1307_v38  ;;  %v1849_v4 = vmax.f32 %v1785_v37, 0.0  ;;  %v1847_v37 = vmax.f32 %v1783_v20, 0.0 }
 0x22f   : > { %v1180_v33 = vpop.f32.mrf.mxu0  ;;  %v1912_v60 = vpack.c.bf16 %v1848_v2, %v1848_v2 }
 0x230   : > { %v1181_v5 = vadd.f32 %v13654_v24, %v1180_v33  ;;  %v1913_v6 = vpack.c.bf16 %v1849_v4, %v1849_v4  ;;  %v1780_v33 = vadd.f32 %v13399_v1, %v13628_v51  ;;  %v1911_v20 = vpack.c.bf16 %v1847_v37, %v1847_v37  ;;  %v10684_v51 = vld [vmem:[%s18494_s3 + $0x110] sm:$0xf] }
 0x231   : > { %v1669_v3 = vpop.f32.mrf.mxu2 }
 0x232   : > { %2659 = vmatmul.bf16.vlgmr.msrb.gmra.mxu0 %v13697_v16  ;;  %v1977_v50 = vpack.c.bf16 %v1669_v3, %v1669_v3  ;;  %v1268_v13 = vmax.f32 %v1181_v5, 0.0  ;;  %v2193_v4 = vunpack.c.l.b16 %v1913_v6  ;;  %v1779_v3 = vadd.f32 %v13399_v1, %v13616_v35 }
 0x233   : > { %3075 = vmatpush.bf16.msrb.mxu0 %v13507_v62  ;;  %v1502_v26 = vpop.f32.mrf.mxu1  ;;  %v1844_v2 = vmax.f32 %v1780_v33, 0.0 }
 0x234   : > { %v1786_v9 = vadd.f32 %v13399_v1, %v1502_v26  ;;  %v1846_v26 = vmax.f32 %v1782_v43, 0.0  ;;  %v13716_v52 = vunpack.c.l.b16 %v1977_v50  ;;  %v13732_v1 = vld [vmem:[%s18480_s26] ss:$0 sm:$0xff] }
 0x236   : > { %v1850_v38 = vmax.f32 %v1786_v9, 0.0  ;;  %18507 = vst [vmem:[#allocation37_spill] sm:$0xff] %v13716_v52  ;;  %v1910_v6 = vpack.c.bf16 %v1846_v26, %v1846_v26 }
 0x237   : > { %3076 = vmatpush.bf16.msrb.mxu0 %v13518_v21  ;;  %v1182_v23 = vpop.f32.mrf.mxu0 }
 0x238   : > { %v1914_v39 = vpack.c.bf16 %v1850_v38, %v1850_v38  ;;  %v1183_v34 = vadd.f32 %v13654_v24, %v1182_v23  ;;  %v2192_v38 = vunpack.c.l.b16 %v1912_v60  ;;  %v1909_v23 = vpack.c.bf16 %v1845_v15, %v1845_v15 }
 0x239   : > { %v1671_v58 = vpop.f32.mrf.mxu2 }
 0x23a   : > { %v2194_v9 = vunpack.c.l.b16 %v1914_v39  ;;  %v1269_v25 = vmax.f32 %v1183_v34, 0.0  ;;  %v1978_v44 = vpack.c.bf16 %v1671_v58, %v1671_v58  ;;  %v12524_v39 = vld [vmem:[%s18494_s3 + $0x114] sm:$0xf0]  ;;  %v2191_v58 = vunpack.c.l.b16 %v1911_v20 }
 0x23b   : > { %3077 = vmatpush.bf16.msrb.mxu0 %v13526_v30  ;;  %v1505_v5 = vpop.f32.mrf.mxu1  ;;  %v13737_v37 = vor.u32 %v12524_v39, %v10684_v51 }
 0x23c   : > { %v13725_v34 = vpack.c.b16 %v2194_v9, %v2193_v4  ;;  %v13727_v43 = vunpack.c.l.b16 %v1978_v44  ;;  %v1787_v35 = vadd.f32 %v13732_v1, %v1505_v5  ;;  %v1308_v50 = vpack.c.bf16 %v1269_v25, %v1268_v13 }
 0x23d   : > { %18509 = vst [vmem:[#allocation39_spill] sm:$0xff] %v13737_v37  ;;  %v1843_v44 = vmax.f32 %v1779_v3, 0.0  ;;  %v1908_v13 = vpack.c.bf16 %v1844_v2, %v1844_v2  ;;  %v2190_v25 = vunpack.c.l.b16 %v1910_v6  ;;  %v13742_v33 = vpack.c.b16 %v2192_v38, %v2191_v58 }
 0x23e   : > { %18508 = vst [vmem:[#allocation38_spill] sm:$0xff] %v13727_v43  ;;  %1544 = vmatmul.bf16.gmra.mxu1 %v1308_v50  ;;  %1713 = vmatmul.bf16.gmra.mxu2 %v1308_v50  ;;  %v1851_v9 = vmax.f32 %v1787_v35, 0.0  ;;  %v2189_v3 = vunpack.c.l.b16 %v1909_v23 }
 0x23f   : > { %2256 = vmatpush.bf16.msrb.mxu3 %v13725_v34  ;;  %2680 = vmatpush.bf16.msrb.mxu1 %v13725_v34  ;;  %v1185_v4 = vpop.f32.mrf.mxu0  ;;  %v1907_v60 = vpack.c.bf16 %v1843_v44, %v1843_v44  ;;  %v2188_v39 = vunpack.c.l.b16 %v1908_v13 }
 0x240   : > { %3078 = vmatpush.bf16.msrb.mxu0 %v13532_v45  ;;  %v1915_v20 = vpack.c.bf16 %v1851_v9, %v1851_v9  ;;  %v1186_v5 = vadd.f32 %v13654_v24, %v1185_v4  ;;  %v13752_v35 = vpack.c.b16 %v2190_v25, %v2189_v3  ;;  %v10692_v3 = vld [vmem:[%s18494_s3 + $0x120] sm:$0xf] }
 0x241   : > { %v13744_v26 = vpop.f32.mrf.mxu2  ;;  %v2187_v2 = vunpack.c.l.b16 %v1907_v60 }
 0x242   : > { %18510 = vst [vmem:[#allocation40_spill] sm:$0xff] %v13744_v26  ;;  %2664 = vmatmul.bf16.gmra.mxu0 %v13737_v37  ;;  %v3543_v38 = vunpack.c.l.b16 %v1915_v20  ;;  %v1270_v44 = vmax.f32 %v1186_v5, 0.0  ;;  %v12554_v37 = vld [vmem:[%s18494_s3 + $0x204] sm:$0xf0] }
 0x243   : > { %2257 = vmatpush.bf16.msrb.mxu3 %v13742_v33  ;;  %2681 = vmatpush.bf16.msrb.mxu1 %v13742_v33  ;;  %v1507_v15 = vpop.f32.mrf.mxu1  ;;  %v13758_v4 = vpack.c.b16 %v2188_v39, %v2187_v2 }
 0x244   : > { %3079 = vmatpush.bf16.msrb.mxu0 %v13453_v48  ;;  %v1788_v51 = vadd.f32 %v13732_v1, %v1507_v15  ;;  %v12526_v15 = vld [vmem:[%s18494_s3 + $0x124] sm:$0xf0] }
 0x245   : > { %v13774_v39 = vor.u32 %v12526_v15, %v10692_v3  ;;  %v10550_v3 = vld [vmem:[%s18494_s3 + $0x8] sm:$0xf0] }
 0x246   : > { %v1852_v50 = vmax.f32 %v1788_v51, 0.0 }
 0x247   : > { %2258 = vmatpush.bf16.msrb.mxu3 %v13752_v35  ;;  %2682 = vmatpush.bf16.msrb.mxu1 %v13752_v35  ;;  %v1187_v6 = vpop.f32.mrf.mxu0  ;;  %18512 = vst [vmem:[#allocation42_spill] sm:$0xff] %v13774_v39 }
 0x248   : > { %v1916_v23 = vpack.c.bf16 %v1852_v50, %v1852_v50  ;;  %3080 = vmatpush.bf16.msrb.mxu0 %v13437_v18  ;;  %v1188_v58 = vadd.f32 %v13654_v24, %v1187_v6 }
 0x249   : > { %v13760_v9 = vpop.f32.mrf.mxu2 }
 0x24a   : > { %18511 = vst [vmem:[#allocation41_spill] sm:$0xff] %v13760_v9  ;;  %v3544_v13 = vunpack.c.l.b16 %v1916_v23  ;;  %v1271_v25 = vmax.f32 %v1188_v58, 0.0  ;;  %v12544_v9 = vld [vmem:[%s18494_s3 + $0x1b4] sm:$0xf0] }
 0x24b   : > { %2259 = vmatpush.bf16.msrb.mxu3 %v13758_v4  ;;  %2683 = vmatpush.bf16.msrb.mxu1 %v13758_v4  ;;  %v1510_v60 = vpop.f32.mrf.mxu1 }
 0x24c   : > { %v13770_v20 = vpack.c.b16 %v3544_v13, %v3543_v38  ;;  %3081 = vmatpush.bf16.msrb.mxu0 %v13423_v54  ;;  %v1789_v5 = vadd.f32 %v13732_v1, %v1510_v60  ;;  %v1309_v51 = vpack.c.bf16 %v1271_v25, %v1270_v44  ;;  %v12489_v60 = vld [vmem:[%s18494_s3 + $0x4] sm:$0xf] }
 0x24d   : > { %v13797_v14 = vor.u32 %v12489_v60, %v10550_v3 }
 0x24e   : > { %1549 = vmatmul.bf16.gmra.mxu1 %v1309_v51  ;;  %1718 = vmatmul.bf16.gmra.mxu2 %v1309_v51  ;;  %v1853_v2 = vmax.f32 %v1789_v5, 0.0 }
 0x24f   : > { %2260 = vmatpush.bf16.msrb.mxu3 %v13620_v41  ;;  %2684 = vmatpush.bf16.msrb.mxu1 %v13620_v41  ;;  %v1190_v50 = vpop.f32.mrf.mxu0  ;;  %18515 = vst [vmem:[#allocation45_spill] sm:$0xff] %v13797_v14 }
 0x250   : > { %3082 = vmatpush.bf16.msrb.mxu0 %v13409_v28  ;;  %v1917_v44 = vpack.c.bf16 %v1853_v2, %v1853_v2  ;;  %v1191_v23 = vadd.f32 %v13654_v24, %v1190_v50 }
 0x251   : > { %v13779_v6 = vpop.f32.mrf.mxu2 }
 0x252   : > { %18513 = vst [vmem:[#allocation43_spill] sm:$0xff] %v13779_v6  ;;  %2669 = vmatmul.bf16.gmra.mxu0 %v13774_v39  ;;  %v3545_v15 = vunpack.c.l.b16 %v1917_v44  ;;  %v1272_v5 = vmax.f32 %v1191_v23, 0.0  ;;  %v12528_v44 = vld [vmem:[%s18494_s3 + $0x134] sm:$0xf0]  ;;  %v10804_v39 = vld [vmem:[%s18494_s3 + $0x200] sm:$0xf] }
 0x253   : > { %2261 = vmatpush.bf16.msrb.mxu3 %v13587_v12  ;;  %2685 = vmatpush.bf16.msrb.mxu1 %v13587_v12  ;;  %v1512_v38 = vpop.f32.mrf.mxu1  ;;  %v13813_v60 = vor.u32 %v12528_v44, %v10700_v59  ;;  %v12491_v44 = vld [vmem:[%s18494_s3 + $0x14] sm:$0xf] }
 0x254   : > { %v1790_v58 = vadd.f32 %v13732_v1, %v1512_v38 }
 0x255   : > { %18516 = vst [vmem:[#allocation46_spill] sm:$0xff] %v13813_v60 }
 0x256   : > { %v1854_v13 = vmax.f32 %v1790_v58, 0.0 }
 0x257   : > { %2262 = vmatpush.bf16.msrb.mxu3 %v13564_v0  ;;  %2686 = vmatpush.bf16.msrb.mxu1 %v13564_v0  ;;  %v1192_v25 = vpop.f32.mrf.mxu0 }
 0x258   : > { %v1918_v51 = vpack.c.bf16 %v1854_v13, %v1854_v13  ;;  %v1193_v50 = vadd.f32 %v13654_v24, %v1192_v25 }
 0x259   : > { %v13795_v2 = vpop.f32.mrf.mxu2 }
 0x25a   : > { %18514 = vst [vmem:[#allocation44_spill] sm:$0xff] %v13795_v2  ;;  %v3546_v38 = vunpack.c.l.b16 %v1918_v51  ;;  %v1273_v58 = vmax.f32 %v1193_v50, 0.0  ;;  %v10740_v2 = vld [vmem:[%s18494_s3 + $0x180] sm:$0xf] }
 0x25b   : > { %2263 = vmatpush.bf16.msrb.mxu3 %v13538_v46  ;;  %2687 = vmatpush.bf16.msrb.mxu1 %v13538_v46  ;;  %v1515_v11 = vpop.f32.mrf.mxu1 }
 0x25c   : > { %v13807_v23 = vpack.c.b16 %v3546_v38, %v3545_v15  ;;  %v1791_v13 = vadd.f32 %v13732_v1, %v1515_v11  ;;  %v1310_v25 = vpack.c.bf16 %v1273_v58, %v1272_v5 }
 0x25e   : > { %2264 = vmatmul.bf16.vlgmr.msrb.gmra.mxu3 %v13797_v14  ;;  %1554 = vmatmul.bf16.gmra.mxu1 %v1310_v25  ;;  %v1855_v51 = vmax.f32 %v1791_v13, 0.0  ;;  %v10558_v13 = vld [vmem:[%s18494_s3 + $0x18] sm:$0xf0]  ;;  %v10764_v14 = vld [vmem:[%s18494_s3 + $0x1b0] sm:$0xf] }
 0x25f   : > { %2333 = vmatpush.bf16.msra.mxu3 %v13507_v62  ;;  %2892 = vmatpush.bf16.msra.mxu1 %v13725_v34  ;;  %v1195_v3 = vpop.f32.mrf.mxu0  ;;  %v13835_v43 = vor.u32 %v12491_v44, %v10558_v13 }
 0x260   : > { %1723 = vmatmul.bf16.gmra.mxu2 %v1310_v25  ;;  %v1919_v50 = vpack.c.bf16 %v1855_v51, %v1855_v51  ;;  %v1196_v5 = vadd.f32 %v13654_v24, %v1195_v3 }
 0x261   : > { %v13817_v15 = vpop.f32.mrf.mxu2  ;;  %18519 = vst [vmem:[#allocation49_spill] sm:$0xff] %v13835_v43 }
 0x262   : > { %18517 = vst [vmem:[#allocation47_spill] sm:$0xff] %v13817_v15  ;;  %2674 = vmatmul.bf16.gmra.mxu0 %v13813_v60  ;;  %v3547_v25 = vunpack.c.l.b16 %v1919_v50  ;;  %v1274_v51 = vmax.f32 %v1196_v5, 0.0  ;;  %v12538_v50 = vld [vmem:[%s18494_s3 + $0x184] sm:$0xf0] }
 0x263   : > { %2334 = vmatpush.bf16.msra.mxu3 %v13518_v21  ;;  %2893 = vmatpush.bf16.msra.mxu1 %v13742_v33  ;;  %v1517_v11 = vpop.f32.mrf.mxu1 }
 0x264   : > { %v1792_v38 = vadd.f32 %v13732_v1, %v1517_v11 }
 0x266   : > { %v1856_v59 = vmax.f32 %v1792_v38, 0.0 }
 0x267   : > { %2335 = vmatpush.bf16.msra.mxu3 %v13526_v30  ;;  %2894 = vmatpush.bf16.msra.mxu1 %v13752_v35  ;;  %v1197_v58 = vpop.f32.mrf.mxu0 }
 0x268   : > { %v1920_v10 = vpack.c.bf16 %v1856_v59, %v1856_v59  ;;  %v1198_v3 = vadd.f32 %v13654_v24, %v1197_v58  ;;  %v13849_v58 = vor.u32 %v12538_v50, %v10740_v2  ;;  %v12493_v50 = vld [vmem:[%s18494_s3 + $0x24] sm:$0xf] }
 0x269   : > { %v13833_v11 = vpop.f32.mrf.mxu2 }
 0x26a   : > { %18518 = vst [vmem:[#allocation48_spill] sm:$0xff] %v13833_v11  ;;  %v3548_v38 = vunpack.c.l.b16 %v1920_v10  ;;  %v1275_v52 = vmax.f32 %v1198_v3, 0.0 }
 0x26b   : > { %2336 = vmatpush.bf16.msra.mxu3 %v13532_v45  ;;  %2895 = vmatpush.bf16.msra.mxu1 %v13758_v4  ;;  %v1520_v15 = vpop.f32.mrf.mxu1  ;;  %18520 = vst [vmem:[#allocation50_spill] sm:$0xff] %v13849_v58 }
 0x26c   : > { %v13843_v5 = vpack.c.b16 %v3548_v38, %v3547_v25  ;;  %v1793_v59 = vadd.f32 %v13732_v1, %v1520_v15  ;;  %v1311_v10 = vpack.c.bf16 %v1275_v52, %v1274_v51 }
 0x26e   : > { %2269 = vmatmul.bf16.gmra.mxu3 %v13835_v43  ;;  %1559 = vmatmul.bf16.gmra.mxu1 %v1311_v10  ;;  %v1857_v13 = vmax.f32 %v1793_v59, 0.0  ;;  %v10566_v59 = vld [vmem:[%s18494_s3 + $0x28] sm:$0xf0] }
 0x26f   : > { %2337 = vmatpush.bf16.msra.mxu3 %v13453_v48  ;;  %2896 = vmatpush.bf16.msra.mxu1 %v13620_v41  ;;  %v1200_v44 = vpop.f32.mrf.mxu0  ;;  %v13872_v11 = vor.u32 %v12493_v50, %v10566_v59 }
 0x270   : > { %1728 = vmatmul.bf16.gmra.mxu2 %v1311_v10  ;;  %v1921_v3 = vpack.c.bf16 %v1857_v13, %v1857_v13  ;;  %v1201_v52 = vadd.f32 %v13654_v24, %v1200_v44 }
 0x271   : > { %v13853_v25 = vpop.f32.mrf.mxu2  ;;  %18523 = vst [vmem:[#allocation53_spill] sm:$0xff] %v13872_v11 }
 0x272   : > { %18521 = vst [vmem:[#allocation51_spill] sm:$0xff] %v13853_v25  ;;  %2871 = vmatmul.bf16.vlgmr.msra.gmra.mxu0 %v13849_v58  ;;  %v3549_v10 = vunpack.c.l.b16 %v1921_v3  ;;  %v1276_v13 = vmax.f32 %v1201_v52, 0.0  ;;  %v10748_v3 = vld [vmem:[%s18494_s3 + $0x190] sm:$0xf]  ;;  %v12540_v52 = vld [vmem:[%s18494_s3 + $0x194] sm:$0xf0] }
 0x273   : > { %2338 = vmatpush.bf16.msra.mxu3 %v13437_v18  ;;  %2897 = vmatpush.bf16.msra.mxu1 %v13587_v12  ;;  %v1522_v15 = vpop.f32.mrf.mxu1 }
 0x274   : > { %v1794_v51 = vadd.f32 %v13732_v1, %v1522_v15 }
 0x276   : > { %v1858_v2 = vmax.f32 %v1794_v51, 0.0 }
 0x277   : > { %2339 = vmatpush.bf16.msra.mxu3 %v13423_v54  ;;  %2898 = vmatpush.bf16.msra.mxu1 %v13564_v0  ;;  %v1202_v38 = vpop.f32.mrf.mxu0 }
 0x278   : > { %v1922_v58 = vpack.c.bf16 %v1858_v2, %v1858_v2  ;;  %v1203_v44 = vadd.f32 %v13654_v24, %v1202_v38 }
 0x279   : > { %v13870_v15 = vpop.f32.mrf.mxu2 }
 0x27a   : > { %18522 = vst [vmem:[#allocation52_spill] sm:$0xff] %v13870_v15  ;;  %v3550_v51 = vunpack.c.l.b16 %v1922_v58  ;;  %v1277_v25 = vmax.f32 %v1203_v44, 0.0  ;;  %v13886_v58 = vor.u32 %v12540_v52, %v10748_v3  ;;  %v10756_v15 = vld [vmem:[%s18494_s3 + $0x1a0] sm:$0xf] }
 0x27b   : > { %2340 = vmatpush.bf16.msra.mxu3 %v13409_v28  ;;  %2899 = vmatpush.bf16.msra.mxu1 %v13538_v46  ;;  %v13874_v43 = vpop.f32.mrf.mxu1 }
 0x27c   : > { %v13882_v2 = vpack.c.b16 %v3550_v51, %v3549_v10  ;;  %v1312_v38 = vpack.c.bf16 %v1277_v25, %v1276_v13  ;;  %18524 = vst [vmem:[#allocation54_spill] sm:$0xff] %v13886_v58  ;;  %v12495_v13 = vld [vmem:[%s18494_s3 + $0x34] sm:$0xf]  ;;  %v10574_v51 = vld [vmem:[%s18494_s3 + $0x38] sm:$0xf0] }
 0x27e   : > { %2274 = vmatmul.bf16.gmra.mxu3 %v13872_v11  ;;  %1564 = vmatmul.bf16.gmra.mxu1 %v1312_v38  ;;  %v12542_v11 = vld [vmem:[%s18494_s3 + $0x1a4] sm:$0xf0] }
 0x27f   : > { %2362 = vmatpush.bf16.msrb.mxu3 %v13725_v34  ;;  %v1205_v50 = vpop.f32.mrf.mxu0 }
 0x280   : > { %1733 = vmatmul.bf16.gmra.mxu2 %v1312_v38  ;;  %v1206_v10 = vadd.f32 %v13654_v24, %v1205_v50  ;;  %v13906_v50 = vor.u32 %v12495_v13, %v10574_v51 }
 0x281   : > { %v13889_v59 = vpop.f32.mrf.mxu2 }
 0x282   : > { %18525 = vst [vmem:[#allocation55_spill] sm:$0xff] %v13889_v59  ;;  %2876 = vmatmul.bf16.gmra.mxu0 %v13886_v58  ;;  %v1278_v3 = vmax.f32 %v1206_v10, 0.0 }
 0x283   : > { %2363 = vmatpush.bf16.msrb.mxu3 %v13742_v33  ;;  %v13892_v44 = vpop.f32.mrf.mxu1  ;;  %18527 = vst [vmem:[#allocation57_spill] sm:$0xff] %v13906_v50 }
 0x287   : > { %2364 = vmatpush.bf16.msrb.mxu3 %v13752_v35  ;;  %v1207_v25 = vpop.f32.mrf.mxu0 }
 0x288   : > { %v1208_v52 = vadd.f32 %v13654_v24, %v1207_v25  ;;  %v13918_v25 = vor.u32 %v12542_v11, %v10756_v15  ;;  %v10580_v11 = vld [vmem:[%s18494_s3 + $0x40] sm:$0xf]  ;;  %v12498_v15 = vld [vmem:[%s18494_s3 + $0x44] sm:$0xf0] }
 0x289   : > { %v13904_v38 = vpop.f32.mrf.mxu2  ;;  %v13937_v6 = vor.u32 %v12498_v15, %v10580_v11 }
 0x28a   : > { %18526 = vst [vmem:[#allocation56_spill] sm:$0xff] %v13904_v38  ;;  %v1279_v58 = vmax.f32 %v1208_v52, 0.0  ;;  %v13924_v38 = vpop.f32.mrf.mxu3 }
 0x28b   : > { %2365 = vmatpush.bf16.msrb.mxu3 %v13758_v4  ;;  %v13908_v59 = vpop.f32.mrf.mxu1  ;;  %18528 = vst [vmem:[#allocation58_spill] sm:$0xff] %v13918_v25 }
 0x28c   : > { %v1313_v10 = vpack.c.bf16 %v1279_v58, %v1278_v3  ;;  %18531 = vst [vmem:[#allocation61_spill] sm:$0xff] %v13937_v6 }
 0x28e   : > { %2279 = vmatmul.bf16.gmra.mxu3 %v13906_v50  ;;  %1569 = vmatmul.bf16.gmra.mxu1 %v1313_v10 }
 0x28f   : > { %2366 = vmatpush.bf16.msrb.mxu3 %v13620_v41  ;;  %v1210_v13 = vpop.f32.mrf.mxu0 }
 0x290   : > { %1738 = vmatmul.bf16.gmra.mxu2 %v1313_v10  ;;  %v1211_v58 = vadd.f32 %v13654_v24, %v1210_v13 }
 0x291   : > { %v13921_v51 = vpop.f32.mrf.mxu2 }
 0x292   : > { %18529 = vst [vmem:[#allocation59_spill] sm:$0xff] %v13921_v51  ;;  %2881 = vmatmul.bf16.gmra.mxu0 %v13918_v25  ;;  %v1280_v10 = vmax.f32 %v1211_v58, 0.0  ;;  %v13945_v60 = vpop.f32.mrf.mxu3  ;;  %v13948_v58 = vor.u32 %v12544_v9, %v10764_v14  ;;  %v10588_v14 = vld [vmem:[%s18494_s3 + $0x50] sm:$0xf] }
 0x293   : > { %2367 = vmatpush.bf16.msrb.mxu3 %v13587_v12  ;;  %v1532_v52 = vpop.f32.mrf.mxu1 }
 0x294   : > { %18532 = vst [vmem:[#allocation62_spill] sm:$0xff] %v13948_v58 }
 0x297   : > { %2368 = vmatpush.bf16.msrb.mxu3 %v13564_v0  ;;  %v1212_v3 = vpop.f32.mrf.mxu0 }
 0x298   : > { %v1213_v51 = vadd.f32 %v13654_v24, %v1212_v3 }
 0x299   : > { %v13935_v25 = vpop.f32.mrf.mxu2 }
 0x29a   : > { %18530 = vst [vmem:[#allocation60_spill] sm:$0xff] %v13935_v25  ;;  %v1281_v50 = vmax.f32 %v1213_v51, 0.0 }
 0x29b   : > { %2369 = vmatpush.bf16.msrb.mxu3 %v13538_v46  ;;  %v1535_v13 = vpop.f32.mrf.mxu1 }
 0x29c   : > { %v1314_v26 = vpack.c.bf16 %v1281_v50, %v1280_v10  ;;  %v13957_v10 = vpop.f32.mrf.mxu3 }
 0x29e   : > { %2341 = vmatmul.bf16.vlgmr.msra.gmra.mxu3 %v13937_v6  ;;  %1574 = vmatmul.bf16.gmra.mxu1 %v1314_v26 }
 0x29f   : > { %2439 = vmatpush.bf16.msra.mxu3 %v13507_v62  ;;  %v1215_v51 = vpop.f32.mrf.mxu0 }
 0x2a0   : > { %1743 = vmatmul.bf16.gmra.mxu2 %v1314_v26  ;;  %v1216_v50 = vadd.f32 %v13654_v24, %v1215_v51  ;;  %v12500_v26 = vld [vmem:[%s18494_s3 + $0x54] sm:$0xf0] }
 0x2a1   : > { %v13951_v3 = vpop.f32.mrf.mxu2  ;;  %v13968_v51 = vor.u32 %v12500_v26, %v10588_v14 }
 0x2a2   : > { %18533 = vst [vmem:[#allocation63_spill] sm:$0xff] %v13951_v3  ;;  %2886 = vmatmul.bf16.gmra.mxu0 %v13948_v58  ;;  %v1282_v9 = vmax.f32 %v1216_v50, 0.0 }
 0x2a3   : > { %2440 = vmatpush.bf16.msra.mxu3 %v13518_v21  ;;  %v1537_v11 = vpop.f32.mrf.mxu1  ;;  %18535 = vst [vmem:[#allocation65_spill] sm:$0xff] %v13968_v51 }
 0x2a4   : > { %v1800_v14 = vadd.f32 %v13732_v1, %v1537_v11  ;;  %v1795_v11 = vadd.f32 %v13732_v1, %v13874_v43  ;;  %v10678_v43 = vld [vmem:[%s18494_s3 + $0x108] sm:$0xf0] }
 0x2a7   : > { %2441 = vmatpush.bf16.msra.mxu3 %v13526_v30  ;;  %v1217_v15 = vpop.f32.mrf.mxu0 }
 0x2a8   : > { %v1218_v58 = vadd.f32 %v13654_v24, %v1217_v15  ;;  %v13979_v24 = vor.u32 %v12554_v37, %v10804_v39  ;;  %v1798_v37 = vadd.f32 %v13732_v1, %v1532_v52  ;;  %v12502_v52 = vld [vmem:[%s18494_s3 + $0x64] sm:$0xf0] }
 0x2a9   : > { %v13966_v3 = vpop.f32.mrf.mxu2 }
 0x2aa   : > { %18534 = vst [vmem:[#allocation64_spill] sm:$0xff] %v13966_v3  ;;  %v1283_v25 = vmax.f32 %v1218_v58, 0.0  ;;  %v1799_v58 = vadd.f32 %v13732_v1, %v1535_v13  ;;  %v13986_v3 = vpop.f32.mrf.mxu3 }
 0x2ab   : > { %2442 = vmatpush.bf16.msra.mxu3 %v13532_v45  ;;  %v1540_v6 = vpop.f32.mrf.mxu1  ;;  %18536 = vst [vmem:[#allocation66_spill] sm:$0xff] %v13979_v24 }
 0x2ac   : > { %v1801_v50 = vadd.f32 %v13732_v1, %v1540_v6  ;;  %v1315_v16 = vpack.c.bf16 %v1283_v25, %v1282_v9  ;;  %v1797_v6 = vadd.f32 %v13732_v1, %v13908_v59  ;;  %v1863_v39 = vmax.f32 %v1799_v58, 0.0  ;;  %v10596_v59 = vld [vmem:[%s18494_s3 + $0x60] sm:$0xf] }
 0x2ae   : > { %2346 = vmatmul.bf16.gmra.mxu3 %v13968_v51  ;;  %1579 = vmatmul.bf16.gmra.mxu1 %v1315_v16  ;;  %v1865_v26 = vmax.f32 %v1801_v50, 0.0  ;;  %v1796_v50 = vadd.f32 %v13732_v1, %v13892_v44  ;;  %v1861_v58 = vmax.f32 %v1797_v6, 0.0  ;;  %v10708_v6 = vld [vmem:[%s18494_s3 + $0x140] sm:$0xf] }
 0x2af   : > { %2443 = vmatpush.bf16.msra.mxu3 %v13453_v48  ;;  %v13983_v15 = vpop.f32.mrf.mxu0 }
 0x2b0   : > { %1748 = vmatmul.bf16.gmra.mxu2 %v1315_v16  ;;  %18537 = vst [vmem:[#allocation67_spill] sm:$0xff] %v13983_v15  ;;  %v1864_v16 = vmax.f32 %v1800_v14, 0.0  ;;  %v1929_v13 = vpack.c.bf16 %v1865_v26, %v1865_v26  ;;  %v1862_v14 = vmax.f32 %v1798_v37, 0.0  ;;  %v1927_v26 = vpack.c.bf16 %v1863_v39, %v1863_v39  ;;  %v12530_v37 = vld [vmem:[%s18494_s3 + $0x144] sm:$0xf0] }
 0x2b1   : > { %v1709_v45 = vpop.f32.mrf.mxu2  ;;  %v1859_v39 = vmax.f32 %v1795_v11, 0.0  ;;  %v14028_v22 = vor.u32 %v12530_v37, %v10708_v6  ;;  %v10812_v11 = vld [vmem:[%s18494_s3 + $0x210] sm:$0xf] }
 0x2b2   : > { %3083 = vmatmul.bf16.vlgmr.msrb.gmra.mxu0 %v13979_v24  ;;  %v1993_v24 = vpack.c.bf16 %v1709_v45, %v1709_v45  ;;  %v12521_v45 = vld [vmem:[%s18494_s3 + $0x104] sm:$0xf]  ;;  %v1928_v44 = vpack.c.bf16 %v1864_v16, %v1864_v16  ;;  %v3555_v36 = vunpack.c.l.b16 %v1927_v26  ;;  %v14025_v62 = vpop.f32.mrf.mxu3 }
 0x2b3   : > { %2444 = vmatpush.bf16.msra.mxu3 %v13437_v18  ;;  %v1542_v25 = vpop.f32.mrf.mxu1  ;;  %v14019_v18 = vor.u32 %v12502_v52, %v10596_v59  ;;  %v14023_v16 = vor.u32 %v12521_v45, %v10678_v43 }
 0x2b4   : > { %v1802_v9 = vadd.f32 %v13732_v1, %v1542_v25  ;;  %v14021_v48 = vunpack.c.l.b16 %v1993_v24  ;;  %v3556_v24 = vunpack.c.l.b16 %v1928_v44  ;;  %v18543_v44 = vpack.c.b16 %v13509_v63, %v13505_v56 }
 0x2b5   : > { %18540 = vst [vmem:[#allocation70_spill] sm:$0xff] %v14023_v16 }
 0x2b6   : > { %v1866_v51 = vmax.f32 %v1802_v9, 0.0  ;;  %v3557_v9 = vunpack.c.l.b16 %v1929_v13  ;;  %18539 = vst [vmem:[#allocation69_spill] sm:$0xff] %v14021_v48  ;;  %v1926_v13 = vpack.c.bf16 %v1862_v14, %v1862_v14  ;;  %v1923_v14 = vpack.c.bf16 %v1859_v39, %v1859_v39 }
 0x2b7   : > { %2445 = vmatpush.bf16.msra.mxu3 %v13423_v54  ;;  %v14005_v25 = vpop.f32.mrf.mxu0 }
 0x2b8   : > { %18538 = vst [vmem:[#allocation68_spill] sm:$0xff] %v14005_v25  ;;  %v1930_v15 = vpack.c.bf16 %v1866_v51, %v1866_v51  ;;  %v1860_v25 = vmax.f32 %v1796_v50, 0.0  ;;  %v1925_v51 = vpack.c.bf16 %v1861_v58, %v1861_v58  ;;  %v3554_v45 = vunpack.c.l.b16 %v1926_v13 }
 0x2b9   : > { %v1711_v54 = vpop.f32.mrf.mxu2 }
 0x2ba   : > { %v3558_v30 = vunpack.c.l.b16 %v1930_v15  ;;  %v1994_v21 = vpack.c.bf16 %v1711_v54, %v1711_v54  ;;  %v12556_v54 = vld [vmem:[%s18494_s3 + $0x214] sm:$0xf0]  ;;  %v1924_v26 = vpack.c.bf16 %v1860_v25, %v1860_v25  ;;  %v3551_v25 = vunpack.c.l.b16 %v1923_v14  ;;  %v14068_v63 = vpop.f32.mrf.mxu3 }
 0x2bb   : > { %2446 = vmatpush.bf16.msra.mxu3 %v13409_v28  ;;  %v1545_v40 = vpop.f32.mrf.mxu1  ;;  %v14045_v58 = vor.u32 %v12556_v54, %v10812_v11  ;;  %v10604_v11 = vld [vmem:[%s18494_s3 + $0x70] sm:$0xf] }
 0x2bc   : > { %v14036_v15 = vpack.c.b16 %v3558_v30, %v3557_v9  ;;  %v14038_v50 = vunpack.c.l.b16 %v1994_v21  ;;  %v1803_v59 = vadd.f32 %v13732_v1, %v1545_v40  ;;  %v3553_v21 = vunpack.c.l.b16 %v1925_v51 }
 0x2bd   : > { %18541 = vst [vmem:[#allocation71_spill] sm:$0xff] %v14045_v58  ;;  %v14051_v40 = vpack.c.b16 %v3556_v24, %v3555_v36  ;;  %v3552_v37 = vunpack.c.l.b16 %v1924_v26  ;;  %v18544_v51 = vpack.c.b16 %v13487_v61, %v13485_v57  ;;  %v12504_v57 = vld [vmem:[%s18494_s3 + $0x74] sm:$0xf0]  ;;  %v12523_v61 = vld [vmem:[%s18494_s3 + $0x114] sm:$0xf] }
 0x2be   : > { %2351 = vmatmul.bf16.gmra.mxu3 %v14019_v18  ;;  %2688 = vmatmul.bf16.vlgmr.msrb.gmra.mxu1 %v14023_v16  ;;  %v1867_v43 = vmax.f32 %v1803_v59, 0.0  ;;  %v14061_v39 = vpack.c.b16 %v3554_v45, %v3553_v21  ;;  %v10686_v24 = vld [vmem:[%s18494_s3 + $0x118] sm:$0xf0]  ;;  %v18546_v21 = vpack.c.b16 %v13477_v32, %v13475_v31  ;;  %v10716_v45 = vld [vmem:[%s18494_s3 + $0x150] sm:$0xf] }
 0x2bf   : > { %3104 = vmatpush.bf16.msrb.mxu1 %v13725_v34  ;;  %v14049_v30 = vpop.f32.mrf.mxu0  ;;  %3607 = vmatpush.bf16.msra.mxu0 %v14036_v15  ;;  %v14085_v59 = vpack.c.b16 %v3552_v37, %v3551_v25  ;;  %v14101_v37 = vor.u32 %v12523_v61, %v10686_v24 }
 0x2c0   : > { %2765 = vmatmul.bf16.vlgmr.msrb.gmra.mxu2 %v14028_v22  ;;  %18542 = vst [vmem:[#allocation72_spill] sm:$0xff] %v14049_v30  ;;  %v1931_v36 = vpack.c.bf16 %v1867_v43, %v1867_v43  ;;  %v12532_v43 = vld [vmem:[%s18494_s3 + $0x154] sm:$0xf0] }
 0x2c1   : > { %3453 = vmatpush.bf16.msrb.mxu2 %v18543_v44  ;;  %v14057_v9 = vpop.f32.mrf.mxu2  ;;  %18547 = vst [vmem:[#allocation74_spill] sm:$0xff] %v14101_v37  ;;  %v14104_v32 = vor.u32 %v12532_v43, %v10716_v45  ;;  %v18554_v45 = vpack.c.b16 %v13439_v19, %v13435_v17  ;;  %v12525_v17 = vld [vmem:[%s18494_s3 + $0x124] sm:$0xf]  ;;  %v10694_v19 = vld [vmem:[%s18494_s3 + $0x128] sm:$0xf0] }
 0x2c2   : > { %3088 = vmatmul.bf16.gmra.mxu0 %v14045_v58  ;;  %v3559_v14 = vunpack.c.l.b16 %v1931_v36  ;;  %v10820_v36 = vld [vmem:[%s18494_s3 + $0x220] sm:$0xf]  ;;  %v14123_v61 = vpop.f32.mrf.mxu3 }
 0x2c3   : > { %3105 = vmatpush.bf16.msrb.mxu1 %v13742_v33  ;;  %v1547_v6 = vpop.f32.mrf.mxu1  ;;  %3608 = vmatpush.bf16.msra.mxu0 %v14051_v40  ;;  %18548 = vst [vmem:[#allocation75_spill] sm:$0xff] %v14104_v32 }
 0x2c4   : > { %v1804_v56 = vadd.f32 %v13732_v1, %v1547_v6  ;;  %v14099_v6 = vor.u32 %v12504_v57, %v10604_v11 }
 0x2c5   : > { %3454 = vmatpush.bf16.msrb.mxu2 %v18544_v51  ;;  %v12558_v51 = vld [vmem:[%s18494_s3 + $0x224] sm:$0xf0] }
 0x2c6   : > { %v1868_v13 = vmax.f32 %v1804_v56, 0.0  ;;  %v14121_v57 = vor.u32 %v12558_v51, %v10820_v36 }
 0x2c7   : > { %3106 = vmatpush.bf16.msrb.mxu1 %v13752_v35  ;;  %v14074_v54 = vpop.f32.mrf.mxu0  ;;  %3609 = vmatpush.bf16.msra.mxu0 %v14061_v39 }
 0x2c8   : > { %18545 = vst [vmem:[#allocation73_spill] sm:$0xff] %v14074_v54  ;;  %v1932_v26 = vpack.c.bf16 %v1868_v13, %v1868_v13  ;;  %v18549_v13 = vpack.c.b16 %v13467_v8, %v13465_v7  ;;  %v18552_v8 = vpack.c.b16 %v13455_v49, %v13451_v47  ;;  %v12497_v49 = vld [vmem:[%s18494_s3 + $0x44] sm:$0xf] }
 0x2c9   : > { %3455 = vmatpush.bf16.msrb.mxu2 %v18546_v21  ;;  %v14097_v44 = vpop.f32.mrf.mxu2  ;;  %18550 = vst [vmem:[#allocation76_spill] sm:$0xff] %v14121_v57 }
 0x2ca   : > { %v3560_v25 = vunpack.c.l.b16 %v1932_v26 }
 0x2cb   : > { %3107 = vmatpush.bf16.msrb.mxu1 %v13758_v4  ;;  %v1550_v31 = vpop.f32.mrf.mxu1  ;;  %3610 = vmatpush.bf16.msra.mxu0 %v14085_v59 }
 0x2cc   : > { %v14112_v56 = vpack.c.b16 %v3560_v25, %v3559_v14  ;;  %v1805_v11 = vadd.f32 %v13732_v1, %v1550_v31  ;;  %v10582_v31 = vld [vmem:[%s18494_s3 + $0x48] sm:$0xf0] }
 0x2cd   : > { %3456 = vmatpush.bf16.msrb.mxu2 %v18549_v13  ;;  %v18556_v13 = vpack.c.b16 %v13425_v55, %v13421_v53 }
 0x2ce   : > { %2356 = vmatmul.bf16.gmra.mxu3 %v14099_v6  ;;  %2693 = vmatmul.bf16.gmra.mxu1 %v14101_v37  ;;  %v1869_v7 = vmax.f32 %v1805_v11, 0.0  ;;  %v10724_v11 = vld [vmem:[%s18494_s3 + $0x160] sm:$0xf] }
 0x2cf   : > { %3108 = vmatpush.bf16.msrb.mxu1 %v13620_v41  ;;  %v14127_v24 = vpop.f32.mrf.mxu0  ;;  %3611 = vmatpush.bf16.msra.mxu0 %v13882_v2 }
 0x2d0   : > { %2770 = vmatmul.bf16.gmra.mxu2 %v14104_v32  ;;  %18551 = vst [vmem:[#allocation77_spill] sm:$0xff] %v14127_v24  ;;  %v1933_v21 = vpack.c.bf16 %v1869_v7, %v1869_v7  ;;  %v12534_v7 = vld [vmem:[%s18494_s3 + $0x164] sm:$0xf0] }
 0x2d1   : > { %3457 = vmatpush.bf16.msrb.mxu2 %v18552_v8  ;;  %v14133_v14 = vpop.f32.mrf.mxu2  ;;  %v14167_v8 = vpop.f32.mrf.mxu3  ;;  %v14176_v55 = vor.u32 %v12534_v7, %v10724_v11 }
 0x2d2   : > { %18553 = vst [vmem:[#allocation78_spill] sm:$0xff] %v14133_v14  ;;  %3093 = vmatmul.bf16.gmra.mxu0 %v14121_v57  ;;  %v3561_v36 = vunpack.c.l.b16 %v1933_v21 }
 0x2d3   : > { %3109 = vmatpush.bf16.msrb.mxu1 %v13587_v12  ;;  %v1552_v26 = vpop.f32.mrf.mxu1  ;;  %3612 = vmatpush.bf16.msra.mxu0 %v13843_v5  ;;  %18560 = vst [vmem:[#allocation83_spill] sm:$0xff] %v14176_v55 }
 0x2d4   : > { %v1806_v43 = vadd.f32 %v13732_v1, %v1552_v26 }
 0x2d5   : > { %3458 = vmatpush.bf16.msrb.mxu2 %v18554_v45  ;;  %v14171_v45 = vor.u32 %v12497_v49, %v10582_v31  ;;  %v18561_v49 = vpack.c.b16 %v13411_v29, %v13407_v27 }
 0x2d6   : > { %v1870_v47 = vmax.f32 %v1806_v43, 0.0  ;;  %v14173_v43 = vor.u32 %v12525_v17, %v10694_v19 }
 0x2d7   : > { %3110 = vmatpush.bf16.msrb.mxu1 %v13564_v0  ;;  %v14146_v25 = vpop.f32.mrf.mxu0  ;;  %3613 = vmatpush.bf16.msra.mxu0 %v13807_v23  ;;  %18558 = vst [vmem:[#allocation81_spill] sm:$0xff] %v14171_v45 }
 0x2d8   : > { %18555 = vst [vmem:[#allocation79_spill] sm:$0xff] %v14146_v25  ;;  %v1934_v51 = vpack.c.bf16 %v1870_v47, %v1870_v47  ;;  %v10828_v47 = vld [vmem:[%s18494_s3 + $0x230] sm:$0xf] }
 0x2d9   : > { %3459 = vmatpush.bf16.msrb.mxu2 %v18556_v13  ;;  %v14169_v26 = vpop.f32.mrf.mxu2  ;;  %18559 = vst [vmem:[#allocation82_spill] sm:$0xff] %v14173_v43  ;;  %v12560_v13 = vld [vmem:[%s18494_s3 + $0x234] sm:$0xf0] }
 0x2da   : > { %18557 = vst [vmem:[#allocation80_spill] sm:$0xff] %v14169_v26  ;;  %v3562_v21 = vunpack.c.l.b16 %v1934_v51  ;;  %v14194_v17 = vor.u32 %v12560_v13, %v10828_v47  ;;  %v12499_v47 = vld [vmem:[%s18494_s3 + $0x54] sm:$0xf]  ;;  %v10590_v13 = vld [vmem:[%s18494_s3 + $0x58] sm:$0xf0] }
 0x2db   : > { %3111 = vmatpush.bf16.msrb.mxu1 %v13538_v46  ;;  %v1555_v53 = vpop.f32.mrf.mxu1  ;;  %3614 = vmatpush.bf16.msra.mxu0 %v13770_v20 }
 0x2dc   : > { %v14184_v52 = vpack.c.b16 %v3562_v21, %v3561_v36  ;;  %v1807_v31 = vadd.f32 %v13732_v1, %v1555_v53  ;;  %18562 = vst [vmem:[#allocation84_spill] sm:$0xff] %v14194_v17 }
 0x2dd   : > { %3460 = vmatpush.bf16.msrb.mxu2 %v18561_v49 }
 0x2de   : > { %2370 = vmatmul.bf16.vlgmr.msrb.gmra.mxu3 %v14171_v45  ;;  %2698 = vmatmul.bf16.gmra.mxu1 %v14173_v43  ;;  %v1871_v27 = vmax.f32 %v1807_v31, 0.0  ;;  %v12527_v31 = vld [vmem:[%s18494_s3 + $0x134] sm:$0xf] }
 0x2df   : > { %3739 = vmatpush.bf16.msrb.mxu0 %v14036_v15  ;;  %2468 = vmatpush.bf16.msrb.mxu3 %v13725_v34  ;;  %v14198_v19 = vpop.f32.mrf.mxu0 }
 0x2e0   : > { %2775 = vmatmul.bf16.gmra.mxu2 %v14176_v55  ;;  %18563 = vst [vmem:[#allocation85_spill] sm:$0xff] %v14198_v19  ;;  %v1935_v11 = vpack.c.bf16 %v1871_v27, %v1871_v27 }
 0x2e1   : > { %v2265_v29 = vpop.f32.mrf.mxu3 }
 0x2e2   : > { %3098 = vmatmul.bf16.gmra.mxu0 %v14194_v17  ;;  %v2266_v21 = vadd.f32 %v2265_v29, %v13924_v38  ;;  %v10702_v38 = vld [vmem:[%s18494_s3 + $0x138] sm:$0xf0]  ;;  %v3563_v27 = vunpack.c.l.b16 %v1935_v11 }
 0x2e3   : > { %3740 = vmatpush.bf16.msrb.mxu0 %v14051_v40  ;;  %v14201_v36 = vpop.f32.mrf.mxu2  ;;  %2469 = vmatpush.bf16.msrb.mxu3 %v13742_v33  ;;  %v1557_v51 = vpop.f32.mrf.mxu1  ;;  %v14235_v11 = vor.u32 %v12527_v31, %v10702_v38 }
 0x2e4   : > { %18564 = vst [vmem:[#allocation86_spill] sm:$0xff] %v14201_v36  ;;  %v1808_v7 = vadd.f32 %v13732_v1, %v1557_v51  ;;  %v10732_v51 = vld [vmem:[%s18494_s3 + $0x170] sm:$0xf]  ;;  %v2285_v19 = vpack.c.bf16 %v2266_v21, %v2266_v21 }
 0x2e5   : > { %18568 = vst [vmem:[#allocation90_spill] sm:$0xff] %v14235_v11 }
 0x2e6   : > { %v1872_v53 = vmax.f32 %v1808_v7, 0.0  ;;  %v12536_v7 = vld [vmem:[%s18494_s3 + $0x174] sm:$0xf0]  ;;  %v14244_v21 = vunpack.c.l.b16 %v2285_v19 }
 0x2e7   : > { %3741 = vmatpush.bf16.msrb.mxu0 %v14061_v39  ;;  %2470 = vmatpush.bf16.msrb.mxu3 %v13752_v35  ;;  %v14215_v49 = vpop.f32.mrf.mxu0  ;;  %v14238_v24 = vor.u32 %v12536_v7, %v10732_v51  ;;  %v12501_v51 = vld [vmem:[%s18494_s3 + $0x64] sm:$0xf]  ;;  %v10598_v7 = vld [vmem:[%s18494_s3 + $0x68] sm:$0xf0] }
 0x2e8   : > { %18565 = vst [vmem:[#allocation87_spill] sm:$0xff] %v14215_v49  ;;  %v1936_v29 = vpack.c.bf16 %v1872_v53, %v1872_v53  ;;  %v14229_v49 = vor.u32 %v12499_v47, %v10590_v13 }
 0x2e9   : > { %v2267_v45 = vpop.f32.mrf.mxu3  ;;  %18569 = vst [vmem:[#allocation91_spill] sm:$0xff] %v14238_v24 }
 0x2ea   : > { %18566 = vst [vmem:[#allocation88_spill] sm:$0xff] %v14229_v49  ;;  %v3564_v17 = vunpack.c.l.b16 %v1936_v29  ;;  %v2268_v55 = vadd.f32 %v2267_v45, %v13945_v60 }
 0x2eb   : > { %3742 = vmatpush.bf16.msrb.mxu0 %v14085_v59  ;;  %v14233_v25 = vpop.f32.mrf.mxu2  ;;  %2471 = vmatpush.bf16.msrb.mxu3 %v13758_v4  ;;  %v1560_v53 = vpop.f32.mrf.mxu1  ;;  %18570 = vst [vmem:[#allocation92_spill] sm:$0xff] %v14244_v21 }
 0x2ec   : > { %18567 = vst [vmem:[#allocation89_spill] sm:$0xff] %v14233_v25  ;;  %v14240_v43 = vpack.c.b16 %v3564_v17, %v3563_v27  ;;  %v2286_v36 = vpack.c.bf16 %v2268_v55, %v2268_v55  ;;  %v1809_v47 = vadd.f32 %v13732_v1, %v1560_v53 }
 0x2ee   : > { %v14246_v13 = vunpack.c.l.b16 %v2286_v36  ;;  %2375 = vmatmul.bf16.gmra.mxu3 %v14229_v49  ;;  %2703 = vmatmul.bf16.gmra.mxu1 %v14235_v11  ;;  %v1873_v55 = vmax.f32 %v1809_v47, 0.0 }
 0x2ef   : > { %3743 = vmatpush.bf16.msrb.mxu0 %v13882_v2  ;;  %2472 = vmatpush.bf16.msrb.mxu3 %v13620_v41  ;;  %v14252_v60 = vpop.f32.mrf.mxu0 }
 0x2f0   : > { %18571 = vst [vmem:[#allocation93_spill] sm:$0xff] %v14246_v13  ;;  %2780 = vmatmul.bf16.gmra.mxu2 %v14238_v24  ;;  %v1937_v31 = vpack.c.bf16 %v1873_v55, %v1873_v55  ;;  %v10772_v55 = vld [vmem:[%s18494_s3 + $0x1c0] sm:$0xf] }
 0x2f1   : > { %v2270_v17 = vpop.f32.mrf.mxu3 }
 0x2f2   : > { %3615 = vmatmul.bf16.vlgmr.msra.gmra.mxu0 %v13610_v42  ;;  %v2271_v27 = vadd.f32 %v2270_v17, %v13957_v10  ;;  %v10742_v10 = vld [vmem:[%s18494_s3 + $0x188] sm:$0xf0]  ;;  %v3565_v53 = vunpack.c.l.b16 %v1937_v31  ;;  %v12546_v17 = vld [vmem:[%s18494_s3 + $0x1c4] sm:$0xf0] }
 0x2f3   : > { %3744 = vmatpush.bf16.msrb.mxu0 %v13843_v5  ;;  %v14257_v19 = vpop.f32.mrf.mxu2  ;;  %2473 = vmatpush.bf16.msrb.mxu3 %v13587_v12  ;;  %v1562_v36 = vpop.f32.mrf.mxu1  ;;  %v14297_v24 = vor.u32 %v12546_v17, %v10772_v55  ;;  %v10606_v17 = vld [vmem:[%s18494_s3 + $0x78] sm:$0xf0] }
 0x2f4   : > { %18572 = vst [vmem:[#allocation94_spill] sm:$0xff] %v14257_v19  ;;  %v1810_v38 = vadd.f32 %v13732_v1, %v1562_v36  ;;  %v12537_v1 = vld [vmem:[%s18494_s3 + $0x184] sm:$0xf]  ;;  %v2287_v45 = vpack.c.bf16 %v2271_v27, %v2271_v27 }
 0x2f5   : > { %v14291_v31 = vor.u32 %v12537_v1, %v10742_v10  ;;  %18576 = vst [vmem:[#allocation98_spill] sm:$0xff] %v14297_v24  ;;  %v18581_v1 = vld [vmem:[#allocation27_spill] sm:$0xff] }
 0x2f6   : > { %v1874_v29 = vmax.f32 %v1810_v38, 0.0  ;;  %v14285_v38 = vor.u32 %v12501_v51, %v10598_v7  ;;  %v14301_v11 = vunpack.c.l.b16 %v2287_v45 }
 0x2f7   : > { %3745 = vmatpush.bf16.msrb.mxu0 %v13807_v23  ;;  %2474 = vmatpush.bf16.msrb.mxu3 %v13564_v0  ;;  %v14271_v42 = vpop.f32.mrf.mxu0  ;;  %18575 = vst [vmem:[#allocation97_spill] sm:$0xff] %v14291_v31 }
 0x2f8   : > { %v1938_v47 = vpack.c.bf16 %v1874_v29, %v1874_v29  ;;  %18573 = vst [vmem:[#allocation95_spill] sm:$0xff] %v14285_v38 }
 0x2f9   : > { %v2272_v36 = vpop.f32.mrf.mxu3  ;;  %18577 = vst [vmem:[#allocation99_spill] sm:$0xff] %v14301_v11 }
 0x2fa   : > { %v3566_v49 = vunpack.c.l.b16 %v1938_v47  ;;  %v2273_v21 = vadd.f32 %v2272_v36, %v13986_v3  ;;  %v12503_v47 = vld [vmem:[%s18494_s3 + $0x74] sm:$0xf] }
 0x2fb   : > { %3746 = vmatpush.bf16.msrb.mxu0 %v13770_v20  ;;  %v14289_v13 = vpop.f32.mrf.mxu2  ;;  %2475 = vmatpush.bf16.msrb.mxu3 %v13538_v46  ;;  %v14295_v29 = vpop.f32.mrf.mxu1  ;;  %v12539_v36 = vld [vmem:[%s18494_s3 + $0x194] sm:$0xf] }
 0x2fc   : > { %18574 = vst [vmem:[#allocation96_spill] sm:$0xff] %v14289_v13  ;;  %v14299_v51 = vpack.c.b16 %v3566_v49, %v3565_v53  ;;  %v2288_v7 = vpack.c.bf16 %v2273_v21, %v2273_v21 }
 0x2fe   : > { %v14303_v27 = vunpack.c.l.b16 %v2288_v7  ;;  %2380 = vmatmul.bf16.gmra.mxu3 %v14285_v38  ;;  %2900 = vmatmul.bf16.vlgmr.msra.gmra.mxu1 %v14291_v31  ;;  %v10750_v7 = vld [vmem:[%s18494_s3 + $0x198] sm:$0xf0] }
 0x2ff   : > { %3871 = vmatpush.bf16.msra.mxu0 %v14036_v15  ;;  %v14308_v3 = vpop.f32.mrf.mxu0  ;;  %v14349_v11 = vor.u32 %v12539_v36, %v10750_v7  ;;  %v10612_v7 = vld [vmem:[%s18494_s3 + $0x80] sm:$0xf] }
 0x300   : > { %18578 = vst [vmem:[#allocation100_spill] sm:$0xff] %v14303_v27  ;;  %2977 = vmatmul.bf16.vlgmr.msra.gmra.mxu2 %v14297_v24 }
 0x301   : > { %18579 = vst [vmem:[#allocation101_spill] sm:$0xff] %v14308_v3  ;;  %3673 = vmatpush.bf16.msra.mxu2 %v14036_v15  ;;  %v2275_v21 = vpop.f32.mrf.mxu3  ;;  %v14347_v3 = vor.u32 %v12503_v47, %v10606_v17 }
 0x302   : > { %3620 = vmatmul.bf16.gmra.mxu0 %v18581_v1  ;;  %v2276_v53 = vadd.f32 %v2275_v21, %v14025_v62  ;;  %v10780_v62 = vld [vmem:[%s18494_s3 + $0x1d0] sm:$0xf]  ;;  %v12548_v21 = vld [vmem:[%s18494_s3 + $0x1d4] sm:$0xf0]  ;;  %18585 = vst [vmem:[#allocation105_spill] sm:$0xff] %v14349_v11 }
 0x303   : > { %3872 = vmatpush.bf16.msra.mxu0 %v14051_v40  ;;  %v14314_v45 = vpop.f32.mrf.mxu2  ;;  %v14317_v10 = vpop.f32.mrf.mxu1  ;;  %18584 = vst [vmem:[#allocation104_spill] sm:$0xff] %v14347_v3  ;;  %v14353_v24 = vor.u32 %v12548_v21, %v10780_v62  ;;  %v12506_v21 = vld [vmem:[%s18494_s3 + $0x84] sm:$0xf0] }
 0x304   : > { %18580 = vst [vmem:[#allocation102_spill] sm:$0xff] %v14314_v45  ;;  %v2289_v49 = vpack.c.bf16 %v2276_v53, %v2276_v53 }
 0x305   : > { %3674 = vmatpush.bf16.msra.mxu2 %v14051_v40  ;;  %18586 = vst [vmem:[#allocation106_spill] sm:$0xff] %v14353_v24 }
 0x306   : > { %v14357_v45 = vunpack.c.l.b16 %v2289_v49 }
 0x307   : > { %3873 = vmatpush.bf16.msra.mxu0 %v14061_v39  ;;  %v14325_v55 = vpop.f32.mrf.mxu0 }
 0x308   : > { %18582 = vst [vmem:[#allocation27_spill] sm:$0xff] %v14325_v55 }
 0x309   : > { %3675 = vmatpush.bf16.msra.mxu2 %v14061_v39  ;;  %v2277_v1 = vpop.f32.mrf.mxu3  ;;  %18587 = vst [vmem:[#allocation107_spill] sm:$0xff] %v14357_v45  ;;  %v10613_v45 = vor.u32 %v12506_v21, %v10612_v7 }
 0x30a   : > { %v2278_v38 = vadd.f32 %v2277_v1, %v14068_v63  ;;  %v12541_v1 = vld [vmem:[%s18494_s3 + $0x1a4] sm:$0xf] }
 0x30b   : > { %3874 = vmatpush.bf16.msra.mxu0 %v14085_v59  ;;  %v14345_v55 = vpop.f32.mrf.mxu2  ;;  %v14351_v27 = vpop.f32.mrf.mxu1 }
 0x30c   : > { %18583 = vst [vmem:[#allocation103_spill] sm:$0xff] %v14345_v55  ;;  %v2290_v31 = vpack.c.bf16 %v2278_v38, %v2278_v38 }
 0x30d   : > { %3676 = vmatpush.bf16.msra.mxu2 %v14085_v59 }
 0x30e   : > { %v14359_v53 = vunpack.c.l.b16 %v2290_v31  ;;  %2385 = vmatmul.bf16.gmra.mxu3 %v14347_v3  ;;  %2905 = vmatmul.bf16.gmra.mxu1 %v14349_v11  ;;  %v18591_v31 = vld [vmem:[#allocation30_spill] sm:$0xff] }
 0x30f   : > { %3875 = vmatpush.bf16.msra.mxu0 %v13882_v2  ;;  %v14364_v63 = vpop.f32.mrf.mxu0 }
 0x310   : > { %18588 = vst [vmem:[#allocation108_spill] sm:$0xff] %v14359_v53  ;;  %2982 = vmatmul.bf16.gmra.mxu2 %v14353_v24 }
 0x311   : > { %18589 = vst [vmem:[#allocation109_spill] sm:$0xff] %v14364_v63  ;;  %3677 = vmatpush.bf16.msra.mxu2 %v13882_v2  ;;  %v2280_v47 = vpop.f32.mrf.mxu3 }
 0x312   : > { %3625 = vmatmul.bf16.gmra.mxu0 %v18591_v31  ;;  %v2281_v36 = vadd.f32 %v2280_v47, %v14123_v61  ;;  %v10758_v31 = vld [vmem:[%s18494_s3 + $0x1a8] sm:$0xf0]  ;;  %v10788_v61 = vld [vmem:[%s18494_s3 + $0x1e0] sm:$0xf]  ;;  %v12550_v47 = vld [vmem:[%s18494_s3 + $0x1e4] sm:$0xf0] }
 0x313   : > { %3876 = vmatpush.bf16.msra.mxu0 %v13843_v5  ;;  %v14370_v49 = vpop.f32.mrf.mxu2  ;;  %v14373_v17 = vpop.f32.mrf.mxu1  ;;  %v14403_v53 = vor.u32 %v12541_v1, %v10758_v31  ;;  %v14405_v11 = vor.u32 %v12550_v47, %v10788_v61  ;;  %v10620_v1 = vld [vmem:[%s18494_s3 + $0x90] sm:$0xf]  ;;  %v12508_v47 = vld [vmem:[%s18494_s3 + $0x94] sm:$0xf0] }
 0x314   : > { %18590 = vst [vmem:[#allocation110_spill] sm:$0xff] %v14370_v49  ;;  %v2291_v3 = vpack.c.bf16 %v2281_v36, %v2281_v36  ;;  %v18598_v36 = vld [vmem:[#allocation15_spill] sm:$0xff]  ;;  %v18603_v31 = vld [vmem:[#allocation17_spill] sm:$0xff] }
 0x315   : > { %3678 = vmatpush.bf16.msra.mxu2 %v13843_v5  ;;  %18594 = vst [vmem:[#allocation112_spill] sm:$0xff] %v14403_v53 }
 0x316   : > { %18595 = vst [vmem:[#allocation113_spill] sm:$0xff] %v14405_v11  ;;  %v14408_v55 = vunpack.c.l.b16 %v2291_v3  ;;  %v18601_v3 = vld [vmem:[#allocation33_spill] sm:$0xff] }
 0x317   : > { %3877 = vmatpush.bf16.msra.mxu0 %v13807_v23  ;;  %v14381_v62 = vpop.f32.mrf.mxu0 }
 0x318   : > { %18592 = vst [vmem:[#allocation30_spill] sm:$0xff] %v14381_v62 }
 0x319   : > { %3679 = vmatpush.bf16.msra.mxu2 %v13807_v23  ;;  %v2282_v38 = vpop.f32.mrf.mxu3  ;;  %18596 = vst [vmem:[#allocation114_spill] sm:$0xff] %v14408_v55 }
 0x31a   : > { %v2283_v62 = vadd.f32 %v2282_v38, %v14167_v8 }
 0x31b   : > { %3878 = vmatpush.bf16.msra.mxu0 %v13770_v20  ;;  %v14401_v63 = vpop.f32.mrf.mxu2  ;;  %v1575_v24 = vpop.f32.mrf.mxu1 }
 0x31c   : > { %18593 = vst [vmem:[#allocation111_spill] sm:$0xff] %v14401_v63  ;;  %v2292_v49 = vpack.c.bf16 %v2283_v62, %v2283_v62 }
 0x31d   : > { %3680 = vmatpush.bf16.msra.mxu2 %v13770_v20 }
 0x31e   : > { %v14410_v13 = vunpack.c.l.b16 %v2292_v49  ;;  %2447 = vmatmul.bf16.vlgmr.msra.gmra.mxu3 %v10613_v45  ;;  %2910 = vmatmul.bf16.gmra.mxu1 %v14403_v53  ;;  %v18602_v49 = vld [vmem:[#allocation16_spill] sm:$0xff] }
 0x31f   : > { %2545 = vmatpush.bf16.msra.mxu3 %v18598_v36  ;;  %v14415_v8 = vpop.f32.mrf.mxu0  ;;  %v12543_v36 = vld [vmem:[%s18494_s3 + $0x1b4] sm:$0xf] }
 0x320   : > { %18597 = vst [vmem:[#allocation115_spill] sm:$0xff] %v14410_v13  ;;  %2987 = vmatmul.bf16.gmra.mxu2 %v14405_v11  ;;  %v18607_v13 = vld [vmem:[#allocation18_spill] sm:$0xff] }
 0x321   : > { %18599 = vst [vmem:[#allocation15_spill] sm:$0xff] %v14415_v8  ;;  %v14419_v7 = vpop.f32.mrf.mxu3  ;;  %v14450_v8 = vor.u32 %v12508_v47, %v10620_v1  ;;  %v18609_v1 = vld [vmem:[#allocation14_spill] sm:$0xff] }
 0x322   : > { %3630 = vmatmul.bf16.gmra.mxu0 %v18601_v3  ;;  %v10766_v3 = vld [vmem:[%s18494_s3 + $0x1b8] sm:$0xf0] }
 0x323   : > { %v14421_v62 = vpop.f32.mrf.mxu2  ;;  %2546 = vmatpush.bf16.msra.mxu3 %v18602_v49  ;;  %v1577_v21 = vpop.f32.mrf.mxu1  ;;  %v10796_v49 = vld [vmem:[%s18494_s3 + $0x1f0] sm:$0xf]  ;;  %v14452_v55 = vor.u32 %v12543_v36, %v10766_v3 }
 0x324   : > { %18600 = vst [vmem:[#allocation116_spill] sm:$0xff] %v14421_v62  ;;  %v12996_v62 = vld [vmem:[%s18480_s26] ss:$0 sm:$0xff] }
 0x325   : > { %18606 = vst [vmem:[#allocation17_spill] sm:$0xff] %v14452_v55  ;;  %v1815_v19 = vadd.f32 %v12996_v62, %v1575_v24  ;;  %v1813_v36 = vadd.f32 %v12996_v62, %v14351_v27 }
 0x327   : > { %2547 = vmatpush.bf16.msra.mxu3 %v18603_v31  ;;  %v14429_v61 = vpop.f32.mrf.mxu0  ;;  %v12552_v31 = vld [vmem:[%s18494_s3 + $0x1f4] sm:$0xf0]  ;;  %v1877_v27 = vmax.f32 %v1813_v36, 0.0 }
 0x328   : > { %18604 = vst [vmem:[#allocation33_spill] sm:$0xff] %v14429_v61  ;;  %v14455_v53 = vor.u32 %v12552_v31, %v10796_v49  ;;  %v1814_v49 = vadd.f32 %v12996_v62, %v14373_v17  ;;  %v1879_v31 = vmax.f32 %v1815_v19, 0.0 }
 0x329   : > { %v14446_v38 = vpop.f32.mrf.mxu3 }
 0x32a   : > { %18608 = vst [vmem:[#allocation18_spill] sm:$0xff] %v14455_v53  ;;  %v1878_v57 = vmax.f32 %v1814_v49, 0.0  ;;  %v1943_v19 = vpack.c.bf16 %v1879_v31, %v1879_v31 }
 0x32b   : > { %v14448_v61 = vpop.f32.mrf.mxu2  ;;  %2548 = vmatpush.bf16.msra.mxu3 %v18607_v13  ;;  %v1580_v11 = vpop.f32.mrf.mxu1 }
 0x32c   : > { %18605 = vst [vmem:[#allocation16_spill] sm:$0xff] %v14448_v61  ;;  %v1817_v63 = vadd.f32 %v12996_v62, %v1580_v11  ;;  %v1816_v61 = vadd.f32 %v12996_v62, %v1577_v21  ;;  %v3571_v26 = vunpack.c.l.b16 %v1943_v19 }
 0x32e   : > { %2452 = vmatmul.bf16.gmra.mxu3 %v14450_v8  ;;  %2915 = vmatmul.bf16.gmra.mxu1 %v14452_v55  ;;  %v1881_v13 = vmax.f32 %v1817_v63, 0.0  ;;  %v1880_v25 = vmax.f32 %v1816_v61, 0.0  ;;  %v18610_v55 = vld [vmem:[#allocation13_spill] sm:$0xff]  ;;  %v1812_v63 = vadd.f32 %v12996_v62, %v14317_v10  ;;  %v12553_v10 = vld [vmem:[%s18494_s3 + $0x204] sm:$0xf] }
 0x32f   : > { %2549 = vmatpush.bf16.msra.mxu3 %v18609_v1  ;;  %v14464_v47 = vpop.f32.mrf.mxu0 }
 0x330   : > { %2992 = vmatmul.bf16.gmra.mxu2 %v14455_v53  ;;  %v1945_v21 = vpack.c.bf16 %v1881_v13, %v1881_v13  ;;  %v1811_v53 = vadd.f32 %v12996_v62, %v14295_v29  ;;  %v1944_v17 = vpack.c.bf16 %v1880_v25, %v1880_v25  ;;  %v12510_v29 = vld [vmem:[%s18494_s3 + $0xa4] sm:$0xf0]  ;;  %v1876_v49 = vmax.f32 %v1812_v63, 0.0 }
 0x331   : > { %v14467_v3 = vpop.f32.mrf.mxu3 }
 0x332   : > { %3747 = vmatmul.bf16.vlgmr.msrb.gmra.mxu0 %v10613_v45  ;;  %v10628_v45 = vld [vmem:[%s18494_s3 + $0xa0] sm:$0xf]  ;;  %v3573_v25 = vunpack.c.l.b16 %v1945_v21  ;;  %v1875_v36 = vmax.f32 %v1811_v53, 0.0  ;;  %v3572_v14 = vunpack.c.l.b16 %v1944_v17  ;;  %v1940_v63 = vpack.c.bf16 %v1876_v49, %v1876_v49  ;;  %v18619_v49 = vld [vmem:[#allocation68_spill] sm:$0xff] }
 0x333   : > { %v1749_v11 = vpop.f32.mrf.mxu2  ;;  %2550 = vmatpush.bf16.msra.mxu3 %v18610_v55  ;;  %v1582_v24 = vpop.f32.mrf.mxu1  ;;  %4003 = vmatpush.bf16.msrb.mxu0 %v14036_v15  ;;  %v18611_v55 = vld [vmem:[#allocation12_spill] sm:$0xff]  ;;  %v14492_v30 = vor.u32 %v12510_v29, %v10628_v45 }
 0x334   : > { %v1818_v1 = vadd.f32 %v12996_v62, %v1582_v24  ;;  %v2009_v61 = vpack.c.bf16 %v1749_v11, %v1749_v11  ;;  %v10806_v62 = vld [vmem:[%s18494_s3 + $0x208] sm:$0xf0]  ;;  %v1941_v11 = vpack.c.bf16 %v1877_v27, %v1877_v27  ;;  %v1942_v24 = vpack.c.bf16 %v1878_v57, %v1878_v57  ;;  %v18615_v27 = vld [vmem:[#allocation67_spill] sm:$0xff]  ;;  %v18616_v29 = vld [vmem:[#allocation36_spill] sm:$0xff] }
 0x335   : > { %v14494_v37 = vor.u32 %v12553_v10, %v10806_v62  ;;  %v1939_v57 = vpack.c.bf16 %v1875_v36, %v1875_v36 }
 0x336   : > { %v1882_v32 = vmax.f32 %v1818_v1, 0.0  ;;  %v14496_v58 = vunpack.c.l.b16 %v2009_v61  ;;  %v3569_v19 = vunpack.c.l.b16 %v1941_v11  ;;  %v3570_v17 = vunpack.c.l.b16 %v1942_v24 }
 0x337   : > { %2551 = vmatpush.bf16.msra.mxu3 %v18611_v55  ;;  %v14478_v54 = vpop.f32.mrf.mxu0  ;;  %4004 = vmatpush.bf16.msrb.mxu0 %v14051_v40  ;;  %18612 = vst [vmem:[#allocation14_spill] sm:$0xff] %v14494_v37  ;;  %v14507_v61 = vpack.c.b16 %v3572_v14, %v3571_v26  ;;  %v3567_v14 = vunpack.c.l.b16 %v1939_v57  ;;  %v3568_v26 = vunpack.c.l.b16 %v1940_v63  ;;  %v12512_v57 = vld [vmem:[%s18494_s3 + $0xb4] sm:$0xf0]  ;;  %v12555_v63 = vld [vmem:[%s18494_s3 + $0x214] sm:$0xf] }
 0x338   : > { %v1946_v13 = vpack.c.bf16 %v1882_v32, %v1882_v32  ;;  %18613 = vst [vmem:[#allocation13_spill] sm:$0xff] %v14496_v58 }
 0x339   : > { %v14490_v31 = vpop.f32.mrf.mxu3 }
 0x33a   : > { %v3574_v1 = vunpack.c.l.b16 %v1946_v13  ;;  %v14522_v13 = vpack.c.b16 %v3570_v17, %v3569_v19  ;;  %v10822_v17 = vld [vmem:[%s18494_s3 + $0x228] sm:$0xf0] }
 0x33b   : > { %v1751_v55 = vpop.f32.mrf.mxu2  ;;  %2552 = vmatpush.bf16.msra.mxu3 %v13409_v28  ;;  %v2689_v32 = vpop.f32.mrf.mxu1  ;;  %4005 = vmatpush.bf16.msrb.mxu0 %v14061_v39  ;;  %v10614_v28 = vld [vmem:[%s18494_s3 + $0x88] sm:$0xf0] }
 0x33c   : > { %v2010_v48 = vpack.c.bf16 %v1751_v55, %v1751_v55  ;;  %v14500_v53 = vpack.c.b16 %v3574_v1, %v3573_v25  ;;  %v2690_v45 = vadd.f32 %v2689_v32, %v18615_v27  ;;  %v14533_v55 = vpack.c.b16 %v3568_v26, %v3567_v14  ;;  %v10814_v27 = vld [vmem:[%s18494_s3 + $0x218] sm:$0xf0] }
 0x33d   : > { %v14557_v26 = vor.u32 %v12555_v63, %v10814_v27  ;;  %v12505_v63 = vld [vmem:[%s18494_s3 + $0x84] sm:$0xf] }
 0x33e   : > { %v14502_v21 = vunpack.c.l.b16 %v2010_v48  ;;  %2457 = vmatmul.bf16.gmra.mxu3 %v14492_v30  ;;  %3112 = vmatmul.bf16.vlgmr.msrb.gmra.mxu1 %v14494_v37  ;;  %v2709_v62 = vpack.c.bf16 %v2690_v45, %v2690_v45 }
 0x33f   : > { %v14512_v10 = vpop.f32.mrf.mxu0  ;;  %3636 = vmatpush.bf16.msra.mxu1 %v14500_v53  ;;  %4006 = vmatpush.bf16.msrb.mxu0 %v14085_v59  ;;  %18624 = vst [vmem:[#allocation121_spill] sm:$0xff] %v14557_v26 }
 0x340   : > { %18614 = vst [vmem:[#allocation12_spill] sm:$0xff] %v14502_v21  ;;  %3461 = vmatmul.bf16.vlgmr.msrb.gmra.mxu2 %v18616_v29  ;;  %v14528_v24 = vunpack.c.l.b16 %v2709_v62 }
 0x341   : > { %18617 = vst [vmem:[#allocation67_spill] sm:$0xff] %v14512_v10  ;;  %3805 = vmatpush.bf16.msrb.mxu2 %v14036_v15  ;;  %v14517_v48 = vpop.f32.mrf.mxu3 }
 0x342   : > { %3752 = vmatmul.bf16.gmra.mxu0 %v14450_v8  ;;  %18620 = vst [vmem:[#allocation68_spill] sm:$0xff] %v14528_v24  ;;  %v10636_v8 = vld [vmem:[%s18494_s3 + $0xb0] sm:$0xf] }
 0x343   : > { %v14519_v25 = vpop.f32.mrf.mxu2  ;;  %v2691_v36 = vpop.f32.mrf.mxu1  ;;  %3637 = vmatpush.bf16.msra.mxu1 %v14507_v61  ;;  %4007 = vmatpush.bf16.msrb.mxu0 %v13882_v2  ;;  %v10637_v14 = vor.u32 %v12512_v57, %v10636_v8 }
 0x344   : > { %18618 = vst [vmem:[#allocation117_spill] sm:$0xff] %v14519_v25  ;;  %v2692_v11 = vadd.f32 %v2691_v36, %v18619_v49  ;;  %v18625_v49 = vld [vmem:[#allocation39_spill] sm:$0xff]  ;;  %v12507_v25 = vld [vmem:[%s18494_s3 + $0x94] sm:$0xf] }
 0x345   : > { %3806 = vmatpush.bf16.msrb.mxu2 %v14051_v40 }
 0x346   : > { %v2710_v1 = vpack.c.bf16 %v2692_v11, %v2692_v11 }
 0x347   : > { %v14535_v32 = vpop.f32.mrf.mxu0  ;;  %3638 = vmatpush.bf16.msra.mxu1 %v14522_v13  ;;  %4008 = vmatpush.bf16.msrb.mxu0 %v13843_v5 }
 0x348   : > { %18621 = vst [vmem:[#allocation118_spill] sm:$0xff] %v14535_v32  ;;  %v14547_v45 = vunpack.c.l.b16 %v2710_v1 }
 0x349   : > { %3807 = vmatpush.bf16.msrb.mxu2 %v14061_v39  ;;  %v14551_v19 = vpop.f32.mrf.mxu3 }
 0x34a   : > { %18622 = vst [vmem:[#allocation119_spill] sm:$0xff] %v14547_v45 }
 0x34b   : > { %v14555_v62 = vpop.f32.mrf.mxu2  ;;  %v14559_v36 = vpop.f32.mrf.mxu1  ;;  %3639 = vmatpush.bf16.msra.mxu1 %v14533_v55  ;;  %4009 = vmatpush.bf16.msrb.mxu0 %v13807_v23 }
 0x34c   : > { %18623 = vst [vmem:[#allocation120_spill] sm:$0xff] %v14555_v62  ;;  %v18631_v62 = vld [vmem:[#allocation42_spill] sm:$0xff] }
 0x34d   : > { %3808 = vmatpush.bf16.msrb.mxu2 %v14085_v59 }
 0x34e   : > { %2462 = vmatmul.bf16.gmra.mxu3 %v10637_v14  ;;  %3117 = vmatmul.bf16.gmra.mxu1 %v14557_v26 }
 0x34f   : > { %v14566_v11 = vpop.f32.mrf.mxu0  ;;  %3640 = vmatpush.bf16.msra.mxu1 %v14299_v51  ;;  %4010 = vmatpush.bf16.msrb.mxu0 %v13770_v20 }
 0x350   : > { %3466 = vmatmul.bf16.gmra.mxu2 %v18625_v49  ;;  %18626 = vst [vmem:[#allocation122_spill] sm:$0xff] %v14566_v11 }
 0x351   : > { %3809 = vmatpush.bf16.msrb.mxu2 %v13882_v2  ;;  %v14571_v1 = vpop.f32.mrf.mxu3 }
 0x352   : > { %3757 = vmatmul.bf16.gmra.mxu0 %v14492_v30  ;;  %v12557_v30 = vld [vmem:[%s18494_s3 + $0x224] sm:$0xf] }
 0x353   : > { %v14573_v8 = vpop.f32.mrf.mxu2  ;;  %v14576_v57 = vpop.f32.mrf.mxu1  ;;  %3641 = vmatpush.bf16.msra.mxu1 %v14240_v43  ;;  %v14602_v24 = vor.u32 %v12557_v30, %v10822_v17 }
 0x354   : > { %18627 = vst [vmem:[#allocation123_spill] sm:$0xff] %v14573_v8  ;;  %v14600_v8 = vor.u32 %v12505_v63, %v10614_v28 }
 0x355   : > { %3810 = vmatpush.bf16.msrb.mxu2 %v13843_v5  ;;  %18630 = vst [vmem:[#allocation126_spill] sm:$0xff] %v14602_v24 }
 0x357   : > { %v14583_v27 = vpop.f32.mrf.mxu0  ;;  %3642 = vmatpush.bf16.msra.mxu1 %v14184_v52 }
 0x358   : > { %18628 = vst [vmem:[#allocation124_spill] sm:$0xff] %v14583_v27 }
 0x359   : > { %3811 = vmatpush.bf16.msrb.mxu2 %v13807_v23  ;;  %v14596_v58 = vpop.f32.mrf.mxu3 }
 0x35b   : > { %v14598_v21 = vpop.f32.mrf.mxu2  ;;  %v14604_v45 = vpop.f32.mrf.mxu1  ;;  %3643 = vmatpush.bf16.msra.mxu1 %v14112_v56 }
 0x35c   : > { %18629 = vst [vmem:[#allocation125_spill] sm:$0xff] %v14598_v21 }
 0x35d   : > { %3812 = vmatpush.bf16.msrb.mxu2 %v13770_v20 }
 0x35e   : > { %2476 = vmatmul.bf16.vlgmr.msrb.gmra.mxu3 %v14600_v8  ;;  %3122 = vmatmul.bf16.gmra.mxu1 %v14602_v24 }
 0x35f   : > { %3768 = vmatpush.bf16.msrb.mxu1 %v14500_v53  ;;  %2574 = vmatpush.bf16.msrb.mxu3 %v13725_v34  ;;  %v14613_v28 = vpop.f32.mrf.mxu0 }
 0x360   : > { %3471 = vmatmul.bf16.gmra.mxu2 %v18631_v62  ;;  %18632 = vst [vmem:[#allocation127_spill] sm:$0xff] %v14613_v28 }
 0x361   : > { %v2371_v17 = vpop.f32.mrf.mxu3 }
 0x362   : > { %v2372_v63 = vadd.f32 %v2371_v17, %v14419_v7  ;;  %3762 = vmatmul.bf16.gmra.mxu0 %v10637_v14  ;;  %v10622_v7 = vld [vmem:[%s18494_s3 + $0x98] sm:$0xf0]  ;;  %v12559_v14 = vld [vmem:[%s18494_s3 + $0x234] sm:$0xf] }
 0x363   : > { %3769 = vmatpush.bf16.msrb.mxu1 %v14507_v61  ;;  %v14617_v30 = vpop.f32.mrf.mxu2  ;;  %2575 = vmatpush.bf16.msrb.mxu3 %v13742_v33  ;;  %v14620_v21 = vpop.f32.mrf.mxu1  ;;  %v10830_v17 = vld [vmem:[%s18494_s3 + $0x238] sm:$0xf0] }
 0x364   : > { %18633 = vst [vmem:[#allocation128_spill] sm:$0xff] %v14617_v30  ;;  %v2391_v27 = vpack.c.bf16 %v2372_v63, %v2372_v63  ;;  %v14644_v32 = vor.u32 %v12559_v14, %v10830_v17  ;;  %v18646_v17 = vld [vmem:[#allocation41_spill] sm:$0xff] }
 0x365   : > { %18634 = vst [vmem:[#allocation129_spill] sm:$0xff] %v14620_v21  ;;  %v1980_v63 = vpack.c.bf16 %v18646_v17, %v18646_v17 }
 0x366   : > { %18637 = vst [vmem:[#allocation132_spill] sm:$0xff] %v14644_v32  ;;  %v14650_v37 = vunpack.c.l.b16 %v2391_v27 }
 0x367   : > { %3770 = vmatpush.bf16.msrb.mxu1 %v14522_v13  ;;  %2576 = vmatpush.bf16.msrb.mxu3 %v13752_v35  ;;  %v14627_v28 = vpop.f32.mrf.mxu0 }
 0x368   : > { %18635 = vst [vmem:[#allocation130_spill] sm:$0xff] %v14627_v28  ;;  %v14642_v28 = vor.u32 %v12507_v25, %v10622_v7  ;;  %v18645_v7 = vld [vmem:[#allocation40_spill] sm:$0xff] }
 0x369   : > { %v2373_v30 = vpop.f32.mrf.mxu3  ;;  %18639 = vst [vmem:[#allocation134_spill] sm:$0xff] %v14650_v37  ;;  %v1979_v14 = vpack.c.bf16 %v18645_v7, %v18645_v7 }
 0x36a   : > { %v2374_v11 = vadd.f32 %v2373_v30, %v14446_v38  ;;  %v18641_v38 = vld [vmem:[#allocation46_spill] sm:$0xff] }
 0x36b   : > { %3771 = vmatpush.bf16.msrb.mxu1 %v14533_v55  ;;  %v14640_v24 = vpop.f32.mrf.mxu2  ;;  %2577 = vmatpush.bf16.msrb.mxu3 %v13758_v4  ;;  %v14647_v10 = vpop.f32.mrf.mxu1  ;;  %v14687_v7 = vunpack.c.l.b16 %v1979_v14  ;;  %v18656_v14 = vld [vmem:[#allocation44_spill] sm:$0xff] }
 0x36c   : > { %18636 = vst [vmem:[#allocation131_spill] sm:$0xff] %v14640_v24  ;;  %v2392_v26 = vpack.c.bf16 %v2374_v11, %v2374_v11  ;;  %v14689_v24 = vunpack.c.l.b16 %v1980_v63 }
 0x36d   : > { %18638 = vst [vmem:[#allocation133_spill] sm:$0xff] %v14647_v10 }
 0x36e   : > { %v14652_v21 = vunpack.c.l.b16 %v2392_v26  ;;  %2481 = vmatmul.bf16.gmra.mxu3 %v14642_v28  ;;  %3127 = vmatmul.bf16.gmra.mxu1 %v14644_v32 }
 0x36f   : > { %3772 = vmatpush.bf16.msrb.mxu1 %v14299_v51  ;;  %2578 = vmatpush.bf16.msrb.mxu3 %v13620_v41  ;;  %v14658_v25 = vpop.f32.mrf.mxu0 }
 0x370   : > { %18640 = vst [vmem:[#allocation135_spill] sm:$0xff] %v14652_v21  ;;  %3476 = vmatmul.bf16.gmra.mxu2 %v18641_v38 }
 0x371   : > { %18642 = vst [vmem:[#allocation136_spill] sm:$0xff] %v14658_v25  ;;  %v2376_v11 = vpop.f32.mrf.mxu3 }
 0x372   : > { %v2377_v27 = vadd.f32 %v2376_v11, %v14467_v3  ;;  %3879 = vmatmul.bf16.vlgmr.msra.gmra.mxu0 %v18616_v29  ;;  %v12509_v11 = vld [vmem:[%s18494_s3 + $0xa4] sm:$0xf] }
 0x373   : > { %3773 = vmatpush.bf16.msrb.mxu1 %v14240_v43  ;;  %v14664_v26 = vpop.f32.mrf.mxu2  ;;  %2579 = vmatpush.bf16.msrb.mxu3 %v13587_v12  ;;  %v14668_v30 = vpop.f32.mrf.mxu1 }
 0x374   : > { %18643 = vst [vmem:[#allocation137_spill] sm:$0xff] %v14664_v26  ;;  %4135 = vmatpush.bf16.msra.mxu0 %v14036_v15  ;;  %v10630_v26 = vld [vmem:[%s18494_s3 + $0xa8] sm:$0xf0]  ;;  %v2393_v37 = vpack.c.bf16 %v2377_v27, %v2377_v27 }
 0x375   : > { %18644 = vst [vmem:[#allocation138_spill] sm:$0xff] %v14668_v30  ;;  %v14694_v29 = vor.u32 %v12509_v11, %v10630_v26  ;;  %v18652_v26 = vld [vmem:[#allocation61_spill] sm:$0xff] }
 0x376   : > { %v14700_v30 = vunpack.c.l.b16 %v2393_v37 }
 0x377   : > { %3774 = vmatpush.bf16.msrb.mxu1 %v14184_v52  ;;  %2580 = vmatpush.bf16.msrb.mxu3 %v13564_v0  ;;  %v14677_v3 = vpop.f32.mrf.mxu0 }
 0x378   : > { %18647 = vst [vmem:[#allocation40_spill] sm:$0xff] %v14677_v3  ;;  %4136 = vmatpush.bf16.msra.mxu0 %v14051_v40 }
 0x379   : > { %v2378_v17 = vpop.f32.mrf.mxu3  ;;  %18649 = vst [vmem:[#allocation139_spill] sm:$0xff] %v14700_v30 }
 0x37a   : > { %v2379_v21 = vadd.f32 %v2378_v17, %v14490_v31  ;;  %v18651_v31 = vld [vmem:[#allocation45_spill] sm:$0xff] }
 0x37b   : > { %3775 = vmatpush.bf16.msrb.mxu1 %v14112_v56  ;;  %v14692_v32 = vpop.f32.mrf.mxu2  ;;  %2581 = vmatpush.bf16.msrb.mxu3 %v13538_v46  ;;  %v2901_v3 = vpop.f32.mrf.mxu1 }
 0x37c   : > { %18648 = vst [vmem:[#allocation41_spill] sm:$0xff] %v14692_v32  ;;  %4137 = vmatpush.bf16.msra.mxu0 %v14061_v39  ;;  %v2394_v25 = vpack.c.bf16 %v2379_v21, %v2379_v21  ;;  %v2902_v27 = vadd.f32 %v2901_v3, %v14252_v60  ;;  %v12511_v32 = vld [vmem:[%s18494_s3 + $0xb4] sm:$0xf] }
 0x37e   : > { %v14702_v63 = vunpack.c.l.b16 %v2394_v25  ;;  %2486 = vmatmul.bf16.gmra.mxu3 %v14694_v29  ;;  %3644 = vmatmul.bf16.vlgmr.msra.gmra.mxu1 %v18651_v31  ;;  %v2921_v25 = vpack.c.bf16 %v2902_v27, %v2902_v27  ;;  %v1982_v27 = vpack.c.bf16 %v18656_v14, %v18656_v14 }
 0x37f   : > { %v14708_v11 = vpop.f32.mrf.mxu0  ;;  %3900 = vmatpush.bf16.msra.mxu1 %v14500_v53 }
 0x380   : > { %18650 = vst [vmem:[#allocation140_spill] sm:$0xff] %v14702_v63  ;;  %3681 = vmatmul.bf16.vlgmr.msra.gmra.mxu2 %v18652_v26  ;;  %4138 = vmatpush.bf16.msra.mxu0 %v14085_v59  ;;  %v18655_v26 = vld [vmem:[#allocation43_spill] sm:$0xff] }
 0x381   : > { %18653 = vst [vmem:[#allocation45_spill] sm:$0xff] %v14708_v11  ;;  %3937 = vmatpush.bf16.msra.mxu2 %v14036_v15  ;;  %v2381_v21 = vpop.f32.mrf.mxu3  ;;  %v1981_v37 = vpack.c.bf16 %v18655_v26, %v18655_v26 }
 0x382   : > { %v2382_v60 = vadd.f32 %v2381_v21, %v14517_v48  ;;  %3884 = vmatmul.bf16.gmra.mxu0 %v18625_v49  ;;  %v14727_v48 = vunpack.c.l.b16 %v2921_v25  ;;  %v14744_v25 = vunpack.c.l.b16 %v1982_v27 }
 0x383   : > { %v14716_v3 = vpop.f32.mrf.mxu2  ;;  %v2903_v17 = vpop.f32.mrf.mxu1  ;;  %3901 = vmatpush.bf16.msra.mxu1 %v14507_v61  ;;  %v14742_v14 = vunpack.c.l.b16 %v1981_v37  ;;  %v18670_v37 = vld [vmem:[#allocation48_spill] sm:$0xff] }
 0x384   : > { %18654 = vst [vmem:[#allocation61_spill] sm:$0xff] %v14716_v3  ;;  %4139 = vmatpush.bf16.msra.mxu0 %v13882_v2  ;;  %v2904_v31 = vadd.f32 %v2903_v17, %v14271_v42  ;;  %v10638_v42 = vld [vmem:[%s18494_s3 + $0xb8] sm:$0xf0]  ;;  %v2395_v26 = vpack.c.bf16 %v2382_v60, %v2382_v60 }
 0x385   : > { %3938 = vmatpush.bf16.msra.mxu2 %v14051_v40  ;;  %18657 = vst [vmem:[#allocation43_spill] sm:$0xff] %v14727_v48  ;;  %v1984_v48 = vpack.c.bf16 %v18670_v37, %v18670_v37 }
 0x386   : > { %v2922_v21 = vpack.c.bf16 %v2904_v31, %v2904_v31  ;;  %v14760_v60 = vunpack.c.l.b16 %v2395_v26 }
 0x387   : > { %v14729_v3 = vpop.f32.mrf.mxu0  ;;  %3902 = vmatpush.bf16.msra.mxu1 %v14522_v13 }
 0x388   : > { %18658 = vst [vmem:[#allocation44_spill] sm:$0xff] %v14729_v3  ;;  %4140 = vmatpush.bf16.msra.mxu0 %v13843_v5  ;;  %v14738_v17 = vunpack.c.l.b16 %v2922_v21  ;;  %v14751_v3 = vor.u32 %v12511_v32, %v10638_v42  ;;  %v18664_v32 = vld [vmem:[#allocation49_spill] sm:$0xff] }
 0x389   : > { %3939 = vmatpush.bf16.msra.mxu2 %v14061_v39  ;;  %v2383_v31 = vpop.f32.mrf.mxu3  ;;  %18662 = vst [vmem:[#allocation144_spill] sm:$0xff] %v14760_v60 }
 0x38a   : > { %18659 = vst [vmem:[#allocation141_spill] sm:$0xff] %v14738_v17  ;;  %v2384_v63 = vadd.f32 %v2383_v31, %v14551_v19  ;;  %v18665_v19 = vld [vmem:[#allocation65_spill] sm:$0xff] }
 0x38b   : > { %v14749_v49 = vpop.f32.mrf.mxu2  ;;  %v14753_v21 = vpop.f32.mrf.mxu1  ;;  %3903 = vmatpush.bf16.msra.mxu1 %v14533_v55 }
 0x38c   : > { %18660 = vst [vmem:[#allocation142_spill] sm:$0xff] %v14749_v49  ;;  %4141 = vmatpush.bf16.msra.mxu0 %v13807_v23  ;;  %v2396_v11 = vpack.c.bf16 %v2384_v63, %v2384_v63 }
 0x38d   : > { %18661 = vst [vmem:[#allocation143_spill] sm:$0xff] %v14753_v21  ;;  %3940 = vmatpush.bf16.msra.mxu2 %v14085_v59 }
 0x38e   : > { %v14762_v27 = vunpack.c.l.b16 %v2396_v11  ;;  %2491 = vmatmul.bf16.gmra.mxu3 %v14751_v3  ;;  %3649 = vmatmul.bf16.gmra.mxu1 %v18664_v32 }
 0x38f   : > { %v14767_v42 = vpop.f32.mrf.mxu0  ;;  %3904 = vmatpush.bf16.msra.mxu1 %v14299_v51 }
 0x390   : > { %18663 = vst [vmem:[#allocation145_spill] sm:$0xff] %v14762_v27  ;;  %3686 = vmatmul.bf16.gmra.mxu2 %v18665_v19  ;;  %4142 = vmatpush.bf16.msra.mxu0 %v13770_v20  ;;  %v18669_v19 = vld [vmem:[#allocation47_spill] sm:$0xff] }
 0x391   : > { %18666 = vst [vmem:[#allocation49_spill] sm:$0xff] %v14767_v42  ;;  %3941 = vmatpush.bf16.msra.mxu2 %v13882_v2  ;;  %v2386_v31 = vpop.f32.mrf.mxu3  ;;  %v1983_v30 = vpack.c.bf16 %v18669_v19, %v18669_v19  ;;  %v14798_v19 = vunpack.c.l.b16 %v1984_v48 }
 0x392   : > { %v2387_v11 = vadd.f32 %v2386_v31, %v14571_v1  ;;  %3889 = vmatmul.bf16.gmra.mxu0 %v18631_v62  ;;  %v10644_v1 = vld [vmem:[%s18494_s3 + $0xc0] sm:$0xf]  ;;  %v12514_v31 = vld [vmem:[%s18494_s3 + $0xc4] sm:$0xf0] }
 0x393   : > { %v14775_v26 = vpop.f32.mrf.mxu2  ;;  %v14778_v32 = vpop.f32.mrf.mxu1  ;;  %3905 = vmatpush.bf16.msra.mxu1 %v14240_v43  ;;  %v14796_v17 = vunpack.c.l.b16 %v1983_v30  ;;  %v10645_v27 = vor.u32 %v12514_v31, %v10644_v1  ;;  %v18680_v31 = vld [vmem:[#allocation51_spill] sm:$0xff] }
 0x394   : > { %18667 = vst [vmem:[#allocation65_spill] sm:$0xff] %v14775_v26  ;;  %v2397_v37 = vpack.c.bf16 %v2387_v11, %v2387_v11  ;;  %v18676_v11 = vld [vmem:[#allocation53_spill] sm:$0xff] }
 0x395   : > { %18668 = vst [vmem:[#allocation146_spill] sm:$0xff] %v14778_v32  ;;  %3942 = vmatpush.bf16.msra.mxu2 %v13843_v5 }
 0x396   : > { %v14809_v42 = vunpack.c.l.b16 %v2397_v37  ;;  %v1985_v37 = vpack.c.bf16 %v18680_v31, %v18680_v31 }
 0x397   : > { %v14786_v63 = vpop.f32.mrf.mxu0  ;;  %3906 = vmatpush.bf16.msra.mxu1 %v14184_v52 }
 0x398   : > { %18671 = vst [vmem:[#allocation47_spill] sm:$0xff] %v14786_v63 }
 0x399   : > { %3943 = vmatpush.bf16.msra.mxu2 %v13807_v23  ;;  %v2388_v26 = vpop.f32.mrf.mxu3  ;;  %18674 = vst [vmem:[#allocation148_spill] sm:$0xff] %v14809_v42 }
 0x39a   : > { %v2389_v49 = vadd.f32 %v2388_v26, %v14596_v58 }
 0x39b   : > { %v14801_v60 = vpop.f32.mrf.mxu2  ;;  %v14803_v62 = vpop.f32.mrf.mxu1  ;;  %3907 = vmatpush.bf16.msra.mxu1 %v14112_v56 }
 0x39c   : > { %18672 = vst [vmem:[#allocation48_spill] sm:$0xff] %v14801_v60  ;;  %v2398_v63 = vpack.c.bf16 %v2389_v49, %v2389_v49  ;;  %v10652_v49 = vld [vmem:[%s18494_s3 + $0xd0] sm:$0xf]  ;;  %v14841_v60 = vunpack.c.l.b16 %v1985_v37 }
 0x39d   : > { %18673 = vst [vmem:[#allocation147_spill] sm:$0xff] %v14803_v62  ;;  %3944 = vmatpush.bf16.msra.mxu2 %v13770_v20 }
 0x39e   : > { %v14811_v48 = vunpack.c.l.b16 %v2398_v63  ;;  %2553 = vmatmul.bf16.vlgmr.msra.gmra.mxu3 %v10645_v27  ;;  %3654 = vmatmul.bf16.gmra.mxu1 %v18676_v11  ;;  %v18681_v11 = vld [vmem:[#allocation52_spill] sm:$0xff] }
 0x39f   : > { %2786 = vmatpush.bf16.msra.mxu3 %v13725_v34  ;;  %v14816_v58 = vpop.f32.mrf.mxu0 }
 0x3a0   : > { %18675 = vst [vmem:[#allocation149_spill] sm:$0xff] %v14811_v48  ;;  %3691 = vmatmul.bf16.gmra.mxu2 %v14019_v18  ;;  %v1986_v18 = vpack.c.bf16 %v18681_v11, %v18681_v11 }
 0x3a1   : > { %18677 = vst [vmem:[#allocation53_spill] sm:$0xff] %v14816_v58  ;;  %v14820_v26 = vpop.f32.mrf.mxu3  ;;  %v18685_v58 = vld [vmem:[#allocation57_spill] sm:$0xff] }
 0x3a2   : > { %3894 = vmatmul.bf16.gmra.mxu0 %v18641_v38  ;;  %v14843_v42 = vunpack.c.l.b16 %v1986_v18 }
 0x3a3   : > { %v14822_v1 = vpop.f32.mrf.mxu2  ;;  %2787 = vmatpush.bf16.msra.mxu3 %v13742_v33  ;;  %v14826_v63 = vpop.f32.mrf.mxu1 }
 0x3a4   : > { %18678 = vst [vmem:[#allocation150_spill] sm:$0xff] %v14822_v1  ;;  %v12516_v1 = vld [vmem:[%s18494_s3 + $0xd4] sm:$0xf0] }
 0x3a5   : > { %18679 = vst [vmem:[#allocation151_spill] sm:$0xff] %v14826_v63  ;;  %v14849_v11 = vor.u32 %v12516_v1, %v10652_v49  ;;  %v18688_v1 = vld [vmem:[#allocation50_spill] sm:$0xff] }
 0x3a7   : > { %2788 = vmatpush.bf16.msra.mxu3 %v13752_v35  ;;  %v14833_v30 = vpop.f32.mrf.mxu0 }
 0x3a8   : > { %18682 = vst [vmem:[#allocation51_spill] sm:$0xff] %v14833_v30  ;;  %v18690_v30 = vld [vmem:[#allocation55_spill] sm:$0xff] }
 0x3a9   : > { %v14845_v31 = vpop.f32.mrf.mxu3 }
 0x3ab   : > { %v14847_v48 = vpop.f32.mrf.mxu2  ;;  %2789 = vmatpush.bf16.msra.mxu3 %v13758_v4  ;;  %v14852_v38 = vpop.f32.mrf.mxu1 }
 0x3ac   : > { %18683 = vst [vmem:[#allocation52_spill] sm:$0xff] %v14847_v48 }
 0x3ad   : > { %18684 = vst [vmem:[#allocation152_spill] sm:$0xff] %v14852_v38  ;;  %v1987_v38 = vpack.c.bf16 %v18690_v30, %v18690_v30 }
 0x3ae   : > { %2558 = vmatmul.bf16.gmra.mxu3 %v14849_v11  ;;  %3659 = vmatmul.bf16.gmra.mxu1 %v18685_v58  ;;  %v18691_v58 = vld [vmem:[#allocation56_spill] sm:$0xff] }
 0x3af   : > { %2790 = vmatpush.bf16.msra.mxu3 %v13620_v41  ;;  %v14860_v37 = vpop.f32.mrf.mxu0  ;;  %v1988_v63 = vpack.c.bf16 %v18691_v58, %v18691_v58 }
 0x3b0   : > { %3696 = vmatmul.bf16.gmra.mxu2 %v14099_v6  ;;  %18686 = vst [vmem:[#allocation57_spill] sm:$0xff] %v14860_v37  ;;  %v14883_v37 = vunpack.c.l.b16 %v1987_v38 }
 0x3b1   : > { %v14862_v18 = vpop.f32.mrf.mxu3 }
 0x3b2   : > { %4011 = vmatmul.bf16.vlgmr.msrb.gmra.mxu0 %v18688_v1  ;;  %v12518_v1 = vld [vmem:[%s18494_s3 + $0xe4] sm:$0xf0] }
 0x3b3   : > { %v14864_v49 = vpop.f32.mrf.mxu2  ;;  %2791 = vmatpush.bf16.msra.mxu3 %v13587_v12  ;;  %v14868_v48 = vpop.f32.mrf.mxu1 }
 0x3b4   : > { %18687 = vst [vmem:[#allocation153_spill] sm:$0xff] %v14864_v49  ;;  %v10660_v49 = vld [vmem:[%s18494_s3 + $0xe0] sm:$0xf] }
 0x3b5   : > { %18689 = vst [vmem:[#allocation50_spill] sm:$0xff] %v14868_v48  ;;  %v14885_v48 = vunpack.c.l.b16 %v1988_v63  ;;  %v14891_v58 = vor.u32 %v12518_v1, %v10660_v49 }
 0x3b7   : > { %2792 = vmatpush.bf16.msra.mxu3 %v13564_v0  ;;  %v14875_v6 = vpop.f32.mrf.mxu0 }
 0x3b8   : > { %18692 = vst [vmem:[#allocation55_spill] sm:$0xff] %v14875_v6 }
 0x3b9   : > { %v14887_v30 = vpop.f32.mrf.mxu3 }
 0x3bb   : > { %v14889_v62 = vpop.f32.mrf.mxu2  ;;  %2793 = vmatpush.bf16.msra.mxu3 %v13538_v46  ;;  %v3113_v6 = vpop.f32.mrf.mxu1 }
 0x3bc   : > { %18693 = vst [vmem:[#allocation56_spill] sm:$0xff] %v14889_v62  ;;  %v3114_v21 = vadd.f32 %v3113_v6, %v14464_v47  ;;  %v18696_v62 = vld [vmem:[#allocation54_spill] sm:$0xff]  ;;  %v18698_v6 = vld [vmem:[#allocation60_spill] sm:$0xff] }
 0x3be   : > { %2563 = vmatmul.bf16.gmra.mxu3 %v14891_v58  ;;  %3776 = vmatmul.bf16.vlgmr.msrb.gmra.mxu1 %v14600_v8  ;;  %v3133_v49 = vpack.c.bf16 %v3114_v21, %v3114_v21  ;;  %v18697_v8 = vld [vmem:[#allocation59_spill] sm:$0xff] }
 0x3bf   : > { %v14899_v38 = vpop.f32.mrf.mxu0  ;;  %4032 = vmatpush.bf16.msrb.mxu1 %v14500_v53 }
 0x3c0   : > { %3813 = vmatmul.bf16.vlgmr.msrb.gmra.mxu2 %v10645_v27  ;;  %18694 = vst [vmem:[#allocation154_spill] sm:$0xff] %v14899_v38  ;;  %v1989_v27 = vpack.c.bf16 %v18697_v8, %v18697_v8  ;;  %v14915_v38 = vunpack.c.l.b16 %v3133_v49 }
 0x3c1   : > { %4069 = vmatpush.bf16.msrb.mxu2 %v14036_v15  ;;  %v14903_v63 = vpop.f32.mrf.mxu3  ;;  %v1990_v15 = vpack.c.bf16 %v18698_v6, %v18698_v6 }
 0x3c2   : > { %4016 = vmatmul.bf16.gmra.mxu0 %v18696_v62  ;;  %18699 = vst [vmem:[#allocation54_spill] sm:$0xff] %v14915_v38  ;;  %v10668_v62 = vld [vmem:[%s18494_s3 + $0xf0] sm:$0xf] }
 0x3c3   : > { %v14905_v1 = vpop.f32.mrf.mxu2  ;;  %v3115_v32 = vpop.f32.mrf.mxu1  ;;  %4033 = vmatpush.bf16.msrb.mxu1 %v14507_v61  ;;  %v14931_v49 = vunpack.c.l.b16 %v1990_v15 }
 0x3c4   : > { %18695 = vst [vmem:[#allocation155_spill] sm:$0xff] %v14905_v1  ;;  %v3116_v47 = vadd.f32 %v3115_v32, %v14478_v54  ;;  %v14929_v32 = vunpack.c.l.b16 %v1989_v27 }
 0x3c5   : > { %4070 = vmatpush.bf16.msrb.mxu2 %v14051_v40  ;;  %v12520_v40 = vld [vmem:[%s18494_s3 + $0xf4] sm:$0xf0] }
 0x3c6   : > { %v3134_v21 = vpack.c.bf16 %v3116_v47, %v3116_v47  ;;  %v10669_v1 = vor.u32 %v12520_v40, %v10668_v62  ;;  %v18705_v62 = vld [vmem:[#allocation58_spill] sm:$0xff]  ;;  %v18707_v40 = vld [vmem:[#allocation64_spill] sm:$0xff] }
 0x3c7   : > { %v14917_v10 = vpop.f32.mrf.mxu0  ;;  %4034 = vmatpush.bf16.msrb.mxu1 %v14522_v13  ;;  %v1992_v8 = vpack.c.bf16 %v18707_v40, %v18707_v40 }
 0x3c8   : > { %18700 = vst [vmem:[#allocation59_spill] sm:$0xff] %v14917_v10  ;;  %v14926_v54 = vunpack.c.l.b16 %v3134_v21 }
 0x3c9   : > { %4071 = vmatpush.bf16.msrb.mxu2 %v14061_v39  ;;  %v14933_v47 = vpop.f32.mrf.mxu3 }
 0x3ca   : > { %18701 = vst [vmem:[#allocation60_spill] sm:$0xff] %v14926_v54 }
 0x3cb   : > { %v14937_v6 = vpop.f32.mrf.mxu2  ;;  %v14939_v10 = vpop.f32.mrf.mxu1  ;;  %4035 = vmatpush.bf16.msrb.mxu1 %v14533_v55 }
 0x3cc   : > { %18702 = vst [vmem:[#allocation156_spill] sm:$0xff] %v14937_v6 }
 0x3cd   : > { %4072 = vmatpush.bf16.msrb.mxu2 %v14085_v59 }
 0x3ce   : > { %2568 = vmatmul.bf16.gmra.mxu3 %v10669_v1  ;;  %3781 = vmatmul.bf16.gmra.mxu1 %v14642_v28  ;;  %v18706_v28 = vld [vmem:[#allocation63_spill] sm:$0xff] }
 0x3cf   : > { %v14947_v27 = vpop.f32.mrf.mxu0  ;;  %4036 = vmatpush.bf16.msrb.mxu1 %v14299_v51 }
 0x3d0   : > { %3818 = vmatmul.bf16.gmra.mxu2 %v14849_v11  ;;  %18703 = vst [vmem:[#allocation157_spill] sm:$0xff] %v14947_v27  ;;  %v1991_v11 = vpack.c.bf16 %v18706_v28, %v18706_v28  ;;  %v14976_v28 = vunpack.c.l.b16 %v1992_v8  ;;  %v18838_v27 = vld [vmem:[#allocation27_spill] sm:$0xff] }
 0x3d1   : > { %4073 = vmatpush.bf16.msrb.mxu2 %v13882_v2  ;;  %v14951_v15 = vpop.f32.mrf.mxu3  ;;  %v12513_v2 = vld [vmem:[%s18494_s3 + $0xc4] sm:$0xf] }
 0x3d2   : > { %4021 = vmatmul.bf16.gmra.mxu0 %v18705_v62  ;;  %v10646_v62 = vld [vmem:[%s18494_s3 + $0xc8] sm:$0xf0] }
 0x3d3   : > { %v14953_v21 = vpop.f32.mrf.mxu2  ;;  %v14956_v59 = vpop.f32.mrf.mxu1  ;;  %4037 = vmatpush.bf16.msrb.mxu1 %v14240_v43  ;;  %v14982_v6 = vor.u32 %v12513_v2, %v10646_v62  ;;  %v18713_v62 = vld [vmem:[#allocation62_spill] sm:$0xff] }
 0x3d4   : > { %18704 = vst [vmem:[#allocation158_spill] sm:$0xff] %v14953_v21 }
 0x3d5   : > { %4074 = vmatpush.bf16.msrb.mxu2 %v13843_v5  ;;  %v14974_v5 = vunpack.c.l.b16 %v1991_v11  ;;  %18710 = vst [vmem:[#allocation64_spill] sm:$0xff] %v14982_v6 }
 0x3d7   : > { %v14964_v39 = vpop.f32.mrf.mxu0  ;;  %4038 = vmatpush.bf16.msrb.mxu1 %v14184_v52 }
 0x3d8   : > { %18708 = vst [vmem:[#allocation58_spill] sm:$0xff] %v14964_v39 }
 0x3d9   : > { %4075 = vmatpush.bf16.msrb.mxu2 %v13807_v23  ;;  %v14978_v21 = vpop.f32.mrf.mxu3 }
 0x3db   : > { %v14980_v40 = vpop.f32.mrf.mxu2  ;;  %v14984_v38 = vpop.f32.mrf.mxu1  ;;  %4039 = vmatpush.bf16.msrb.mxu1 %v14112_v56 }
 0x3dc   : > { %18709 = vst [vmem:[#allocation63_spill] sm:$0xff] %v14980_v40 }
 0x3dd   : > { %4076 = vmatpush.bf16.msrb.mxu2 %v13770_v20 }
 0x3de   : > { %2582 = vmatmul.bf16.vlgmr.msrb.gmra.mxu3 %v14982_v6  ;;  %3786 = vmatmul.bf16.gmra.mxu1 %v14694_v29 }
 0x3df   : > { %2998 = vmatpush.bf16.msrb.mxu3 %v13725_v34  ;;  %v14994_v23 = vpop.f32.mrf.mxu0  ;;  %v12515_v34 = vld [vmem:[%s18494_s3 + $0xd4] sm:$0xf] }
 0x3e0   : > { %3823 = vmatmul.bf16.gmra.mxu2 %v14891_v58  ;;  %18711 = vst [vmem:[#allocation159_spill] sm:$0xff] %v14994_v23  ;;  %v18822_v23 = vld [vmem:[#allocation98_spill] sm:$0xff] }
 0x3e1   : > { %v2477_v8 = vpop.f32.mrf.mxu3 }
 0x3e2   : > { %v2478_v11 = vadd.f32 %v2477_v8, %v14820_v26  ;;  %4026 = vmatmul.bf16.gmra.mxu0 %v18713_v62  ;;  %v10654_v26 = vld [vmem:[%s18494_s3 + $0xd8] sm:$0xf0] }
 0x3e3   : > { %v14997_v2 = vpop.f32.mrf.mxu2  ;;  %2999 = vmatpush.bf16.msrb.mxu3 %v13742_v33  ;;  %v15001_v20 = vpop.f32.mrf.mxu1  ;;  %v15015_v33 = vor.u32 %v12515_v34, %v10654_v26 }
 0x3e4   : > { %18712 = vst [vmem:[#allocation160_spill] sm:$0xff] %v14997_v2  ;;  %v2497_v8 = vpack.c.bf16 %v2478_v11, %v2478_v11 }
 0x3e5   : > { %18716 = vst [vmem:[#allocation162_spill] sm:$0xff] %v15015_v33 }
 0x3e6   : > { %v15020_v40 = vunpack.c.l.b16 %v2497_v8  ;;  %v10662_v8 = vld [vmem:[%s18494_s3 + $0xe8] sm:$0xf0] }
 0x3e7   : > { %3000 = vmatpush.bf16.msrb.mxu3 %v13752_v35  ;;  %v15004_v29 = vpop.f32.mrf.mxu0 }
 0x3e8   : > { %18714 = vst [vmem:[#allocation62_spill] sm:$0xff] %v15004_v29 }
 0x3e9   : > { %v2479_v58 = vpop.f32.mrf.mxu3 }
 0x3ea   : > { %v2480_v62 = vadd.f32 %v2479_v58, %v14845_v31  ;;  %v18719_v58 = vld [vmem:[#allocation66_spill] sm:$0xff] }
 0x3eb   : > { %v15013_v54 = vpop.f32.mrf.mxu2  ;;  %3001 = vmatpush.bf16.msrb.mxu3 %v13758_v4  ;;  %v15018_v35 = vpop.f32.mrf.mxu1 }
 0x3ec   : > { %18715 = vst [vmem:[#allocation161_spill] sm:$0xff] %v15013_v54  ;;  %v2498_v2 = vpack.c.bf16 %v2480_v62, %v2480_v62 }
 0x3ee   : > { %v15022_v6 = vunpack.c.l.b16 %v2498_v2  ;;  %2587 = vmatmul.bf16.gmra.mxu3 %v15015_v33  ;;  %3791 = vmatmul.bf16.gmra.mxu1 %v14751_v3  ;;  %v1995_v3 = vpack.c.bf16 %v14057_v9, %v14057_v9  ;;  %v12567_v9 = vld [vmem:[%s18721_s0 + $0x30] sm:$0xff] }
 0x3ef   : > { %3002 = vmatpush.bf16.msrb.mxu3 %v13620_v41  ;;  %v15027_v31 = vpop.f32.mrf.mxu0  ;;  %v12568_v41 = vld [vmem:[%s18720_s4 + $0x38] sm:$0xff] }
 0x3f0   : > { %3828 = vmatmul.bf16.gmra.mxu2 %v10669_v1  ;;  %18717 = vst [vmem:[#allocation163_spill] sm:$0xff] %v15027_v31  ;;  %v1996_v1 = vpack.c.bf16 %v14097_v44, %v14097_v44  ;;  %5165 = vmatpush.bf16.msrb.mxu0 %v12568_v41  ;;  %v15057_v62 = vunpack.c.l.b16 %v1995_v3  ;;  %v12566_v3 = vld [vmem:[%s18721_s0 + $0x28] sm:$0xff]  ;;  %v18793_v33 = vld [vmem:[#allocation138_spill] sm:$0xff] }
 0x3f1   : > { %v2482_v4 = vpop.f32.mrf.mxu3 }
 0x3f2   : > { %v2483_v34 = vadd.f32 %v2482_v4, %v14862_v18  ;;  %4143 = vmatmul.bf16.vlgmr.msra.gmra.mxu0 %v18719_v58  ;;  %18723 = vst [vmem:[#allocation165_spill] sm:$0xff] %v15057_v62  ;;  %v15059_v44 = vunpack.c.l.b16 %v1996_v1  ;;  %v12519_v1 = vld [vmem:[%s18494_s3 + $0xf4] sm:$0xf] }
 0x3f3   : > { %v15032_v26 = vpop.f32.mrf.mxu2  ;;  %3003 = vmatpush.bf16.msrb.mxu3 %v13587_v12  ;;  %v15036_v2 = vpop.f32.mrf.mxu1  ;;  %v12517_v12 = vld [vmem:[%s18494_s3 + $0xe4] sm:$0xf] }
 0x3f4   : > { %18718 = vst [vmem:[#allocation164_spill] sm:$0xff] %v15032_v26  ;;  %5166 = vmatpush.bf16.msrb.mxu0 %v12567_v9  ;;  %v15064_v11 = vor.u32 %v12517_v12, %v10662_v8  ;;  %v12565_v12 = vld [vmem:[%s18721_s0 + $0x20] sm:$0xff]  ;;  %v18728_v8 = vld [vmem:[#allocation69_spill] sm:$0xff] }
 0x3f5   : > { %18724 = vst [vmem:[#allocation166_spill] sm:$0xff] %v15059_v44  ;;  %v18729_v9 = vpack.c.b16 %v14038_v50, %v18728_v8  ;;  %v12564_v50 = vld [vmem:[%s18721_s0 + $0x18] sm:$0xff]  ;;  %v18732_v8 = vpack.c.b16 %v14976_v28, %v14974_v5  ;;  %v12563_v28 = vld [vmem:[%s18721_s0 + $0x10] sm:$0xff] }
 0x3f6   : > { %18726 = vst [vmem:[#allocation168_spill] sm:$0xff] %v15064_v11  ;;  %v10670_v5 = vld [vmem:[%s18494_s3 + $0xf8] sm:$0xf0] }
 0x3f7   : > { %3004 = vmatpush.bf16.msrb.mxu3 %v13564_v0  ;;  %v15046_v18 = vpop.f32.mrf.mxu0  ;;  %v2499_v0 = vpack.c.bf16 %v2483_v34, %v2483_v34  ;;  %v15131_v44 = vor.u32 %v12519_v1, %v10670_v5  ;;  %v18743_v5 = vld [vmem:[#allocation72_spill] sm:$0xff] }
 0x3f8   : > { %18722 = vst [vmem:[#allocation66_spill] sm:$0xff] %v15046_v18  ;;  %5167 = vmatpush.bf16.msrb.mxu0 %v12566_v3  ;;  %v18859_v18 = vld [vmem:[#allocation147_spill] sm:$0xff] }
 0x3f9   : > { %v2484_v4 = vpop.f32.mrf.mxu3  ;;  %v15074_v34 = vunpack.c.l.b16 %v2499_v0  ;;  %18740 = vst [vmem:[#allocation171_spill] sm:$0xff] %v15131_v44 }
 0x3fa   : > { %v2485_v58 = vadd.f32 %v2484_v4, %v14887_v30 }
 0x3fb   : > { %v15062_v41 = vpop.f32.mrf.mxu2  ;;  %3005 = vmatpush.bf16.msrb.mxu3 %v13538_v46  ;;  %v15067_v26 = vpop.f32.mrf.mxu1 }
 0x3fc   : > { %18725 = vst [vmem:[#allocation167_spill] sm:$0xff] %v15062_v41  ;;  %v2500_v54 = vpack.c.bf16 %v2485_v58, %v2485_v58  ;;  %5168 = vmatpush.bf16.msrb.mxu0 %v12565_v12  ;;  %v18731_v58 = vld [vmem:[#allocation71_spill] sm:$0xff] }
 0x3fe   : > { %v15076_v30 = vunpack.c.l.b16 %v2500_v54  ;;  %2592 = vmatmul.bf16.gmra.mxu3 %v15064_v11  ;;  %3908 = vmatmul.bf16.vlgmr.msra.gmra.mxu1 %v14023_v16  ;;  %v18790_v11 = vld [vmem:[#allocation85_spill] sm:$0xff] }
 0x3ff   : > { %v15081_v46 = vpop.f32.mrf.mxu0  ;;  %4164 = vmatpush.bf16.msra.mxu1 %v14500_v53 }
 0x400   : > { %3945 = vmatmul.bf16.vlgmr.msra.gmra.mxu2 %v14028_v22  ;;  %18727 = vst [vmem:[#allocation169_spill] sm:$0xff] %v15081_v46  ;;  %5169 = vmatpush.bf16.msrb.mxu0 %v12564_v50  ;;  %v18835_v46 = vld [vmem:[#allocation105_spill] sm:$0xff] }
 0x401   : > { %4513 = vmatpush.bf16.msra.mxu2 %v18729_v9  ;;  %v2487_v4 = vpop.f32.mrf.mxu3  ;;  %v18733_v9 = vld [vmem:[#allocation78_spill] sm:$0xff] }
 0x402   : > { %v2488_v0 = vadd.f32 %v2487_v4, %v14903_v63  ;;  %4148 = vmatmul.bf16.gmra.mxu0 %v18731_v58  ;;  %v1997_v12 = vpack.c.bf16 %v18733_v9, %v18733_v9  ;;  %v18734_v63 = vld [vmem:[#allocation80_spill] sm:$0xff] }
 0x403   : > { %v15093_v22 = vpop.f32.mrf.mxu2  ;;  %v15096_v3 = vpop.f32.mrf.mxu1  ;;  %4165 = vmatpush.bf16.msra.mxu1 %v14507_v61  ;;  %v1998_v4 = vpack.c.bf16 %v18734_v63, %v18734_v63 }
 0x404   : > { %18730 = vst [vmem:[#allocation69_spill] sm:$0xff] %v15093_v22  ;;  %v15124_v50 = vunpack.c.l.b16 %v1997_v12  ;;  %5170 = vmatpush.bf16.msrb.mxu0 %v12563_v28  ;;  %v2501_v54 = vpack.c.bf16 %v2488_v0, %v2488_v0  ;;  %v18741_v12 = vpack.c.b16 %v14885_v48, %v14883_v37  ;;  %v2695_v28 = vadd.f32 %v14559_v36, %v18743_v5  ;;  %v18745_v48 = vld [vmem:[#allocation75_spill] sm:$0xff] }
 0x405   : > { %4514 = vmatpush.bf16.msra.mxu2 %v18732_v8  ;;  %v18736_v8 = vpack.c.b16 %v14931_v49, %v14929_v32  ;;  %v15126_v9 = vunpack.c.l.b16 %v1998_v4  ;;  %v12562_v32 = vld [vmem:[%s18721_s0 + $0x8] sm:$0xff]  ;;  %v18742_v4 = vld [vmem:[#allocation74_spill] sm:$0xff] }
 0x406   : > { %18737 = vst [vmem:[#allocation78_spill] sm:$0xff] %v15124_v50  ;;  %v15144_v0 = vunpack.c.l.b16 %v2501_v54  ;;  %v12561_v54 = vld [vmem:[%s18721_s0] sm:$0xff]  ;;  %v2711_v5 = vpack.c.bf16 %v2695_v28, %v2695_v28 }
 0x407   : > { %v15109_v58 = vpop.f32.mrf.mxu0  ;;  %4166 = vmatpush.bf16.msra.mxu1 %v14522_v13  ;;  %18738 = vst [vmem:[#allocation80_spill] sm:$0xff] %v15126_v9 }
 0x408   : > { %18735 = vst [vmem:[#allocation71_spill] sm:$0xff] %v15109_v58  ;;  %5171 = vmatpush.bf16.msrb.mxu0 %v12562_v32  ;;  %v18828_v58 = vld [vmem:[#allocation110_spill] sm:$0xff] }
 0x409   : > { %4515 = vmatpush.bf16.msra.mxu2 %v18736_v8  ;;  %v2489_v63 = vpop.f32.mrf.mxu3 }
 0x40a   : > { %v2490_v41 = vadd.f32 %v2489_v63, %v14933_v47  ;;  %v18747_v63 = vpack.c.b16 %v14843_v42, %v14841_v60  ;;  %v18750_v60 = vpack.c.b16 %v14798_v19, %v14796_v17  ;;  %v18751_v42 = vld [vmem:[#allocation86_spill] sm:$0xff]  ;;  %v10710_v17 = vld [vmem:[%s18494_s3 + $0x148] sm:$0xf0]  ;;  %v18754_v19 = vpack.c.b16 %v14744_v25, %v14742_v14 }
 0x40b   : > { %v15129_v62 = vpop.f32.mrf.mxu2  ;;  %v15133_v22 = vpop.f32.mrf.mxu1  ;;  %4167 = vmatpush.bf16.msra.mxu1 %v14533_v55 }
 0x40c   : > { %18739 = vst [vmem:[#allocation170_spill] sm:$0xff] %v15129_v62  ;;  %v2502_v49 = vpack.c.bf16 %v2490_v41, %v2490_v41  ;;  %v18744_v41 = vld [vmem:[#allocation73_spill] sm:$0xff]  ;;  %5172 = vmatpush.bf16.msrb.mxu0 %v12561_v54 }
 0x40d   : > { %4516 = vmatpush.bf16.msra.mxu2 %v18741_v12  ;;  %v2697_v8 = vadd.f32 %v14576_v57, %v18744_v41  ;;  %v18749_v12 = vld [vmem:[#allocation76_spill] sm:$0xff]  ;;  %v18752_v54 = vld [vmem:[#allocation89_spill] sm:$0xff] }
 0x40e   : > { %v15146_v1 = vunpack.c.l.b16 %v2502_v49  ;;  %2597 = vmatmul.bf16.gmra.mxu3 %v15131_v44  ;;  %3913 = vmatmul.bf16.gmra.mxu1 %v18742_v4 }
 0x40f   : > { %v15155_v37 = vpop.f32.mrf.mxu0  ;;  %4168 = vmatpush.bf16.msra.mxu1 %v14299_v51  ;;  %v2712_v41 = vpack.c.bf16 %v2697_v8, %v2697_v8  ;;  %v12529_v8 = vld [vmem:[%s18494_s3 + $0x144] sm:$0xf] }
 0x410   : > { %3950 = vmatmul.bf16.gmra.mxu2 %v18745_v48  ;;  %18746 = vst [vmem:[#allocation72_spill] sm:$0xff] %v15155_v37  ;;  %v15203_v36 = vor.u32 %v12529_v8, %v10710_v17  ;;  %v18762_v8 = vld [vmem:[#allocation82_spill] sm:$0xff]  ;;  %v18763_v17 = vld [vmem:[#allocation77_spill] sm:$0xff]  ;;  %v18803_v37 = vld [vmem:[#allocation24_spill] sm:$0xff] }
 0x411   : > { %4517 = vmatpush.bf16.msra.mxu2 %v18747_v63  ;;  %v2492_v32 = vpop.f32.mrf.mxu3  ;;  %v1999_v63 = vpack.c.bf16 %v18751_v42, %v18751_v42  ;;  %v15182_v47 = vunpack.c.l.b16 %v2712_v41 }
 0x412   : > { %v2493_v57 = vadd.f32 %v2492_v32, %v14951_v15  ;;  %4153 = vmatmul.bf16.gmra.mxu0 %v18749_v12  ;;  %v2000_v15 = vpack.c.bf16 %v18752_v54, %v18752_v54  ;;  %v15180_v32 = vunpack.c.l.b16 %v2711_v5  ;;  %18758 = vst [vmem:[#allocation172_spill] sm:$0xff] %v15203_v36 }
 0x413   : > { %v15167_v49 = vpop.f32.mrf.mxu2  ;;  %v15170_v48 = vpop.f32.mrf.mxu1  ;;  %4169 = vmatpush.bf16.msra.mxu1 %v14240_v43  ;;  %v15196_v12 = vunpack.c.l.b16 %v1999_v63  ;;  %v18759_v63 = vpack.c.b16 %v14689_v24, %v14687_v7  ;;  %v18767_v24 = vld [vmem:[#allocation37_spill] sm:$0xff] }
 0x414   : > { %18748 = vst [vmem:[#allocation73_spill] sm:$0xff] %v15167_v49  ;;  %v15198_v5 = vunpack.c.l.b16 %v2000_v15  ;;  %v18772_v49 = vld [vmem:[#allocation84_spill] sm:$0xff] }
 0x415   : > { %4518 = vmatpush.bf16.msra.mxu2 %v18750_v60  ;;  %18755 = vst [vmem:[#allocation76_spill] sm:$0xff] %v15196_v12  ;;  %v2503_v60 = vpack.c.bf16 %v2493_v57, %v2493_v57 }
 0x416   : > { %18756 = vst [vmem:[#allocation86_spill] sm:$0xff] %v15198_v5 }
 0x417   : > { %v15184_v28 = vpop.f32.mrf.mxu0  ;;  %4170 = vmatpush.bf16.msra.mxu1 %v14184_v52 }
 0x418   : > { %18753 = vst [vmem:[#allocation75_spill] sm:$0xff] %v15184_v28 }
 0x419   : > { %4519 = vmatpush.bf16.msra.mxu2 %v18754_v19  ;;  %v2494_v41 = vpop.f32.mrf.mxu3  ;;  %v2700_v19 = vadd.f32 %v14604_v45, %v18763_v17 }
 0x41a   : > { %v2495_v42 = vadd.f32 %v2494_v41, %v14978_v21  ;;  %v15215_v21 = vunpack.c.l.b16 %v2503_v60  ;;  %v18764_v41 = vld [vmem:[#allocation79_spill] sm:$0xff] }
 0x41b   : > { %v15201_v54 = vpop.f32.mrf.mxu2  ;;  %v15205_v50 = vpop.f32.mrf.mxu1  ;;  %4171 = vmatpush.bf16.msra.mxu1 %v14112_v56  ;;  %v2713_v45 = vpack.c.bf16 %v2700_v19, %v2700_v19 }
 0x41c   : > { %18757 = vst [vmem:[#allocation89_spill] sm:$0xff] %v15201_v54  ;;  %v2504_v25 = vpack.c.bf16 %v2495_v42, %v2495_v42  ;;  %v18765_v42 = vld [vmem:[#allocation129_spill] sm:$0xff]  ;;  %v18766_v54 = vld [vmem:[#allocation38_spill] sm:$0xff] }
 0x41d   : > { %4520 = vmatpush.bf16.msra.mxu2 %v18759_v63  ;;  %18760 = vst [vmem:[#allocation173_spill] sm:$0xff] %v15215_v21  ;;  %v2702_v14 = vadd.f32 %v18765_v42, %v18764_v41  ;;  %v18768_v7 = vpack.c.b16 %v18766_v54, %v18767_v24  ;;  %v18769_v63 = vld [vmem:[#allocation83_spill] sm:$0xff]  ;;  %v18774_v42 = vld [vmem:[#allocation34_spill] sm:$0xff]  ;;  %v15247_v5 = vunpack.c.l.b16 %v2713_v45 }
 0x41e   : > { %v15217_v15 = vunpack.c.l.b16 %v2504_v25  ;;  %2794 = vmatmul.bf16.vlgmr.msra.gmra.mxu3 %v15203_v36  ;;  %3918 = vmatmul.bf16.gmra.mxu1 %v18762_v8  ;;  %v18773_v41 = vld [vmem:[#allocation35_spill] sm:$0xff]  ;;  %v18776_v24 = vld [vmem:[#allocation94_spill] sm:$0xff] }
 0x41f   : > { %3482 = vmatpush.bf16.msra.mxu3 %v18768_v7  ;;  %v15229_v60 = vpop.f32.mrf.mxu0  ;;  %v2714_v17 = vpack.c.bf16 %v2702_v14, %v2702_v14  ;;  %v18775_v12 = vpack.c.b16 %v18773_v41, %v18774_v42  ;;  %v2001_v7 = vpack.c.bf16 %v18776_v24, %v18776_v24  ;;  %v10718_v41 = vld [vmem:[%s18494_s3 + $0x158] sm:$0xf0]  ;;  %v18839_v21 = vld [vmem:[#allocation146_spill] sm:$0xff] }
 0x420   : > { %18761 = vst [vmem:[#allocation174_spill] sm:$0xff] %v15217_v15  ;;  %3955 = vmatmul.bf16.gmra.mxu2 %v18769_v63  ;;  %v18777_v63 = vld [vmem:[#allocation96_spill] sm:$0xff]  ;;  %v2909_v15 = vadd.f32 %v18839_v21, %v18838_v27 }
 0x421   : > { %18770 = vst [vmem:[#allocation77_spill] sm:$0xff] %v15229_v60  ;;  %v15233_v57 = vpop.f32.mrf.mxu3  ;;  %v2002_v25 = vpack.c.bf16 %v18777_v63, %v18777_v63  ;;  %v15249_v62 = vunpack.c.l.b16 %v2714_v17  ;;  %v15262_v42 = vunpack.c.l.b16 %v2001_v7  ;;  %v18786_v63 = vld [vmem:[#allocation29_spill] sm:$0xff]  ;;  %v18797_v60 = vld [vmem:[#allocation91_spill] sm:$0xff]  ;;  %v18848_v27 = vld [vmem:[#allocation16_spill] sm:$0xff] }
 0x422   : > { %4158 = vmatmul.bf16.gmra.mxu0 %v18772_v49  ;;  %v18779_v49 = vld [vmem:[#allocation31_spill] sm:$0xff]  ;;  %v2008_v21 = vpack.c.bf16 %v18848_v27, %v18848_v27  ;;  %v18863_v27 = vld [vmem:[#allocation136_spill] sm:$0xff] }
 0x423   : > { %v15235_v9 = vpop.f32.mrf.mxu2  ;;  %3483 = vmatpush.bf16.msra.mxu3 %v18775_v12  ;;  %v15241_v54 = vpop.f32.mrf.mxu1  ;;  %v12531_v12 = vld [vmem:[%s18494_s3 + $0x154] sm:$0xf]  ;;  %18782 = vst [vmem:[#allocation38_spill] sm:$0xff] %v15262_v42  ;;  %v15264_v45 = vunpack.c.l.b16 %v2002_v25  ;;  %v18800_v42 = vld [vmem:[#allocation93_spill] sm:$0xff] }
 0x424   : > { %18771 = vst [vmem:[#allocation79_spill] sm:$0xff] %v15235_v9  ;;  %v18778_v9 = vld [vmem:[#allocation32_spill] sm:$0xff]  ;;  %v18789_v25 = vld [vmem:[#allocation90_spill] sm:$0xff] }
 0x425   : > { %v18780_v19 = vpack.c.b16 %v18778_v9, %v18779_v49  ;;  %18783 = vst [vmem:[#allocation37_spill] sm:$0xff] %v15264_v45  ;;  %v15270_v9 = vor.u32 %v12531_v12, %v10718_v41  ;;  %v18787_v49 = vld [vmem:[#allocation28_spill] sm:$0xff]  ;;  %v18792_v41 = vld [vmem:[#allocation87_spill] sm:$0xff] }
 0x426   : > { %v18801_v45 = vld [vmem:[#allocation92_spill] sm:$0xff] }
 0x427   : > { %3484 = vmatpush.bf16.msra.mxu3 %v18780_v19  ;;  %v15254_v14 = vpop.f32.mrf.mxu0  ;;  %18785 = vst [vmem:[#allocation84_spill] sm:$0xff] %v15270_v9  ;;  %v18788_v19 = vpack.c.b16 %v18786_v63, %v18787_v49  ;;  %v18794_v63 = vld [vmem:[#allocation26_spill] sm:$0xff]  ;;  %v18795_v49 = vld [vmem:[#allocation25_spill] sm:$0xff] }
 0x428   : > { %18781 = vst [vmem:[#allocation129_spill] sm:$0xff] %v15254_v14  ;;  %v2707_v14 = vadd.f32 %v18793_v33, %v18792_v41  ;;  %v18804_v33 = vld [vmem:[#allocation23_spill] sm:$0xff] }
 0x429   : > { %v15266_v17 = vpop.f32.mrf.mxu3  ;;  %v18805_v41 = vpack.c.b16 %v18803_v37, %v18804_v33  ;;  %v12533_v37 = vld [vmem:[%s18494_s3 + $0x164] sm:$0xf] }
 0x42b   : > { %v15268_v24 = vpop.f32.mrf.mxu2  ;;  %3485 = vmatpush.bf16.msra.mxu3 %v18788_v19  ;;  %v15275_v36 = vpop.f32.mrf.mxu1  ;;  %v18796_v19 = vpack.c.b16 %v18794_v63, %v18795_v49  ;;  %v18806_v49 = vld [vmem:[#allocation102_spill] sm:$0xff] }
 0x42c   : > { %18784 = vst [vmem:[#allocation83_spill] sm:$0xff] %v15268_v24  ;;  %v18791_v24 = vld [vmem:[#allocation133_spill] sm:$0xff] }
 0x42d   : > { %v2705_v12 = vadd.f32 %v18791_v24, %v18790_v11  ;;  %v2716_v24 = vpack.c.bf16 %v2707_v14, %v2707_v14 }
 0x42e   : > { %2799 = vmatmul.bf16.gmra.mxu3 %v15270_v9  ;;  %3923 = vmatmul.bf16.gmra.mxu1 %v18789_v25  ;;  %v18802_v9 = vpack.c.b16 %v18800_v42, %v18801_v45  ;;  %v18810_v42 = vld [vmem:[#allocation22_spill] sm:$0xff]  ;;  %v18811_v45 = vld [vmem:[#allocation21_spill] sm:$0xff] }
 0x42f   : > { %3486 = vmatpush.bf16.msra.mxu3 %v18796_v19  ;;  %v15291_v44 = vpop.f32.mrf.mxu0  ;;  %v2715_v11 = vpack.c.bf16 %v2705_v12, %v2705_v12  ;;  %v18807_v19 = vld [vmem:[#allocation103_spill] sm:$0xff]  ;;  %v10726_v12 = vld [vmem:[%s18494_s3 + $0x168] sm:$0xf0] }
 0x430   : > { %3960 = vmatmul.bf16.gmra.mxu2 %v18797_v60  ;;  %18798 = vst [vmem:[#allocation35_spill] sm:$0xff] %v15291_v44  ;;  %v2003_v60 = vpack.c.bf16 %v18806_v49, %v18806_v49  ;;  %v2004_v44 = vpack.c.bf16 %v18807_v19, %v18807_v19  ;;  %v15332_v49 = vor.u32 %v12533_v37, %v10726_v12  ;;  %v18818_v19 = vld [vmem:[#allocation20_spill] sm:$0xff] }
 0x431   : > { %v15293_v28 = vpop.f32.mrf.mxu3  ;;  %v15309_v29 = vunpack.c.l.b16 %v2715_v11 }
 0x432   : > { %5173 = vmatmul.bf16.vlgmr.msrb.gmra.mxu0 %v18802_v9  ;;  %v18812_v9 = vpack.c.b16 %v18810_v42, %v18811_v45  ;;  %v15324_v33 = vunpack.c.l.b16 %v2003_v60  ;;  %v15326_v11 = vunpack.c.l.b16 %v2004_v44  ;;  %18817 = vst [vmem:[#allocation85_spill] sm:$0xff] %v15332_v49  ;;  %v18819_v42 = vld [vmem:[#allocation19_spill] sm:$0xff]  ;;  %v18821_v44 = vld [vmem:[#allocation97_spill] sm:$0xff]  ;;  %v2005_v60 = vpack.c.bf16 %v18828_v58, %v18828_v58 }
 0x433   : > { %v15295_v7 = vpop.f32.mrf.mxu2  ;;  %3487 = vmatpush.bf16.msra.mxu3 %v18805_v41  ;;  %v15303_v63 = vpop.f32.mrf.mxu1  ;;  %18808 = vst [vmem:[#allocation94_spill] sm:$0xff] %v15309_v29  ;;  %v18820_v45 = vpack.c.b16 %v18818_v19, %v18819_v42  ;;  %v18825_v42 = vld [vmem:[#allocation100_spill] sm:$0xff]  ;;  %v18843_v29 = vld [vmem:[#allocation107_spill] sm:$0xff] }
 0x434   : > { %18799 = vst [vmem:[#allocation34_spill] sm:$0xff] %v15295_v7  ;;  %v15311_v7 = vunpack.c.l.b16 %v2716_v24 }
 0x435   : > { %18814 = vst [vmem:[#allocation31_spill] sm:$0xff] %v15324_v33 }
 0x436   : > { %18809 = vst [vmem:[#allocation96_spill] sm:$0xff] %v15311_v7 }
 0x437   : > { %3488 = vmatpush.bf16.msra.mxu3 %v18812_v9  ;;  %v15316_v14 = vpop.f32.mrf.mxu0  ;;  %18815 = vst [vmem:[#allocation29_spill] sm:$0xff] %v15326_v11 }
 0x438   : > { %18813 = vst [vmem:[#allocation32_spill] sm:$0xff] %v15316_v14 }
 0x439   : > { %v15328_v24 = vpop.f32.mrf.mxu3 }
 0x43b   : > { %v15330_v41 = vpop.f32.mrf.mxu2  ;;  %3489 = vmatpush.bf16.msra.mxu3 %v18820_v45  ;;  %v15337_v9 = vpop.f32.mrf.mxu1  ;;  %v18826_v45 = vld [vmem:[#allocation99_spill] sm:$0xff] }
 0x43c   : > { %18816 = vst [vmem:[#allocation28_spill] sm:$0xff] %v15330_v41  ;;  %v18827_v41 = vpack.c.b16 %v18825_v42, %v18826_v45 }
 0x43e   : > { %2804 = vmatmul.bf16.gmra.mxu3 %v15332_v49  ;;  %4040 = vmatmul.bf16.vlgmr.msrb.gmra.mxu1 %v18821_v44  ;;  %v18829_v49 = vld [vmem:[#allocation111_spill] sm:$0xff] }
 0x43f   : > { %v15346_v37 = vpop.f32.mrf.mxu0  ;;  %v2006_v44 = vpack.c.bf16 %v18829_v49, %v18829_v49 }
 0x440   : > { %4077 = vmatmul.bf16.vlgmr.msrb.gmra.mxu2 %v18822_v23  ;;  %18823 = vst [vmem:[#allocation133_spill] sm:$0xff] %v15346_v37  ;;  %v12535_v23 = vld [vmem:[%s18494_s3 + $0x174] sm:$0xf]  ;;  %v15367_v37 = vunpack.c.l.b16 %v2005_v60  ;;  %v18836_v60 = vld [vmem:[#allocation101_spill] sm:$0xff] }
 0x441   : > { %v15348_v12 = vpop.f32.mrf.mxu3  ;;  %v15369_v42 = vunpack.c.l.b16 %v2006_v44  ;;  %v18837_v44 = vld [vmem:[#allocation143_spill] sm:$0xff] }
 0x442   : > { %5178 = vmatmul.bf16.gmra.mxu0 %v18827_v41  ;;  %18830 = vst [vmem:[#allocation138_spill] sm:$0xff] %v15367_v37  ;;  %v2907_v39 = vadd.f32 %v18837_v44, %v18836_v60  ;;  %v18847_v60 = vld [vmem:[#allocation116_spill] sm:$0xff] }
 0x443   : > { %v15350_v19 = vpop.f32.mrf.mxu2  ;;  %v15355_v14 = vpop.f32.mrf.mxu1  ;;  %18831 = vst [vmem:[#allocation26_spill] sm:$0xff] %v15369_v42  ;;  %v2007_v44 = vpack.c.bf16 %v18847_v60, %v18847_v60 }
 0x444   : > { %18824 = vst [vmem:[#allocation87_spill] sm:$0xff] %v15350_v19  ;;  %v10734_v19 = vld [vmem:[%s18494_s3 + $0x178] sm:$0xf0]  ;;  %v2923_v11 = vpack.c.bf16 %v2907_v39, %v2907_v39  ;;  %v10774_v39 = vld [vmem:[%s18494_s3 + $0x1c8] sm:$0xf0] }
 0x445   : > { %v15377_v33 = vor.u32 %v12535_v23, %v10734_v19  ;;  %v18842_v23 = vld [vmem:[#allocation108_spill] sm:$0xff] }
 0x446   : > { %v18844_v7 = vpack.c.b16 %v18842_v23, %v18843_v29  ;;  %v12545_v29 = vld [vmem:[%s18494_s3 + $0x1c4] sm:$0xf] }
 0x447   : > { %v15373_v45 = vpop.f32.mrf.mxu0  ;;  %18834 = vst [vmem:[#allocation93_spill] sm:$0xff] %v15377_v33 }
 0x448   : > { %18832 = vst [vmem:[#allocation25_spill] sm:$0xff] %v15373_v45  ;;  %v18840_v45 = vld [vmem:[#allocation106_spill] sm:$0xff] }
 0x449   : > { %v15371_v41 = vpop.f32.mrf.mxu3 }
 0x44b   : > { %v15375_v58 = vpop.f32.mrf.mxu2  ;;  %v15379_v49 = vpop.f32.mrf.mxu1 }
 0x44c   : > { %18833 = vst [vmem:[#allocation91_spill] sm:$0xff] %v15375_v58 }
 0x44e   : > { %2809 = vmatmul.bf16.gmra.mxu3 %v15377_v33  ;;  %4045 = vmatmul.bf16.gmra.mxu1 %v18835_v46  ;;  %v2924_v33 = vpack.c.bf16 %v2909_v15, %v2909_v15  ;;  %v15415_v15 = vunpack.c.l.b16 %v2007_v44  ;;  %v18857_v44 = vld [vmem:[#allocation112_spill] sm:$0xff] }
 0x44f   : > { %v15399_v46 = vpop.f32.mrf.mxu0 }
 0x450   : > { %4082 = vmatmul.bf16.gmra.mxu2 %v18840_v45  ;;  %18846 = vst [vmem:[#allocation23_spill] sm:$0xff] %v15399_v46  ;;  %v15405_v45 = vunpack.c.l.b16 %v2923_v11  ;;  %v15407_v42 = vunpack.c.l.b16 %v2924_v33  ;;  %v15423_v11 = vor.u32 %v12545_v29, %v10774_v39  ;;  %v18861_v29 = vld [vmem:[#allocation151_spill] sm:$0xff] }
 0x451   : > { %v15390_v58 = vpop.f32.mrf.mxu3  ;;  %18851 = vst [vmem:[#allocation22_spill] sm:$0xff] %v15415_v15  ;;  %v18864_v15 = vld [vmem:[#allocation40_spill] sm:$0xff] }
 0x452   : > { %5183 = vmatmul.bf16.gmra.mxu0 %v18844_v7  ;;  %18849 = vst [vmem:[#allocation102_spill] sm:$0xff] %v15405_v45  ;;  %v15417_v7 = vunpack.c.l.b16 %v2008_v21  ;;  %v18858_v21 = vld [vmem:[#allocation109_spill] sm:$0xff]  ;;  %v3646_v45 = vadd.f32 %v15067_v26, %v18863_v27 }
 0x453   : > { %v15392_v19 = vpop.f32.mrf.mxu2  ;;  %v15397_v37 = vpop.f32.mrf.mxu1  ;;  %18850 = vst [vmem:[#allocation103_spill] sm:$0xff] %v15407_v42  ;;  %v2912_v31 = vadd.f32 %v18859_v18, %v18858_v21  ;;  %v18867_v18 = vld [vmem:[#allocation114_spill] sm:$0xff] }
 0x454   : > { %18841 = vst [vmem:[#allocation92_spill] sm:$0xff] %v15392_v19  ;;  %v3665_v42 = vpack.c.bf16 %v3646_v45, %v3646_v45 }
 0x455   : > { %18845 = vst [vmem:[#allocation24_spill] sm:$0xff] %v15397_v37 }
 0x456   : > { %18852 = vst [vmem:[#allocation21_spill] sm:$0xff] %v15417_v7  ;;  %v18866_v7 = vld [vmem:[#allocation115_spill] sm:$0xff] }
 0x457   : > { %18854 = vst [vmem:[#allocation19_spill] sm:$0xff] %v15423_v11  ;;  %v15431_v46 = vpop.f32.mrf.mxu0  ;;  %v18868_v21 = vpack.c.b16 %v18866_v7, %v18867_v18 }
 0x458   : > { %18856 = vst [vmem:[#allocation98_spill] sm:$0xff] %v15431_v46  ;;  %v3648_v46 = vadd.f32 %v15096_v3, %v18864_v15  ;;  %v12547_v3 = vld [vmem:[%s18494_s3 + $0x1d4] sm:$0xf] }
 0x459   : > { %v15419_v23 = vpop.f32.mrf.mxu3 }
 0x45a   : > { %v3666_v26 = vpack.c.bf16 %v3648_v46, %v3648_v46 }
 0x45b   : > { %v15421_v60 = vpop.f32.mrf.mxu2  ;;  %v15425_v33 = vpop.f32.mrf.mxu1 }
 0x45c   : > { %18853 = vst [vmem:[#allocation20_spill] sm:$0xff] %v15421_v60  ;;  %v18860_v60 = vld [vmem:[#allocation30_spill] sm:$0xff]  ;;  %v4210_v45 = vunpack.c.l.b16 %v3666_v26  ;;  %v18876_v26 = vld [vmem:[#allocation15_spill] sm:$0xff] }
 0x45d   : > { %18855 = vst [vmem:[#allocation97_spill] sm:$0xff] %v15425_v33  ;;  %v2914_v39 = vadd.f32 %v18861_v29, %v18860_v60  ;;  %v18862_v33 = vld [vmem:[#allocation113_spill] sm:$0xff]  ;;  %v2925_v60 = vpack.c.bf16 %v2912_v31, %v2912_v31  ;;  %v10782_v31 = vld [vmem:[%s18494_s3 + $0x1d8] sm:$0xf0] }
 0x45e   : > { %3006 = vmatmul.bf16.vlgmr.msrb.gmra.mxu3 %v15423_v11  ;;  %4050 = vmatmul.bf16.gmra.mxu1 %v18857_v44  ;;  %v15470_v18 = vor.u32 %v12547_v3, %v10782_v31  ;;  %v18877_v3 = vld [vmem:[#allocation152_spill] sm:$0xff] }
 0x45f   : > { %3702 = vmatpush.bf16.msrb.mxu3 %v14500_v53  ;;  %v2926_v29 = vpack.c.bf16 %v2914_v39, %v2914_v39  ;;  %v15454_v27 = vunpack.c.l.b16 %v2925_v60  ;;  %v2917_v31 = vadd.f32 %v18877_v3, %v18876_v26 }
 0x460   : > { %4087 = vmatmul.bf16.gmra.mxu2 %v18862_v33  ;;  %18871 = vst [vmem:[#allocation111_spill] sm:$0xff] %v15470_v18 }
 0x461   : > { %v2583_v19 = vpop.f32.mrf.mxu3  ;;  %v15456_v37 = vunpack.c.l.b16 %v2926_v29 }
 0x462   : > { %v2584_v11 = vadd.f32 %v2583_v19, %v15233_v57  ;;  %5188 = vmatmul.bf16.gmra.mxu0 %v18868_v21  ;;  %v15465_v57 = vpop.f32.mrf.mxu0  ;;  %v4209_v19 = vunpack.c.l.b16 %v3665_v42 }
 0x463   : > { %v15446_v44 = vpop.f32.mrf.mxu2  ;;  %3703 = vmatpush.bf16.msrb.mxu3 %v14507_v61  ;;  %v15452_v33 = vpop.f32.mrf.mxu1  ;;  %18869 = vst [vmem:[#allocation99_spill] sm:$0xff] %v15465_v57 }
 0x464   : > { %18865 = vst [vmem:[#allocation100_spill] sm:$0xff] %v15446_v44  ;;  %v2603_v46 = vpack.c.bf16 %v2584_v11, %v2584_v11  ;;  %v18875_v11 = vld [vmem:[#allocation17_spill] sm:$0xff] }
 0x466   : > { %v15477_v44 = vunpack.c.l.b16 %v2603_v46 }
 0x467   : > { %3704 = vmatpush.bf16.msrb.mxu3 %v14522_v13 }
 0x468   : > { %18873 = vst [vmem:[#allocation101_spill] sm:$0xff] %v15477_v44  ;;  %v12598_v44 = vld [vmem:[%s18721_s0 + $0x128] sm:$0xff] }
 0x469   : > { %v2585_v15 = vpop.f32.mrf.mxu3 }
 0x46a   : > { %v2586_v7 = vadd.f32 %v2585_v15, %v15266_v17  ;;  %v4217_v17 = vpack.c.b16 %v4210_v45, %v4209_v19  ;;  %v18878_v15 = vld [vmem:[#allocation33_spill] sm:$0xff]  ;;  %v15495_v45 = vpop.f32.mrf.mxu0 }
 0x46b   : > { %v15468_v39 = vpop.f32.mrf.mxu2  ;;  %3705 = vmatpush.bf16.msrb.mxu3 %v14533_v55  ;;  %v15473_v21 = vpop.f32.mrf.mxu1 }
 0x46c   : > { %18870 = vst [vmem:[#allocation110_spill] sm:$0xff] %v15468_v39  ;;  %v2604_v29 = vpack.c.bf16 %v2586_v7, %v2586_v7  ;;  %v18879_v39 = vld [vmem:[#allocation50_spill] sm:$0xff]  ;;  %v18881_v7 = vld [vmem:[#allocation45_spill] sm:$0xff] }
 0x46d   : > { %18872 = vst [vmem:[#allocation105_spill] sm:$0xff] %v15473_v21  ;;  %v2919_v57 = vadd.f32 %v18879_v39, %v18878_v15  ;;  %v18880_v21 = vld [vmem:[#allocation18_spill] sm:$0xff]  ;;  %v2927_v39 = vpack.c.bf16 %v2917_v31, %v2917_v31 }
 0x46e   : > { %v15479_v42 = vunpack.c.l.b16 %v2604_v29  ;;  %3011 = vmatmul.bf16.gmra.mxu3 %v15470_v18  ;;  %4055 = vmatmul.bf16.gmra.mxu1 %v18875_v11  ;;  %v3651_v29 = vadd.f32 %v15133_v22, %v18881_v7  ;;  %v18882_v18 = vld [vmem:[#allocation44_spill] sm:$0xff]  ;;  %v12600_v22 = vld [vmem:[%s18721_s0 + $0x138] sm:$0xff] }
 0x46f   : > { %3706 = vmatpush.bf16.msrb.mxu3 %v14299_v51  ;;  %v3653_v19 = vadd.f32 %v15170_v48, %v18882_v18  ;;  %v2928_v3 = vpack.c.bf16 %v2919_v57, %v2919_v57  ;;  %5361 = vmatpush.bf16.msra.mxu0 %v12600_v22  ;;  %v15506_v18 = vunpack.c.l.b16 %v2927_v39  ;;  %v10790_v57 = vld [vmem:[%s18494_s3 + $0x1e8] sm:$0xf0] }
 0x470   : > { %18874 = vst [vmem:[#allocation143_spill] sm:$0xff] %v15479_v42  ;;  %4092 = vmatmul.bf16.gmra.mxu2 %v18880_v21  ;;  %v3667_v15 = vpack.c.bf16 %v3651_v29, %v3651_v29  ;;  %v12576_v42 = vld [vmem:[%s18721_s0 + $0x78] sm:$0xff] }
 0x471   : > { %v2588_v60 = vpop.f32.mrf.mxu3  ;;  %v3668_v48 = vpack.c.bf16 %v3653_v19, %v3653_v19  ;;  %v15508_v7 = vunpack.c.l.b16 %v2928_v3  ;;  %5214 = vmatpush.bf16.msrb.mxu1 %v12576_v42 }
 0x472   : > { %v2589_v11 = vadd.f32 %v2588_v60, %v15293_v28  ;;  %5193 = vmatmul.bf16.gmra.mxu0 %v4217_v17  ;;  %v12549_v28 = vld [vmem:[%s18494_s3 + $0x1e4] sm:$0xf]  ;;  %v12599_v60 = vld [vmem:[%s18721_s0 + $0x130] sm:$0xff]  ;;  %v4211_v17 = vunpack.c.l.b16 %v3667_v15 }
 0x473   : > { %v15498_v26 = vpop.f32.mrf.mxu2  ;;  %3707 = vmatpush.bf16.msrb.mxu3 %v14240_v43  ;;  %v15501_v21 = vpop.f32.mrf.mxu1  ;;  %5362 = vmatpush.bf16.msra.mxu0 %v12599_v60  ;;  %v4212_v29 = vunpack.c.l.b16 %v3668_v48  ;;  %v15523_v22 = vor.u32 %v12549_v28, %v10790_v57  ;;  %v18888_v28 = vld [vmem:[#allocation14_spill] sm:$0xff] }
 0x474   : > { %18883 = vst [vmem:[#allocation27_spill] sm:$0xff] %v15498_v26  ;;  %v2605_v19 = vpack.c.bf16 %v2589_v11, %v2589_v11  ;;  %v15533_v60 = vpop.f32.mrf.mxu0 }
 0x475   : > { %18885 = vst [vmem:[#allocation106_spill] sm:$0xff] %v15523_v22  ;;  %v4218_v57 = vpack.c.b16 %v4212_v29, %v4211_v17 }
 0x477   : > { %3708 = vmatpush.bf16.msrb.mxu3 %v14184_v52  ;;  %5363 = vmatpush.bf16.msra.mxu0 %v12598_v44  ;;  %v12597_v44 = vld [vmem:[%s18721_s0 + $0x120] sm:$0xff] }
 0x479   : > { %v2590_v31 = vpop.f32.mrf.mxu3 }
 0x47a   : > { %v2591_v39 = vadd.f32 %v2590_v31, %v15328_v24  ;;  %v15535_v24 = vunpack.c.l.b16 %v2605_v19  ;;  %v18889_v31 = vld [vmem:[#allocation36_spill] sm:$0xff]  ;;  %v12575_v19 = vld [vmem:[%s18721_s0 + $0x70] sm:$0xff] }
 0x47b   : > { %v15521_v3 = vpop.f32.mrf.mxu2  ;;  %3709 = vmatpush.bf16.msrb.mxu3 %v14112_v56  ;;  %v15526_v46 = vpop.f32.mrf.mxu1  ;;  %5364 = vmatpush.bf16.msra.mxu0 %v12597_v44  ;;  %v10798_v44 = vld [vmem:[%s18494_s3 + $0x1f8] sm:$0xf0] }
 0x47c   : > { %18884 = vst [vmem:[#allocation146_spill] sm:$0xff] %v15521_v3  ;;  %v2606_v11 = vpack.c.bf16 %v2591_v39, %v2591_v39  ;;  %v12584_v39 = vld [vmem:[%s18721_s0 + $0xb8] sm:$0xff]  ;;  %5215 = vmatpush.bf16.msrb.mxu1 %v12575_v19  ;;  %v12582_v19 = vld [vmem:[%s18721_s0 + $0xa8] sm:$0xff] }
 0x47d   : > { %18886 = vst [vmem:[#allocation108_spill] sm:$0xff] %v15535_v24  ;;  %5263 = vmatpush.bf16.msrb.mxu2 %v12584_v39  ;;  %v12551_v39 = vld [vmem:[%s18494_s3 + $0x1f4] sm:$0xf] }
 0x47e   : > { %v15537_v48 = vunpack.c.l.b16 %v2606_v11  ;;  %3016 = vmatmul.bf16.gmra.mxu3 %v15523_v22  ;;  %4172 = vmatmul.bf16.vlgmr.msra.gmra.mxu1 %v18888_v28  ;;  %v18890_v11 = vld [vmem:[#allocation49_spill] sm:$0xff]  ;;  %v18891_v28 = vld [vmem:[#allocation47_spill] sm:$0xff] }
 0x47f   : > { %v3656_v17 = vadd.f32 %v15205_v50, %v18890_v11  ;;  %v12583_v50 = vld [vmem:[%s18721_s0 + $0xb0] sm:$0xff]  ;;  %v12574_v11 = vld [vmem:[%s18721_s0 + $0x68] sm:$0xff]  ;;  %v12573_v22 = vld [vmem:[%s18721_s0 + $0x60] sm:$0xff] }
 0x480   : > { %18887 = vst [vmem:[#allocation107_spill] sm:$0xff] %v15537_v48  ;;  %4521 = vmatmul.bf16.vlgmr.msra.gmra.mxu2 %v18889_v31  ;;  %v3658_v31 = vadd.f32 %v15241_v54, %v18891_v28  ;;  %v12596_v54 = vld [vmem:[%s18721_s0 + $0x118] sm:$0xff]  ;;  %5216 = vmatpush.bf16.msrb.mxu1 %v12574_v11  ;;  %v15591_v48 = vor.u32 %v12551_v39, %v10798_v44  ;;  %v18898_v44 = vld [vmem:[#allocation121_spill] sm:$0xff] }
 0x481   : > { %v2593_v29 = vpop.f32.mrf.mxu3  ;;  %v3669_v42 = vpack.c.bf16 %v3656_v17, %v3656_v17  ;;  %5264 = vmatpush.bf16.msrb.mxu2 %v12583_v50  ;;  %5365 = vmatpush.bf16.msra.mxu0 %v12596_v54  ;;  %v12595_v17 = vld [vmem:[%s18721_s0 + $0x110] sm:$0xff] }
 0x482   : > { %v2594_v15 = vadd.f32 %v2593_v29, %v15348_v12  ;;  %5198 = vmatmul.bf16.gmra.mxu0 %v4218_v57  ;;  %v3670_v12 = vpack.c.bf16 %v3658_v31, %v3658_v31  ;;  %v15571_v57 = vpop.f32.mrf.mxu0  ;;  %18895 = vst [vmem:[#allocation109_spill] sm:$0xff] %v15591_v48 }
 0x483   : > { %v15558_v3 = vpop.f32.mrf.mxu2  ;;  %v15560_v26 = vpop.f32.mrf.mxu1  ;;  %18893 = vst [vmem:[#allocation16_spill] sm:$0xff] %v15571_v57  ;;  %v4213_v29 = vunpack.c.l.b16 %v3669_v42  ;;  %v12581_v42 = vld [vmem:[%s18721_s0 + $0xa0] sm:$0xff] }
 0x484   : > { %18892 = vst [vmem:[#allocation116_spill] sm:$0xff] %v15558_v3  ;;  %v4214_v31 = vunpack.c.l.b16 %v3670_v12  ;;  %v2607_v50 = vpack.c.bf16 %v2594_v15, %v2594_v15  ;;  %v12594_v15 = vld [vmem:[%s18721_s0 + $0x108] sm:$0xff]  ;;  %5217 = vmatpush.bf16.msrb.mxu1 %v12573_v22  ;;  %v18901_v57 = vld [vmem:[#allocation39_spill] sm:$0xff] }
 0x485   : > { %5265 = vmatpush.bf16.msrb.mxu2 %v12582_v19  ;;  %5366 = vmatpush.bf16.msra.mxu0 %v12595_v17  ;;  %v18899_v19 = vld [vmem:[#allocation67_spill] sm:$0xff] }
 0x486   : > { %v15604_v12 = vunpack.c.l.b16 %v2607_v50  ;;  %v4219_v11 = vpack.c.b16 %v4214_v31, %v4213_v29  ;;  %v3119_v17 = vadd.f32 %v14939_v10, %v18899_v19  ;;  %v12572_v22 = vld [vmem:[%s18721_s0 + $0x58] sm:$0xff]  ;;  %v12593_v29 = vld [vmem:[%s18721_s0 + $0x100] sm:$0xff] }
 0x487   : > { %v12580_v50 = vld [vmem:[%s18721_s0 + $0x98] sm:$0xff] }
 0x488   : > { %18896 = vst [vmem:[#allocation147_spill] sm:$0xff] %v15604_v12  ;;  %5218 = vmatpush.bf16.msrb.mxu1 %v12572_v22  ;;  %v3135_v19 = vpack.c.bf16 %v3119_v17, %v3119_v17  ;;  %v12571_v22 = vld [vmem:[%s18721_s0 + $0x50] sm:$0xff]  ;;  %v12578_v17 = vld [vmem:[%s18721_s0 + $0x88] sm:$0xff] }
 0x489   : > { %v2595_v28 = vpop.f32.mrf.mxu3  ;;  %5266 = vmatpush.bf16.msrb.mxu2 %v12581_v42  ;;  %5367 = vmatpush.bf16.msra.mxu0 %v12594_v15  ;;  %v18904_v42 = vld [vmem:[#allocation51_spill] sm:$0xff]  ;;  %v18912_v12 = vld [vmem:[#allocation124_spill] sm:$0xff] }
 0x48a   : > { %v2596_v54 = vadd.f32 %v2595_v28, %v15371_v41  ;;  %v18900_v28 = vld [vmem:[#allocation118_spill] sm:$0xff]  ;;  %v15624_v31 = vpop.f32.mrf.mxu0  ;;  %v3663_v15 = vadd.f32 %v15303_v63, %v18904_v42 }
 0x48b   : > { %v15589_v24 = vpop.f32.mrf.mxu2  ;;  %v15593_v3 = vpop.f32.mrf.mxu1  ;;  %18902 = vst [vmem:[#allocation151_spill] sm:$0xff] %v15624_v31  ;;  %v18987_v31 = vld [vmem:[#allocation58_spill] sm:$0xff] }
 0x48c   : > { %18894 = vst [vmem:[#allocation112_spill] sm:$0xff] %v15589_v24  ;;  %v2608_v41 = vpack.c.bf16 %v2596_v54, %v2596_v54  ;;  %v3121_v24 = vadd.f32 %v14956_v59, %v18900_v28  ;;  %5219 = vmatpush.bf16.msrb.mxu1 %v12571_v22  ;;  %v12569_v22 = vld [vmem:[%s18721_s0 + $0x40] sm:$0xff] }
 0x48d   : > { %5267 = vmatpush.bf16.msrb.mxu2 %v12580_v50  ;;  %5368 = vmatpush.bf16.msra.mxu0 %v12593_v29  ;;  %v15643_v50 = vunpack.c.l.b16 %v3135_v19 }
 0x48e   : > { %v15606_v39 = vunpack.c.l.b16 %v2608_v41  ;;  %3021 = vmatmul.bf16.gmra.mxu3 %v15591_v48  ;;  %4177 = vmatmul.bf16.gmra.mxu1 %v18898_v44  ;;  %v3136_v28 = vpack.c.bf16 %v3121_v24, %v3121_v24  ;;  %v12570_v24 = vld [vmem:[%s18721_s0 + $0x48] sm:$0xff] }
 0x490   : > { %18897 = vst [vmem:[#allocation30_spill] sm:$0xff] %v15606_v39  ;;  %4526 = vmatmul.bf16.gmra.mxu2 %v18901_v57  ;;  %v18903_v57 = vld [vmem:[#allocation53_spill] sm:$0xff]  ;;  %5220 = vmatpush.bf16.msrb.mxu1 %v12570_v24  ;;  %v18910_v24 = vld [vmem:[#allocation126_spill] sm:$0xff]  ;;  %v3126_v39 = vadd.f32 %v15001_v20, %v18912_v12 }
 0x491   : > { %v2598_v59 = vpop.f32.mrf.mxu3  ;;  %v3661_v54 = vadd.f32 %v15275_v36, %v18903_v57  ;;  %v12579_v36 = vld [vmem:[%s18721_s0 + $0x90] sm:$0xff] }
 0x492   : > { %v2599_v41 = vadd.f32 %v2598_v59, %v15390_v58  ;;  %5203 = vmatmul.bf16.gmra.mxu0 %v4219_v11  ;;  %5268 = vmatpush.bf16.msrb.mxu2 %v12579_v36  ;;  %v3672_v58 = vpack.c.bf16 %v3663_v15, %v3663_v15  ;;  %v15645_v11 = vunpack.c.l.b16 %v3136_v28  ;;  %v15653_v42 = vpop.f32.mrf.mxu0  ;;  %v12577_v36 = vld [vmem:[%s18721_s0 + $0x80] sm:$0xff]  ;;  %v18916_v20 = vld [vmem:[#allocation117_spill] sm:$0xff] }
 0x493   : > { %v15633_v44 = vpop.f32.mrf.mxu2  ;;  %v15635_v48 = vpop.f32.mrf.mxu1  ;;  %v3671_v63 = vpack.c.bf16 %v3661_v54, %v3661_v54  ;;  %18906 = vst [vmem:[#allocation136_spill] sm:$0xff] %v15653_v42 }
 0x494   : > { %18905 = vst [vmem:[#allocation113_spill] sm:$0xff] %v15633_v44  ;;  %v4216_v57 = vunpack.c.l.b16 %v3672_v58  ;;  %v2609_v54 = vpack.c.bf16 %v2599_v41, %v2599_v41  ;;  %5221 = vmatpush.bf16.msrb.mxu1 %v12569_v22 }
 0x495   : > { %v4215_v59 = vunpack.c.l.b16 %v3671_v63  ;;  %v18917_v63 = vld [vmem:[#allocation120_spill] sm:$0xff] }
 0x496   : > { %5269 = vmatpush.bf16.msrb.mxu2 %v12578_v17  ;;  %v15668_v41 = vunpack.c.l.b16 %v2609_v54 }
 0x497   : > { %v4220_v17 = vpack.c.b16 %v4216_v57, %v4215_v59 }
 0x498   : > { %18908 = vst [vmem:[#allocation115_spill] sm:$0xff] %v15668_v41  ;;  %v18923_v41 = vld [vmem:[#allocation46_spill] sm:$0xff] }
 0x499   : > { %v2600_v29 = vpop.f32.mrf.mxu3 }
 0x49a   : > { %v2601_v15 = vadd.f32 %v2600_v29, %v15419_v23  ;;  %5270 = vmatpush.bf16.msrb.mxu2 %v12577_v36  ;;  %v18911_v29 = vld [vmem:[#allocation122_spill] sm:$0xff] }
 0x49b   : > { %v15656_v19 = vpop.f32.mrf.mxu2  ;;  %v15658_v28 = vpop.f32.mrf.mxu1  ;;  %v3124_v10 = vadd.f32 %v14984_v38, %v18911_v29 }
 0x49c   : > { %18907 = vst [vmem:[#allocation40_spill] sm:$0xff] %v15656_v19  ;;  %v2610_v58 = vpack.c.bf16 %v2601_v15, %v2601_v15  ;;  %v18913_v15 = vld [vmem:[#allocation42_spill] sm:$0xff]  ;;  %v15687_v38 = vpop.f32.mrf.mxu0  ;;  %v18926_v19 = vld [vmem:[#allocation68_spill] sm:$0xff] }
 0x49d   : > { %18915 = vst [vmem:[#allocation15_spill] sm:$0xff] %v15687_v38 }
 0x49e   : > { %v15670_v23 = vunpack.c.l.b16 %v2610_v58  ;;  %3490 = vmatmul.bf16.vlgmr.msra.gmra.mxu3 %v14023_v16  ;;  %4182 = vmatmul.bf16.gmra.mxu1 %v18910_v24  ;;  %v3137_v58 = vpack.c.bf16 %v3124_v10, %v3124_v10  ;;  %v3138_v24 = vpack.c.bf16 %v3126_v39, %v3126_v39 }
 0x49f   : > { %3834 = vmatpush.bf16.msra.mxu3 %v14500_v53 }
 0x4a0   : > { %18909 = vst [vmem:[#allocation114_spill] sm:$0xff] %v15670_v23  ;;  %4531 = vmatmul.bf16.gmra.mxu2 %v18913_v15  ;;  %v15690_v57 = vunpack.c.l.b16 %v3137_v58  ;;  %v15692_v29 = vunpack.c.l.b16 %v3138_v24  ;;  %v18922_v23 = vld [vmem:[#allocation130_spill] sm:$0xff] }
 0x4a1   : > { %v2795_v22 = vpop.f32.mrf.mxu3 }
 0x4a2   : > { %5208 = vmatmul.bf16.gmra.mxu0 %v4220_v17  ;;  %v2796_v12 = vadd.f32 %v2795_v22, %v18916_v20 }
 0x4a3   : > { %v15682_v36 = vpop.f32.mrf.mxu2  ;;  %3835 = vmatpush.bf16.msra.mxu3 %v14507_v61  ;;  %v15685_v59 = vpop.f32.mrf.mxu1 }
 0x4a4   : > { %18914 = vst [vmem:[#allocation17_spill] sm:$0xff] %v15682_v36  ;;  %v2815_v54 = vpack.c.bf16 %v2796_v12, %v2796_v12  ;;  %v15703_v58 = vpop.f32.mrf.mxu0  ;;  %v18920_v12 = vld [vmem:[#allocation132_spill] sm:$0xff]  ;;  %v18925_v36 = vld [vmem:[#allocation119_spill] sm:$0xff] }
 0x4a5   : > { %18919 = vst [vmem:[#allocation33_spill] sm:$0xff] %v15703_v58  ;;  %v18927_v44 = vpack.c.b16 %v18925_v36, %v18926_v19  ;;  %v18930_v19 = vld [vmem:[#allocation125_spill] sm:$0xff] }
 0x4a6   : > { %v15705_v24 = vunpack.c.l.b16 %v2815_v54 }
 0x4a7   : > { %3836 = vmatpush.bf16.msra.mxu3 %v14522_v13 }
 0x4a9   : > { %v2797_v15 = vpop.f32.mrf.mxu3 }
 0x4aa   : > { %v2798_v17 = vadd.f32 %v2797_v15, %v18917_v63  ;;  %v18921_v63 = vld [vmem:[#allocation127_spill] sm:$0xff] }
 0x4ab   : > { %v15696_v10 = vpop.f32.mrf.mxu2  ;;  %3837 = vmatpush.bf16.msra.mxu3 %v14533_v55  ;;  %v15699_v39 = vpop.f32.mrf.mxu1  ;;  %v3129_v15 = vadd.f32 %v15018_v35, %v18921_v63 }
 0x4ac   : > { %18918 = vst [vmem:[#allocation152_spill] sm:$0xff] %v15696_v10  ;;  %v2816_v22 = vpack.c.bf16 %v2798_v17, %v2798_v17  ;;  %v3131_v10 = vadd.f32 %v15036_v2, %v18922_v23  ;;  %v18928_v2 = vld [vmem:[#allocation123_spill] sm:$0xff]  ;;  %v15733_v54 = vpop.f32.mrf.mxu0 }
 0x4ad   : > { %18929 = vst [vmem:[#allocation18_spill] sm:$0xff] %v15733_v54 }
 0x4ae   : > { %v15707_v20 = vunpack.c.l.b16 %v2816_v22  ;;  %3495 = vmatmul.bf16.gmra.mxu3 %v18742_v4  ;;  %4187 = vmatmul.bf16.gmra.mxu1 %v18920_v12  ;;  %v3139_v12 = vpack.c.bf16 %v3129_v15, %v3129_v15  ;;  %v3140_v4 = vpack.c.bf16 %v3131_v10, %v3131_v10 }
 0x4af   : > { %3838 = vmatpush.bf16.msra.mxu3 %v14299_v51 }
 0x4b0   : > { %4536 = vmatmul.bf16.gmra.mxu2 %v18923_v41  ;;  %v15728_v63 = vunpack.c.l.b16 %v3139_v12  ;;  %v15730_v41 = vunpack.c.l.b16 %v3140_v4 }
 0x4b1   : > { %v2800_v17 = vpop.f32.mrf.mxu3 }
 0x4b2   : > { %5369 = vmatmul.bf16.vlgmr.msra.gmra.mxu0 %v18927_v44  ;;  %v2801_v23 = vadd.f32 %v2800_v17, %v18928_v2  ;;  %v18934_v2 = vld [vmem:[#allocation135_spill] sm:$0xff] }
 0x4b3   : > { %v15719_v22 = vpop.f32.mrf.mxu2  ;;  %3839 = vmatpush.bf16.msra.mxu3 %v14240_v43  ;;  %v15725_v35 = vpop.f32.mrf.mxu1 }
 0x4b4   : > { %18924 = vst [vmem:[#allocation50_spill] sm:$0xff] %v15719_v22  ;;  %v2817_v16 = vpack.c.bf16 %v2801_v23, %v2801_v23  ;;  %v18935_v23 = vld [vmem:[#allocation134_spill] sm:$0xff]  ;;  %v15756_v15 = vpop.f32.mrf.mxu0 }
 0x4b5   : > { %v18936_v54 = vpack.c.b16 %v18934_v2, %v18935_v23  ;;  %18938 = vst [vmem:[#allocation36_spill] sm:$0xff] %v15756_v15  ;;  %v18941_v2 = vld [vmem:[#allocation128_spill] sm:$0xff] }
 0x4b6   : > { %v15743_v4 = vunpack.c.l.b16 %v2817_v16 }
 0x4b7   : > { %3840 = vmatpush.bf16.msra.mxu3 %v14184_v52 }
 0x4b8   : > { %18932 = vst [vmem:[#allocation44_spill] sm:$0xff] %v15743_v4 }
 0x4b9   : > { %v2802_v22 = vpop.f32.mrf.mxu3 }
 0x4ba   : > { %v2803_v44 = vadd.f32 %v2802_v22, %v18930_v19  ;;  %v18937_v22 = vpack.c.b16 %v15022_v6, %v15020_v40  ;;  %v18942_v6 = vld [vmem:[#allocation131_spill] sm:$0xff] }
 0x4bb   : > { %v15736_v36 = vpop.f32.mrf.mxu2  ;;  %3841 = vmatpush.bf16.msra.mxu3 %v14112_v56  ;;  %v15739_v10 = vpop.f32.mrf.mxu1 }
 0x4bc   : > { %18931 = vst [vmem:[#allocation45_spill] sm:$0xff] %v15736_v36  ;;  %v2818_v17 = vpack.c.bf16 %v2803_v44, %v2803_v44  ;;  %v18940_v44 = vpack.c.b16 %v15182_v47, %v15180_v32  ;;  %v15771_v58 = vpop.f32.mrf.mxu0  ;;  %v18946_v47 = vld [vmem:[#allocation140_spill] sm:$0xff]  ;;  %v18947_v32 = vld [vmem:[#allocation139_spill] sm:$0xff] }
 0x4be   : > { %v15745_v12 = vunpack.c.l.b16 %v2818_v17  ;;  %3500 = vmatmul.bf16.gmra.mxu3 %v18762_v8  ;;  %5222 = vmatmul.bf16.vlgmr.msrb.gmra.mxu1 %v18936_v54 }
 0x4c0   : > { %18933 = vst [vmem:[#allocation14_spill] sm:$0xff] %v15745_v12  ;;  %5271 = vmatmul.bf16.vlgmr.msrb.gmra.mxu2 %v18937_v22 }
 0x4c1   : > { %v2805_v36 = vpop.f32.mrf.mxu3 }
 0x4c2   : > { %5374 = vmatmul.bf16.gmra.mxu0 %v18940_v44  ;;  %v2806_v54 = vadd.f32 %v2805_v36, %v18941_v2  ;;  %v18948_v36 = vpack.c.b16 %v18946_v47, %v18947_v32  ;;  %v18949_v44 = vpack.c.b16 %v15076_v30, %v15074_v34  ;;  %v18953_v47 = vpack.c.b16 %v15249_v62, %v15247_v5 }
 0x4c3   : > { %v15758_v16 = vpop.f32.mrf.mxu2  ;;  %v15763_v17 = vpop.f32.mrf.mxu1 }
 0x4c4   : > { %18939 = vst [vmem:[#allocation49_spill] sm:$0xff] %v15758_v16  ;;  %v2819_v8 = vpack.c.bf16 %v2806_v54, %v2806_v54 }
 0x4c6   : > { %v15773_v16 = vunpack.c.l.b16 %v2819_v8 }
 0x4c8   : > { %18944 = vst [vmem:[#allocation121_spill] sm:$0xff] %v15773_v16 }
 0x4c9   : > { %v2807_v23 = vpop.f32.mrf.mxu3 }
 0x4ca   : > { %v2808_v40 = vadd.f32 %v2807_v23, %v18942_v6  ;;  %v18950_v23 = vld [vmem:[#allocation57_spill] sm:$0xff]  ;;  %v18951_v6 = vld [vmem:[#allocation55_spill] sm:$0xff] }
 0x4cb   : > { %v15767_v22 = vpop.f32.mrf.mxu2  ;;  %v15769_v19 = vpop.f32.mrf.mxu1  ;;  %v3778_v8 = vadd.f32 %v15337_v9, %v18950_v23  ;;  %v18955_v23 = vld [vmem:[#allocation41_spill] sm:$0xff] }
 0x4cc   : > { %18943 = vst [vmem:[#allocation47_spill] sm:$0xff] %v15767_v22  ;;  %v2820_v15 = vpack.c.bf16 %v2808_v40, %v2808_v40 }
 0x4cd   : > { %v3797_v34 = vpack.c.bf16 %v3778_v8, %v3778_v8 }
 0x4ce   : > { %v15775_v38 = vunpack.c.l.b16 %v2820_v15  ;;  %3505 = vmatmul.bf16.gmra.mxu3 %v18789_v25  ;;  %5227 = vmatmul.bf16.gmra.mxu1 %v18948_v36  ;;  %v3780_v15 = vadd.f32 %v15355_v14, %v18951_v6  ;;  %v15797_v36 = vpop.f32.mrf.mxu0 }
 0x4cf   : > { %v15800_v25 = vunpack.c.l.b16 %v3797_v34 }
 0x4d0   : > { %18945 = vst [vmem:[#allocation67_spill] sm:$0xff] %v15775_v38  ;;  %5276 = vmatmul.bf16.gmra.mxu2 %v18949_v44  ;;  %v3798_v30 = vpack.c.bf16 %v3780_v15, %v3780_v15  ;;  %v18954_v44 = vld [vmem:[#allocation137_spill] sm:$0xff] }
 0x4d1   : > { %v2810_v54 = vpop.f32.mrf.mxu3  ;;  %v18959_v15 = vld [vmem:[#allocation81_spill] sm:$0xff] }
 0x4d2   : > { %5379 = vmatmul.bf16.gmra.mxu0 %v18953_v47  ;;  %v2811_v2 = vadd.f32 %v2810_v54, %v18954_v44  ;;  %v15802_v9 = vunpack.c.l.b16 %v3798_v30  ;;  %v18960_v54 = vld [vmem:[#allocation145_spill] sm:$0xff]  ;;  %v18961_v44 = vld [vmem:[#allocation144_spill] sm:$0xff] }
 0x4d3   : > { %v15790_v40 = vpop.f32.mrf.mxu2  ;;  %v15795_v32 = vpop.f32.mrf.mxu1  ;;  %v18962_v34 = vpack.c.b16 %v18960_v54, %v18961_v44 }
 0x4d4   : > { %18952 = vst [vmem:[#allocation118_spill] sm:$0xff] %v15790_v40  ;;  %v2821_v14 = vpack.c.bf16 %v2811_v2, %v2811_v2 }
 0x4d6   : > { %v15809_v47 = vunpack.c.l.b16 %v2821_v14  ;;  %v15823_v30 = vpop.f32.mrf.mxu0 }
 0x4d8   : > { %18957 = vst [vmem:[#allocation53_spill] sm:$0xff] %v15809_v47  ;;  %v18973_v47 = vld [vmem:[#allocation61_spill] sm:$0xff] }
 0x4d9   : > { %v2812_v22 = vpop.f32.mrf.mxu3 }
 0x4da   : > { %v2813_v6 = vadd.f32 %v2812_v22, %v18955_v23  ;;  %v18963_v22 = vpack.c.b16 %v15146_v1, %v15144_v0  ;;  %v18964_v23 = vld [vmem:[#allocation154_spill] sm:$0xff]  ;;  %v18970_v1 = vld [vmem:[#allocation96_spill] sm:$0xff] }
 0x4db   : > { %v15805_v40 = vpop.f32.mrf.mxu2  ;;  %v15807_v62 = vpop.f32.mrf.mxu1 }
 0x4dc   : > { %18956 = vst [vmem:[#allocation39_spill] sm:$0xff] %v15805_v40  ;;  %v2822_v5 = vpack.c.bf16 %v2813_v6, %v2813_v6  ;;  %v3783_v6 = vadd.f32 %v15379_v49, %v18964_v23  ;;  %v18968_v40 = vld [vmem:[#allocation66_spill] sm:$0xff] }
 0x4dd   : > { %v3912_v16 = vadd.f32 %v15560_v26, %v18968_v40 }
 0x4de   : > { %v15811_v8 = vunpack.c.l.b16 %v2822_v5  ;;  %3710 = vmatmul.bf16.vlgmr.msrb.gmra.mxu3 %v18959_v15  ;;  %5232 = vmatmul.bf16.gmra.mxu1 %v18962_v34  ;;  %v18965_v5 = vld [vmem:[#allocation59_spill] sm:$0xff]  ;;  %v18966_v15 = vld [vmem:[#allocation24_spill] sm:$0xff]  ;;  %v3799_v49 = vpack.c.bf16 %v3783_v6, %v3783_v6 }
 0x4df   : > { %3966 = vmatpush.bf16.msrb.mxu3 %v14500_v53  ;;  %v3785_v54 = vadd.f32 %v18966_v15, %v18965_v5  ;;  %v18967_v34 = vld [vmem:[#allocation163_spill] sm:$0xff]  ;;  %v3930_v15 = vpack.c.bf16 %v3912_v16, %v3912_v16 }
 0x4e0   : > { %18958 = vst [vmem:[#allocation51_spill] sm:$0xff] %v15811_v8  ;;  %5281 = vmatmul.bf16.gmra.mxu2 %v18963_v22  ;;  %v3910_v2 = vadd.f32 %v15526_v46, %v18967_v34  ;;  %v18971_v22 = vld [vmem:[#allocation94_spill] sm:$0xff]  ;;  %v15845_v46 = vunpack.c.l.b16 %v3799_v49  ;;  %v18979_v49 = vld [vmem:[#allocation149_spill] sm:$0xff] }
 0x4e1   : > { %v3007_v44 = vpop.f32.mrf.mxu3  ;;  %v18972_v38 = vpack.c.b16 %v18970_v1, %v18971_v22  ;;  %v3800_v23 = vpack.c.bf16 %v3785_v54, %v3785_v54  ;;  %v4306_v1 = vunpack.c.l.b16 %v3930_v15  ;;  %v18982_v15 = vld [vmem:[#allocation174_spill] sm:$0xff] }
 0x4e2   : > { %v3929_v5 = vpack.c.bf16 %v3910_v2, %v3910_v2  ;;  %v3008_v8 = vadd.f32 %v3007_v44, %v18973_v47  ;;  %v18978_v44 = vld [vmem:[#allocation88_spill] sm:$0xff] }
 0x4e3   : > { %v15835_v0 = vpop.f32.mrf.mxu2  ;;  %5384 = vmatmul.bf16.gmra.mxu0 %v18972_v38  ;;  %3967 = vmatpush.bf16.msrb.mxu3 %v14507_v61  ;;  %v15841_v14 = vpop.f32.mrf.mxu1  ;;  %v15847_v26 = vunpack.c.l.b16 %v3800_v23  ;;  %v18980_v23 = vld [vmem:[#allocation148_spill] sm:$0xff] }
 0x4e4   : > { %18969 = vst [vmem:[#allocation126_spill] sm:$0xff] %v15835_v0  ;;  %v4305_v34 = vunpack.c.l.b16 %v3929_v5  ;;  %v15849_v38 = vpop.f32.mrf.mxu0  ;;  %v3027_v22 = vpack.c.bf16 %v3008_v8, %v3008_v8  ;;  %v18974_v0 = vld [vmem:[#allocation142_spill] sm:$0xff]  ;;  %v18981_v5 = vpack.c.b16 %v18979_v49, %v18980_v23  ;;  %v3790_v49 = vadd.f32 %v15452_v33, %v18987_v31 }
 0x4e6   : > { %v15857_v2 = vunpack.c.l.b16 %v3027_v22  ;;  %v4313_v8 = vpack.c.b16 %v4306_v1, %v4305_v34  ;;  %v18985_v22 = vld [vmem:[#allocation157_spill] sm:$0xff]  ;;  %v3802_v31 = vpack.c.bf16 %v3790_v49, %v3790_v49 }
 0x4e7   : > { %3968 = vmatpush.bf16.msrb.mxu3 %v14522_v13  ;;  %v18988_v34 = vld [vmem:[#allocation169_spill] sm:$0xff] }
 0x4e8   : > { %18976 = vst [vmem:[#allocation124_spill] sm:$0xff] %v15857_v2  ;;  %v3915_v1 = vadd.f32 %v15593_v3, %v18988_v34 }
 0x4e9   : > { %v3009_v40 = vpop.f32.mrf.mxu3 }
 0x4ea   : > { %v3010_v42 = vadd.f32 %v3009_v40, %v18974_v0  ;;  %v18983_v40 = vld [vmem:[#allocation173_spill] sm:$0xff]  ;;  %v3931_v3 = vpack.c.bf16 %v3915_v1, %v3915_v1 }
 0x4eb   : > { %v15852_v6 = vpop.f32.mrf.mxu2  ;;  %3969 = vmatpush.bf16.msrb.mxu3 %v14533_v55  ;;  %v15855_v16 = vpop.f32.mrf.mxu1 }
 0x4ec   : > { %18975 = vst [vmem:[#allocation122_spill] sm:$0xff] %v15852_v6  ;;  %v3028_v47 = vpack.c.bf16 %v3010_v42, %v3010_v42  ;;  %v18984_v6 = vpack.c.b16 %v18982_v15, %v18983_v40  ;;  %v12632_v15 = vld [vmem:[%s18721_s0 + $0x238] sm:$0xff]  ;;  %v15889_v40 = vpop.f32.mrf.mxu0  ;;  %v4307_v2 = vunpack.c.l.b16 %v3931_v3 }
 0x4ed   : > { %5557 = vmatpush.bf16.msrb.mxu0 %v12632_v15  ;;  %v18992_v15 = vld [vmem:[#allocation48_spill] sm:$0xff] }
 0x4ee   : > { %v15859_v54 = vunpack.c.l.b16 %v3028_v47  ;;  %3715 = vmatmul.bf16.gmra.mxu3 %v18978_v44  ;;  %5237 = vmatmul.bf16.gmra.mxu1 %v18981_v5  ;;  %v18986_v47 = vld [vmem:[#allocation97_spill] sm:$0xff]  ;;  %v18989_v5 = vld [vmem:[#allocation71_spill] sm:$0xff] }
 0x4ef   : > { %3970 = vmatpush.bf16.msrb.mxu3 %v14299_v51  ;;  %v3788_v44 = vadd.f32 %v18986_v47, %v18985_v22  ;;  %v3917_v0 = vadd.f32 %v15635_v48, %v18989_v5  ;;  %v18991_v47 = vld [vmem:[#allocation65_spill] sm:$0xff]  ;;  %v15898_v5 = vunpack.c.l.b16 %v3802_v31 }
 0x4f0   : > { %18977 = vst [vmem:[#allocation42_spill] sm:$0xff] %v15859_v54  ;;  %5286 = vmatmul.bf16.gmra.mxu2 %v18984_v6 }
 0x4f1   : > { %v3012_v23 = vpop.f32.mrf.mxu3  ;;  %v3801_v33 = vpack.c.bf16 %v3788_v44, %v3788_v44  ;;  %v3932_v22 = vpack.c.bf16 %v3917_v0, %v3917_v0 }
 0x4f2   : > { %v3013_v48 = vadd.f32 %v3012_v23, %v18991_v47 }
 0x4f3   : > { %v15881_v4 = vpop.f32.mrf.mxu2  ;;  %5389 = vmatmul.bf16.gmra.mxu0 %v4313_v8  ;;  %3971 = vmatpush.bf16.msrb.mxu3 %v14240_v43  ;;  %v15884_v6 = vpop.f32.mrf.mxu1  ;;  %v12631_v8 = vld [vmem:[%s18721_s0 + $0x230] sm:$0xff]  ;;  %v15896_v34 = vunpack.c.l.b16 %v3801_v33  ;;  %v4308_v44 = vunpack.c.l.b16 %v3932_v22  ;;  %v12630_v33 = vld [vmem:[%s18721_s0 + $0x228] sm:$0xff]  ;;  %v18995_v22 = vld [vmem:[#allocation95_spill] sm:$0xff] }
 0x4f4   : > { %18990 = vst [vmem:[#allocation117_spill] sm:$0xff] %v15881_v4  ;;  %5558 = vmatpush.bf16.msrb.mxu0 %v12631_v8  ;;  %v3029_v49 = vpack.c.bf16 %v3013_v48, %v3013_v48  ;;  %v15909_v31 = vpop.f32.mrf.mxu0 }
 0x4f6   : > { %v15911_v8 = vunpack.c.l.b16 %v3029_v49  ;;  %v12629_v49 = vld [vmem:[%s18721_s0 + $0x220] sm:$0xff] }
 0x4f7   : > { %3972 = vmatpush.bf16.msrb.mxu3 %v14184_v52 }
 0x4f8   : > { %5559 = vmatpush.bf16.msrb.mxu0 %v12630_v33  ;;  %18994 = vst [vmem:[#allocation132_spill] sm:$0xff] %v15911_v8  ;;  %v12613_v8 = vld [vmem:[%s18721_s0 + $0x1a0] sm:$0xff] }
 0x4f9   : > { %v3014_v42 = vpop.f32.mrf.mxu3 }
 0x4fa   : > { %v3015_v1 = vadd.f32 %v3014_v42, %v18992_v15  ;;  %v4314_v42 = vpack.c.b16 %v4308_v44, %v4307_v2  ;;  %v18996_v15 = vpack.c.b16 %v15802_v9, %v15800_v25  ;;  %v18998_v2 = vld [vmem:[#allocation105_spill] sm:$0xff]  ;;  %v19000_v25 = vld [vmem:[#allocation72_spill] sm:$0xff] }
 0x4fb   : > { %v15901_v0 = vpop.f32.mrf.mxu2  ;;  %3973 = vmatpush.bf16.msrb.mxu3 %v14112_v56  ;;  %v15904_v23 = vpop.f32.mrf.mxu1  ;;  %v3920_v9 = vadd.f32 %v15658_v28, %v19000_v25  ;;  %v12627_v25 = vld [vmem:[%s18721_s0 + $0x210] sm:$0xff] }
 0x4fc   : > { %18993 = vst [vmem:[#allocation120_spill] sm:$0xff] %v15901_v0  ;;  %v3030_v47 = vpack.c.bf16 %v3015_v1, %v3015_v1  ;;  %v12616_v1 = vld [vmem:[%s18721_s0 + $0x1b8] sm:$0xff]  ;;  %5560 = vmatpush.bf16.msrb.mxu0 %v12629_v49 }
 0x4fd   : > { %5459 = vmatpush.bf16.msra.mxu2 %v12616_v1  ;;  %v3933_v28 = vpack.c.bf16 %v3920_v9, %v3920_v9 }
 0x4fe   : > { %v15913_v3 = vunpack.c.l.b16 %v3030_v47  ;;  %3720 = vmatmul.bf16.gmra.mxu3 %v18995_v22  ;;  %v18997_v47 = vld [vmem:[#allocation159_spill] sm:$0xff]  ;;  %v18999_v22 = vld [vmem:[#allocation62_spill] sm:$0xff] }
 0x4ff   : > { %v3793_v44 = vadd.f32 %v18998_v2, %v18997_v47  ;;  %v3795_v48 = vadd.f32 %v15501_v21, %v18999_v22  ;;  %v12615_v47 = vld [vmem:[%s18721_s0 + $0x1b0] sm:$0xff]  ;;  %v12628_v21 = vld [vmem:[%s18721_s0 + $0x218] sm:$0xff] }
 0x500   : > { %5291 = vmatmul.bf16.gmra.mxu2 %v18996_v15  ;;  %v19001_v15 = vld [vmem:[#allocation75_spill] sm:$0xff]  ;;  %5561 = vmatpush.bf16.msrb.mxu0 %v12628_v21 }
 0x501   : > { %v3017_v54 = vpop.f32.mrf.mxu3  ;;  %v3922_v0 = vadd.f32 %v15685_v59, %v19001_v15  ;;  %v3803_v1 = vpack.c.bf16 %v3793_v44, %v3793_v44  ;;  %v3804_v49 = vpack.c.bf16 %v3795_v48, %v3795_v48  ;;  %5460 = vmatpush.bf16.msra.mxu2 %v12615_v47  ;;  %v19003_v59 = vld [vmem:[#allocation150_spill] sm:$0xff]  ;;  %v15954_v15 = vpop.f32.mrf.mxu0  ;;  %v19004_v47 = vld [vmem:[#allocation52_spill] sm:$0xff] }
 0x502   : > { %v3018_v22 = vadd.f32 %v3017_v54, %v19003_v59 }
 0x503   : > { %v15937_v4 = vpop.f32.mrf.mxu2  ;;  %5394 = vmatmul.bf16.gmra.mxu0 %v4314_v42  ;;  %v15939_v12 = vpop.f32.mrf.mxu1  ;;  %v3934_v2 = vpack.c.bf16 %v3922_v0, %v3922_v0  ;;  %v12614_v42 = vld [vmem:[%s18721_s0 + $0x1a8] sm:$0xff]  ;;  %v15956_v33 = vunpack.c.l.b16 %v3803_v1  ;;  %v15958_v44 = vunpack.c.l.b16 %v3804_v49  ;;  %v4309_v0 = vunpack.c.l.b16 %v3933_v28 }
 0x504   : > { %19002 = vst [vmem:[#allocation127_spill] sm:$0xff] %v15937_v4  ;;  %5562 = vmatpush.bf16.msrb.mxu0 %v12627_v25  ;;  %v3031_v54 = vpack.c.bf16 %v3018_v22, %v3018_v22  ;;  %v12626_v1 = vld [vmem:[%s18721_s0 + $0x208] sm:$0xff] }
 0x505   : > { %5461 = vmatpush.bf16.msra.mxu2 %v12614_v42  ;;  %v4310_v9 = vunpack.c.l.b16 %v3934_v2  ;;  %v19007_v22 = vld [vmem:[#allocation104_spill] sm:$0xff]  ;;  %v4268_v25 = vpack.c.b16 %v15958_v44, %v15956_v33  ;;  %v19010_v44 = vld [vmem:[#allocation129_spill] sm:$0xff] }
 0x506   : > { %v15971_v28 = vunpack.c.l.b16 %v3031_v54  ;;  %v19013_v54 = vld [vmem:[#allocation56_spill] sm:$0xff] }
 0x507   : > { %v4315_v42 = vpack.c.b16 %v4310_v9, %v4309_v0  ;;  %v19009_v0 = vld [vmem:[#allocation77_spill] sm:$0xff] }
 0x508   : > { %5563 = vmatpush.bf16.msrb.mxu0 %v12626_v1  ;;  %19006 = vst [vmem:[#allocation46_spill] sm:$0xff] %v15971_v28  ;;  %v3925_v33 = vadd.f32 %v15699_v39, %v19009_v0  ;;  %v12610_v39 = vld [vmem:[%s18721_s0 + $0x188] sm:$0xff] }
 0x509   : > { %v3019_v48 = vpop.f32.mrf.mxu3  ;;  %5462 = vmatpush.bf16.msra.mxu2 %v12613_v8  ;;  %v12625_v8 = vld [vmem:[%s18721_s0 + $0x200] sm:$0xff] }
 0x50a   : > { %v3020_v21 = vadd.f32 %v3019_v48, %v19004_v47  ;;  %v19008_v48 = vpack.c.b16 %v15847_v26, %v15845_v46  ;;  %v12612_v47 = vld [vmem:[%s18721_s0 + $0x198] sm:$0xff]  ;;  %v3927_v46 = vadd.f32 %v15725_v35, %v19010_v44  ;;  %v15993_v26 = vpop.f32.mrf.mxu0 }
 0x50b   : > { %v15961_v59 = vpop.f32.mrf.mxu2  ;;  %v15963_v4 = vpop.f32.mrf.mxu1 }
 0x50c   : > { %19005 = vst [vmem:[#allocation130_spill] sm:$0xff] %v15961_v59  ;;  %v3032_v49 = vpack.c.bf16 %v3020_v21, %v3020_v21  ;;  %5564 = vmatpush.bf16.msrb.mxu0 %v12625_v8 }
 0x50d   : > { %5463 = vmatpush.bf16.msra.mxu2 %v12612_v47  ;;  %v19012_v47 = vld [vmem:[#allocation153_spill] sm:$0xff] }
 0x50e   : > { %v15973_v2 = vunpack.c.l.b16 %v3032_v49  ;;  %3725 = vmatmul.bf16.gmra.mxu3 %v19007_v22  ;;  %v12611_v49 = vld [vmem:[%s18721_s0 + $0x190] sm:$0xff]  ;;  %v3935_v22 = vpack.c.bf16 %v3925_v33, %v3925_v33  ;;  %v12609_v33 = vld [vmem:[%s18721_s0 + $0x180] sm:$0xff] }
 0x510   : > { %5296 = vmatmul.bf16.gmra.mxu2 %v19008_v48  ;;  %v3936_v48 = vpack.c.bf16 %v3927_v46, %v3927_v46  ;;  %v4311_v0 = vunpack.c.l.b16 %v3935_v22  ;;  %v19015_v22 = vld [vmem:[#allocation64_spill] sm:$0xff] }
 0x511   : > { %v3022_v21 = vpop.f32.mrf.mxu3  ;;  %5464 = vmatpush.bf16.msra.mxu2 %v12611_v49 }
 0x512   : > { %v3023_v8 = vadd.f32 %v3022_v21, %v19012_v47  ;;  %v4312_v44 = vunpack.c.l.b16 %v3936_v48  ;;  %v16014_v21 = vpop.f32.mrf.mxu0 }
 0x513   : > { %v15995_v9 = vpop.f32.mrf.mxu2  ;;  %5399 = vmatmul.bf16.gmra.mxu0 %v4315_v42  ;;  %v15997_v1 = vpop.f32.mrf.mxu1 }
 0x514   : > { %19011 = vst [vmem:[#allocation119_spill] sm:$0xff] %v15995_v9  ;;  %v3033_v42 = vpack.c.bf16 %v3023_v8, %v3023_v8  ;;  %v4316_v48 = vpack.c.b16 %v4312_v44, %v4311_v0  ;;  %v19021_v0 = vld [vmem:[#allocation162_spill] sm:$0xff]  ;;  %v19031_v8 = vld [vmem:[#allocation43_spill] sm:$0xff] }
 0x515   : > { %5465 = vmatpush.bf16.msra.mxu2 %v12610_v39 }
 0x516   : > { %v16016_v49 = vunpack.c.l.b16 %v3033_v42 }
 0x519   : > { %v3024_v35 = vpop.f32.mrf.mxu3  ;;  %5466 = vmatpush.bf16.msra.mxu2 %v12609_v33 }
 0x51a   : > { %v3025_v9 = vadd.f32 %v3024_v35, %v19013_v54  ;;  %v19016_v54 = vpack.c.b16 %v15898_v5, %v15896_v34  ;;  %v16034_v42 = vpop.f32.mrf.mxu0 }
 0x51b   : > { %v16007_v59 = vpop.f32.mrf.mxu2  ;;  %v16009_v28 = vpop.f32.mrf.mxu1 }
 0x51c   : > { %19014 = vst [vmem:[#allocation68_spill] sm:$0xff] %v16007_v59  ;;  %v3034_v46 = vpack.c.bf16 %v3025_v9, %v3025_v9 }
 0x51e   : > { %v16018_v47 = vunpack.c.l.b16 %v3034_v46  ;;  %3842 = vmatmul.bf16.vlgmr.msra.gmra.mxu3 %v19015_v22  ;;  %v19025_v46 = vld [vmem:[#allocation54_spill] sm:$0xff] }
 0x51f   : > { %4098 = vmatpush.bf16.msra.mxu3 %v14500_v53 }
 0x520   : > { %5301 = vmatmul.bf16.gmra.mxu2 %v19016_v54 }
 0x521   : > { %v16027_v39 = vpop.f32.mrf.mxu3 }
 0x522   : > { %19017 = vst [vmem:[#allocation123_spill] sm:$0xff] %v16027_v39 }
 0x523   : > { %v16029_v9 = vpop.f32.mrf.mxu2  ;;  %5404 = vmatmul.bf16.gmra.mxu0 %v4316_v48  ;;  %4099 = vmatpush.bf16.msra.mxu3 %v14507_v61  ;;  %v16032_v35 = vpop.f32.mrf.mxu1  ;;  %v16061_v48 = vld [vmem:[%s18480_s26 + $0x1] ss:$0 sm:$0xff] }
 0x524   : > { %19018 = vst [vmem:[#allocation125_spill] sm:$0xff] %v16029_v9  ;;  %v16046_v61 = vpop.f32.mrf.mxu0 }
 0x527   : > { %4100 = vmatpush.bf16.msra.mxu3 %v14522_v13  ;;  %v19024_v13 = vld [vmem:[#allocation60_spill] sm:$0xff] }
 0x528   : > { %v19026_v22 = vpack.c.b16 %v19024_v13, %v19025_v46  ;;  %v19029_v46 = vld [vmem:[#allocation168_spill] sm:$0xff] }
 0x529   : > { %v16037_v53 = vpop.f32.mrf.mxu3 }
 0x52a   : > { %19019 = vst [vmem:[#allocation135_spill] sm:$0xff] %v16037_v53 }
 0x52b   : > { %v16039_v34 = vpop.f32.mrf.mxu2  ;;  %4101 = vmatpush.bf16.msra.mxu3 %v14533_v55  ;;  %v16042_v5 = vpop.f32.mrf.mxu1 }
 0x52c   : > { %19020 = vst [vmem:[#allocation134_spill] sm:$0xff] %v16039_v34  ;;  %v16068_v54 = vpop.f32.mrf.mxu0 }
 0x52e   : > { %3847 = vmatmul.bf16.gmra.mxu3 %v19021_v0 }
 0x52f   : > { %4102 = vmatpush.bf16.msra.mxu3 %v14299_v51 }
 0x530   : > { %5306 = vmatmul.bf16.gmra.mxu2 %v4268_v25  ;;  %v5175_v25 = vadd.f32 %v16061_v48, %v15771_v58  ;;  %v19034_v58 = vpack.c.b16 %v15645_v11, %v15643_v50 }
 0x531   : > { %v16048_v44 = vpop.f32.mrf.mxu3 }
 0x532   : > { %19022 = vst [vmem:[#allocation128_spill] sm:$0xff] %v16048_v44 }
 0x533   : > { %v16050_v33 = vpop.f32.mrf.mxu2  ;;  %5565 = vmatmul.bf16.vlgmr.msrb.gmra.mxu0 %v19026_v22  ;;  %4103 = vmatpush.bf16.msra.mxu3 %v14240_v43  ;;  %v16056_v55 = vpop.f32.mrf.mxu1  ;;  %v19030_v22 = vld [vmem:[#allocation141_spill] sm:$0xff] }
 0x534   : > { %19023 = vst [vmem:[#allocation131_spill] sm:$0xff] %v16050_v33  ;;  %v19032_v33 = vpack.c.b16 %v19030_v22, %v19031_v8  ;;  %v16084_v59 = vpop.f32.mrf.mxu0  ;;  %v5180_v8 = vadd.f32 %v16061_v48, %v15823_v30 }
 0x537   : > { %4104 = vmatpush.bf16.msra.mxu3 %v14184_v52 }
 0x539   : > { %v16064_v51 = vpop.f32.mrf.mxu3 }
 0x53a   : > { %19027 = vst [vmem:[#allocation140_spill] sm:$0xff] %v16064_v51 }
 0x53b   : > { %v16070_v0 = vpop.f32.mrf.mxu2  ;;  %4105 = vmatpush.bf16.msra.mxu3 %v14112_v56  ;;  %v5223_v43 = vpop.f32.mrf.mxu1  ;;  %v5177_v56 = vadd.f32 %v16061_v48, %v15797_v36 }
 0x53c   : > { %19028 = vst [vmem:[#allocation139_spill] sm:$0xff] %v16070_v0  ;;  %v5224_v13 = vadd.f32 %v5223_v43, %v5175_v25  ;;  %v16094_v11 = vpop.f32.mrf.mxu0 }
 0x53e   : > { %3852 = vmatmul.bf16.gmra.mxu3 %v19029_v46 }
 0x540   : > { %5467 = vmatmul.bf16.vlgmr.msra.gmra.mxu2 %v19032_v33 }
 0x541   : > { %v16077_v52 = vpop.f32.mrf.mxu3 }
 0x542   : > { %19033 = vst [vmem:[#allocation57_spill] sm:$0xff] %v16077_v52 }
 0x543   : > { %v5272_v34 = vpop.f32.mrf.mxu2  ;;  %5570 = vmatmul.bf16.gmra.mxu0 %v19034_v58  ;;  %v5225_v0 = vpop.f32.mrf.mxu1  ;;  %v19038_v58 = vld [vmem:[#allocation102_spill] sm:$0xff] }
 0x544   : > { %v16082_v9 = vadd.f32 %v5272_v34, %v5224_v13  ;;  %v5226_v25 = vadd.f32 %v5225_v0, %v5177_v56  ;;  %v19036_v34 = vld [vmem:[#allocation171_spill] sm:$0xff]  ;;  %v19041_v56 = vpack.c.b16 %v15692_v29, %v15690_v57  ;;  %v19043_v29 = vld [vmem:[#allocation172_spill] sm:$0xff] }
 0x545   : > { %v19037_v13 = vld [vmem:[#allocation103_spill] sm:$0xff] }
 0x546   : > { %v19039_v52 = vpack.c.b16 %v19037_v13, %v19038_v58 }
 0x549   : > { %v16088_v43 = vpop.f32.mrf.mxu3 }
 0x54a   : > { %19035 = vst [vmem:[#allocation55_spill] sm:$0xff] %v16088_v43 }
 0x54b   : > { %v5274_v33 = vpop.f32.mrf.mxu2  ;;  %v5228_v22 = vpop.f32.mrf.mxu1 }
 0x54c   : > { %v16092_v46 = vadd.f32 %v5274_v33, %v5226_v25  ;;  %v5229_v50 = vadd.f32 %v5228_v22, %v5180_v8  ;;  %v5182_v8 = vadd.f32 %v16061_v48, %v15849_v38  ;;  %v16109_v33 = vpop.f32.mrf.mxu0  ;;  %v19047_v38 = vpack.c.b16 %v15456_v37, %v15454_v27  ;;  %v19054_v27 = vld [vmem:[#allocation26_spill] sm:$0xff] }
 0x54d   : > { %v5187_v37 = vadd.f32 %v16061_v48, %v15909_v31 }
 0x54e   : > { %3857 = vmatmul.bf16.gmra.mxu3 %v19036_v34 }
 0x550   : > { %5472 = vmatmul.bf16.gmra.mxu2 %v19039_v52  ;;  %v5185_v52 = vadd.f32 %v16061_v48, %v15889_v40  ;;  %v19049_v40 = vpack.c.b16 %v15730_v41, %v15728_v63  ;;  %v5190_v63 = vadd.f32 %v16061_v48, %v15954_v15 }
 0x551   : > { %v16100_v36 = vpop.f32.mrf.mxu3 }
 0x552   : > { %19040 = vst [vmem:[#allocation137_spill] sm:$0xff] %v16100_v36 }
 0x553   : > { %v5277_v0 = vpop.f32.mrf.mxu2  ;;  %5575 = vmatmul.bf16.gmra.mxu0 %v19041_v56  ;;  %v5230_v25 = vpop.f32.mrf.mxu1 }
 0x554   : > { %v16105_v30 = vadd.f32 %v5277_v0, %v5229_v50  ;;  %v5231_v22 = vadd.f32 %v5230_v25, %v5182_v8  ;;  %v19044_v50 = vld [vmem:[#allocation12_spill] sm:$0xff]  ;;  %v19045_v0 = vld [vmem:[#allocation13_spill] sm:$0xff]  ;;  %v16124_v8 = vpop.f32.mrf.mxu0 }
 0x555   : > { %v19046_v56 = vpack.c.b16 %v19044_v50, %v19045_v0  ;;  %19048 = vst [vmem:[#allocation81_spill] sm:$0xff] %v16124_v8  ;;  %v19053_v50 = vld [vmem:[#allocation69_spill] sm:$0xff] }
 0x559   : > { %v16111_v34 = vpop.f32.mrf.mxu3 }
 0x55a   : > { %19042 = vst [vmem:[#allocation41_spill] sm:$0xff] %v16111_v34 }
 0x55b   : > { %v5279_v13 = vpop.f32.mrf.mxu2  ;;  %v5233_v36 = vpop.f32.mrf.mxu1 }
 0x55c   : > { %v16115_v58 = vadd.f32 %v5279_v13, %v5231_v22  ;;  %v5234_v57 = vadd.f32 %v5233_v36, %v5185_v52  ;;  %v19050_v22 = vld [vmem:[#allocation21_spill] sm:$0xff]  ;;  %v19051_v36 = vld [vmem:[#allocation22_spill] sm:$0xff] }
 0x55d   : > { %v19052_v52 = vpack.c.b16 %v19050_v22, %v19051_v36  ;;  %v19059_v36 = vld [vmem:[#allocation31_spill] sm:$0xff] }
 0x55e   : > { %3974 = vmatmul.bf16.vlgmr.msrb.gmra.mxu3 %v19043_v29 }
 0x55f   : > { %4542 = vmatpush.bf16.msrb.mxu3 %v19046_v56  ;;  %v19055_v56 = vld [vmem:[#allocation138_spill] sm:$0xff] }
 0x560   : > { %5477 = vmatmul.bf16.gmra.mxu2 %v19047_v38  ;;  %v19056_v38 = vpack.c.b16 %v19054_v27, %v19055_v56 }
 0x561   : > { %v3711_v25 = vpop.f32.mrf.mxu3 }
 0x562   : > { %v3712_v0 = vadd.f32 %v3711_v25, %v19053_v50 }
 0x563   : > { %v5282_v34 = vpop.f32.mrf.mxu2  ;;  %5580 = vmatmul.bf16.gmra.mxu0 %v19049_v40  ;;  %4543 = vmatpush.bf16.msrb.mxu3 %v19052_v52  ;;  %v5235_v29 = vpop.f32.mrf.mxu1  ;;  %v19057_v40 = vld [vmem:[#allocation170_spill] sm:$0xff] }
 0x564   : > { %v16132_v13 = vadd.f32 %v5282_v34, %v5234_v57  ;;  %v5236_v43 = vadd.f32 %v5235_v29, %v5187_v37  ;;  %v3731_v41 = vpack.c.bf16 %v3712_v0, %v3712_v0  ;;  %v19058_v57 = vld [vmem:[#allocation29_spill] sm:$0xff]  ;;  %v19061_v29 = vld [vmem:[#allocation84_spill] sm:$0xff] }
 0x565   : > { %v19060_v52 = vpack.c.b16 %v19058_v57, %v19059_v36  ;;  %v19062_v37 = vld [vmem:[#allocation37_spill] sm:$0xff] }
 0x566   : > { %v4233_v27 = vunpack.c.l.b16 %v3731_v41  ;;  %v19066_v41 = vld [vmem:[#allocation86_spill] sm:$0xff]  ;;  %v19069_v36 = vld [vmem:[#allocation73_spill] sm:$0xff] }
 0x567   : > { %4544 = vmatpush.bf16.msrb.mxu3 %v19056_v38  ;;  %v19063_v38 = vld [vmem:[#allocation38_spill] sm:$0xff] }
 0x568   : > { %v19064_v15 = vpack.c.b16 %v19062_v37, %v19063_v38  ;;  %v19072_v37 = vld [vmem:[#allocation80_spill] sm:$0xff] }
 0x569   : > { %v3713_v51 = vpop.f32.mrf.mxu3 }
 0x56a   : > { %v3714_v22 = vadd.f32 %v3713_v51, %v19057_v40  ;;  %v19065_v51 = vpack.c.b16 %v15508_v7, %v15506_v18  ;;  %v12607_v18 = vld [vmem:[%s18721_s0 + $0x170] sm:$0xff]  ;;  %v19070_v7 = vld [vmem:[#allocation35_spill] sm:$0xff] }
 0x56b   : > { %v5284_v34 = vpop.f32.mrf.mxu2  ;;  %4545 = vmatpush.bf16.msrb.mxu3 %v19060_v52  ;;  %v5238_v31 = vpop.f32.mrf.mxu1 }
 0x56c   : > { %v16146_v25 = vadd.f32 %v5284_v34, %v5236_v43  ;;  %v3732_v50 = vpack.c.bf16 %v3714_v22, %v3714_v22  ;;  %v5239_v44 = vadd.f32 %v5238_v31, %v5190_v63  ;;  %v12608_v63 = vld [vmem:[%s18721_s0 + $0x178] sm:$0xff]  ;;  %v19067_v22 = vld [vmem:[#allocation76_spill] sm:$0xff] }
 0x56d   : > { %v19068_v34 = vpack.c.b16 %v19066_v41, %v19067_v22  ;;  %5410 = vmatpush.bf16.msra.mxu1 %v12608_v63  ;;  %v19076_v22 = vld [vmem:[#allocation166_spill] sm:$0xff] }
 0x56e   : > { %v4234_v56 = vunpack.c.l.b16 %v3732_v50  ;;  %3979 = vmatmul.bf16.gmra.mxu3 %v19061_v29  ;;  %v4042_v50 = vadd.f32 %v15739_v10, %v19070_v7  ;;  %v5192_v29 = vadd.f32 %v16061_v48, %v15993_v26  ;;  %v12606_v10 = vld [vmem:[%s18721_s0 + $0x168] sm:$0xff] }
 0x56f   : > { %4546 = vmatpush.bf16.msrb.mxu3 %v19064_v15 }
 0x570   : > { %5482 = vmatmul.bf16.gmra.mxu2 %v19065_v51  ;;  %v4241_v0 = vpack.c.b16 %v4234_v56, %v4233_v27  ;;  %v19071_v27 = vld [vmem:[#allocation32_spill] sm:$0xff]  ;;  %v4061_v41 = vpack.c.bf16 %v4042_v50, %v4042_v50 }
 0x571   : > { %v3716_v40 = vpop.f32.mrf.mxu3  ;;  %v4044_v56 = vadd.f32 %v15763_v17, %v19071_v27  ;;  %5411 = vmatpush.bf16.msra.mxu1 %v12607_v18  ;;  %v12605_v27 = vld [vmem:[%s18721_s0 + $0x160] sm:$0xff] }
 0x572   : > { %5242 = vmatmul.bf16.gmra.mxu1 %v4241_v0  ;;  %v3717_v52 = vadd.f32 %v3716_v40, %v19069_v36  ;;  %v19075_v40 = vld [vmem:[#allocation89_spill] sm:$0xff] }
 0x573   : > { %v5287_v43 = vpop.f32.mrf.mxu2  ;;  %4547 = vmatpush.bf16.msrb.mxu3 %v19068_v34  ;;  %v5240_v31 = vpop.f32.mrf.mxu1  ;;  %v4062_v17 = vpack.c.bf16 %v4044_v56, %v4044_v56  ;;  %v19077_v34 = vld [vmem:[#allocation165_spill] sm:$0xff] }
 0x574   : > { %v16161_v57 = vadd.f32 %v5287_v43, %v5239_v44  ;;  %v19073_v44 = vld [vmem:[#allocation78_spill] sm:$0xff]  ;;  %v5241_v15 = vadd.f32 %v5240_v31, %v5192_v29  ;;  %v3733_v0 = vpack.c.bf16 %v3717_v52, %v3717_v52  ;;  %v19078_v26 = vpack.c.b16 %v19076_v22, %v19077_v34  ;;  %v19079_v52 = vld [vmem:[#allocation85_spill] sm:$0xff]  ;;  %v19083_v22 = vld [vmem:[#allocation83_spill] sm:$0xff] }
 0x575   : > { %v19074_v38 = vpack.c.b16 %v19072_v37, %v19073_v44  ;;  %5412 = vmatpush.bf16.msra.mxu1 %v12606_v10  ;;  %v4353_v29 = vunpack.c.l.b16 %v4061_v41  ;;  %v4354_v37 = vunpack.c.l.b16 %v4062_v17  ;;  %v12604_v44 = vld [vmem:[%s18721_s0 + $0x158] sm:$0xff] }
 0x576   : > { %v4235_v31 = vunpack.c.l.b16 %v3733_v0  ;;  %v12603_v0 = vld [vmem:[%s18721_s0 + $0x150] sm:$0xff] }
 0x577   : > { %4548 = vmatpush.bf16.msrb.mxu3 %v19074_v38  ;;  %v4361_v38 = vpack.c.b16 %v4354_v37, %v4353_v29  ;;  %v19084_v29 = vld [vmem:[#allocation93_spill] sm:$0xff] }
 0x579   : > { %v3718_v51 = vpop.f32.mrf.mxu3  ;;  %5413 = vmatpush.bf16.msra.mxu1 %v12605_v27 }
 0x57a   : > { %v3719_v43 = vadd.f32 %v3718_v51, %v19075_v40  ;;  %v19081_v40 = vld [vmem:[#allocation133_spill] sm:$0xff] }
 0x57b   : > { %v5289_v63 = vpop.f32.mrf.mxu2  ;;  %4549 = vmatpush.bf16.msrb.mxu3 %v19078_v26  ;;  %v12602_v26 = vld [vmem:[%s18721_s0 + $0x148] sm:$0xff] }
 0x57c   : > { %v16183_v36 = vadd.f32 %v5289_v63, %v5241_v15  ;;  %v3734_v7 = vpack.c.bf16 %v3719_v43, %v3719_v43  ;;  %v19080_v15 = vld [vmem:[#allocation79_spill] sm:$0xff]  ;;  %v4047_v43 = vadd.f32 %v15769_v19, %v19081_v40  ;;  %v19082_v63 = vld [vmem:[#allocation25_spill] sm:$0xff]  ;;  %v19087_v40 = vld [vmem:[#allocation98_spill] sm:$0xff] }
 0x57d   : > { %5414 = vmatpush.bf16.msra.mxu1 %v12604_v44  ;;  %v4049_v10 = vadd.f32 %v15795_v32, %v19082_v63  ;;  %v12601_v19 = vld [vmem:[%s18721_s0 + $0x140] sm:$0xff] }
 0x57e   : > { %v4236_v18 = vunpack.c.l.b16 %v3734_v7  ;;  %3984 = vmatmul.bf16.gmra.mxu3 %v19079_v52  ;;  %v4063_v7 = vpack.c.bf16 %v4047_v43, %v4047_v43  ;;  %v4054_v43 = vadd.f32 %v15841_v14, %v19087_v40 }
 0x580   : > { %v4242_v50 = vpack.c.b16 %v4236_v18, %v4235_v31  ;;  %5487 = vmatmul.bf16.gmra.mxu2 %v4361_v38  ;;  %v4064_v31 = vpack.c.bf16 %v4049_v10, %v4049_v10  ;;  %v4355_v32 = vunpack.c.l.b16 %v4063_v7  ;;  %v19085_v38 = vld [vmem:[#allocation34_spill] sm:$0xff] }
 0x581   : > { %v3721_v56 = vpop.f32.mrf.mxu3  ;;  %5415 = vmatpush.bf16.msra.mxu1 %v12603_v0 }
 0x582   : > { %5247 = vmatmul.bf16.gmra.mxu1 %v4242_v50  ;;  %v3722_v51 = vadd.f32 %v3721_v56, %v19080_v15  ;;  %v4356_v37 = vunpack.c.l.b16 %v4064_v31 }
 0x584   : > { %v3735_v17 = vpack.c.bf16 %v3722_v51, %v3722_v51  ;;  %v4362_v44 = vpack.c.b16 %v4356_v37, %v4355_v32  ;;  %v19086_v51 = vld [vmem:[#allocation23_spill] sm:$0xff] }
 0x585   : > { %5416 = vmatpush.bf16.msra.mxu1 %v12602_v26  ;;  %v4052_v0 = vadd.f32 %v15807_v62, %v19086_v51  ;;  %v19090_v32 = vld [vmem:[#allocation87_spill] sm:$0xff] }
 0x586   : > { %v4237_v52 = vunpack.c.l.b16 %v3735_v17  ;;  %v19091_v37 = vld [vmem:[#allocation99_spill] sm:$0xff] }
 0x589   : > { %v3723_v41 = vpop.f32.mrf.mxu3  ;;  %5417 = vmatpush.bf16.msra.mxu1 %v12601_v19 }
 0x58a   : > { %v3724_v34 = vadd.f32 %v3723_v41, %v19083_v22  ;;  %v19088_v41 = vld [vmem:[#allocation28_spill] sm:$0xff]  ;;  %v4065_v22 = vpack.c.bf16 %v4052_v0, %v4052_v0 }
 0x58c   : > { %v3736_v18 = vpack.c.bf16 %v3724_v34, %v3724_v34  ;;  %v4066_v34 = vpack.c.bf16 %v4054_v43, %v4054_v43 }
 0x58e   : > { %v4238_v27 = vunpack.c.l.b16 %v3736_v18  ;;  %3989 = vmatmul.bf16.gmra.mxu3 %v19084_v29  ;;  %v19089_v18 = vld [vmem:[#allocation19_spill] sm:$0xff] }
 0x590   : > { %v4243_v50 = vpack.c.b16 %v4238_v27, %v4237_v52  ;;  %5492 = vmatmul.bf16.gmra.mxu2 %v4362_v44  ;;  %v4357_v52 = vunpack.c.l.b16 %v4065_v22  ;;  %v4358_v27 = vunpack.c.l.b16 %v4066_v34  ;;  %v16226_v34 = vpop.f32.mrf.mxu0 }
 0x591   : > { %v3726_v56 = vpop.f32.mrf.mxu3 }
 0x592   : > { %5252 = vmatmul.bf16.gmra.mxu1 %v4243_v50  ;;  %v3727_v15 = vadd.f32 %v3726_v56, %v19085_v38  ;;  %v4363_v62 = vpack.c.b16 %v4358_v27, %v4357_v52  ;;  %v4057_v50 = vadd.f32 %v15855_v16, %v19091_v37  ;;  %v4059_v56 = vadd.f32 %v15884_v6, %v15495_v45  ;;  %v19096_v52 = vld [vmem:[#allocation16_spill] sm:$0xff] }
 0x593   : > { %v19094_v6 = vpack.c.b16 %v15707_v20, %v15705_v24  ;;  %v4176_v27 = vadd.f32 %v15939_v12, %v19096_v52 }
 0x594   : > { %v3737_v10 = vpack.c.bf16 %v3727_v15, %v3727_v15  ;;  %v19092_v15 = vld [vmem:[#allocation91_spill] sm:$0xff]  ;;  %v4067_v0 = vpack.c.bf16 %v4057_v50, %v4057_v50  ;;  %v4068_v40 = vpack.c.bf16 %v4059_v56, %v4059_v56 }
 0x595   : > { %v4194_v50 = vpack.c.bf16 %v4176_v27, %v4176_v27 }
 0x596   : > { %v4239_v7 = vunpack.c.l.b16 %v3737_v10  ;;  %v4360_v22 = vunpack.c.l.b16 %v4068_v40 }
 0x599   : > { %v3728_v63 = vpop.f32.mrf.mxu3 }
 0x59a   : > { %v3729_v17 = vadd.f32 %v3728_v63, %v19088_v41  ;;  %v19093_v41 = vld [vmem:[#allocation111_spill] sm:$0xff] }
 0x59c   : > { %v3738_v26 = vpack.c.bf16 %v3729_v17, %v3729_v17  ;;  %v4359_v17 = vunpack.c.l.b16 %v4067_v0 }
 0x59e   : > { %v4240_v31 = vunpack.c.l.b16 %v3738_v26  ;;  %4106 = vmatmul.bf16.vlgmr.msra.gmra.mxu3 %v19089_v18  ;;  %v4364_v26 = vpack.c.b16 %v4360_v22, %v4359_v17  ;;  %v4174_v18 = vadd.f32 %v15904_v23, %v15533_v60  ;;  %v4402_v60 = vunpack.c.l.b16 %v4194_v50  ;;  %v19103_v22 = vld [vmem:[#allocation151_spill] sm:$0xff]  ;;  %v19106_v50 = vld [vmem:[#allocation109_spill] sm:$0xff] }
 0x5a0   : > { %v4244_v29 = vpack.c.b16 %v4240_v31, %v4239_v7  ;;  %5497 = vmatmul.bf16.gmra.mxu2 %v4363_v62  ;;  %v19095_v7 = vld [vmem:[#allocation92_spill] sm:$0xff]  ;;  %v4193_v37 = vpack.c.bf16 %v4174_v18, %v4174_v18  ;;  %v19105_v18 = vld [vmem:[#allocation110_spill] sm:$0xff] }
 0x5a1   : > { %v3843_v19 = vpop.f32.mrf.mxu3 }
 0x5a2   : > { %5257 = vmatmul.bf16.gmra.mxu1 %v4244_v29  ;;  %v3844_v14 = vadd.f32 %v3843_v19, %v19090_v32  ;;  %v16238_v29 = vpop.f32.mrf.mxu0  ;;  %v19097_v32 = vld [vmem:[#allocation20_spill] sm:$0xff] }
 0x5a4   : > { %v3863_v38 = vpack.c.bf16 %v3844_v14, %v3844_v14 }
 0x5a6   : > { %v16221_v63 = vunpack.c.l.b16 %v3863_v38  ;;  %v4401_v38 = vunpack.c.l.b16 %v4193_v37 }
 0x5a9   : > { %v3845_v44 = vpop.f32.mrf.mxu3 }
 0x5aa   : > { %v3846_v51 = vadd.f32 %v3845_v44, %v19092_v15  ;;  %v19098_v44 = vld [vmem:[#allocation106_spill] sm:$0xff]  ;;  %v16251_v40 = vpop.f32.mrf.mxu0 }
 0x5ab   : > { %v19099_v15 = vld [vmem:[#allocation14_spill] sm:$0xff] }
 0x5ac   : > { %v3864_v43 = vpack.c.bf16 %v3846_v51, %v3846_v51  ;;  %v19100_v51 = vld [vmem:[#allocation44_spill] sm:$0xff] }
 0x5ad   : > { %v19101_v0 = vpack.c.b16 %v19099_v15, %v19100_v51  ;;  %v19110_v51 = vld [vmem:[#allocation27_spill] sm:$0xff] }
 0x5ae   : > { %v16223_v10 = vunpack.c.l.b16 %v3864_v43  ;;  %4111 = vmatmul.bf16.gmra.mxu3 %v19093_v41  ;;  %v4409_v43 = vpack.c.b16 %v4402_v60, %v4401_v38  ;;  %v19102_v41 = vld [vmem:[#allocation100_spill] sm:$0xff]  ;;  %v19107_v38 = vld [vmem:[#allocation67_spill] sm:$0xff]  ;;  %v19108_v60 = vld [vmem:[#allocation121_spill] sm:$0xff] }
 0x5b0   : > { %v4289_v45 = vpack.c.b16 %v16223_v10, %v16221_v63  ;;  %5502 = vmatmul.bf16.gmra.mxu2 %v4364_v26  ;;  %5585 = vmatmul.bf16.gmra.mxu0 %v4409_v43  ;;  %v19111_v43 = vld [vmem:[#allocation15_spill] sm:$0xff]  ;;  %v12622_v63 = vld [vmem:[%s18721_s0 + $0x1e8] sm:$0xff] }
 0x5b1   : > { %v3848_v16 = vpop.f32.mrf.mxu3 }
 0x5b2   : > { %5418 = vmatmul.bf16.vlgmr.msra.gmra.mxu1 %v19094_v6  ;;  %v3849_v31 = vadd.f32 %v3848_v16, %v19095_v7  ;;  %v4179_v16 = vadd.f32 %v15963_v4, %v19103_v22  ;;  %v19104_v6 = vld [vmem:[#allocation136_spill] sm:$0xff] }
 0x5b3   : > { %v4181_v26 = vadd.f32 %v15997_v1, %v19104_v6 }
 0x5b4   : > { %v3865_v62 = vpack.c.bf16 %v3849_v31, %v3849_v31  ;;  %v4195_v27 = vpack.c.bf16 %v4179_v16, %v4179_v16 }
 0x5b6   : > { %v16241_v20 = vunpack.c.l.b16 %v3865_v62 }
 0x5b9   : > { %v3850_v19 = vpop.f32.mrf.mxu3 }
 0x5ba   : > { %v3851_v14 = vadd.f32 %v3850_v19, %v19097_v32  ;;  %v4196_v19 = vpack.c.bf16 %v4181_v26, %v4181_v26  ;;  %v16259_v32 = vpop.f32.mrf.mxu0 }
 0x5bc   : > { %v3866_v24 = vpack.c.bf16 %v3851_v14, %v3851_v14  ;;  %v4404_v4 = vunpack.c.l.b16 %v4196_v19 }
 0x5be   : > { %v16243_v56 = vunpack.c.l.b16 %v3866_v24  ;;  %4116 = vmatmul.bf16.gmra.mxu3 %v19098_v44  ;;  %v4403_v24 = vunpack.c.l.b16 %v4195_v27 }
 0x5c0   : > { %v4410_v15 = vpack.c.b16 %v4404_v4, %v4403_v24 }
 0x5c1   : > { %v3853_v23 = vpop.f32.mrf.mxu3 }
 0x5c2   : > { %5423 = vmatmul.bf16.gmra.mxu1 %v19101_v0  ;;  %v3854_v17 = vadd.f32 %v3853_v23, %v19102_v41  ;;  %v19109_v23 = vpack.c.b16 %v19107_v38, %v19108_v60  ;;  %5590 = vmatmul.bf16.gmra.mxu0 %v4410_v15  ;;  %v4184_v41 = vadd.f32 %v16009_v28, %v19111_v43  ;;  %v16276_v16 = vpop.f32.mrf.mxu0  ;;  %v12592_v28 = vld [vmem:[%s18721_s0 + $0xf8] sm:$0xff]  ;;  %v19118_v43 = vld [vmem:[#allocation116_spill] sm:$0xff] }
 0x5c3   : > { %5312 = vmatpush.bf16.msra.mxu3 %v12592_v28  ;;  %v19115_v60 = vld [vmem:[#allocation51_spill] sm:$0xff] }
 0x5c4   : > { %v3867_v31 = vpack.c.bf16 %v3854_v17, %v3854_v17  ;;  %v19112_v17 = vld [vmem:[#allocation33_spill] sm:$0xff] }
 0x5c5   : > { %v4186_v22 = vadd.f32 %v16032_v35, %v19112_v17  ;;  %v12590_v17 = vld [vmem:[%s18721_s0 + $0xe8] sm:$0xff] }
 0x5c6   : > { %v16261_v14 = vunpack.c.l.b16 %v3867_v31 }
 0x5c9   : > { %v3855_v7 = vpop.f32.mrf.mxu3 }
 0x5ca   : > { %v3856_v52 = vadd.f32 %v3855_v7, %v19105_v18  ;;  %v19113_v7 = vld [vmem:[#allocation146_spill] sm:$0xff]  ;;  %v4197_v18 = vpack.c.bf16 %v4184_v41, %v4184_v41 }
 0x5cc   : > { %v3868_v62 = vpack.c.bf16 %v3856_v52, %v3856_v52  ;;  %v4198_v52 = vpack.c.bf16 %v4186_v22, %v4186_v22  ;;  %v4405_v35 = vunpack.c.l.b16 %v4197_v18  ;;  %v19119_v22 = vld [vmem:[#allocation18_spill] sm:$0xff] }
 0x5ce   : > { %v16263_v37 = vunpack.c.l.b16 %v3868_v62  ;;  %4121 = vmatmul.bf16.gmra.mxu3 %v19106_v50  ;;  %v19114_v50 = vld [vmem:[#allocation70_spill] sm:$0xff]  ;;  %v4406_v24 = vunpack.c.l.b16 %v4198_v52  ;;  %v19121_v52 = vld [vmem:[#allocation112_spill] sm:$0xff] }
 0x5d1   : > { %v3858_v44 = vpop.f32.mrf.mxu3 }
 0x5d2   : > { %5428 = vmatmul.bf16.gmra.mxu1 %v19109_v23  ;;  %v3859_v0 = vadd.f32 %v3858_v44, %v19110_v51  ;;  %v16289_v44 = vpop.f32.mrf.mxu0  ;;  %v19116_v23 = vld [vmem:[#allocation53_spill] sm:$0xff] }
 0x5d3   : > { %v19117_v15 = vpack.c.b16 %v19115_v60, %v19116_v23  ;;  %v12591_v51 = vld [vmem:[%s18721_s0 + $0xf0] sm:$0xff] }
 0x5d4   : > { %v3869_v26 = vpack.c.bf16 %v3859_v0, %v3859_v0  ;;  %v4411_v0 = vpack.c.b16 %v4406_v24, %v4405_v35  ;;  %5313 = vmatpush.bf16.msra.mxu3 %v12591_v51  ;;  %v19122_v23 = vld [vmem:[#allocation74_spill] sm:$0xff] }
 0x5d6   : > { %v16279_v19 = vunpack.c.l.b16 %v3869_v26  ;;  %5595 = vmatmul.bf16.gmra.mxu0 %v4411_v0  ;;  %v19120_v26 = vld [vmem:[#allocation36_spill] sm:$0xff] }
 0x5d8   : > { %5314 = vmatpush.bf16.msra.mxu3 %v12590_v17 }
 0x5d9   : > { %v3860_v6 = vpop.f32.mrf.mxu3 }
 0x5da   : > { %v3861_v31 = vadd.f32 %v3860_v6, %v19113_v7  ;;  %v4189_v6 = vadd.f32 %v16042_v5, %v19119_v22  ;;  %v4191_v7 = vadd.f32 %v16056_v55, %v19120_v26  ;;  %v16309_v24 = vpop.f32.mrf.mxu0  ;;  %v5195_v5 = vadd.f32 %v16061_v48, %v16014_v21  ;;  %v12587_v21 = vld [vmem:[%s18721_s0 + $0xd0] sm:$0xff] }
 0x5dc   : > { %v3870_v27 = vpack.c.bf16 %v3861_v31, %v3861_v31  ;;  %v4199_v28 = vpack.c.bf16 %v4189_v6, %v4189_v6  ;;  %v4200_v35 = vpack.c.bf16 %v4191_v7, %v4191_v7  ;;  %v19123_v7 = vld [vmem:[#allocation113_spill] sm:$0xff] }
 0x5de   : > { %v16281_v62 = vunpack.c.l.b16 %v3870_v27  ;;  %4550 = vmatmul.bf16.vlgmr.msrb.gmra.mxu3 %v19114_v50  ;;  %v12589_v50 = vld [vmem:[%s18721_s0 + $0xe0] sm:$0xff]  ;;  %v4407_v51 = vunpack.c.l.b16 %v4199_v28  ;;  %v4408_v0 = vunpack.c.l.b16 %v4200_v35 }
 0x5df   : > { %5315 = vmatpush.bf16.msra.mxu3 %v12589_v50  ;;  %v19124_v28 = vld [vmem:[#allocation40_spill] sm:$0xff] }
 0x5e0   : > { %v4412_v6 = vpack.c.b16 %v4408_v0, %v4407_v51 }
 0x5e1   : > { %v3975_v38 = vpop.f32.mrf.mxu3 }
 0x5e2   : > { %5433 = vmatmul.bf16.gmra.mxu1 %v19117_v15  ;;  %v3976_v41 = vadd.f32 %v3975_v38, %v19118_v43  ;;  %v12588_v15 = vld [vmem:[%s18721_s0 + $0xd8] sm:$0xff]  ;;  %v16322_v26 = vpop.f32.mrf.mxu0 }
 0x5e3   : > { %5316 = vmatpush.bf16.msra.mxu3 %v12588_v15  ;;  %v19125_v15 = vld [vmem:[#allocation82_spill] sm:$0xff] }
 0x5e4   : > { %v3995_v18 = vpack.c.bf16 %v3976_v41, %v3976_v41 }
 0x5e6   : > { %v4329_v60 = vunpack.c.l.b16 %v3995_v18  ;;  %5600 = vmatmul.bf16.gmra.mxu0 %v4412_v6  ;;  %v12586_v18 = vld [vmem:[%s18721_s0 + $0xc8] sm:$0xff] }
 0x5e7   : > { %5317 = vmatpush.bf16.msra.mxu3 %v12587_v21 }
 0x5e9   : > { %v3977_v31 = vpop.f32.mrf.mxu3 }
 0x5ea   : > { %v3978_v27 = vadd.f32 %v3977_v31, %v19121_v52 }
 0x5eb   : > { %5318 = vmatpush.bf16.msra.mxu3 %v12586_v18  ;;  %v19127_v18 = vld [vmem:[#allocation152_spill] sm:$0xff] }
 0x5ec   : > { %v3996_v38 = vpack.c.bf16 %v3978_v27, %v3978_v27 }
 0x5ee   : > { %v4330_v55 = vunpack.c.l.b16 %v3996_v38  ;;  %4555 = vmatmul.bf16.gmra.mxu3 %v19122_v23  ;;  %v12585_v38 = vld [vmem:[%s18721_s0 + $0xc0] sm:$0xff] }
 0x5ef   : > { %v5243_v43 = vpop.f32.mrf.mxu1  ;;  %5319 = vmatpush.bf16.msra.mxu3 %v12585_v38  ;;  %v19128_v38 = vld [vmem:[#allocation90_spill] sm:$0xff] }
 0x5f0   : > { %v16317_v41 = vadd.f32 %v5243_v43, %v5195_v5  ;;  %v4337_v17 = vpack.c.b16 %v4330_v55, %v4329_v60  ;;  %v5200_v60 = vadd.f32 %v16061_v48, %v16046_v61  ;;  %v5205_v61 = vadd.f32 %v16061_v48, %v16084_v59 }
 0x5f1   : > { %v3980_v22 = vpop.f32.mrf.mxu3  ;;  %v5210_v59 = vadd.f32 %v16061_v48, %v16109_v33 }
 0x5f2   : > { %5438 = vmatmul.bf16.gmra.mxu1 %v4337_v17  ;;  %v3981_v31 = vadd.f32 %v3980_v22, %v19123_v7  ;;  %v19126_v22 = vld [vmem:[#allocation17_spill] sm:$0xff] }
 0x5f4   : > { %v3997_v50 = vpack.c.bf16 %v3981_v31, %v3981_v31 }
 0x5f6   : > { %v4331_v55 = vunpack.c.l.b16 %v3997_v50 }
 0x5f7   : > { %v16328_v52 = vpop.f32.mrf.mxu1 }
 0x5f9   : > { %v3982_v27 = vpop.f32.mrf.mxu3 }
 0x5fa   : > { %v3983_v35 = vadd.f32 %v3982_v27, %v19124_v28 }
 0x5fc   : > { %v3998_v5 = vpack.c.bf16 %v3983_v35, %v3983_v35 }
 0x5fe   : > { %v4332_v23 = vunpack.c.l.b16 %v3998_v5  ;;  %4560 = vmatmul.bf16.gmra.mxu3 %v19125_v15  ;;  %v19129_v15 = vld [vmem:[#allocation50_spill] sm:$0xff] }
 0x5ff   : > { %v5248_v51 = vpop.f32.mrf.mxu1 }
 0x600   : > { %v16337_v0 = vadd.f32 %v5248_v51, %v5200_v60  ;;  %v4338_v43 = vpack.c.b16 %v4332_v23, %v4331_v55 }
 0x601   : > { %v3985_v17 = vpop.f32.mrf.mxu3 }
 0x602   : > { %5443 = vmatmul.bf16.gmra.mxu1 %v4338_v43  ;;  %v3986_v21 = vadd.f32 %v3985_v17, %v19126_v22 }
 0x604   : > { %v3999_v31 = vpack.c.bf16 %v3986_v21, %v3986_v21  ;;  %v19130_v21 = vld [vmem:[#allocation45_spill] sm:$0xff] }
 0x606   : > { %v4333_v50 = vunpack.c.l.b16 %v3999_v31 }
 0x607   : > { %v16340_v6 = vpop.f32.mrf.mxu1 }
 0x609   : > { %v3987_v7 = vpop.f32.mrf.mxu3 }
 0x60a   : > { %v3988_v27 = vadd.f32 %v3987_v7, %v19127_v18 }
 0x60c   : > { %v4000_v28 = vpack.c.bf16 %v3988_v27, %v3988_v27 }
 0x60e   : > { %v4334_v35 = vunpack.c.l.b16 %v4000_v28  ;;  %4565 = vmatmul.bf16.gmra.mxu3 %v19128_v38  ;;  %v19131_v28 = vld [vmem:[#allocation143_spill] sm:$0xff] }
 0x60f   : > { %v5253_v5 = vpop.f32.mrf.mxu1 }
 0x610   : > { %v16346_v60 = vadd.f32 %v5253_v5, %v5205_v61  ;;  %v4339_v55 = vpack.c.b16 %v4334_v35, %v4333_v50  ;;  %v19132_v61 = vld [vmem:[#allocation101_spill] sm:$0xff] }
 0x611   : > { %v3990_v23 = vpop.f32.mrf.mxu3  ;;  %v19133_v38 = vpack.c.b16 %v19131_v28, %v19132_v61 }
 0x612   : > { %5448 = vmatmul.bf16.gmra.mxu1 %v4339_v55  ;;  %v3991_v51 = vadd.f32 %v3990_v23, %v19129_v15  ;;  %v19134_v23 = vld [vmem:[#allocation49_spill] sm:$0xff] }
 0x614   : > { %v4001_v22 = vpack.c.bf16 %v3991_v51, %v3991_v51 }
 0x616   : > { %v4335_v31 = vunpack.c.l.b16 %v4001_v22  ;;  %v19136_v22 = vld [vmem:[#allocation107_spill] sm:$0xff] }
 0x617   : > { %v16349_v43 = vpop.f32.mrf.mxu1 }
 0x619   : > { %v3992_v17 = vpop.f32.mrf.mxu3 }
 0x61a   : > { %v3993_v7 = vadd.f32 %v3992_v17, %v19130_v21  ;;  %v19135_v21 = vld [vmem:[#allocation47_spill] sm:$0xff] }
 0x61c   : > { %v4002_v18 = vpack.c.bf16 %v3993_v7, %v3993_v7 }
 0x61e   : > { %v4336_v27 = vunpack.c.l.b16 %v4002_v18  ;;  %5320 = vmatmul.bf16.vlgmr.msra.gmra.mxu3 %v19133_v38  ;;  %v19137_v18 = vld [vmem:[#allocation108_spill] sm:$0xff] }
 0x61f   : > { %v5258_v50 = vpop.f32.mrf.mxu1  ;;  %v19138_v28 = vpack.c.b16 %v19136_v22, %v19137_v18  ;;  %v19144_v18 = vld [vmem:[#allocation126_spill] sm:$0xff] }
 0x620   : > { %v16357_v35 = vadd.f32 %v5258_v50, %v5210_v59  ;;  %v4340_v5 = vpack.c.b16 %v4336_v27, %v4335_v31  ;;  %v19139_v27 = vld [vmem:[#allocation118_spill] sm:$0xff] }
 0x621   : > { %v4107_v55 = vpop.f32.mrf.mxu3 }
 0x622   : > { %5453 = vmatmul.bf16.gmra.mxu1 %v4340_v5  ;;  %v4108_v15 = vadd.f32 %v4107_v55, %v19134_v23  ;;  %v19140_v5 = vld [vmem:[#allocation39_spill] sm:$0xff] }
 0x624   : > { %v4127_v17 = vpack.c.bf16 %v4108_v15, %v4108_v15 }
 0x626   : > { %v16361_v48 = vunpack.c.l.b16 %v4127_v17  ;;  %v19142_v17 = vld [vmem:[#allocation147_spill] sm:$0xff] }
 0x629   : > { %v4109_v51 = vpop.f32.mrf.mxu3 }
 0x62a   : > { %v4110_v7 = vadd.f32 %v4109_v51, %v19135_v21 }
 0x62c   : > { %v4128_v4 = vpack.c.bf16 %v4110_v7, %v4110_v7 }
 0x62e   : > { %v16363_v33 = vunpack.c.l.b16 %v4128_v4  ;;  %5325 = vmatmul.bf16.gmra.mxu3 %v19138_v28  ;;  %v19141_v4 = vld [vmem:[#allocation30_spill] sm:$0xff] }
 0x62f   : > { %v19143_v21 = vpack.c.b16 %v19141_v4, %v19142_v17 }
 0x631   : > { %v4112_v31 = vpop.f32.mrf.mxu3 }
 0x632   : > { %v4113_v61 = vadd.f32 %v4112_v31, %v19139_v27 }
 0x634   : > { %v4129_v50 = vpack.c.bf16 %v4113_v61, %v4113_v61  ;;  %v19145_v61 = vld [vmem:[#allocation122_spill] sm:$0xff] }
 0x636   : > { %v16372_v15 = vunpack.c.l.b16 %v4129_v50 }
 0x639   : > { %v4114_v38 = vpop.f32.mrf.mxu3 }
 0x63a   : > { %v4115_v55 = vadd.f32 %v4114_v38, %v19140_v5 }
 0x63c   : > { %v4130_v23 = vpack.c.bf16 %v4115_v55, %v4115_v55  ;;  %v19146_v55 = vld [vmem:[#allocation114_spill] sm:$0xff] }
 0x63e   : > { %v16374_v51 = vunpack.c.l.b16 %v4130_v23  ;;  %5330 = vmatmul.bf16.gmra.mxu3 %v19143_v21  ;;  %v19147_v23 = vld [vmem:[#allocation115_spill] sm:$0xff]  ;;  %v19149_v21 = vld [vmem:[#allocation117_spill] sm:$0xff] }
 0x63f   : > { %v19148_v1 = vpack.c.b16 %v19146_v55, %v19147_v23  ;;  %v12620_v55 = vld [vmem:[%s18721_s0 + $0x1d8] sm:$0xff] }
 0x641   : > { %v4117_v22 = vpop.f32.mrf.mxu3 }
 0x642   : > { %v4118_v28 = vadd.f32 %v4117_v22, %v19144_v18 }
 0x644   : > { %v4131_v27 = vpack.c.bf16 %v4118_v28, %v4118_v28  ;;  %v19150_v28 = vld [vmem:[#allocation120_spill] sm:$0xff] }
 0x646   : > { %v16383_v5 = vunpack.c.l.b16 %v4131_v27 }
 0x649   : > { %v4119_v31 = vpop.f32.mrf.mxu3 }
 0x64a   : > { %v4120_v59 = vadd.f32 %v4119_v31, %v19145_v61 }
 0x64c   : > { %v4132_v38 = vpack.c.bf16 %v4120_v59, %v4120_v59 }
 0x64e   : > { %v16385_v50 = vunpack.c.l.b16 %v4132_v38  ;;  %5335 = vmatmul.bf16.gmra.mxu3 %v19148_v1  ;;  %v12624_v1 = vld [vmem:[%s18721_s0 + $0x1f8] sm:$0xff]  ;;  %v19153_v38 = vpack.c.b16 %v16243_v56, %v16241_v20  ;;  %v12617_v20 = vld [vmem:[%s18721_s0 + $0x1c0] sm:$0xff]  ;;  %v19156_v56 = vpack.c.b16 %v16263_v37, %v16261_v14 }
 0x64f   : > { %5508 = vmatpush.bf16.msrb.mxu3 %v12624_v1 }
 0x651   : > { %v4122_v17 = vpop.f32.mrf.mxu3 }
 0x652   : > { %v4123_v7 = vadd.f32 %v4122_v17, %v19149_v21  ;;  %v12619_v17 = vld [vmem:[%s18721_s0 + $0x1d0] sm:$0xff]  ;;  %v12618_v21 = vld [vmem:[%s18721_s0 + $0x1c8] sm:$0xff] }
 0x654   : > { %v4133_v18 = vpack.c.bf16 %v4123_v7, %v4123_v7 }
 0x656   : > { %v16394_v59 = vunpack.c.l.b16 %v4133_v18 }
 0x659   : > { %v4124_v22 = vpop.f32.mrf.mxu3 }
 0x65a   : > { %v4125_v12 = vadd.f32 %v4124_v22, %v19150_v28 }
 0x65c   : > { %v4134_v31 = vpack.c.bf16 %v4125_v12, %v4125_v12  ;;  %v12623_v12 = vld [vmem:[%s18721_s0 + $0x1f0] sm:$0xff] }
 0x65d   : > { %5509 = vmatpush.bf16.msrb.mxu3 %v12623_v12 }
 0x65e   : > { %v16396_v27 = vunpack.c.l.b16 %v4134_v31  ;;  %5340 = vmatmul.bf16.gmra.mxu3 %v4289_v45  ;;  %v12621_v45 = vld [vmem:[%s18721_s0 + $0x1e0] sm:$0xff]  ;;  %v19159_v31 = vpack.c.b16 %v16281_v62, %v16279_v19 }
 0x661   : > { %v16406_v7 = vpop.f32.mrf.mxu3  ;;  %5510 = vmatpush.bf16.msrb.mxu3 %v12622_v63  ;;  %v19162_v63 = vld [vmem:[#allocation42_spill] sm:$0xff] }
 0x662   : > { %19151 = vst [vmem:[#allocation145_spill] sm:$0xff] %v16406_v7 }
 0x665   : > { %5511 = vmatpush.bf16.msrb.mxu3 %v12621_v45  ;;  %v19163_v45 = vld [vmem:[#allocation124_spill] sm:$0xff] }
 0x669   : > { %v16414_v10 = vpop.f32.mrf.mxu3  ;;  %5512 = vmatpush.bf16.msrb.mxu3 %v12620_v55 }
 0x66a   : > { %19152 = vst [vmem:[#allocation144_spill] sm:$0xff] %v16414_v10 }
 0x66d   : > { %5513 = vmatpush.bf16.msrb.mxu3 %v12619_v17 }
 0x66e   : > { %5345 = vmatmul.bf16.gmra.mxu3 %v19153_v38  ;;  %v19164_v38 = vpack.c.b16 %v19162_v63, %v19163_v45 }
 0x671   : > { %v16425_v23 = vpop.f32.mrf.mxu3  ;;  %5514 = vmatpush.bf16.msrb.mxu3 %v12618_v21  ;;  %v19165_v21 = vld [vmem:[#allocation132_spill] sm:$0xff] }
 0x672   : > { %19154 = vst [vmem:[#allocation154_spill] sm:$0xff] %v16425_v23  ;;  %v19166_v19 = vpack.c.b16 %v15913_v3, %v19165_v21 }
 0x675   : > { %5515 = vmatpush.bf16.msrb.mxu3 %v12617_v20 }
 0x679   : > { %v16433_v22 = vpop.f32.mrf.mxu3 }
 0x67a   : > { %19155 = vst [vmem:[#allocation59_spill] sm:$0xff] %v16433_v22 }
 0x67e   : > { %5350 = vmatmul.bf16.gmra.mxu3 %v19156_v56  ;;  %v5292_v56 = vpop.f32.mrf.mxu2 }
 0x681   : > { %v16441_v18 = vpop.f32.mrf.mxu3 }
 0x682   : > { %19157 = vst [vmem:[#allocation24_spill] sm:$0xff] %v16441_v18  ;;  %v12635_v18 = vld [vmem:[%s19173_s29 + $0x10] sm:$0xff] }
 0x689   : > { %v16443_v28 = vpop.f32.mrf.mxu3 }
 0x68a   : > { %19158 = vst [vmem:[#allocation163_spill] sm:$0xff] %v16443_v28 }
 0x68e   : > { %5355 = vmatmul.bf16.gmra.mxu3 %v19159_v31  ;;  %v16467_v31 = vpop.f32.mrf.mxu0 }
 0x691   : > { %v16448_v1 = vpop.f32.mrf.mxu3 }
 0x692   : > { %19160 = vst [vmem:[#allocation66_spill] sm:$0xff] %v16448_v1  ;;  %v12636_v1 = vld [vmem:[%s19173_s29 + $0x18] sm:$0xff] }
 0x699   : > { %v16450_v12 = vpop.f32.mrf.mxu3 }
 0x69a   : > { %19161 = vst [vmem:[#allocation96_spill] sm:$0xff] %v16450_v12 }
 0x69e   : > { %5516 = vmatmul.bf16.vlgmr.msrb.gmra.mxu3 %v19164_v38 }
 0x6a1   : > { %v5321_v55 = vpop.f32.mrf.mxu3 }
 0x6a2   : > { %v16456_v14 = vadd.f32 %v5321_v55, %v16082_v9  ;;  %v16472_v9 = vpop.f32.mrf.mxu2  ;;  %v16477_v55 = vpop.f32.mrf.mxu0 }
 0x6a9   : > { %v5323_v37 = vpop.f32.mrf.mxu3 }
 0x6aa   : > { %v16459_v17 = vadd.f32 %v5323_v37, %v16092_v46  ;;  %v19167_v46 = vld [vmem:[#allocation46_spill] sm:$0xff] }
 0x6ab   : > { %v19168_v38 = vpack.c.b16 %v15973_v2, %v19167_v46 }
 0x6ae   : > { %5521 = vmatmul.bf16.gmra.mxu3 %v19166_v19  ;;  %v16482_v19 = vpop.f32.mrf.mxu0 }
 0x6b1   : > { %v5326_v62 = vpop.f32.mrf.mxu3 }
 0x6b2   : > { %v16465_v20 = vadd.f32 %v5326_v62, %v16105_v30  ;;  %v5297_v30 = vpop.f32.mrf.mxu2 }
 0x6b3   : > { %v5298_v12 = vadd.f32 %v5297_v30, %v16337_v0 }
 0x6b9   : > { %v5328_v63 = vpop.f32.mrf.mxu3 }
 0x6ba   : > { %v16470_v45 = vadd.f32 %v5328_v63, %v16115_v58  ;;  %v19169_v58 = vpack.c.b16 %v16018_v47, %v16016_v49  ;;  %v16490_v63 = vpop.f32.mrf.mxu2  ;;  %v5293_v49 = vadd.f32 %v5292_v56, %v16317_v41  ;;  %v12640_v56 = vld [vmem:[%s19173_s29 + $0x38] sm:$0xff] }
 0x6bb   : > { %5695 = vmatpush.bf16.msrb.mxu1 %v12640_v56 }
 0x6be   : > { %5526 = vmatmul.bf16.gmra.mxu3 %v19168_v38  ;;  %v16495_v38 = vpop.f32.mrf.mxu0 }
 0x6c1   : > { %v5331_v3 = vpop.f32.mrf.mxu3 }
 0x6c2   : > { %v16480_v37 = vadd.f32 %v5331_v3, %v16132_v13  ;;  %v5302_v61 = vpop.f32.mrf.mxu2 }
 0x6c6   : > { %v16500_v4 = vpop.f32.mrf.mxu0 }
 0x6c9   : > { %v5333_v21 = vpop.f32.mrf.mxu3 }
 0x6ca   : > { %v16485_v62 = vadd.f32 %v5333_v21, %v16146_v25  ;;  %v19170_v25 = vpack.c.b16 %v16363_v33, %v16361_v48 }
 0x6ce   : > { %5531 = vmatmul.bf16.gmra.mxu3 %v19169_v58  ;;  %v16510_v58 = vpop.f32.mrf.mxu0 }
 0x6d1   : > { %v5336_v2 = vpop.f32.mrf.mxu3 }
 0x6d2   : > { %v16493_v46 = vadd.f32 %v5336_v2, %v16161_v57  ;;  %v16508_v57 = vpop.f32.mrf.mxu2 }
 0x6d6   : > { %v16518_v33 = vpop.f32.mrf.mxu0 }
 0x6d7   : > { %19172 = vst [vmem:[#allocation94_spill] sm:$0xff] %v16518_v33 }
 0x6d9   : > { %v5338_v13 = vpop.f32.mrf.mxu3 }
 0x6da   : > { %v16498_v3 = vadd.f32 %v5338_v13, %v16183_v36  ;;  %v19171_v36 = vpack.c.b16 %v16374_v51, %v16372_v15  ;;  %v5307_v13 = vpop.f32.mrf.mxu2  ;;  %v12639_v15 = vld [vmem:[%s19173_s29 + $0x30] sm:$0xff] }
 0x6db   : > { %5696 = vmatpush.bf16.msrb.mxu1 %v12639_v15 }
 0x6de   : > { %5536 = vmatmul.bf16.gmra.mxu3 %v19170_v25  ;;  %v16525_v25 = vpop.f32.mrf.mxu1  ;;  %v16537_v30 = vpop.f32.mrf.mxu0 }
 0x6df   : > { %19174 = vst [vmem:[#allocation61_spill] sm:$0xff] %v16525_v25  ;;  %v5376_v25 = vadd.f32 %v16251_v40, %v16465_v20 }
 0x6e0   : > { %19176 = vst [vmem:[#allocation88_spill] sm:$0xff] %v16537_v30 }
 0x6e1   : > { %v5341_v47 = vpop.f32.mrf.mxu3 }
 0x6e2   : > { %v16506_v21 = vadd.f32 %v5341_v47, %v5293_v49  ;;  %v16530_v51 = vpop.f32.mrf.mxu2  ;;  %v12637_v49 = vld [vmem:[%s19173_s29 + $0x20] sm:$0xff] }
 0x6e3   : > { %19175 = vst [vmem:[#allocation142_spill] sm:$0xff] %v16530_v51 }
 0x6e6   : > { %v5419_v47 = vpop.f32.mrf.mxu1  ;;  %v5566_v28 = vpop.f32.mrf.mxu0 }
 0x6e9   : > { %v16512_v2 = vpop.f32.mrf.mxu3 }
 0x6ee   : > { %5541 = vmatmul.bf16.gmra.mxu3 %v19171_v36  ;;  %v19177_v36 = vpack.c.b16 %v16385_v50, %v16383_v5  ;;  %v5421_v22 = vpop.f32.mrf.mxu1 }
 0x6f1   : > { %v5346_v48 = vpop.f32.mrf.mxu3 }
 0x6f2   : > { %v16520_v41 = vadd.f32 %v5346_v48, %v5298_v12  ;;  %v12638_v12 = vld [vmem:[%s19173_s29 + $0x28] sm:$0xff]  ;;  %v5303_v48 = vadd.f32 %v5302_v61, %v16346_v60  ;;  %v19178_v61 = vpack.c.b16 %v16396_v27, %v16394_v59  ;;  %v5371_v59 = vadd.f32 %v16226_v34, %v16456_v14 }
 0x6f3   : > { %5697 = vmatpush.bf16.msrb.mxu1 %v12638_v12  ;;  %v5468_v12 = vpop.f32.mrf.mxu2  ;;  %v12634_v60 = vld [vmem:[%s19173_s29 + $0x8] sm:$0xff]  ;;  %v5373_v27 = vadd.f32 %v16238_v29, %v16459_v17 }
 0x6f7   : > { %5698 = vmatpush.bf16.msrb.mxu1 %v12637_v49  ;;  %v5568_v49 = vpop.f32.mrf.mxu0 }
 0x6f9   : > { %v16532_v0 = vpop.f32.mrf.mxu3 }
 0x6fb   : > { %5699 = vmatpush.bf16.msrb.mxu1 %v12636_v1  ;;  %v5470_v50 = vpop.f32.mrf.mxu2  ;;  %v12633_v1 = vld [vmem:[%s19173_s29] sm:$0xff] }
 0x6fe   : > { %5546 = vmatmul.bf16.gmra.mxu3 %v19177_v36  ;;  %v5308_v36 = vadd.f32 %v5307_v13, %v16357_v35 }
 0x6ff   : > { %5700 = vmatpush.bf16.msrb.mxu1 %v12635_v18  ;;  %v5424_v18 = vpop.f32.mrf.mxu1 }
 0x701   : > { %v5351_v56 = vpop.f32.mrf.mxu3 }
 0x702   : > { %v16546_v15 = vadd.f32 %v5351_v56, %v5303_v48 }
 0x703   : > { %5701 = vmatpush.bf16.msrb.mxu1 %v12634_v60  ;;  %v5473_v23 = vpop.f32.mrf.mxu2  ;;  %v5571_v60 = vpop.f32.mrf.mxu0 }
 0x707   : > { %5702 = vmatpush.bf16.msrb.mxu1 %v12633_v1  ;;  %v5426_v7 = vpop.f32.mrf.mxu1  ;;  %v5422_v1 = vadd.f32 %v5421_v22, %v5373_v27  ;;  %v5425_v22 = vadd.f32 %v5424_v18, %v5376_v25 }
 0x709   : > { %v16554_v5 = vpop.f32.mrf.mxu3 }
 0x70b   : > { %v5475_v53 = vpop.f32.mrf.mxu2  ;;  %v5573_v35 = vpop.f32.mrf.mxu0 }
 0x70e   : > { %5551 = vmatmul.bf16.gmra.mxu3 %v19178_v61  ;;  %v5420_v61 = vadd.f32 %v5419_v47, %v5371_v59  ;;  %v5378_v47 = vadd.f32 %v16259_v32, %v16470_v45  ;;  %v5383_v45 = vadd.f32 %v16289_v44, %v16485_v62 }
 0x70f   : > { %v5429_v30 = vpop.f32.mrf.mxu1 }
 0x710   : > { %v5469_v13 = vadd.f32 %v5468_v12, %v5420_v61 }
 0x711   : > { %v5356_v48 = vpop.f32.mrf.mxu3 }
 0x712   : > { %v16566_v56 = vadd.f32 %v5356_v48, %v5308_v36  ;;  %v5471_v48 = vadd.f32 %v5470_v50, %v5422_v1  ;;  %v5427_v50 = vadd.f32 %v5426_v7, %v5378_v47 }
 0x713   : > { %v5478_v51 = vpop.f32.mrf.mxu2  ;;  %v5576_v14 = vpop.f32.mrf.mxu0 }
 0x714   : > { %19179 = vst [vmem:[#allocation149_spill] sm:$0xff] %v16566_v56  ;;  %v5476_v61 = vadd.f32 %v5475_v53, %v5427_v50 }
 0x717   : > { %v5431_v17 = vpop.f32.mrf.mxu1 }
 0x719   : > { %v16568_v10 = vpop.f32.mrf.mxu3 }
 0x71a   : > { %19180 = vst [vmem:[#allocation148_spill] sm:$0xff] %v16568_v10 }
 0x71b   : > { %v5578_v27 = vpop.f32.mrf.mxu0 }
 0x721   : > { %v5517_v39 = vpop.f32.mrf.mxu3 }
 0x722   : > { %v5518_v36 = vadd.f32 %v5517_v39, %v5469_v13  ;;  %v5474_v39 = vadd.f32 %v5473_v23, %v5425_v22  ;;  %v5434_v13 = vpop.f32.mrf.mxu1 }
 0x723   : > { %v5581_v18 = vpop.f32.mrf.mxu0 }
 0x724   : > { %v5567_v56 = vadd.f32 %v5566_v28, %v5518_v36  ;;  %v5480_v28 = vpop.f32.mrf.mxu2 }
 0x726   : > { %v5606_v8 = vmax.f32 %v5567_v56, 0.0 }
 0x729   : > { %v5519_v33 = vpop.f32.mrf.mxu3 }
 0x72a   : > { %v5520_v10 = vadd.f32 %v5519_v33, %v5471_v48  ;;  %v5436_v53 = vpop.f32.mrf.mxu1  ;;  %v5432_v48 = vadd.f32 %v5431_v17, %v5383_v45 }
 0x72b   : > { %v5583_v22 = vpop.f32.mrf.mxu0 }
 0x72c   : > { %v5569_v34 = vadd.f32 %v5568_v49, %v5520_v10  ;;  %v5381_v49 = vadd.f32 %v16276_v16, %v16480_v37 }
 0x72e   : > { %v5607_v29 = vmax.f32 %v5569_v34, 0.0  ;;  %v5430_v23 = vadd.f32 %v5429_v30, %v5381_v49  ;;  %v5481_v34 = vadd.f32 %v5480_v28, %v5432_v48 }
 0x730   : > { %v5622_v12 = vpack.c.bf16 %v5607_v29, %v5606_v8  ;;  %v5483_v8 = vpop.f32.mrf.mxu2  ;;  %v5479_v36 = vadd.f32 %v5478_v51, %v5430_v23 }
 0x731   : > { %v5522_v59 = vpop.f32.mrf.mxu3 }
 0x732   : > { %5703 = vmatmul.bf16.vlgmr.msrb.gmra.mxu1 %v5622_v12  ;;  %v5523_v33 = vadd.f32 %v5522_v59, %v5474_v39  ;;  %v5439_v44 = vpop.f32.mrf.mxu1  ;;  %v5388_v59 = vadd.f32 %v16322_v26, %v16498_v3 }
 0x734   : > { %v5572_v10 = vadd.f32 %v5571_v60, %v5523_v33  ;;  %v5437_v28 = vadd.f32 %v5436_v53, %v5388_v59  ;;  %v5586_v33 = vpop.f32.mrf.mxu0 }
 0x736   : > { %v5608_v1 = vmax.f32 %v5572_v10, 0.0 }
 0x738   : > { %v5485_v29 = vpop.f32.mrf.mxu2 }
 0x739   : > { %v5524_v40 = vpop.f32.mrf.mxu3  ;;  %v5486_v3 = vadd.f32 %v5485_v29, %v5437_v28 }
 0x73a   : > { %v5525_v20 = vadd.f32 %v5524_v40, %v5476_v61  ;;  %v5441_v26 = vpop.f32.mrf.mxu1 }
 0x73c   : > { %v5574_v56 = vadd.f32 %v5573_v35, %v5525_v20  ;;  %v5386_v35 = vadd.f32 %v16309_v24, %v16493_v46  ;;  %v5588_v45 = vpop.f32.mrf.mxu0 }
 0x73e   : > { %v5609_v32 = vmax.f32 %v5574_v56, 0.0  ;;  %v5435_v39 = vadd.f32 %v5434_v13, %v5386_v35  ;;  %v5391_v56 = vadd.f32 %v16467_v31, %v16506_v21 }
 0x740   : > { %v5623_v7 = vpack.c.bf16 %v5609_v32, %v5608_v1  ;;  %v5488_v17 = vpop.f32.mrf.mxu2  ;;  %v5484_v46 = vadd.f32 %v5483_v8, %v5435_v39  ;;  %v5440_v23 = vadd.f32 %v5439_v44, %v5391_v56 }
 0x741   : > { %v5527_v25 = vpop.f32.mrf.mxu3 }
 0x742   : > { %5708 = vmatmul.bf16.gmra.mxu1 %v5623_v7  ;;  %v5528_v60 = vadd.f32 %v5527_v25, %v5479_v36  ;;  %v5444_v25 = vpop.f32.mrf.mxu1 }
 0x744   : > { %v5577_v16 = vadd.f32 %v5576_v14, %v5528_v60  ;;  %v16589_v14 = vld [vmem:[%s18480_s26 + $0x1] ss:$0 sm:$0xff]  ;;  %v5591_v60 = vpop.f32.mrf.mxu0 }
 0x745   : > { %v5197_v24 = vadd.f32 %v16589_v14, %v16034_v42 }
 0x746   : > { %v5610_v62 = vmax.f32 %v5577_v16, 0.0 }
 0x748   : > { %v5490_v49 = vpop.f32.mrf.mxu2 }
 0x749   : > { %v5529_v47 = vpop.f32.mrf.mxu3 }
 0x74a   : > { %v5530_v37 = vadd.f32 %v5529_v47, %v5481_v34  ;;  %v5446_v16 = vpop.f32.mrf.mxu1 }
 0x74c   : > { %v5579_v12 = vadd.f32 %v5578_v27, %v5530_v37  ;;  %v5246_v27 = vadd.f32 %v16328_v52, %v5197_v24  ;;  %v5396_v37 = vadd.f32 %v16482_v19, %v16520_v41  ;;  %v5593_v39 = vpop.f32.mrf.mxu0 }
 0x74e   : > { %v5611_v30 = vmax.f32 %v5579_v12, 0.0  ;;  %v5295_v40 = vadd.f32 %v16472_v9, %v5246_v27  ;;  %v5202_v9 = vadd.f32 %v16589_v14, %v16068_v54  ;;  %v5401_v27 = vadd.f32 %v16500_v4, %v16546_v15  ;;  %v12655_v4 = vld [vmem:[%s19181_s8 + $0x74] sm:$0xf]  ;;  %v11214_v15 = vld [vmem:[%s19181_s8 + $0x78] sm:$0xf0] }
 0x74f   : > { %v11217_v56 = vor.u32 %v12655_v4, %v11214_v15  ;;  %v12646_v4 = vld [vmem:[%s19181_s8 + $0x24] sm:$0xf0]  ;;  %v12645_v15 = vld [vmem:[%s19181_s8 + $0x24] sm:$0xf] }
 0x750   : > { %v5624_v51 = vpack.c.bf16 %v5611_v30, %v5610_v62  ;;  %v5344_v1 = vadd.f32 %v16512_v2, %v5295_v40  ;;  %v5493_v48 = vpop.f32.mrf.mxu2  ;;  %v5251_v31 = vadd.f32 %v16340_v6, %v5202_v9  ;;  %v5445_v62 = vadd.f32 %v5444_v25, %v5396_v37  ;;  %v12656_v40 = vld [vmem:[%s19181_s8 + $0x74] sm:$0xf0]  ;;  %v19182_v25 = vld [vmem:[#allocation81_spill] sm:$0xff] }
 0x751   : > { %v5532_v50 = vpop.f32.mrf.mxu3  ;;  %5933 = vmatpush.bf16.msra.mxu3 %v11217_v56  ;;  %v11190_v37 = vld [vmem:[%s19181_s8 + $0x48] sm:$0xf0] }
 0x752   : > { %5713 = vmatmul.bf16.gmra.mxu1 %v5624_v51  ;;  %v5533_v61 = vadd.f32 %v5532_v50, %v5484_v46  ;;  %v5393_v52 = vadd.f32 %v16477_v55, %v5344_v1  ;;  %v5300_v29 = vadd.f32 %v16490_v63, %v5251_v31  ;;  %v5207_v63 = vadd.f32 %v16589_v14, %v16094_v11  ;;  %v5449_v50 = vpop.f32.mrf.mxu1  ;;  %v11198_v31 = vld [vmem:[%s19181_s8 + $0x58] sm:$0xf0]  ;;  %v11174_v56 = vld [vmem:[%s19181_s8 + $0x28] sm:$0xf0] }
 0x753   : > { %v5494_v51 = vadd.f32 %v5493_v48, %v5445_v62  ;;  %v12651_v48 = vld [vmem:[%s19181_s8 + $0x54] sm:$0xf] }
 0x754   : > { %v5582_v10 = vadd.f32 %v5581_v18, %v5533_v61  ;;  %v5489_v18 = vadd.f32 %v5488_v17, %v5440_v23  ;;  %v5442_v36 = vadd.f32 %v5441_v26, %v5393_v52  ;;  %v5349_v35 = vadd.f32 %v16532_v0, %v5300_v29  ;;  %v5596_v11 = vpop.f32.mrf.mxu0  ;;  %v11206_v52 = vld [vmem:[%s19181_s8 + $0x68] sm:$0xf0]  ;;  %v11196_v23 = vld [vmem:[%s19181_s8 + $0x50] sm:$0xf] }
 0x755   : > { %v5256_v19 = vadd.f32 %v16349_v43, %v5207_v63  ;;  %v11212_v43 = vld [vmem:[%s19181_s8 + $0x70] sm:$0xf]  ;;  %v11201_v29 = vor.u32 %v12651_v48, %v11198_v31  ;;  %v19186_v63 = vld [vmem:[#allocation94_spill] sm:$0xff]  ;;  %v11156_v48 = vld [vmem:[%s19181_s8] sm:$0xf] }
 0x756   : > { %v5612_v32 = vmax.f32 %v5582_v10, 0.0  ;;  %v5491_v2 = vadd.f32 %v5490_v49, %v5442_v36  ;;  %v5398_v6 = vadd.f32 %v16495_v38, %v5349_v35  ;;  %v11213_v10 = vor.u32 %v12656_v40, %v11212_v43  ;;  %v12642_v31 = vld [vmem:[%s19181_s8 + $0x4] sm:$0xf0] }
 0x757   : > { %v5305_v28 = vadd.f32 %v16508_v57, %v5256_v19 }
 0x758   : > { %v5495_v44 = vpop.f32.mrf.mxu2  ;;  %v5447_v17 = vadd.f32 %v5446_v16, %v5398_v6  ;;  %5884 = vmatpush.bf16.msrb.mxu2 %v11213_v10  ;;  %v12649_v16 = vld [vmem:[%s19181_s8 + $0x44] sm:$0xf]  ;;  %v11172_v10 = vld [vmem:[%s19181_s8 + $0x20] sm:$0xf] }
 0x759   : > { %v5534_v13 = vpop.f32.mrf.mxu3  ;;  %v5354_v61 = vadd.f32 %v16554_v5, %v5305_v28  ;;  %v12648_v28 = vld [vmem:[%s19181_s8 + $0x34] sm:$0xf0] }
 0x75a   : > { %v5535_v20 = vadd.f32 %v5534_v13, %v5486_v3  ;;  %v5496_v0 = vadd.f32 %v5495_v44, %v5447_v17  ;;  %v5451_v57 = vpop.f32.mrf.mxu1  ;;  %v19184_v44 = vld [vmem:[#allocation142_spill] sm:$0xff]  ;;  %v19187_v17 = vld [vmem:[#allocation148_spill] sm:$0xff] }
 0x75b   : > { %v5403_v5 = vadd.f32 %v16510_v58, %v5354_v61 }
 0x75c   : > { %v5584_v42 = vadd.f32 %v5583_v22, %v5535_v20  ;;  %v5450_v20 = vadd.f32 %v5449_v50, %v5401_v27 }
 0x75e   : > { %v5613_v8 = vmax.f32 %v5584_v42, 0.0  ;;  %v11204_v42 = vld [vmem:[%s19181_s8 + $0x60] sm:$0xf] }
 0x760   : > { %v5625_v7 = vpack.c.bf16 %v5613_v8, %v5612_v32  ;;  %v5498_v24 = vpop.f32.mrf.mxu2  ;;  %v12654_v32 = vld [vmem:[%s19181_s8 + $0x64] sm:$0xf0]  ;;  %v12653_v8 = vld [vmem:[%s19181_s8 + $0x64] sm:$0xf] }
 0x761   : > { %v5537_v53 = vpop.f32.mrf.mxu3  ;;  %v5499_v9 = vadd.f32 %v5498_v24, %v5450_v20  ;;  %v11209_v36 = vor.u32 %v12653_v8, %v11206_v52  ;;  %v11164_v8 = vld [vmem:[%s19181_s8 + $0x10] sm:$0xf] }
 0x762   : > { %5718 = vmatmul.bf16.gmra.mxu1 %v5625_v7  ;;  %v5538_v21 = vadd.f32 %v5537_v53, %v5489_v18  ;;  %v12652_v7 = vld [vmem:[%s19181_s8 + $0x54] sm:$0xf0]  ;;  %v5212_v53 = vadd.f32 %v16589_v14, %v19182_v25  ;;  %v5452_v18 = vadd.f32 %v5451_v57, %v5403_v5  ;;  %v11188_v14 = vld [vmem:[%s19181_s8 + $0x40] sm:$0xf] }
 0x763   : > { %5934 = vmatpush.bf16.msra.mxu3 %v11209_v36 }
 0x764   : > { %v5587_v55 = vadd.f32 %v5586_v33, %v5538_v21  ;;  %v11197_v21 = vor.u32 %v12652_v7, %v11196_v23  ;;  %v11166_v7 = vld [vmem:[%s19181_s8 + $0x18] sm:$0xf0] }
 0x766   : > { %v5614_v12 = vmax.f32 %v5587_v55, 0.0  ;;  %v12650_v55 = vld [vmem:[%s19181_s8 + $0x44] sm:$0xf0] }
 0x767   : > { %5935 = vmatpush.bf16.msra.mxu3 %v11201_v29 }
 0x768   : > { %v5500_v58 = vpop.f32.mrf.mxu2 }
 0x769   : > { %v5539_v34 = vpop.f32.mrf.mxu3  ;;  %v5501_v35 = vadd.f32 %v5500_v58, %v5452_v18  ;;  %v12644_v58 = vld [vmem:[%s19181_s8 + $0x14] sm:$0xf0] }
 0x76a   : > { %v5540_v47 = vadd.f32 %v5539_v34, %v5491_v2  ;;  %v19183_v2 = vld [vmem:[#allocation61_spill] sm:$0xff]  ;;  %v11165_v23 = vor.u32 %v12644_v58, %v11164_v8 }
 0x76c   : > { %v5589_v54 = vadd.f32 %v5588_v45, %v5540_v47  ;;  %v11205_v45 = vor.u32 %v12654_v32, %v11204_v42  ;;  %v5598_v47 = vpop.f32.mrf.mxu0 }
 0x76e   : > { %v5615_v22 = vmax.f32 %v5589_v54, 0.0  ;;  %5885 = vmatpush.bf16.msrb.mxu2 %v11205_v45  ;;  %v5454_v54 = vpop.f32.mrf.mxu1  ;;  %v12643_v45 = vld [vmem:[%s19181_s8 + $0x14] sm:$0xf] }
 0x770   : > { %v5626_v30 = vpack.c.bf16 %v5615_v22, %v5614_v12  ;;  %v11189_v22 = vor.u32 %v12650_v55, %v11188_v14 }
 0x771   : > { %v5542_v59 = vpop.f32.mrf.mxu3 }
 0x772   : > { %5723 = vmatmul.bf16.gmra.mxu1 %v5626_v30  ;;  %v5543_v41 = vadd.f32 %v5542_v59, %v5494_v51  ;;  %5886 = vmatpush.bf16.msrb.mxu2 %v11197_v21  ;;  %v11193_v59 = vor.u32 %v12649_v16, %v11190_v37  ;;  %v12641_v21 = vld [vmem:[%s19181_s8 + $0x4] sm:$0xf]  ;;  %v16722_v37 = vld [vmem:[%s18480_s26 + $0x2] ss:$0 sm:$0xff] }
 0x774   : > { %v5592_v38 = vadd.f32 %v5591_v60, %v5543_v41  ;;  %v5261_v60 = vadd.f32 %v19183_v2, %v5212_v53  ;;  %v5503_v41 = vpop.f32.mrf.mxu2  ;;  %5936 = vmatpush.bf16.msra.mxu3 %v11193_v59  ;;  %v11169_v53 = vor.u32 %v12643_v45, %v11166_v7 }
 0x776   : > { %v5616_v3 = vmax.f32 %v5592_v38, 0.0  ;;  %v5310_v6 = vadd.f32 %v19184_v44, %v5261_v60  ;;  %5887 = vmatpush.bf16.msrb.mxu2 %v11189_v22  ;;  %v12647_v38 = vld [vmem:[%s19181_s8 + $0x34] sm:$0xf]  ;;  %v5456_v57 = vpop.f32.mrf.mxu1  ;;  %v11157_v60 = vor.u32 %v12642_v31, %v11156_v48  ;;  %v16729_v22 = vld [vmem:[%s18480_s26 + $0x3] ss:$0 sm:$0xff]  ;;  %v19191_v44 = vld [vmem:[#allocation156_spill] sm:$0xff] }
 0x777   : > { %v19201_v48 = vld [vmem:[#allocation164_spill] sm:$0xff]  ;;  %v19202_v31 = vld [vmem:[#allocation137_spill] sm:$0xff] }
 0x778   : > { %v5359_v50 = vadd.f32 %v19187_v17, %v5310_v6  ;;  %v19192_v6 = vld [vmem:[#allocation135_spill] sm:$0xff] }
 0x779   : > { %v5544_v46 = vpop.f32.mrf.mxu3 }
 0x77a   : > { %v5545_v33 = vadd.f32 %v5544_v46, %v5496_v0  ;;  %v11180_v46 = vld [vmem:[%s19181_s8 + $0x30] sm:$0xf] }
 0x77c   : > { %v5594_v26 = vadd.f32 %v5593_v39, %v5545_v33  ;;  %v19185_v39 = vld [vmem:[#allocation149_spill] sm:$0xff]  ;;  %v19188_v33 = vld [vmem:[#allocation88_spill] sm:$0xff]  ;;  %v5505_v32 = vpop.f32.mrf.mxu2 }
 0x77d   : > { %v5406_v51 = vadd.f32 %v19186_v63, %v19185_v39  ;;  %v5408_v27 = vadd.f32 %v19188_v33, %v5359_v50  ;;  %v19195_v33 = vld [vmem:[#allocation63_spill] sm:$0xff] }
 0x77e   : > { %v5617_v13 = vmax.f32 %v5594_v26, 0.0 }
 0x77f   : > { %v5455_v61 = vadd.f32 %v5454_v54, %v5406_v51  ;;  %v5457_v20 = vadd.f32 %v5456_v57, %v5408_v27  ;;  %v19190_v54 = vld [vmem:[#allocation123_spill] sm:$0xff]  ;;  %v19196_v27 = vld [vmem:[#allocation140_spill] sm:$0xff] }
 0x780   : > { %v5627_v49 = vpack.c.bf16 %v5617_v13, %v5616_v3  ;;  %v11182_v3 = vld [vmem:[%s19181_s8 + $0x38] sm:$0xf0]  ;;  %v5601_v13 = vpop.f32.mrf.mxu0 }
 0x781   : > { %v5547_v1 = vpop.f32.mrf.mxu3  ;;  %v11185_v40 = vor.u32 %v12647_v38, %v11182_v3  ;;  %v5504_v5 = vadd.f32 %v5503_v41, %v5455_v61  ;;  %v5506_v52 = vadd.f32 %v5505_v32, %v5457_v20  ;;  %v3499_v61 = vadd.f32 %v19196_v27, %v19195_v33  ;;  %v19197_v20 = vld [vmem:[#allocation160_spill] sm:$0xff] }
 0x782   : > { %5728 = vmatmul.bf16.gmra.mxu1 %v5627_v49  ;;  %v5548_v34 = vadd.f32 %v5547_v1, %v5499_v9  ;;  %v11173_v49 = vor.u32 %v12646_v4, %v11172_v10  ;;  %v11177_v1 = vor.u32 %v12645_v15, %v11174_v56 }
 0x783   : > { %5937 = vmatpush.bf16.msra.mxu3 %v11185_v40 }
 0x784   : > { %v5597_v62 = vadd.f32 %v5596_v11, %v5548_v34  ;;  %v11181_v11 = vor.u32 %v12648_v28, %v11180_v46  ;;  %v11158_v34 = vld [vmem:[%s19181_s8 + $0x8] sm:$0xf0]  ;;  %v19193_v46 = vld [vmem:[#allocation158_spill] sm:$0xff]  ;;  %v19194_v28 = vld [vmem:[#allocation128_spill] sm:$0xff]  ;;  %s703_s8 = scalar_lea.vmem [#allocation2], %s10247_s2  ;;  %s13018_s2 = scalar_lea.hbm %s18278_s23, 4 }
 0x785   : > { %v11161_v29 = vor.u32 %v12641_v21, %v11158_v34  ;;  %v3497_v38 = vadd.f32 %v19194_v28, %v19193_v46  ;;  %v3507_v21 = vadd.f32 %v19202_v31, %v19201_v48  ;;  %s10181_s4 = sshll.u32 %s703_s8, 4  ;;  %p13020_p1 = scmp.lt.s32.totalorder %s13018_s2, %s13014_s28  ;;  %s10182_s4 = int_to_ptr.vmem [resolvable:$true] %s10181_s4 }
 0x786   : > { %v5618_v0 = vmax.f32 %v5597_v62, 0.0  ;;  %5888 = vmatpush.bf16.msrb.mxu2 %v11181_v11  ;;  %v3494_v62 = vadd.f32 %v19192_v6, %v19191_v44 }
 0x787   : > { %5938 = vmatpush.bf16.msra.mxu3 %v11177_v1  ;;  %v4574_v11 = vadd.f32 %v16729_v22, %v3497_v38  ;;  %v19199_v1 = vld [vmem:[#allocation161_spill] sm:$0xff]  ;;  %p13021_p2 = por %p13020_p1, %p13019_p0 }
 0x788   : > { %v5603_v36 = vpop.f32.mrf.mxu0  ;;  %v4573_v63 = vadd.f32 %v16729_v22, %v3494_v62 }
 0x789   : > { %v5549_v12 = vpop.f32.mrf.mxu3  ;;  %p13022_p3 = pnand %p13021_p2, %p13017_p13 }
 0x78a   : > { %v5550_v30 = vadd.f32 %v5549_v12, %v5501_v35  ;;  %5889 = vmatpush.bf16.msrb.mxu2 %v11173_v49  ;;  %v19189_v35 = vld [vmem:[#allocation155_spill] sm:$0xff]  ;;  %v19198_v49 = vld [vmem:[#allocation57_spill] sm:$0xff] }
 0x78b   : > { %5939 = vmatpush.bf16.msra.mxu3 %v11169_v53  ;;  %v3492_v12 = vadd.f32 %v19190_v54, %v19189_v35  ;;  %v3502_v56 = vadd.f32 %v19198_v49, %v19197_v20 }
 0x78c   : > { %v5599_v19 = vadd.f32 %v5598_v47, %v5550_v30 }
 0x78d   : > { %v4572_v59 = vadd.f32 %v16729_v22, %v3492_v12  ;;  %v4576_v58 = vadd.f32 %v16729_v22, %v3502_v56 }
 0x78e   : > { %v5619_v24 = vmax.f32 %v5599_v19, 0.0  ;;  %5890 = vmatpush.bf16.msrb.mxu2 %v11165_v23 }
 0x78f   : > { %5940 = vmatpush.bf16.msra.mxu3 %v11161_v29 }
 0x790   : > { %v5628_v26 = vpack.c.bf16 %v5619_v24, %v5618_v0 }
 0x791   : > { %v5552_v43 = vpop.f32.mrf.mxu3 }
 0x792   : > { %5733 = vmatmul.bf16.gmra.mxu1 %v5628_v26  ;;  %v5553_v42 = vadd.f32 %v5552_v43, %v5504_v5  ;;  %5891 = vmatpush.bf16.msrb.mxu2 %v11157_v60  ;;  %v19204_v60 = vld [vmem:[#allocation41_spill] sm:$0xff] }
 0x794   : > { %v5602_v9 = vadd.f32 %v5601_v13, %v5553_v42  ;;  %v4575_v13 = vadd.f32 %v16729_v22, %v3499_v61  ;;  %v19200_v42 = vld [vmem:[#allocation55_spill] sm:$0xff] }
 0x795   : > { %v3504_v32 = vadd.f32 %v19200_v42, %v19199_v1 }
 0x796   : > { %v5620_v14 = vmax.f32 %v5602_v9, 0.0 }
 0x799   : > { %v5554_v25 = vpop.f32.mrf.mxu3 }
 0x79a   : > { %v5555_v18 = vadd.f32 %v5554_v25, %v5506_v52  ;;  %v4577_v52 = vadd.f32 %v16729_v22, %v3504_v32 }
 0x79c   : > { %v5604_v2 = vadd.f32 %v5603_v36, %v5555_v18 }
 0x79e   : > { %v5621_v55 = vmax.f32 %v5604_v2, 0.0  ;;  %v19203_v2 = vld [vmem:[#allocation167_spill] sm:$0xff] }
 0x79f   : > { %v3509_v34 = vadd.f32 %v19204_v60, %v19203_v2 }
 0x7a0   : > { %v5629_v47 = vpack.c.bf16 %v5621_v55, %v5620_v14  ;;  %v4578_v14 = vadd.f32 %v16729_v22, %v3507_v21 }
 0x7a2   : > { %5738 = vmatmul.bf16.gmra.mxu1 %v5629_v47  ;;  %v4579_v47 = vadd.f32 %v16729_v22, %v3509_v34 }
 0x7af   : > { %v5704_v16 = vpop.f32.mrf.mxu1 }
 0x7b0   : > { %v5705_v30 = vadd.f32 %v16722_v37, %v5704_v16 }
 0x7b2   : > { %v5744_v51 = vadd.f32 %v5705_v30, %v4572_v59  ;;  %v19205_v30 = vld [vmem:[#allocation127_spill] sm:$0xff]  ;;  %v19206_v59 = vld [vmem:[#allocation145_spill] sm:$0xff] }
 0x7b4   : > { %v5760_v19 = vmax.f32 %v5744_v51, 0.0  ;;  %v19208_v51 = vld [vmem:[#allocation144_spill] sm:$0xff] }
 0x7b7   : > { %v5706_v39 = vpop.f32.mrf.mxu1 }
 0x7b8   : > { %v5707_v17 = vadd.f32 %v16722_v37, %v5706_v39  ;;  %v4552_v39 = vadd.f32 %v19206_v59, %v19205_v30 }
 0x7ba   : > { %v5745_v50 = vadd.f32 %v5707_v17, %v4573_v63  ;;  %v19207_v63 = vld [vmem:[#allocation130_spill] sm:$0xff] }
 0x7bb   : > { %v4554_v17 = vadd.f32 %v19208_v51, %v19207_v63 }
 0x7bc   : > { %v5761_v41 = vmax.f32 %v5745_v50, 0.0 }
 0x7be   : > { %v5776_v0 = vpack.c.bf16 %v5761_v41, %v5760_v19  ;;  %v4580_v19 = vadd.f32 %v16729_v22, %v4552_v39 }
 0x7bf   : > { %v5709_v24 = vpop.f32.mrf.mxu1 }
 0x7c0   : > { %5892 = vmatmul.bf16.vlgmr.msrb.gmra.mxu2 %v5776_v0  ;;  %5941 = vmatmul.bf16.vlgmr.msra.gmra.mxu3 %v5776_v0  ;;  %v5710_v26 = vadd.f32 %v16722_v37, %v5709_v24  ;;  %v4581_v0 = vadd.f32 %v16729_v22, %v4554_v17 }
 0x7c2   : > { %v5746_v43 = vadd.f32 %v5710_v26, %v4574_v11  ;;  %v19209_v26 = vld [vmem:[#allocation119_spill] sm:$0xff]  ;;  %v19210_v11 = vld [vmem:[#allocation154_spill] sm:$0xff] }
 0x7c4   : > { %v5762_v10 = vmax.f32 %v5746_v43, 0.0  ;;  %v19212_v43 = vld [vmem:[#allocation59_spill] sm:$0xff] }
 0x7c7   : > { %v5711_v3 = vpop.f32.mrf.mxu1 }
 0x7c8   : > { %v5712_v40 = vadd.f32 %v16722_v37, %v5711_v3  ;;  %v4557_v3 = vadd.f32 %v19210_v11, %v19209_v26 }
 0x7ca   : > { %v5747_v57 = vadd.f32 %v5712_v40, %v4575_v13  ;;  %v19211_v13 = vld [vmem:[#allocation68_spill] sm:$0xff] }
 0x7cb   : > { %v4559_v40 = vadd.f32 %v19212_v43, %v19211_v13 }
 0x7cc   : > { %v5763_v4 = vmax.f32 %v5747_v57, 0.0 }
 0x7ce   : > { %v5777_v15 = vpack.c.bf16 %v5763_v4, %v5762_v10  ;;  %v4582_v10 = vadd.f32 %v16729_v22, %v4557_v3 }
 0x7cf   : > { %v5714_v5 = vpop.f32.mrf.mxu1 }
 0x7d0   : > { %5897 = vmatmul.bf16.gmra.mxu2 %v5777_v15  ;;  %5946 = vmatmul.bf16.gmra.mxu3 %v5777_v15  ;;  %v5715_v8 = vadd.f32 %v16722_v37, %v5714_v5  ;;  %v4583_v15 = vadd.f32 %v16729_v22, %v4559_v40 }
 0x7d2   : > { %v5748_v23 = vadd.f32 %v5715_v8, %v4576_v58  ;;  %v19213_v8 = vld [vmem:[#allocation125_spill] sm:$0xff]  ;;  %v19214_v58 = vld [vmem:[#allocation24_spill] sm:$0xff] }
 0x7d4   : > { %v5764_v53 = vmax.f32 %v5748_v23, 0.0  ;;  %v19216_v23 = vld [vmem:[#allocation163_spill] sm:$0xff] }
 0x7d7   : > { %v5716_v45 = vpop.f32.mrf.mxu1 }
 0x7d8   : > { %v5717_v7 = vadd.f32 %v16722_v37, %v5716_v45  ;;  %v4562_v45 = vadd.f32 %v19214_v58, %v19213_v8 }
 0x7da   : > { %v5749_v25 = vadd.f32 %v5717_v7, %v4577_v52  ;;  %v19215_v52 = vld [vmem:[#allocation134_spill] sm:$0xff] }
 0x7db   : > { %v4564_v7 = vadd.f32 %v19216_v23, %v19215_v52 }
 0x7dc   : > { %v5765_v9 = vmax.f32 %v5749_v25, 0.0 }
 0x7de   : > { %v5778_v18 = vpack.c.bf16 %v5765_v9, %v5764_v53  ;;  %v4584_v53 = vadd.f32 %v16729_v22, %v4562_v45 }
 0x7df   : > { %v5719_v36 = vpop.f32.mrf.mxu1 }
 0x7e0   : > { %5902 = vmatmul.bf16.gmra.mxu2 %v5778_v18  ;;  %5951 = vmatmul.bf16.gmra.mxu3 %v5778_v18  ;;  %v5720_v29 = vadd.f32 %v16722_v37, %v5719_v36  ;;  %v4585_v18 = vadd.f32 %v16729_v22, %v4564_v7 }
 0x7e2   : > { %v5750_v16 = vadd.f32 %v5720_v29, %v4578_v14  ;;  %v19217_v29 = vld [vmem:[#allocation131_spill] sm:$0xff]  ;;  %v19218_v14 = vld [vmem:[#allocation66_spill] sm:$0xff] }
 0x7e4   : > { %v5766_v12 = vmax.f32 %v5750_v16, 0.0  ;;  %v19220_v16 = vld [vmem:[#allocation96_spill] sm:$0xff] }
 0x7e7   : > { %v5721_v55 = vpop.f32.mrf.mxu1 }
 0x7e8   : > { %v5722_v35 = vadd.f32 %v16722_v37, %v5721_v55  ;;  %v4567_v55 = vadd.f32 %v19218_v14, %v19217_v29 }
 0x7ea   : > { %v5751_v54 = vadd.f32 %v5722_v35, %v4579_v47  ;;  %v19219_v47 = vld [vmem:[#allocation139_spill] sm:$0xff] }
 0x7eb   : > { %v4569_v35 = vadd.f32 %v19220_v16, %v19219_v47 }
 0x7ec   : > { %v5767_v44 = vmax.f32 %v5751_v54, 0.0 }
 0x7ee   : > { %v5779_v6 = vpack.c.bf16 %v5767_v44, %v5766_v12  ;;  %v4586_v12 = vadd.f32 %v16729_v22, %v4567_v55 }
 0x7ef   : > { %v5724_v62 = vpop.f32.mrf.mxu1 }
 0x7f0   : > { %5907 = vmatmul.bf16.gmra.mxu2 %v5779_v6  ;;  %5956 = vmatmul.bf16.gmra.mxu3 %v5779_v6  ;;  %v5725_v50 = vadd.f32 %v16722_v37, %v5724_v62  ;;  %v4587_v6 = vadd.f32 %v16729_v22, %v4569_v35 }
 0x7f2   : > { %v5752_v24 = vadd.f32 %v5725_v50, %v4580_v19 }
 0x7f4   : > { %v5768_v38 = vmax.f32 %v5752_v24, 0.0 }
 0x7f7   : > { %v5726_v41 = vpop.f32.mrf.mxu1 }
 0x7f8   : > { %v5727_v46 = vadd.f32 %v16722_v37, %v5726_v41 }
 0x7fa   : > { %v5753_v28 = vadd.f32 %v5727_v46, %v4581_v0 }
 0x7fc   : > { %v5769_v33 = vmax.f32 %v5753_v28, 0.0 }
 0x7fe   : > { %v5780_v27 = vpack.c.bf16 %v5769_v33, %v5768_v38 }
 0x7ff   : > { %v5729_v61 = vpop.f32.mrf.mxu1 }
 0x800   : > { %5912 = vmatmul.bf16.gmra.mxu2 %v5780_v27  ;;  %5961 = vmatmul.bf16.gmra.mxu3 %v5780_v27  ;;  %v5730_v57 = vadd.f32 %v16722_v37, %v5729_v61  ;;  %v16808_v61 = vld [vmem:[%s18266_s11] ss:$0 sm:$0xff] }
 0x802   : > { %v5754_v5 = vadd.f32 %v5730_v57, %v4582_v10 }
 0x804   : > { %v5770_v56 = vmax.f32 %v5754_v5, 0.0 }
 0x807   : > { %v5731_v4 = vpop.f32.mrf.mxu1 }
 0x808   : > { %v5732_v20 = vadd.f32 %v16722_v37, %v5731_v4 }
 0x80a   : > { %v5755_v49 = vadd.f32 %v5732_v20, %v4583_v15 }
 0x80c   : > { %v5771_v1 = vmax.f32 %v5755_v49, 0.0 }
 0x80e   : > { %v5781_v42 = vpack.c.bf16 %v5771_v1, %v5770_v56 }
 0x80f   : > { %v5734_v32 = vpop.f32.mrf.mxu1 }
 0x810   : > { %5917 = vmatmul.bf16.gmra.mxu2 %v5781_v42  ;;  %5966 = vmatmul.bf16.gmra.mxu3 %v5781_v42  ;;  %v5735_v25 = vadd.f32 %v16722_v37, %v5734_v32 }
 0x812   : > { %v5756_v36 = vadd.f32 %v5735_v25, %v4584_v53 }
 0x814   : > { %v5772_v21 = vmax.f32 %v5756_v36, 0.0 }
 0x817   : > { %v5736_v9 = vpop.f32.mrf.mxu1 }
 0x818   : > { %v5737_v48 = vadd.f32 %v16722_v37, %v5736_v9 }
 0x81a   : > { %v5757_v31 = vadd.f32 %v5737_v48, %v4585_v18 }
 0x81c   : > { %v5773_v2 = vmax.f32 %v5757_v31, 0.0 }
 0x81e   : > { %v5782_v60 = vpack.c.bf16 %v5773_v2, %v5772_v21 }
 0x81f   : > { %v5739_v34 = vpop.f32.mrf.mxu1 }
 0x820   : > { %5922 = vmatmul.bf16.gmra.mxu2 %v5782_v60  ;;  %5971 = vmatmul.bf16.gmra.mxu3 %v5782_v60  ;;  %v5740_v54 = vadd.f32 %v16722_v37, %v5739_v34 }
 0x822   : > { %v5758_v62 = vadd.f32 %v5740_v54, %v4586_v12 }
 0x824   : > { %v5774_v39 = vmax.f32 %v5758_v62, 0.0 }
 0x827   : > { %v5741_v44 = vpop.f32.mrf.mxu1 }
 0x828   : > { %v5742_v30 = vadd.f32 %v16722_v37, %v5741_v44  ;;  %v16851_v44 = vld [vmem:[%s18267_s12] sm:$0xff] }
 0x82a   : > { %v5759_v59 = vadd.f32 %v5742_v30, %v4587_v6  ;;  %v16856_v6 = vld [vmem:[%s18267_s12 + $0x8] sm:$0xff]  ;;  %v16865_v30 = vld [vmem:[%s18267_s12 + $0x18] sm:$0xff] }
 0x82c   : > { %v5775_v63 = vmax.f32 %v5759_v59, 0.0  ;;  %v16874_v59 = vld [vmem:[%s18267_s12 + $0x20] sm:$0xff] }
 0x82e   : > { %v5783_v51 = vpack.c.bf16 %v5775_v63, %v5774_v39 }
 0x830   : > { %5927 = vmatmul.bf16.gmra.mxu2 %v5783_v51  ;;  %5976 = vmatmul.bf16.gmra.mxu3 %v5783_v51 }
 0x843   : > { %v5893_v17 = vpop.f32.mrf.mxu2  ;;  %v16793_v50 = vpop.f32.mrf.mxu3 }
 0x844   : > { %v5983_v8 = vadd.f32 %v16808_v61, %v5893_v17 }
 0x846   : > { %v5999_v48 = vmax.f32 %v5983_v8, 0.0 }
 0x848   : > { %v6015_v29 = vpack.c.bf16 %v5999_v48, %v5999_v48 }
 0x84a   : > { %v6086_v35 = vunpack.c.l.b16 %v6015_v29 }
 0x84b   : > { %v5895_v19 = vpop.f32.mrf.mxu2  ;;  %v16795_v41 = vpop.f32.mrf.mxu3 }
 0x84c   : > { %v5984_v56 = vadd.f32 %v16808_v61, %v5895_v19 }
 0x84e   : > { %v6000_v25 = vmax.f32 %v5984_v56, 0.0 }
 0x850   : > { %v6016_v2 = vpack.c.bf16 %v6000_v25, %v6000_v25 }
 0x852   : > { %v6087_v47 = vunpack.c.l.b16 %v6016_v2 }
 0x853   : > { %v5898_v0 = vpop.f32.mrf.mxu2  ;;  %v16797_v24 = vpop.f32.mrf.mxu3 }
 0x854   : > { %v5985_v15 = vadd.f32 %v16808_v61, %v5898_v0  ;;  %v16844_v12 = vpack.c.b16 %v6087_v47, %v6086_v35 }
 0x856   : > { %v6001_v58 = vmax.f32 %v5985_v15, 0.0 }
 0x858   : > { %v6017_v31 = vpack.c.bf16 %v6001_v58, %v6001_v58 }
 0x85a   : > { %v6088_v14 = vunpack.c.l.b16 %v6017_v31 }
 0x85b   : > { %v5900_v46 = vpop.f32.mrf.mxu2  ;;  %v16799_v22 = vpop.f32.mrf.mxu3 }
 0x85c   : > { %v5986_v57 = vadd.f32 %v16808_v61, %v5900_v46 }
 0x85e   : > { %v6002_v1 = vmax.f32 %v5986_v57, 0.0  ;;  %v16926_v57 = vld [vmem:[%s18267_s12 + $0x38] sm:$0xff] }
 0x860   : > { %v6018_v53 = vpack.c.bf16 %v6002_v1, %v6002_v1 }
 0x862   : > { %v6089_v60 = vunpack.c.l.b16 %v6018_v53 }
 0x863   : > { %v5903_v28 = vpop.f32.mrf.mxu2  ;;  %v16801_v37 = vpop.f32.mrf.mxu3 }
 0x864   : > { %v5987_v3 = vadd.f32 %v16808_v61, %v5903_v28  ;;  %v16836_v16 = vpack.c.b16 %v6089_v60, %v6088_v14  ;;  %v6035_v46 = vpack.c.bf16 %v16801_v37, %v16801_v37 }
 0x866   : > { %v6003_v5 = vmax.f32 %v5987_v3, 0.0  ;;  %v16914_v3 = vld [vmem:[%s18267_s12 + $0x10] sm:$0xff] }
 0x868   : > { %v6019_v45 = vpack.c.bf16 %v6003_v5, %v6003_v5 }
 0x86a   : > { %v6090_v21 = vunpack.c.l.b16 %v6019_v45 }
 0x86b   : > { %v5905_v38 = vpop.f32.mrf.mxu2  ;;  %v16803_v33 = vpop.f32.mrf.mxu3 }
 0x86c   : > { %v5988_v11 = vadd.f32 %v16808_v61, %v5905_v38  ;;  %v6036_v19 = vpack.c.bf16 %v16803_v33, %v16803_v33  ;;  %v6034_v38 = vpack.c.bf16 %v16799_v22, %v16799_v22  ;;  %v6033_v33 = vpack.c.bf16 %v16797_v24, %v16797_v24 }
 0x86d   : > { %v6032_v24 = vpack.c.bf16 %v16795_v41, %v16795_v41 }
 0x86e   : > { %v6004_v10 = vmax.f32 %v5988_v11, 0.0  ;;  %v6380_v11 = vunpack.c.l.b16 %v6035_v46  ;;  %v6378_v15 = vunpack.c.l.b16 %v6033_v33 }
 0x86f   : > { %v6377_v41 = vunpack.c.l.b16 %v6032_v24 }
 0x870   : > { %v6020_v42 = vpack.c.bf16 %v6004_v10, %v6004_v10  ;;  %v16931_v10 = vld [vmem:[%s18267_s12 + $0x40] sm:$0xff] }
 0x872   : > { %v6091_v9 = vunpack.c.l.b16 %v6020_v42  ;;  %v16951_v42 = vld [vmem:[%s18267_s12 + $0x30] sm:$0xff] }
 0x873   : > { %v5908_v27 = vpop.f32.mrf.mxu2  ;;  %v16813_v43 = vpop.f32.mrf.mxu3 }
 0x874   : > { %v5989_v26 = vadd.f32 %v16808_v61, %v5908_v27  ;;  %v16828_v34 = vpack.c.b16 %v6091_v9, %v6090_v21  ;;  %v6037_v51 = vpack.c.bf16 %v16813_v43, %v16813_v43  ;;  %v6381_v27 = vunpack.c.l.b16 %v6036_v19 }
 0x875   : > { %v6379_v43 = vunpack.c.l.b16 %v6034_v38 }
 0x876   : > { %v6005_v13 = vmax.f32 %v5989_v26, 0.0  ;;  %v6382_v28 = vunpack.c.l.b16 %v6037_v51 }
 0x877   : > { %v6385_v5 = vpack.c.b16 %v6379_v43, %v6378_v15 }
 0x878   : > { %v6021_v20 = vpack.c.bf16 %v6005_v13, %v6005_v13  ;;  %v16919_v13 = vld [vmem:[%s18267_s12 + $0x28] sm:$0xff] }
 0x87a   : > { %v6092_v52 = vunpack.c.l.b16 %v6021_v20 }
 0x87b   : > { %v5910_v40 = vpop.f32.mrf.mxu2  ;;  %v5959_v36 = vpop.f32.mrf.mxu3 }
 0x87c   : > { %v5990_v4 = vadd.f32 %v16808_v61, %v5910_v40  ;;  %v6038_v39 = vpack.c.bf16 %v5959_v36, %v5959_v36  ;;  %v6386_v40 = vpack.c.b16 %v6381_v27, %v6380_v11 }
 0x87e   : > { %v6006_v49 = vmax.f32 %v5990_v4, 0.0  ;;  %v6383_v0 = vunpack.c.l.b16 %v6038_v39  ;;  %v6031_v4 = vpack.c.bf16 %v16793_v50, %v16793_v50 }
 0x880   : > { %v6022_v32 = vpack.c.bf16 %v6006_v49, %v6006_v49  ;;  %v6387_v26 = vpack.c.b16 %v6383_v0, %v6382_v28  ;;  %v6376_v20 = vunpack.c.l.b16 %v6031_v4 }
 0x882   : > { %v6093_v23 = vunpack.c.l.b16 %v6022_v32  ;;  %v6384_v49 = vpack.c.b16 %v6377_v41, %v6376_v20 }
 0x883   : > { %v16820_v7 = vpop.f32.mrf.mxu2  ;;  %v16840_v54 = vpop.f32.mrf.mxu3 }
 0x884   : > { %v16822_v18 = vpack.c.b16 %v6093_v23, %v6092_v52  ;;  %v5991_v29 = vadd.f32 %v16808_v61, %v16820_v7 }
 0x886   : > { %6110 = vmatpush.bf16.msra.mxu1 %v16822_v18  ;;  %6134 = vmatpush.bf16.msra.mxu0 %v16822_v18  ;;  %v6007_v19 = vmax.f32 %v5991_v29, 0.0  ;;  %v12693_v29 = vld [vmem:[%s19221_s9 + $0xd8] sm:$0xff] }
 0x887   : > { %6182 = vmatpush.bf16.msra.mxu2 %v16822_v18  ;;  %6206 = vmatpush.bf16.msrb.mxu3 %v16822_v18 }
 0x88a   : > { %6111 = vmatpush.bf16.msra.mxu1 %v16828_v34  ;;  %6135 = vmatpush.bf16.msra.mxu0 %v16828_v34 }
 0x88b   : > { %6183 = vmatpush.bf16.msra.mxu2 %v16828_v34  ;;  %6207 = vmatpush.bf16.msrb.mxu3 %v16828_v34  ;;  %v16834_v55 = vpop.f32.mrf.mxu2  ;;  %v16886_v63 = vpop.f32.mrf.mxu3 }
 0x88c   : > { %v5992_v21 = vadd.f32 %v16808_v61, %v16834_v55 }
 0x88e   : > { %6112 = vmatpush.bf16.msra.mxu1 %v16836_v16  ;;  %6136 = vmatpush.bf16.msra.mxu0 %v16836_v16  ;;  %v6008_v39 = vmax.f32 %v5992_v21, 0.0  ;;  %v12678_v21 = vld [vmem:[%s19221_s9 + $0x60] sm:$0xff] }
 0x88f   : > { %6184 = vmatpush.bf16.msra.mxu2 %v16836_v16  ;;  %6208 = vmatpush.bf16.msrb.mxu3 %v16836_v16 }
 0x890   : > { %v6024_v55 = vpack.c.bf16 %v6008_v39, %v6008_v39  ;;  %v12684_v39 = vld [vmem:[%s19221_s9 + $0x90] sm:$0xff] }
 0x892   : > { %6113 = vmatpush.bf16.msra.mxu1 %v16844_v12  ;;  %6137 = vmatpush.bf16.msra.mxu0 %v16844_v12 }
 0x893   : > { %6185 = vmatpush.bf16.msra.mxu2 %v16844_v12  ;;  %6209 = vmatpush.bf16.msrb.mxu3 %v16844_v12  ;;  %v16860_v62 = vpop.f32.mrf.mxu2  ;;  %v16909_v37 = vpop.f32.mrf.mxu3 }
 0x895   : > { %11238 = vmatmul.msk.bf16.vlgmr.msra.gmra.mxu1 %vm6102_vm1, %v16851_v44  ;;  %11243 = vmatmul.msk.bf16.vlgmr.msra.gmra.mxu0 %vm6102_vm1, %v16856_v6 }
 0x896   : > { %6158 = vmatpush.bf16.msrb.mxu1 %v16822_v18  ;;  %6230 = vmatpush.bf16.msrb.mxu0 %v16822_v18 }
 0x897   : > { %6278 = vmatpush.bf16.msrb.mxu2 %v16822_v18  ;;  %6302 = vmatpush.bf16.msra.mxu3 %v16822_v18 }
 0x898   : > { %11253 = vmatmul.msk.bf16.vlgmr.msra.gmra.mxu2 %vm6102_vm1, %v16865_v30  ;;  %11258 = vmatmul.msk.bf16.vlgmr.msrb.gmra.mxu3 %vm6102_vm1, %v16874_v59 }
 0x89a   : > { %6159 = vmatpush.bf16.msrb.mxu1 %v16828_v34  ;;  %6231 = vmatpush.bf16.msrb.mxu0 %v16828_v34 }
 0x89b   : > { %6279 = vmatpush.bf16.msrb.mxu2 %v16828_v34  ;;  %6303 = vmatpush.bf16.msra.mxu3 %v16828_v34  ;;  %v5920_v17 = vpop.f32.mrf.mxu2  ;;  %v16945_v56 = vpop.f32.mrf.mxu3 }
 0x89c   : > { %v5994_v25 = vadd.f32 %v16808_v61, %v5920_v17 }
 0x89e   : > { %6160 = vmatpush.bf16.msrb.mxu1 %v16836_v16  ;;  %6232 = vmatpush.bf16.msrb.mxu0 %v16836_v16  ;;  %v6010_v2 = vmax.f32 %v5994_v25, 0.0  ;;  %v12689_v25 = vld [vmem:[%s19221_s9 + $0xb8] sm:$0xff] }
 0x89f   : > { %6280 = vmatpush.bf16.msrb.mxu2 %v16836_v16  ;;  %6304 = vmatpush.bf16.msra.mxu3 %v16836_v16 }
 0x8a0   : > { %v6026_v51 = vpack.c.bf16 %v6010_v2, %v6010_v2  ;;  %v12687_v2 = vld [vmem:[%s19221_s9 + $0xa8] sm:$0xff] }
 0x8a2   : > { %6161 = vmatpush.bf16.msrb.mxu1 %v16844_v12  ;;  %6233 = vmatpush.bf16.msrb.mxu0 %v16844_v12  ;;  %v6417_v28 = vunpack.c.l.b16 %v6026_v51  ;;  %v12691_v51 = vld [vmem:[%s19221_s9 + $0xc8] sm:$0xff] }
 0x8a3   : > { %6281 = vmatpush.bf16.msrb.mxu2 %v16844_v12  ;;  %6305 = vmatpush.bf16.msra.mxu3 %v16844_v12  ;;  %v5923_v22 = vpop.f32.mrf.mxu2  ;;  %v16954_v8 = vpop.f32.mrf.mxu3 }
 0x8a4   : > { %v5995_v45 = vadd.f32 %v16808_v61, %v5923_v22 }
 0x8a5   : > { %11248 = vmatmul.msk.bf16.vlgmr.msrb.gmra.mxu1 %vm6102_vm1, %v16914_v3  ;;  %11263 = vmatmul.msk.bf16.vlgmr.msrb.gmra.mxu0 %vm6102_vm1, %v16919_v13 }
 0x8a6   : > { %6254 = vmatpush.bf16.msra.mxu1 %v16822_v18  ;;  %6396 = vmatpush.bf16.msra.mxu0 %v6387_v26  ;;  %v5993_v18 = vadd.f32 %v16808_v61, %v16860_v62  ;;  %v6011_v36 = vmax.f32 %v5995_v45, 0.0  ;;  %v6415_v26 = vunpack.c.l.b16 %v6024_v55  ;;  %v12671_v45 = vld [vmem:[%s19221_s9 + $0x28] sm:$0xff] }
 0x8a8   : > { %11273 = vmatmul.msk.bf16.vlgmr.msrb.gmra.mxu2 %vm6102_vm1, %v16926_v57  ;;  %11278 = vmatmul.msk.bf16.vlgmr.msra.gmra.mxu3 %vm6102_vm1, %v16931_v10  ;;  %v6009_v47 = vmax.f32 %v5993_v18, 0.0  ;;  %v12679_v18 = vld [vmem:[%s19221_s9 + $0x68] sm:$0xff] }
 0x8aa   : > { %6255 = vmatpush.bf16.msra.mxu1 %v16828_v34  ;;  %6397 = vmatpush.bf16.msra.mxu0 %v6386_v40  ;;  %v6025_v0 = vpack.c.bf16 %v6009_v47, %v6009_v47  ;;  %v12676_v47 = vld [vmem:[%s19221_s9 + $0x50] sm:$0xff] }
 0x8ab   : > { %v5925_v50 = vpop.f32.mrf.mxu2  ;;  %v5974_v14 = vpop.f32.mrf.mxu3 }
 0x8ac   : > { %v5996_v58 = vadd.f32 %v16808_v61, %v5925_v50  ;;  %v6416_v7 = vunpack.c.l.b16 %v6025_v0  ;;  %v6044_v4 = vpack.c.bf16 %v5974_v14, %v5974_v14  ;;  %v12673_v50 = vld [vmem:[%s19221_s9 + $0x38] sm:$0xff]  ;;  %v12666_v14 = vld [vmem:[%s19221_s9] sm:$0xff] }
 0x8ad   : > { %v12682_v0 = vld [vmem:[%s19221_s9 + $0x80] sm:$0xff] }
 0x8ae   : > { %6256 = vmatpush.bf16.msra.mxu1 %v16836_v16  ;;  %6398 = vmatpush.bf16.msra.mxu0 %v6385_v5  ;;  %v6012_v53 = vmax.f32 %v5996_v58, 0.0  ;;  %v6027_v16 = vpack.c.bf16 %v6011_v36, %v6011_v36  ;;  %v6423_v33 = vpack.c.b16 %v6417_v28, %v6416_v7  ;;  %v6041_v5 = vpack.c.bf16 %v16909_v37, %v16909_v37  ;;  %v12672_v37 = vld [vmem:[%s19221_s9 + $0x30] sm:$0xff] }
 0x8af   : > { %v12688_v36 = vld [vmem:[%s19221_s9 + $0xb0] sm:$0xff] }
 0x8b0   : > { %v6028_v60 = vpack.c.bf16 %v6012_v53, %v6012_v53  ;;  %v6418_v46 = vunpack.c.l.b16 %v6027_v16  ;;  %v12696_v53 = vld [vmem:[%s19221_s9 + $0xf0] sm:$0xff]  ;;  %v12685_v16 = vld [vmem:[%s19221_s9 + $0x98] sm:$0xff] }
 0x8b2   : > { %6257 = vmatpush.bf16.msra.mxu1 %v16844_v12  ;;  %6399 = vmatpush.bf16.msra.mxu0 %v6384_v49  ;;  %v6419_v62 = vunpack.c.l.b16 %v6028_v60  ;;  %v6040_v49 = vpack.c.bf16 %v16886_v63, %v16886_v63  ;;  %v12694_v60 = vld [vmem:[%s19221_s9 + $0xe0] sm:$0xff] }
 0x8b3   : > { %v5928_v1 = vpop.f32.mrf.mxu2  ;;  %v5977_v27 = vpop.f32.mrf.mxu3 }
 0x8b4   : > { %v5997_v32 = vadd.f32 %v16808_v61, %v5928_v1  ;;  %v6424_v38 = vpack.c.b16 %v6419_v62, %v6418_v46  ;;  %v6045_v40 = vpack.c.bf16 %v5977_v27, %v5977_v27  ;;  %v6637_v63 = vunpack.c.l.b16 %v6040_v49  ;;  %v12674_v62 = vld [vmem:[%s19221_s9 + $0x40] sm:$0xff] }
 0x8b5   : > { %11268 = vmatmul.msk.bf16.vlgmr.msra.gmra.mxu1 %vm6102_vm1, %v16951_v42  ;;  %11279 = vmatmul.msk.bf16.vlgmr.msra.gmra.mxu0 %vm6102_vm1, %v16874_v59 }
 0x8b6   : > { %v6013_v52 = vmax.f32 %v5997_v32, 0.0  ;;  %v6039_v32 = vpack.c.bf16 %v16840_v54, %v16840_v54 }
 0x8b8   : > { %v6029_v48 = vpack.c.bf16 %v6013_v52, %v6013_v52  ;;  %v6636_v54 = vunpack.c.l.b16 %v6039_v32 }
 0x8ba   : > { %v6420_v35 = vunpack.c.l.b16 %v6029_v48  ;;  %v6644_v52 = vpack.c.b16 %v6637_v63, %v6636_v54  ;;  %v12695_v48 = vld [vmem:[%s19221_s9 + $0xe8] sm:$0xff]  ;;  %v12705_v63 = vld [vmem:[%s19221_s9 + $0x138] sm:$0xff] }
 0x8bb   : > { %v5930_v23 = vpop.f32.mrf.mxu2  ;;  %v5979_v24 = vpop.f32.mrf.mxu3 }
 0x8bc   : > { %v5998_v9 = vadd.f32 %v16808_v61, %v5930_v23  ;;  %v6023_v61 = vpack.c.bf16 %v6007_v19, %v6007_v19  ;;  %v6046_v43 = vpack.c.bf16 %v5979_v24, %v5979_v24  ;;  %v12680_v23 = vld [vmem:[%s19221_s9 + $0x70] sm:$0xff]  ;;  %v12690_v19 = vld [vmem:[%s19221_s9 + $0xc0] sm:$0xff] }
 0x8be   : > { %v6014_v31 = vmax.f32 %v5998_v9, 0.0  ;;  %v6414_v11 = vunpack.c.l.b16 %v6023_v61  ;;  %v6643_v15 = vunpack.c.l.b16 %v6046_v43  ;;  %v12669_v9 = vld [vmem:[%s19221_s9 + $0x18] sm:$0xff] }
 0x8c0   : > { %v6030_v34 = vpack.c.bf16 %v6014_v31, %v6014_v31  ;;  %v16970_v22 = vpack.c.b16 %v6415_v26, %v6414_v11  ;;  %v12668_v31 = vld [vmem:[%s19221_s9 + $0x10] sm:$0xff] }
 0x8c2   : > { %v6421_v12 = vunpack.c.l.b16 %v6030_v34  ;;  %v12686_v34 = vld [vmem:[%s19221_s9 + $0xa0] sm:$0xff] }
 0x8c4   : > { %v6425_v17 = vpack.c.b16 %v6421_v12, %v6420_v35  ;;  %v12692_v35 = vld [vmem:[%s19221_s9 + $0xd0] sm:$0xff]  ;;  %v12675_v12 = vld [vmem:[%s19221_s9 + $0x48] sm:$0xff] }
 0x8c6   : > { %6434 = vmatpush.bf16.msrb.mxu1 %v6425_v17  ;;  %6450 = vmatpush.bf16.msra.mxu2 %v6425_v17 }
 0x8c7   : > { %6466 = vmatpush.bf16.msrb.mxu3 %v6425_v17  ;;  %6482 = vmatpush.bf16.msrb.mxu0 %v6425_v17 }
 0x8ca   : > { %6435 = vmatpush.bf16.msrb.mxu1 %v6424_v38  ;;  %6451 = vmatpush.bf16.msra.mxu2 %v6424_v38 }
 0x8cb   : > { %6467 = vmatpush.bf16.msrb.mxu3 %v6424_v38  ;;  %6483 = vmatpush.bf16.msrb.mxu0 %v6424_v38 }
 0x8ce   : > { %6436 = vmatpush.bf16.msrb.mxu1 %v6423_v33  ;;  %6452 = vmatpush.bf16.msra.mxu2 %v6423_v33 }
 0x8cf   : > { %6468 = vmatpush.bf16.msrb.mxu3 %v6423_v33  ;;  %6484 = vmatpush.bf16.msrb.mxu0 %v6423_v33 }
 0x8d2   : > { %6437 = vmatpush.bf16.msrb.mxu1 %v16970_v22  ;;  %6453 = vmatpush.bf16.msra.mxu2 %v16970_v22 }
 0x8d3   : > { %6469 = vmatpush.bf16.msrb.mxu3 %v16970_v22  ;;  %6485 = vmatpush.bf16.msrb.mxu0 %v16970_v22 }
 0x8d5   : > { %11280 = vmatmul.msk.bf16.vlgmr.msrb.gmra.mxu1 %vm6102_vm1, %v16851_v44  ;;  %11281 = vmatmul.msk.bf16.vlgmr.msra.gmra.mxu2 %vm6102_vm1, %v16856_v6  ;;  %v6043_v44 = vpack.c.bf16 %v16954_v8, %v16954_v8  ;;  %v6642_v6 = vunpack.c.l.b16 %v6045_v40  ;;  %v6638_v8 = vunpack.c.l.b16 %v6041_v5 }
 0x8d6   : > { %6498 = vmatpush.bf16.msra.mxu1 %v6425_v17  ;;  %6514 = vmatpush.bf16.msrb.mxu2 %v6425_v17 }
 0x8d7   : > { %6530 = vmatpush.bf16.msra.mxu3 %v6425_v17  ;;  %6546 = vmatpush.bf16.msra.mxu0 %v6425_v17  ;;  %v6647_v41 = vpack.c.b16 %v6643_v15, %v6642_v6  ;;  %v6640_v20 = vunpack.c.l.b16 %v6043_v44 }
 0x8d8   : > { %11282 = vmatmul.msk.bf16.vlgmr.msrb.gmra.mxu3 %vm6102_vm1, %v16914_v3  ;;  %11283 = vmatmul.msk.bf16.vlgmr.msrb.gmra.mxu0 %vm6102_vm1, %v16865_v30  ;;  %v6042_v3 = vpack.c.bf16 %v16945_v56, %v16945_v56  ;;  %v6641_v30 = vunpack.c.l.b16 %v6044_v4 }
 0x8da   : > { %6499 = vmatpush.bf16.msra.mxu1 %v6424_v38  ;;  %6515 = vmatpush.bf16.msrb.mxu2 %v6424_v38  ;;  %v6639_v56 = vunpack.c.l.b16 %v6042_v3  ;;  %v6646_v1 = vpack.c.b16 %v6641_v30, %v6640_v20 }
 0x8db   : > { %6531 = vmatpush.bf16.msra.mxu3 %v6424_v38  ;;  %6547 = vmatpush.bf16.msra.mxu0 %v6424_v38 }
 0x8dc   : > { %v6645_v58 = vpack.c.b16 %v6639_v56, %v6638_v8 }
 0x8de   : > { %6500 = vmatpush.bf16.msra.mxu1 %v6423_v33  ;;  %6516 = vmatpush.bf16.msrb.mxu2 %v6423_v33 }
 0x8df   : > { %6532 = vmatpush.bf16.msra.mxu3 %v6423_v33  ;;  %6548 = vmatpush.bf16.msra.mxu0 %v6423_v33 }
 0x8e2   : > { %6501 = vmatpush.bf16.msra.mxu1 %v16970_v22  ;;  %6517 = vmatpush.bf16.msrb.mxu2 %v16970_v22 }
 0x8e3   : > { %6533 = vmatpush.bf16.msra.mxu3 %v16970_v22  ;;  %6549 = vmatpush.bf16.msra.mxu0 %v16970_v22 }
 0x8e5   : > { %11284 = vmatmul.msk.bf16.vlgmr.msra.gmra.mxu1 %vm6102_vm1, %v16874_v59  ;;  %11285 = vmatmul.msk.bf16.vlgmr.msrb.gmra.mxu2 %vm6102_vm1, %v16919_v13  ;;  %v12681_v13 = vld [vmem:[%s19221_s9 + $0x78] sm:$0xff] }
 0x8e6   : > { %6562 = vmatpush.bf16.msrb.mxu1 %v6425_v17  ;;  %6656 = vmatpush.bf16.msra.mxu2 %v6647_v41  ;;  %v12683_v17 = vld [vmem:[%s19221_s9 + $0x88] sm:$0xff] }
 0x8e7   : > { %7248 = vmatpush.bf16.msrb.mxu3 %v12673_v50  ;;  %7267 = vmatpush.bf16.msrb.mxu0 %v12681_v13  ;;  %v12728_v13 = vld [vmem:[%s19221_s9 + $0x1f0] sm:$0xff] }
 0x8e8   : > { %11286 = vmatmul.msk.bf16.vlgmr.msra.gmra.mxu3 %vm6102_vm1, %v16951_v42  ;;  %11287 = vmatmul.msk.bf16.vlgmr.msra.gmra.mxu0 %vm6102_vm1, %v16926_v57  ;;  %v12697_v57 = vld [vmem:[%s19221_s9 + $0xf8] sm:$0xff]  ;;  %v12670_v42 = vld [vmem:[%s19221_s9 + $0x20] sm:$0xff] }
 0x8ea   : > { %6563 = vmatpush.bf16.msrb.mxu1 %v6424_v38  ;;  %6657 = vmatpush.bf16.msra.mxu2 %v6646_v1 }
 0x8eb   : > { %7249 = vmatpush.bf16.msrb.mxu3 %v12672_v37  ;;  %7268 = vmatpush.bf16.msrb.mxu0 %v12680_v23  ;;  %v12727_v23 = vld [vmem:[%s19221_s9 + $0x1e8] sm:$0xff] }
 0x8ee   : > { %6564 = vmatpush.bf16.msrb.mxu1 %v6423_v33  ;;  %6658 = vmatpush.bf16.msra.mxu2 %v6645_v58  ;;  %v12729_v58 = vld [vmem:[%s19221_s9 + $0x1f8] sm:$0xff] }
 0x8ef   : > { %7250 = vmatpush.bf16.msrb.mxu3 %v12671_v45  ;;  %7269 = vmatpush.bf16.msrb.mxu0 %v12679_v18  ;;  %v12704_v45 = vld [vmem:[%s19221_s9 + $0x130] sm:$0xff]  ;;  %v12702_v18 = vld [vmem:[%s19221_s9 + $0x120] sm:$0xff] }
 0x8f2   : > { %6565 = vmatpush.bf16.msrb.mxu1 %v16970_v22  ;;  %6659 = vmatpush.bf16.msra.mxu2 %v6644_v52  ;;  %v12713_v52 = vld [vmem:[%s19221_s9 + $0x178] sm:$0xff] }
 0x8f3   : > { %7251 = vmatpush.bf16.msrb.mxu3 %v12670_v42  ;;  %7270 = vmatpush.bf16.msrb.mxu0 %v12678_v21  ;;  %v12703_v42 = vld [vmem:[%s19221_s9 + $0x128] sm:$0xff] }
 0x8f4   : > { %v12719_v21 = vld [vmem:[%s19221_s9 + $0x1a8] sm:$0xff] }
 0x8f5   : > { %11288 = vmatmul.msk.bf16.vlgmr.msrb.gmra.mxu1 %vm6102_vm1, %v16931_v10  ;;  %11289 = vmatmul.msk.bf16.vlgmr.msra.gmra.mxu2 %vm6102_vm1, %v16874_v59  ;;  %v12667_v10 = vld [vmem:[%s19221_s9 + $0x8] sm:$0xff]  ;;  %v12677_v59 = vld [vmem:[%s19221_s9 + $0x58] sm:$0xff] }
 0x8f6   : > { %7305 = vmatpush.bf16.msrb.mxu2 %v12697_v57  ;;  %7286 = vmatpush.bf16.msra.mxu1 %v12689_v25  ;;  %v12721_v57 = vld [vmem:[%s19221_s9 + $0x1b8] sm:$0xff] }
 0x8f7   : > { %7252 = vmatpush.bf16.msrb.mxu3 %v12669_v9  ;;  %7271 = vmatpush.bf16.msrb.mxu0 %v12677_v59  ;;  %v12720_v9 = vld [vmem:[%s19221_s9 + $0x1b0] sm:$0xff]  ;;  %v12710_v59 = vld [vmem:[%s19221_s9 + $0x160] sm:$0xff] }
 0x8fa   : > { %7306 = vmatpush.bf16.msrb.mxu2 %v12696_v53  ;;  %7287 = vmatpush.bf16.msra.mxu1 %v12688_v36  ;;  %v12712_v53 = vld [vmem:[%s19221_s9 + $0x170] sm:$0xff]  ;;  %v12726_v36 = vld [vmem:[%s19221_s9 + $0x1e0] sm:$0xff] }
 0x8fb   : > { %7253 = vmatpush.bf16.msrb.mxu3 %v12668_v31  ;;  %7272 = vmatpush.bf16.msrb.mxu0 %v12676_v47  ;;  %v12711_v31 = vld [vmem:[%s19221_s9 + $0x168] sm:$0xff] }
 0x8fe   : > { %7307 = vmatpush.bf16.msrb.mxu2 %v12695_v48  ;;  %7288 = vmatpush.bf16.msra.mxu1 %v12687_v2 }
 0x8ff   : > { %7254 = vmatpush.bf16.msrb.mxu3 %v12667_v10  ;;  %7273 = vmatpush.bf16.msrb.mxu0 %v12675_v12  ;;  %v12725_v10 = vld [vmem:[%s19221_s9 + $0x1d8] sm:$0xff] }
 0x900   : > { %v12709_v12 = vld [vmem:[%s19221_s9 + $0x158] sm:$0xff] }
 0x902   : > { %7308 = vmatpush.bf16.msrb.mxu2 %v12694_v60  ;;  %7289 = vmatpush.bf16.msra.mxu1 %v12686_v34  ;;  %v12701_v60 = vld [vmem:[%s19221_s9 + $0x118] sm:$0xff]  ;;  %v12718_v34 = vld [vmem:[%s19221_s9 + $0x1a0] sm:$0xff] }
 0x903   : > { %7255 = vmatpush.bf16.msrb.mxu3 %v12666_v14  ;;  %7274 = vmatpush.bf16.msrb.mxu0 %v12674_v62  ;;  %v12700_v14 = vld [vmem:[%s19221_s9 + $0x110] sm:$0xff] }
 0x904   : > { %v12708_v62 = vld [vmem:[%s19221_s9 + $0x150] sm:$0xff] }
 0x906   : > { %7309 = vmatpush.bf16.msrb.mxu2 %v12693_v29  ;;  %7290 = vmatpush.bf16.msra.mxu1 %v12685_v16  ;;  %v12724_v16 = vld [vmem:[%s19221_s9 + $0x1d0] sm:$0xff] }
 0x907   : > { %7324 = vmatpush.bf16.msra.mxu3 %v12705_v63  ;;  %7343 = vmatpush.bf16.msra.mxu0 %v12713_v52 }
 0x90a   : > { %7310 = vmatpush.bf16.msrb.mxu2 %v12692_v35  ;;  %7291 = vmatpush.bf16.msra.mxu1 %v12684_v39  ;;  %v12699_v35 = vld [vmem:[%s19221_s9 + $0x108] sm:$0xff]  ;;  %v12717_v39 = vld [vmem:[%s19221_s9 + $0x198] sm:$0xff] }
 0x90b   : > { %7325 = vmatpush.bf16.msra.mxu3 %v12704_v45  ;;  %7344 = vmatpush.bf16.msra.mxu0 %v12712_v53 }
 0x90e   : > { %7311 = vmatpush.bf16.msrb.mxu2 %v12691_v51  ;;  %7292 = vmatpush.bf16.msra.mxu1 %v12683_v17  ;;  %v12716_v17 = vld [vmem:[%s19221_s9 + $0x190] sm:$0xff] }
 0x90f   : > { %7326 = vmatpush.bf16.msra.mxu3 %v12703_v42  ;;  %7345 = vmatpush.bf16.msra.mxu0 %v12711_v31  ;;  %v12733_v42 = vld [vmem:[%s19221_s9 + $0x218] sm:$0xff] }
 0x912   : > { %7312 = vmatpush.bf16.msrb.mxu2 %v12690_v19  ;;  %7293 = vmatpush.bf16.msra.mxu1 %v12682_v0  ;;  %v6115_v46 = vpop.f32.mrf.mxu1  ;;  %v6139_v55 = vpop.f32.mrf.mxu0  ;;  %v12723_v19 = vld [vmem:[%s19221_s9 + $0x1c8] sm:$0xff] }
 0x913   : > { %v6120_v28 = vpack.c.bf16 %v6115_v46, %v6115_v46  ;;  %v6144_v38 = vpack.c.bf16 %v6139_v55, %v6139_v55  ;;  %7327 = vmatpush.bf16.msra.mxu3 %v12702_v18  ;;  %7346 = vmatpush.bf16.msra.mxu0 %v12710_v59  ;;  %v12698_v46 = vld [vmem:[%s19221_s9 + $0x100] sm:$0xff]  ;;  %v12732_v18 = vld [vmem:[%s19221_s9 + $0x210] sm:$0xff]  ;;  %v12731_v59 = vld [vmem:[%s19221_s9 + $0x208] sm:$0xff] }
 0x914   : > { %v12722_v55 = vld [vmem:[%s19221_s9 + $0x1c0] sm:$0xff] }
 0x915   : > { %v6316_v26 = vunpack.c.l.b16 %v6120_v28  ;;  %v6322_v33 = vunpack.c.l.b16 %v6144_v38 }
 0x916   : > { %7381 = vmatpush.bf16.msra.mxu2 %v12729_v58  ;;  %7362 = vmatpush.bf16.msrb.mxu1 %v12721_v57 }
 0x917   : > { %7328 = vmatpush.bf16.msra.mxu3 %v12701_v60  ;;  %7347 = vmatpush.bf16.msra.mxu0 %v12709_v12 }
 0x91a   : > { %v6117_v7 = vpop.f32.mrf.mxu1  ;;  %v6141_v27 = vpop.f32.mrf.mxu0  ;;  %7382 = vmatpush.bf16.msra.mxu2 %v12728_v13  ;;  %7363 = vmatpush.bf16.msrb.mxu1 %v12720_v9 }
 0x91b   : > { %v6187_v61 = vpop.f32.mrf.mxu2  ;;  %v6121_v11 = vpack.c.bf16 %v6117_v7, %v6117_v7  ;;  %v6145_v22 = vpack.c.bf16 %v6141_v27, %v6141_v27  ;;  %v17109_v37 = vpop.f32.mrf.mxu3  ;;  %7329 = vmatpush.bf16.msra.mxu3 %v12700_v14  ;;  %7348 = vmatpush.bf16.msra.mxu0 %v12708_v62  ;;  %v12715_v7 = vld [vmem:[%s19221_s9 + $0x188] sm:$0xff]  ;;  %v12737_v27 = vld [vmem:[%s19221_s9 + $0x238] sm:$0xff] }
 0x91c   : > { %v6192_v40 = vpack.c.bf16 %v6187_v61, %v6187_v61  ;;  %v12707_v61 = vld [vmem:[%s19221_s9 + $0x148] sm:$0xff]  ;;  %v6216_v60 = vpack.c.bf16 %v17109_v37, %v17109_v37 }
 0x91d   : > { %v6317_v24 = vunpack.c.l.b16 %v6121_v11  ;;  %v6323_v43 = vunpack.c.l.b16 %v6145_v22  ;;  %v12714_v11 = vld [vmem:[%s19221_s9 + $0x180] sm:$0xff] }
 0x91e   : > { %v6334_v6 = vunpack.c.l.b16 %v6192_v40  ;;  %7383 = vmatpush.bf16.msra.mxu2 %v12727_v23  ;;  %7364 = vmatpush.bf16.msrb.mxu1 %v12719_v21  ;;  %v6340_v12 = vunpack.c.l.b16 %v6216_v60 }
 0x91f   : > { %v6318_v4 = vpack.c.b16 %v6317_v24, %v6316_v26  ;;  %v6324_v15 = vpack.c.b16 %v6323_v43, %v6322_v33  ;;  %7330 = vmatpush.bf16.msra.mxu3 %v12699_v35  ;;  %7349 = vmatpush.bf16.msra.mxu0 %v12707_v61  ;;  %v12706_v26 = vld [vmem:[%s19221_s9 + $0x140] sm:$0xff]  ;;  %v12736_v24 = vld [vmem:[%s19221_s9 + $0x230] sm:$0xff]  ;;  %v12735_v43 = vld [vmem:[%s19221_s9 + $0x228] sm:$0xff] }
 0x921   : > { %7256 = vmatmul.bf16.vlgmr.msrb.gmra.mxu3 %v6318_v4  ;;  %7275 = vmatmul.bf16.vlgmr.msrb.gmra.mxu0 %v6324_v15 }
 0x922   : > { %v6163_v30 = vpop.f32.mrf.mxu1  ;;  %v17107_v50 = vpop.f32.mrf.mxu0  ;;  %7384 = vmatpush.bf16.msra.mxu2 %v12726_v36  ;;  %7365 = vmatpush.bf16.msrb.mxu1 %v12718_v34 }
 0x923   : > { %v6189_v44 = vpop.f32.mrf.mxu2  ;;  %v6168_v20 = vpack.c.bf16 %v6163_v30, %v6163_v30  ;;  %v17137_v25 = vpop.f32.mrf.mxu3  ;;  %7331 = vmatpush.bf16.msra.mxu3 %v12698_v46  ;;  %7350 = vmatpush.bf16.msra.mxu0 %v12706_v26 }
 0x924   : > { %v6193_v3 = vpack.c.bf16 %v6189_v44, %v6189_v44 }
 0x925   : > { %v6328_v56 = vunpack.c.l.b16 %v6168_v20 }
 0x926   : > { %v6335_v41 = vunpack.c.l.b16 %v6193_v3  ;;  %7385 = vmatpush.bf16.msra.mxu2 %v12725_v10  ;;  %7366 = vmatpush.bf16.msrb.mxu1 %v12717_v39  ;;  %v6217_v10 = vpack.c.bf16 %v17137_v25, %v17137_v25  ;;  %v12730_v25 = vld [vmem:[%s19221_s9 + $0x200] sm:$0xff] }
 0x927   : > { %7400 = vmatpush.bf16.msrb.mxu3 %v12737_v27 }
 0x928   : > { %v6336_v5 = vpack.c.b16 %v6335_v41, %v6334_v6  ;;  %v12734_v41 = vld [vmem:[%s19221_s9 + $0x220] sm:$0xff]  ;;  %v6341_v37 = vunpack.c.l.b16 %v6217_v10 }
 0x92a   : > { %7313 = vmatmul.bf16.vlgmr.msrb.gmra.mxu2 %v6336_v5  ;;  %v6165_v49 = vpop.f32.mrf.mxu1  ;;  %v17117_v54 = vpop.f32.mrf.mxu0  ;;  %7367 = vmatpush.bf16.msrb.mxu1 %v12716_v17  ;;  %v6240_v17 = vpack.c.bf16 %v17107_v50, %v17107_v50 }
 0x92b   : > { %v6169_v1 = vpack.c.bf16 %v6165_v49, %v6165_v49  ;;  %v17173_v29 = vpop.f32.mrf.mxu2  ;;  %v17178_v47 = vpop.f32.mrf.mxu3  ;;  %7386 = vmatpush.bf16.msra.mxu2 %v12724_v16  ;;  %7401 = vmatpush.bf16.msrb.mxu3 %v12736_v24 }
 0x92c   : > { %v6288_v34 = vpack.c.bf16 %v17173_v29, %v17173_v29  ;;  %v6241_v29 = vpack.c.bf16 %v17117_v54, %v17117_v54  ;;  %v6346_v27 = vunpack.c.l.b16 %v6240_v17 }
 0x92d   : > { %v6329_v32 = vunpack.c.l.b16 %v6169_v1 }
 0x92e   : > { %7368 = vmatpush.bf16.msrb.mxu1 %v12715_v7  ;;  %v6358_v39 = vunpack.c.l.b16 %v6288_v34  ;;  %v6347_v26 = vunpack.c.l.b16 %v6241_v29 }
 0x92f   : > { %v6330_v8 = vpack.c.b16 %v6329_v32, %v6328_v56  ;;  %7387 = vmatpush.bf16.msra.mxu2 %v12723_v19  ;;  %7402 = vmatpush.bf16.msrb.mxu3 %v12735_v43 }
 0x930   : > { %v6348_v54 = vpack.c.b16 %v6347_v26, %v6346_v27  ;;  %v12740_v27 = vld [vmem:[%s19222_s10 + $0x10] sm:$0xff] }
 0x931   : > { %7294 = vmatmul.bf16.vlgmr.msra.gmra.mxu1 %v6330_v8 }
 0x932   : > { %v17151_v48 = vpop.f32.mrf.mxu0  ;;  %v17159_v2 = vpop.f32.mrf.mxu1  ;;  %7369 = vmatpush.bf16.msrb.mxu1 %v12714_v11 }
 0x933   : > { %v17211_v28 = vpop.f32.mrf.mxu2  ;;  %v17213_v38 = vpop.f32.mrf.mxu3  ;;  %7388 = vmatpush.bf16.msra.mxu2 %v12722_v55  ;;  %7403 = vmatpush.bf16.msrb.mxu3 %v12734_v41  ;;  %v6264_v19 = vpack.c.bf16 %v17159_v2, %v17159_v2 }
 0x934   : > { %v6289_v14 = vpack.c.bf16 %v17211_v28, %v17211_v28  ;;  %v6342_v28 = vpack.c.b16 %v6341_v37, %v6340_v12  ;;  %v12744_v37 = vld [vmem:[%s19222_s10 + $0x30] sm:$0xff] }
 0x936   : > { %v6359_v62 = vunpack.c.l.b16 %v6289_v14 }
 0x937   : > { %7404 = vmatpush.bf16.msrb.mxu3 %v12733_v42 }
 0x938   : > { %v6360_v7 = vpack.c.b16 %v6359_v62, %v6358_v39  ;;  %v12743_v62 = vld [vmem:[%s19222_s10 + $0x28] sm:$0xff] }
 0x93a   : > { %v17192_v51 = vpop.f32.mrf.mxu0  ;;  %v17203_v0 = vpop.f32.mrf.mxu1 }
 0x93b   : > { %7405 = vmatpush.bf16.msrb.mxu3 %v12732_v18  ;;  %v6265_v46 = vpack.c.bf16 %v17203_v0, %v17203_v0 }
 0x93d   : > { %v6353_v11 = vunpack.c.l.b16 %v6265_v46 }
 0x93f   : > { %7406 = vmatpush.bf16.msrb.mxu3 %v12731_v59 }
 0x943   : > { %7407 = vmatpush.bf16.msrb.mxu3 %v12730_v25 }
 0x952   : > { %v6439_v33 = vpop.f32.mrf.mxu1 }
 0x953   : > { %v6444_v15 = vpack.c.bf16 %v6439_v33, %v6439_v33  ;;  %v6352_v33 = vunpack.c.l.b16 %v6264_v19  ;;  %v12742_v19 = vld [vmem:[%s19222_s10 + $0x20] sm:$0xff] }
 0x955   : > { %v6487_v22 = vpop.f32.mrf.mxu0  ;;  %v6576_v49 = vunpack.c.l.b16 %v6444_v15  ;;  %v6354_v24 = vpack.c.b16 %v6353_v11, %v6352_v33  ;;  %v12984_v11 = vld [vmem:[%s18266_s11 + $0x1] ss:$0 sm:$0xff] }
 0x956   : > { %v6492_v40 = vpack.c.bf16 %v6487_v22, %v6487_v22 }
 0x958   : > { %v6455_v4 = vpop.f32.mrf.mxu2  ;;  %v6594_v5 = vunpack.c.l.b16 %v6492_v40 }
 0x959   : > { %v6460_v1 = vpack.c.bf16 %v6455_v4, %v6455_v4 }
 0x95a   : > { %v6441_v6 = vpop.f32.mrf.mxu1 }
 0x95b   : > { %v6471_v44 = vpop.f32.mrf.mxu3  ;;  %v6445_v3 = vpack.c.bf16 %v6441_v6, %v6441_v6  ;;  %v6582_v13 = vunpack.c.l.b16 %v6460_v1 }
 0x95c   : > { %v6476_v32 = vpack.c.bf16 %v6471_v44, %v6471_v44 }
 0x95d   : > { %v6489_v30 = vpop.f32.mrf.mxu0  ;;  %v6577_v56 = vunpack.c.l.b16 %v6445_v3 }
 0x95e   : > { %v6493_v20 = vpack.c.bf16 %v6489_v30, %v6489_v30  ;;  %v6588_v23 = vunpack.c.l.b16 %v6476_v32 }
 0x95f   : > { %v6578_v63 = vpack.c.b16 %v6577_v56, %v6576_v49 }
 0x960   : > { %v6595_v8 = vunpack.c.l.b16 %v6493_v20  ;;  %v6457_v58 = vpop.f32.mrf.mxu2 }
 0x961   : > { %7261 = vmatmul.bf16.gmra.mxu3 %v6578_v63  ;;  %v6461_v52 = vpack.c.bf16 %v6457_v58, %v6457_v58 }
 0x962   : > { %v6596_v45 = vpack.c.b16 %v6595_v8, %v6594_v5  ;;  %v6503_v35 = vpop.f32.mrf.mxu1 }
 0x963   : > { %v6473_v57 = vpop.f32.mrf.mxu3  ;;  %v6583_v9 = vunpack.c.l.b16 %v6461_v52  ;;  %v6508_v40 = vpack.c.bf16 %v6503_v35, %v6503_v35  ;;  %v6312_v52 = vpack.c.bf16 %v17178_v47, %v17178_v47  ;;  %v12745_v35 = vld [vmem:[%s19222_s10 + $0x38] sm:$0xff] }
 0x964   : > { %v6477_v53 = vpack.c.bf16 %v6473_v57, %v6473_v57  ;;  %7318 = vmatmul.bf16.gmra.mxu2 %v6596_v45  ;;  %v6313_v57 = vpack.c.bf16 %v17213_v38, %v17213_v38  ;;  %7490 = vmatpush.bf16.msrb.mxu0 %v12745_v35 }
 0x965   : > { %v6584_v31 = vpack.c.b16 %v6583_v9, %v6582_v13  ;;  %v6551_v16 = vpop.f32.mrf.mxu0  ;;  %v6600_v3 = vunpack.c.l.b16 %v6508_v40 }
 0x966   : > { %v6589_v36 = vunpack.c.l.b16 %v6477_v53  ;;  %v6556_v43 = vpack.c.bf16 %v6551_v16, %v6551_v16  ;;  %v6365_v53 = vunpack.c.l.b16 %v6313_v57  ;;  %v11668_v57 = vld [vmem:[%s18268_s13 + $0x70] sm:$0xf] }
 0x967   : > { %7280 = vmatmul.bf16.gmra.mxu0 %v6584_v31 }
 0x968   : > { %v6590_v21 = vpack.c.b16 %v6589_v36, %v6588_v23  ;;  %v6519_v55 = vpop.f32.mrf.mxu2  ;;  %v6618_v44 = vunpack.c.l.b16 %v6556_v43  ;;  %v6364_v23 = vunpack.c.l.b16 %v6312_v52  ;;  %7491 = vmatpush.bf16.msrb.mxu0 %v12744_v37  ;;  %v12738_v43 = vld [vmem:[%s19222_s10] sm:$0xff] }
 0x969   : > { %v6524_v41 = vpack.c.bf16 %v6519_v55, %v6519_v55 }
 0x96a   : > { %7299 = vmatmul.bf16.gmra.mxu1 %v6590_v21  ;;  %v6505_v22 = vpop.f32.mrf.mxu1  ;;  %v6366_v9 = vpack.c.b16 %v6365_v53, %v6364_v23  ;;  %v12760_v23 = vld [vmem:[%s18268_s13 + $0x74] sm:$0xf] }
 0x96b   : > { %v6535_v61 = vpop.f32.mrf.mxu3  ;;  %v6509_v0 = vpack.c.bf16 %v6505_v22, %v6505_v22  ;;  %v6606_v32 = vunpack.c.l.b16 %v6524_v41 }
 0x96c   : > { %v6540_v20 = vpack.c.bf16 %v6535_v61, %v6535_v61  ;;  %7492 = vmatpush.bf16.msrb.mxu0 %v12743_v62  ;;  %v12757_v62 = vld [vmem:[%s18268_s13 + $0x54] sm:$0xf0] }
 0x96d   : > { %v6553_v50 = vpop.f32.mrf.mxu0  ;;  %v6601_v30 = vunpack.c.l.b16 %v6509_v0 }
 0x96e   : > { %v6557_v2 = vpack.c.bf16 %v6553_v50, %v6553_v50  ;;  %v6612_v63 = vunpack.c.l.b16 %v6540_v20  ;;  %v12739_v50 = vld [vmem:[%s19222_s10 + $0x8] sm:$0xff] }
 0x96f   : > { %v6602_v1 = vpack.c.b16 %v6601_v30, %v6600_v3 }
 0x970   : > { %v6521_v4 = vpop.f32.mrf.mxu2  ;;  %v6619_v6 = vunpack.c.l.b16 %v6557_v2  ;;  %7493 = vmatpush.bf16.msrb.mxu0 %v12742_v19 }
 0x971   : > { %7332 = vmatmul.bf16.vlgmr.msra.gmra.mxu3 %v6342_v28  ;;  %v6525_v5 = vpack.c.bf16 %v6521_v4, %v6521_v4  ;;  %v12741_v28 = vld [vmem:[%s19222_s10 + $0x18] sm:$0xff] }
 0x972   : > { %v6620_v56 = vpack.c.b16 %v6619_v6, %v6618_v44  ;;  %v6567_v42 = vpop.f32.mrf.mxu1 }
 0x973   : > { %v6537_v15 = vpop.f32.mrf.mxu3  ;;  %v6607_v8 = vunpack.c.l.b16 %v6525_v5  ;;  %v6572_v36 = vpack.c.bf16 %v6567_v42, %v6567_v42  ;;  %v12761_v42 = vld [vmem:[%s18268_s13 + $0x74] sm:$0xf0] }
 0x974   : > { %7389 = vmatmul.bf16.vlgmr.msra.gmra.mxu2 %v6360_v7  ;;  %v6541_v49 = vpack.c.bf16 %v6537_v15, %v6537_v15  ;;  %7494 = vmatpush.bf16.msrb.mxu0 %v12741_v28 }
 0x975   : > { %v6608_v45 = vpack.c.b16 %v6607_v8, %v6606_v32  ;;  %v6624_v21 = vunpack.c.l.b16 %v6572_v36  ;;  %v11660_v36 = vld [vmem:[%s18268_s13 + $0x60] sm:$0xf] }
 0x976   : > { %v6613_v58 = vunpack.c.l.b16 %v6541_v49 }
 0x977   : > { %7351 = vmatmul.bf16.vlgmr.msra.gmra.mxu0 %v6348_v54 }
 0x978   : > { %v6614_v13 = vpack.c.b16 %v6613_v58, %v6612_v63  ;;  %v17271_v59 = vpop.f32.mrf.mxu2  ;;  %7495 = vmatpush.bf16.msrb.mxu0 %v12740_v27 }
 0x97a   : > { %7370 = vmatmul.bf16.vlgmr.msrb.gmra.mxu1 %v6354_v24  ;;  %v6569_v18 = vpop.f32.mrf.mxu1 }
 0x97b   : > { %v6573_v31 = vpack.c.bf16 %v6569_v18, %v6569_v18  ;;  %v11670_v18 = vld [vmem:[%s18268_s13 + $0x78] sm:$0xf0] }
 0x97c   : > { %7496 = vmatpush.bf16.msrb.mxu0 %v12739_v50  ;;  %v12755_v50 = vld [vmem:[%s18268_s13 + $0x44] sm:$0xf0] }
 0x97d   : > { %v6625_v60 = vunpack.c.l.b16 %v6573_v31  ;;  %v12759_v31 = vld [vmem:[%s18268_s13 + $0x64] sm:$0xf0] }
 0x97e   : > { %v11661_v35 = vor.u32 %v12759_v31, %v11660_v36  ;;  %v11638_v36 = vld [vmem:[%s18268_s13 + $0x38] sm:$0xf0] }
 0x97f   : > { %v6626_v10 = vpack.c.b16 %v6625_v60, %v6624_v21 }
 0x980   : > { %v17273_v34 = vpop.f32.mrf.mxu2  ;;  %7497 = vmatpush.bf16.msrb.mxu0 %v12738_v43 }
 0x981   : > { %7337 = vmatmul.bf16.gmra.mxu3 %v6602_v1 }
 0x984   : > { %7394 = vmatmul.bf16.gmra.mxu2 %v6620_v56 }
 0x987   : > { %7356 = vmatmul.bf16.gmra.mxu0 %v6608_v45 }
 0x98a   : > { %7375 = vmatmul.bf16.gmra.mxu1 %v6614_v13 }
 0x991   : > { %7408 = vmatmul.bf16.vlgmr.msrb.gmra.mxu3 %v6366_v9  ;;  %v11669_v9 = vor.u32 %v12761_v42, %v11668_v57 }
 0x993   : > { %7619 = vmatpush.bf16.msra.mxu1 %v11669_v9  ;;  %v12752_v9 = vld [vmem:[%s18268_s13 + $0x34] sm:$0xf] }
 0x994   : > { %v11641_v31 = vor.u32 %v12752_v9, %v11638_v36  ;;  %v11674_v36 = vld [vmem:[%s18272_s17 + $0x2] sm:$0x3] }
 0x997   : > { %7620 = vmatpush.bf16.msra.mxu1 %v11661_v35  ;;  %v12749_v35 = vld [vmem:[%s18268_s13 + $0x14] sm:$0xf0] }
 0x99e   : > { %v7276_v14 = vpop.f32.mrf.mxu0 }
 0x9a1   : > { %7413 = vmatmul.bf16.gmra.mxu3 %v6626_v10  ;;  %v11673_v10 = vor.u32 %v12760_v23, %v11670_v18  ;;  %v11636_v23 = vld [vmem:[%s18268_s13 + $0x30] sm:$0xf] }
 0x9a3   : > { %7638 = vmatpush.bf16.msrb.mxu2 %v11673_v10  ;;  %v12750_v10 = vld [vmem:[%s18268_s13 + $0x24] sm:$0xf] }
 0x9a4   : > { %v7257_v47 = vpop.f32.mrf.mxu3 }
 0x9a5   : > { %v7258_v24 = vadd.f32 %v12984_v11, %v7257_v47  ;;  %v12758_v47 = vld [vmem:[%s18268_s13 + $0x64] sm:$0xf] }
 0x9a6   : > { %v7278_v39 = vpop.f32.mrf.mxu0 }
 0x9a7   : > { %v7277_v40 = vadd.f32 %v7276_v14, %v7258_v24 }
 0x9ac   : > { %v7259_v38 = vpop.f32.mrf.mxu3 }
 0x9ad   : > { %v7314_v25 = vpop.f32.mrf.mxu2  ;;  %v7260_v0 = vadd.f32 %v12984_v11, %v7259_v38  ;;  %v11662_v38 = vld [vmem:[%s18268_s13 + $0x68] sm:$0xf0] }
 0x9ae   : > { %v7295_v16 = vpop.f32.mrf.mxu1 }
 0x9af   : > { %v7296_v44 = vadd.f32 %v7295_v16, %v7277_v40  ;;  %v7279_v6 = vadd.f32 %v7278_v39, %v7260_v0  ;;  %v11652_v39 = vld [vmem:[%s18268_s13 + $0x50] sm:$0xf] }
 0x9b0   : > { %v11653_v28 = vor.u32 %v12757_v62, %v11652_v39  ;;  %v11612_v62 = vld [vmem:[%s18268_s13] sm:$0xf] }
 0x9b1   : > { %v7315_v41 = vadd.f32 %v7314_v25, %v7296_v44  ;;  %v11665_v25 = vor.u32 %v12758_v47, %v11662_v38  ;;  %v11630_v38 = vld [vmem:[%s18268_s13 + $0x28] sm:$0xf0] }
 0x9b2   : > { %7621 = vmatpush.bf16.msra.mxu1 %v11653_v28 }
 0x9b3   : > { %7639 = vmatpush.bf16.msrb.mxu2 %v11665_v25  ;;  %v11622_v25 = vld [vmem:[%s18268_s13 + $0x18] sm:$0xf0] }
 0x9b5   : > { %v7316_v46 = vpop.f32.mrf.mxu2 }
 0x9b6   : > { %v7297_v17 = vpop.f32.mrf.mxu1 }
 0x9b7   : > { %v7298_v30 = vadd.f32 %v7297_v17, %v7279_v6  ;;  %v12756_v17 = vld [vmem:[%s18268_s13 + $0x54] sm:$0xf] }
 0x9b9   : > { %v7317_v49 = vadd.f32 %v7316_v46, %v7298_v30 }
 0x9e4   : > { %v7262_v12 = vpop.f32.mrf.mxu3  ;;  %v7281_v55 = vpop.f32.mrf.mxu0 }
 0x9e5   : > { %v7263_v32 = vadd.f32 %v12984_v11, %v7262_v12 }
 0x9e7   : > { %v7300_v61 = vpop.f32.mrf.mxu1  ;;  %v17293_v26 = vpop.f32.mrf.mxu2  ;;  %v7282_v13 = vadd.f32 %v7281_v55, %v7263_v32 }
 0x9e9   : > { %v7301_v12 = vadd.f32 %v7300_v61, %v7282_v13 }
 0x9eb   : > { %v7320_v61 = vadd.f32 %v17293_v26, %v7301_v12  ;;  %v11646_v26 = vld [vmem:[%s18268_s13 + $0x48] sm:$0xf0]  ;;  %v12748_v12 = vld [vmem:[%s18268_s13 + $0x14] sm:$0xf] }
 0x9ec   : > { %v7264_v29 = vpop.f32.mrf.mxu3  ;;  %v7283_v33 = vpop.f32.mrf.mxu0  ;;  %v11625_v39 = vor.u32 %v12748_v12, %v11622_v25 }
 0x9ed   : > { %v7265_v63 = vadd.f32 %v12984_v11, %v7264_v29  ;;  %v11654_v29 = vld [vmem:[%s18268_s13 + $0x58] sm:$0xf0]  ;;  %v11644_v11 = vld [vmem:[%s18268_s13 + $0x40] sm:$0xf] }
 0x9ef   : > { %v7302_v54 = vpop.f32.mrf.mxu1  ;;  %v7321_v2 = vpop.f32.mrf.mxu2  ;;  %v7284_v21 = vadd.f32 %v7283_v33, %v7265_v63  ;;  %v11657_v33 = vor.u32 %v12756_v17, %v11654_v29  ;;  %v12747_v17 = vld [vmem:[%s18268_s13 + $0x4] sm:$0xf0]  ;;  %v12746_v29 = vld [vmem:[%s18268_s13 + $0x4] sm:$0xf] }
 0x9f1   : > { %v7303_v19 = vadd.f32 %v7302_v54, %v7284_v21  ;;  %v12754_v54 = vld [vmem:[%s18268_s13 + $0x44] sm:$0xf]  ;;  %7640 = vmatpush.bf16.msrb.mxu2 %v11657_v33  ;;  %v11628_v21 = vld [vmem:[%s18268_s13 + $0x20] sm:$0xf] }
 0x9f2   : > { %v11649_v30 = vor.u32 %v12754_v54, %v11646_v26 }
 0x9f3   : > { %v7322_v24 = vadd.f32 %v7321_v2, %v7303_v19  ;;  %v11613_v19 = vor.u32 %v12747_v17, %v11612_v62  ;;  %v11677_v17 = vld [vmem:[%s18272_s17 + $0x8] sm:$0x3] }
 0x9f4   : > { %v7333_v7 = vpop.f32.mrf.mxu3  ;;  %v7352_v4 = vpop.f32.mrf.mxu0 }
 0x9f5   : > { %v7334_v56 = vadd.f32 %v7333_v7, %v7315_v41  ;;  %7641 = vmatpush.bf16.msrb.mxu2 %v11649_v30 }
 0x9f7   : > { %v7371_v3 = vpop.f32.mrf.mxu1  ;;  %v7390_v5 = vpop.f32.mrf.mxu2  ;;  %v7353_v58 = vadd.f32 %v7352_v4, %v7334_v56  ;;  %v11645_v4 = vor.u32 %v12755_v50, %v11644_v11 }
 0x9f9   : > { %v7372_v60 = vadd.f32 %v7371_v3, %v7353_v58  ;;  %7622 = vmatpush.bf16.msra.mxu1 %v11645_v4  ;;  %7642 = vmatpush.bf16.msrb.mxu2 %v11641_v31 }
 0x9fb   : > { %v7391_v46 = vadd.f32 %v7390_v5, %v7372_v60  ;;  %v12751_v60 = vld [vmem:[%s18268_s13 + $0x24] sm:$0xf0] }
 0x9fc   : > { %v7335_v22 = vpop.f32.mrf.mxu3  ;;  %v7354_v1 = vpop.f32.mrf.mxu0  ;;  %v11629_v47 = vor.u32 %v12751_v60, %v11628_v21  ;;  %v11675_v21 = vld [vmem:[%s18272_s17 + $0x4] sm:$0x3]  ;;  %v11676_v60 = vld [vmem:[%s18272_s17 + $0x6] sm:$0x3] }
 0x9fd   : > { %v7336_v8 = vadd.f32 %v7335_v22, %v7317_v49 }
 0x9ff   : > { %v7373_v45 = vpop.f32.mrf.mxu1  ;;  %v7355_v52 = vadd.f32 %v7354_v1, %v7336_v8  ;;  %v7392_v14 = vpop.f32.mrf.mxu2 }
 0xa01   : > { %v7374_v37 = vadd.f32 %v7373_v45, %v7355_v52 }
 0xa03   : > { %v7393_v7 = vadd.f32 %v7392_v14, %v7374_v37  ;;  %v11633_v14 = vor.u32 %v12750_v10, %v11630_v38 }
 0xa04   : > { %v7338_v15 = vpop.f32.mrf.mxu3  ;;  %v7357_v16 = vpop.f32.mrf.mxu0 }
 0xa05   : > { %v7339_v43 = vadd.f32 %v7338_v15, %v7320_v61  ;;  %7643 = vmatpush.bf16.msrb.mxu2 %v11633_v14  ;;  %v12985_v61 = vld [vmem:[%s18266_s11 + $0x2] ss:$0 sm:$0xff] }
 0xa07   : > { %v7376_v55 = vpop.f32.mrf.mxu1  ;;  %v7395_v0 = vpop.f32.mrf.mxu2  ;;  %v7358_v49 = vadd.f32 %v7357_v16, %v7339_v43  ;;  %v11620_v16 = vld [vmem:[%s18268_s13 + $0x10] sm:$0xf] }
 0xa08   : > { %v11621_v37 = vor.u32 %v12749_v35, %v11620_v16 }
 0xa09   : > { %v7377_v2 = vadd.f32 %v7376_v55, %v7358_v49  ;;  %7644 = vmatpush.bf16.msrb.mxu2 %v11625_v39 }
 0xa0b   : > { %v7396_v63 = vadd.f32 %v7395_v0, %v7377_v2 }
 0xa0c   : > { %v7340_v20 = vpop.f32.mrf.mxu3  ;;  %v7359_v41 = vpop.f32.mrf.mxu0 }
 0xa0d   : > { %v7341_v44 = vadd.f32 %v7340_v20, %v7322_v24 }
 0xa0f   : > { %v7360_v56 = vadd.f32 %v7359_v41, %v7341_v44  ;;  %v7378_v32 = vpop.f32.mrf.mxu1  ;;  %v7397_v8 = vpop.f32.mrf.mxu2 }
 0xa11   : > { %v7379_v15 = vadd.f32 %v7378_v32, %v7360_v56  ;;  %v12986_v56 = vld [vmem:[%s18271_s16] ss:$0 sm:$0xff] }
 0xa13   : > { %v7398_v45 = vadd.f32 %v7397_v8, %v7379_v15 }
 0xa14   : > { %v7409_v53 = vpop.f32.mrf.mxu3 }
 0xa15   : > { %v7410_v27 = vadd.f32 %v7409_v53, %v7391_v46  ;;  %v12753_v53 = vld [vmem:[%s18268_s13 + $0x34] sm:$0xf0]  ;;  %v11614_v46 = vld [vmem:[%s18268_s13 + $0x8] sm:$0xf0] }
 0xa16   : > { %v11637_v18 = vor.u32 %v12753_v53, %v11636_v23  ;;  %v11617_v55 = vor.u32 %v12746_v29, %v11614_v46  ;;  %v11678_v29 = vld [vmem:[%s18272_s17 + $0xa] sm:$0x3]  ;;  %v11680_v46 = vld [vmem:[%s18272_s17 + $0xe] sm:$0x3] }
 0xa17   : > { %v7419_v6 = vmax.f32 %v7410_v27, 0.0 }
 0xa18   : > { %7623 = vmatpush.bf16.msra.mxu1 %v11637_v18  ;;  %7645 = vmatpush.bf16.msrb.mxu2 %v11617_v55  ;;  %v7674_v18 = vld [vmem:[%s18272_s17] sm:$0x3] }
 0xa1c   : > { %v7411_v22 = vpop.f32.mrf.mxu3  ;;  %7624 = vmatpush.bf16.msra.mxu1 %v11629_v47 }
 0xa1d   : > { %v7412_v40 = vadd.f32 %v7411_v22, %v7393_v7  ;;  %v12983_v7 = vld [vmem:[%s18266_s11 + $0x3] ss:$0 sm:$0xff] }
 0xa1e   : > { %v6667_v33 = vadd.f32 %v12983_v7, %v17151_v48  ;;  %v6668_v50 = vadd.f32 %v12983_v7, %v17192_v51  ;;  %v6669_v44 = vadd.f32 %v12983_v7, %v17271_v59 }
 0xa1f   : > { %v7420_v3 = vmax.f32 %v7412_v40, 0.0 }
 0xa20   : > { %7625 = vmatpush.bf16.msra.mxu1 %v11621_v37 }
 0xa21   : > { %v7423_v5 = vpack.c.bf16 %v7420_v3, %v7419_v6  ;;  %v6670_v3 = vadd.f32 %v12983_v7, %v17273_v34 }
 0xa23   : > { %7498 = vmatmul.bf16.vlgmr.msrb.gmra.mxu0 %v7423_v5 }
 0xa24   : > { %v7414_v1 = vpop.f32.mrf.mxu3  ;;  %7626 = vmatpush.bf16.msra.mxu1 %v11613_v19  ;;  %v11679_v19 = vld [vmem:[%s18272_s17 + $0xc] sm:$0x3] }
 0xa25   : > { %v7415_v58 = vadd.f32 %v7414_v1, %v7396_v63 }
 0xa27   : > { %v7421_v52 = vmax.f32 %v7415_v58, 0.0 }
 0xa2c   : > { %v7416_v20 = vpop.f32.mrf.mxu3 }
 0xa2d   : > { %v7417_v13 = vadd.f32 %v7416_v20, %v7398_v45 }
 0xa2f   : > { %v7422_v57 = vmax.f32 %v7417_v13, 0.0 }
 0xa31   : > { %v7424_v42 = vpack.c.bf16 %v7422_v57, %v7421_v52 }
 0xa33   : > { %7503 = vmatmul.bf16.gmra.mxu0 %v7424_v42 }
 0xaa0   : > { %v7499_v28 = vpop.f32.mrf.mxu0 }
 0xaa1   : > { %v7500_v27 = vadd.f32 %v12985_v61, %v7499_v28 }
 0xaa3   : > { %v7509_v22 = vadd.f32 %v7500_v27, %v6667_v33  ;;  %v11681_v27 = vld [vmem:[%s18272_s17 + $0x10] sm:$0x3] }
 0xaa5   : > { %v7513_v24 = vmax.f32 %v7509_v22, 0.0  ;;  %v12768_v22 = vld [vmem:[%s18269_s14 + $0x30] sm:$0xff] }
 0xaa8   : > { %v7501_v11 = vpop.f32.mrf.mxu0 }
 0xaa9   : > { %v7502_v54 = vadd.f32 %v12985_v61, %v7501_v11 }
 0xaab   : > { %v7510_v26 = vadd.f32 %v7502_v54, %v6668_v50  ;;  %v12769_v50 = vld [vmem:[%s18269_s14 + $0x38] sm:$0xff]  ;;  %v12767_v54 = vld [vmem:[%s18269_s14 + $0x28] sm:$0xff] }
 0xaad   : > { %v7514_v43 = vmax.f32 %v7510_v26, 0.0  ;;  %v12766_v26 = vld [vmem:[%s18269_s14 + $0x20] sm:$0xff] }
 0xaaf   : > { %v7517_v40 = vpack.c.bf16 %v7514_v43, %v7513_v24  ;;  %v12765_v24 = vld [vmem:[%s18269_s14 + $0x18] sm:$0xff] }
 0xab0   : > { %v7504_v0 = vpop.f32.mrf.mxu0  ;;  %v12777_v43 = vld [vmem:[%s18269_s14 + $0x78] sm:$0xff] }
 0xab1   : > { %7627 = vmatmul.bf16.vlgmr.msra.gmra.mxu1 %v7517_v40  ;;  %7646 = vmatmul.bf16.vlgmr.msrb.gmra.mxu2 %v7517_v40  ;;  %v7505_v4 = vadd.f32 %v12985_v61, %v7504_v0  ;;  %v12764_v40 = vld [vmem:[%s18269_s14 + $0x10] sm:$0xff] }
 0xab2   : > { %v12776_v0 = vld [vmem:[%s18269_s14 + $0x70] sm:$0xff] }
 0xab3   : > { %v7511_v30 = vadd.f32 %v7505_v4, %v6669_v44  ;;  %v12763_v4 = vld [vmem:[%s18269_s14 + $0x8] sm:$0xff]  ;;  %v12793_v44 = vld [vmem:[%s18269_s14 + $0xf8] sm:$0xff] }
 0xab5   : > { %v7515_v5 = vmax.f32 %v7511_v30, 0.0  ;;  %v12801_v30 = vld [vmem:[%s18269_s14 + $0x138] sm:$0xff] }
 0xab8   : > { %v7506_v6 = vpop.f32.mrf.mxu0 }
 0xab9   : > { %v7507_v48 = vadd.f32 %v12985_v61, %v7506_v6  ;;  %v12762_v6 = vld [vmem:[%s18269_s14] sm:$0xff] }
 0xabb   : > { %v7512_v41 = vadd.f32 %v7507_v48, %v6670_v3  ;;  %v12775_v3 = vld [vmem:[%s18269_s14 + $0x68] sm:$0xff]  ;;  %v12774_v48 = vld [vmem:[%s18269_s14 + $0x60] sm:$0xff] }
 0xabd   : > { %v7516_v51 = vmax.f32 %v7512_v41, 0.0  ;;  %v12785_v41 = vld [vmem:[%s18269_s14 + $0xb8] sm:$0xff] }
 0xabf   : > { %v7518_v49 = vpack.c.bf16 %v7516_v51, %v7515_v5  ;;  %v12792_v5 = vld [vmem:[%s18269_s14 + $0xf0] sm:$0xff] }
 0xac0   : > { %v12800_v51 = vld [vmem:[%s18269_s14 + $0x130] sm:$0xff] }
 0xac1   : > { %7632 = vmatmul.bf16.gmra.mxu1 %v7518_v49  ;;  %7651 = vmatmul.bf16.gmra.mxu2 %v7518_v49  ;;  %v12773_v49 = vld [vmem:[%s18269_s14 + $0x58] sm:$0xff] }
 0xb2e   : > { %v7628_v1 = vpop.f32.mrf.mxu1 }
 0xb2f   : > { %v7658_v32 = vadd.f32 %v12986_v56, %v7628_v1  ;;  %v12791_v1 = vld [vmem:[%s18269_s14 + $0xe8] sm:$0xff] }
 0xb31   : > { %v7662_v15 = vmax.f32 %v7658_v32, 0.0  ;;  %v12799_v32 = vld [vmem:[%s18269_s14 + $0x128] sm:$0xff] }
 0xb33   : > { %v7666_v63 = vpack.c.bf16 %v7662_v15, %v7662_v15  ;;  %v12783_v15 = vld [vmem:[%s18269_s14 + $0xa8] sm:$0xff] }
 0xb34   : > { %v7647_v2 = vpop.f32.mrf.mxu2 }
 0xb35   : > { %v7693_v20 = vunpack.c.l.b16 %v7666_v63  ;;  %v7670_v42 = vpack.c.bf16 %v7647_v2, %v7647_v2  ;;  %v12772_v2 = vld [vmem:[%s18269_s14 + $0x50] sm:$0xff]  ;;  %v12782_v63 = vld [vmem:[%s18269_s14 + $0xa0] sm:$0xff] }
 0xb36   : > { %v7630_v59 = vpop.f32.mrf.mxu1 }
 0xb37   : > { %v7659_v8 = vadd.f32 %v12986_v56, %v7630_v59  ;;  %v7853_v31 = vunpack.c.l.b16 %v7670_v42  ;;  %v12790_v59 = vld [vmem:[%s18269_s14 + $0xe0] sm:$0xff]  ;;  %v12796_v42 = vld [vmem:[%s18269_s14 + $0x110] sm:$0xff] }
 0xb39   : > { %v7663_v34 = vmax.f32 %v7659_v8, 0.0  ;;  %v12798_v8 = vld [vmem:[%s18269_s14 + $0x120] sm:$0xff] }
 0xb3b   : > { %v7667_v58 = vpack.c.bf16 %v7663_v34, %v7663_v34  ;;  %v12789_v34 = vld [vmem:[%s18269_s14 + $0xd8] sm:$0xff] }
 0xb3c   : > { %v7649_v45 = vpop.f32.mrf.mxu2 }
 0xb3d   : > { %v7694_v13 = vunpack.c.l.b16 %v7667_v58  ;;  %v7671_v52 = vpack.c.bf16 %v7649_v45, %v7649_v45  ;;  %v12771_v58 = vld [vmem:[%s18269_s14 + $0x48] sm:$0xff]  ;;  %v12797_v45 = vld [vmem:[%s18269_s14 + $0x118] sm:$0xff] }
 0xb3e   : > { %v7633_v57 = vpop.f32.mrf.mxu1 }
 0xb3f   : > { %v7695_v23 = vpack.c.b16 %v7694_v13, %v7693_v20  ;;  %v7854_v53 = vunpack.c.l.b16 %v7671_v52  ;;  %v7660_v9 = vadd.f32 %v12986_v56, %v7633_v57  ;;  %v12770_v20 = vld [vmem:[%s18269_s14 + $0x40] sm:$0xff]  ;;  %v12781_v13 = vld [vmem:[%s18269_s14 + $0x98] sm:$0xff]  ;;  %v12788_v52 = vld [vmem:[%s18269_s14 + $0xd0] sm:$0xff] }
 0xb40   : > { %v12809_v57 = vld [vmem:[%s18269_s14 + $0x178] sm:$0xff] }
 0xb41   : > { %7708 = vmatpush.bf16.msra.mxu3 %v7695_v23  ;;  %7725 = vmatpush.bf16.msra.mxu0 %v7695_v23  ;;  %v7855_v10 = vpack.c.b16 %v7854_v53, %v7853_v31  ;;  %v7664_v47 = vmax.f32 %v7660_v9, 0.0  ;;  %v12808_v9 = vld [vmem:[%s18269_s14 + $0x170] sm:$0xff] }
 0xb42   : > { %7742 = vmatpush.bf16.msrb.mxu1 %v7695_v23  ;;  %7759 = vmatpush.bf16.msra.mxu2 %v7695_v23  ;;  %v12780_v31 = vld [vmem:[%s18269_s14 + $0x90] sm:$0xff] }
 0xb43   : > { %v7668_v16 = vpack.c.bf16 %v7664_v47, %v7664_v47  ;;  %v12779_v47 = vld [vmem:[%s18269_s14 + $0x88] sm:$0xff] }
 0xb44   : > { %11682 = vmatmul.msk.bf16.vlgmr.msra.gmra.mxu3 %vm7697_vm2, %v7674_v18  ;;  %11683 = vmatmul.msk.bf16.vlgmr.msra.gmra.mxu0 %vm7697_vm2, %v11674_v36  ;;  %v7652_v62 = vpop.f32.mrf.mxu2 }
 0xb45   : > { %7776 = vmatpush.bf16.msrb.mxu3 %v7695_v23  ;;  %7793 = vmatpush.bf16.msrb.mxu0 %v7695_v23  ;;  %v7872_v37 = vunpack.c.l.b16 %v7668_v16  ;;  %v7672_v61 = vpack.c.bf16 %v7652_v62, %v7652_v62  ;;  %v12817_v62 = vld [vmem:[%s18269_s14 + $0x1b8] sm:$0xff] }
 0xb46   : > { %7810 = vmatpush.bf16.msra.mxu1 %v7695_v23  ;;  %7827 = vmatpush.bf16.msrb.mxu2 %v7695_v23  ;;  %v7635_v38 = vpop.f32.mrf.mxu1 }
 0xb47   : > { %11684 = vmatmul.msk.bf16.vlgmr.msrb.gmra.mxu1 %vm7697_vm2, %v11675_v21  ;;  %11685 = vmatmul.msk.bf16.vlgmr.msra.gmra.mxu2 %vm7697_vm2, %v11676_v60  ;;  %v7661_v14 = vadd.f32 %v12986_v56, %v7635_v38  ;;  %v8004_v33 = vunpack.c.l.b16 %v7672_v61  ;;  %v12784_v56 = vld [vmem:[%s18269_s14 + $0xb0] sm:$0xff]  ;;  %v12786_v38 = vld [vmem:[%s18269_s14 + $0xc0] sm:$0xff] }
 0xb49   : > { %7844 = vmatpush.bf16.msra.mxu3 %v7695_v23  ;;  %7864 = vmatpush.bf16.msra.mxu0 %v7855_v10  ;;  %v7665_v35 = vmax.f32 %v7661_v14, 0.0  ;;  %v12825_v14 = vld [vmem:[%s18269_s14 + $0x1f8] sm:$0xff] }
 0xb4b   : > { %v7669_v12 = vpack.c.bf16 %v7665_v35, %v7665_v35  ;;  %v12794_v35 = vld [vmem:[%s18269_s14 + $0x100] sm:$0xff] }
 0xb4c   : > { %v7654_v55 = vpop.f32.mrf.mxu2 }
 0xb4d   : > { %v7873_v25 = vunpack.c.l.b16 %v7669_v12  ;;  %v7673_v28 = vpack.c.bf16 %v7654_v55, %v7654_v55 }
 0xb4f   : > { %v7874_v39 = vpack.c.b16 %v7873_v25, %v7872_v37  ;;  %v8005_v7 = vunpack.c.l.b16 %v7673_v28  ;;  %v12824_v37 = vld [vmem:[%s18269_s14 + $0x1f0] sm:$0xff]  ;;  %v12806_v25 = vld [vmem:[%s18269_s14 + $0x160] sm:$0xff] }
 0xb50   : > { %v12816_v28 = vld [vmem:[%s18269_s14 + $0x1b0] sm:$0xff] }
 0xb51   : > { %7883 = vmatpush.bf16.msrb.mxu1 %v7874_v39  ;;  %7897 = vmatpush.bf16.msra.mxu2 %v7874_v39  ;;  %v8006_v11 = vpack.c.b16 %v8005_v7, %v8004_v33  ;;  %v12804_v7 = vld [vmem:[%s18269_s14 + $0x150] sm:$0xff] }
 0xb54   : > { %11686 = vmatmul.msk.bf16.vlgmr.msrb.gmra.mxu3 %vm7697_vm2, %v11677_v17  ;;  %11687 = vmatmul.msk.bf16.vlgmr.msrb.gmra.mxu0 %vm7697_vm2, %v11678_v29 }
 0xb55   : > { %7911 = vmatpush.bf16.msrb.mxu3 %v7874_v39  ;;  %7925 = vmatpush.bf16.msrb.mxu0 %v7874_v39 }
 0xb57   : > { %11688 = vmatmul.msk.bf16.vlgmr.msra.gmra.mxu1 %vm7697_vm2, %v11679_v19  ;;  %11689 = vmatmul.msk.bf16.vlgmr.msrb.gmra.mxu2 %vm7697_vm2, %v11680_v46 }
 0xb58   : > { %7939 = vmatpush.bf16.msra.mxu1 %v7874_v39  ;;  %7953 = vmatpush.bf16.msrb.mxu2 %v7874_v39 }
 0xb64   : > { %11690 = vmatmul.msk.bf16.vlgmr.msra.gmra.mxu3 %vm7697_vm2, %v11681_v27  ;;  %11691 = vmatmul.msk.bf16.vlgmr.msra.gmra.mxu0 %vm7697_vm2, %v11677_v17 }
 0xb65   : > { %7967 = vmatpush.bf16.msra.mxu3 %v7874_v39  ;;  %7981 = vmatpush.bf16.msra.mxu0 %v7874_v39 }
 0xb67   : > { %11692 = vmatmul.msk.bf16.vlgmr.msrb.gmra.mxu1 %vm7697_vm2, %v7674_v18  ;;  %11693 = vmatmul.msk.bf16.vlgmr.msra.gmra.mxu2 %vm7697_vm2, %v11674_v36  ;;  %v12787_v18 = vld [vmem:[%s18269_s14 + $0xc8] sm:$0xff] }
 0xb68   : > { %7995 = vmatpush.bf16.msrb.mxu1 %v7874_v39  ;;  %8015 = vmatpush.bf16.msra.mxu2 %v8006_v11  ;;  %v12795_v36 = vld [vmem:[%s18269_s14 + $0x108] sm:$0xff]  ;;  %v12778_v39 = vld [vmem:[%s18269_s14 + $0x80] sm:$0xff] }
 0xb69   : > { %v12815_v11 = vld [vmem:[%s18269_s14 + $0x1a8] sm:$0xff] }
 0xb74   : > { %11694 = vmatmul.msk.bf16.vlgmr.msrb.gmra.mxu3 %vm7697_vm2, %v11675_v21  ;;  %11695 = vmatmul.msk.bf16.vlgmr.msrb.gmra.mxu0 %vm7697_vm2, %v11676_v60  ;;  %v12807_v60 = vld [vmem:[%s18269_s14 + $0x168] sm:$0xff] }
 0xb75   : > { %8660 = vmatpush.bf16.msrb.mxu3 %v12769_v50  ;;  %8673 = vmatpush.bf16.msrb.mxu0 %v12777_v43  ;;  %v12803_v50 = vld [vmem:[%s18269_s14 + $0x148] sm:$0xff]  ;;  %v12814_v43 = vld [vmem:[%s18269_s14 + $0x1a0] sm:$0xff] }
 0xb77   : > { %11696 = vmatmul.msk.bf16.vlgmr.msra.gmra.mxu1 %vm7697_vm2, %v11677_v17  ;;  %11697 = vmatmul.msk.bf16.vlgmr.msrb.gmra.mxu2 %vm7697_vm2, %v11678_v29  ;;  %v12823_v29 = vld [vmem:[%s18269_s14 + $0x1e8] sm:$0xff] }
 0xb78   : > { %8699 = vmatpush.bf16.msrb.mxu2 %v12793_v44  ;;  %8686 = vmatpush.bf16.msra.mxu1 %v12785_v41 }
 0xb79   : > { %8661 = vmatpush.bf16.msrb.mxu3 %v12768_v22  ;;  %8674 = vmatpush.bf16.msrb.mxu0 %v12776_v0  ;;  %v12813_v0 = vld [vmem:[%s18269_s14 + $0x198] sm:$0xff] }
 0xb7c   : > { %8700 = vmatpush.bf16.msrb.mxu2 %v12792_v5  ;;  %8687 = vmatpush.bf16.msra.mxu1 %v12784_v56  ;;  %v12833_v56 = vld [vmem:[%s18269_s14 + $0x238] sm:$0xff] }
 0xb7d   : > { %8662 = vmatpush.bf16.msrb.mxu3 %v12767_v54  ;;  %8675 = vmatpush.bf16.msrb.mxu0 %v12775_v3 }
 0xb80   : > { %8701 = vmatpush.bf16.msrb.mxu2 %v12791_v1  ;;  %8688 = vmatpush.bf16.msra.mxu1 %v12783_v15  ;;  %v12818_v1 = vld [vmem:[%s18269_s14 + $0x1c0] sm:$0xff]  ;;  %v12811_v15 = vld [vmem:[%s18269_s14 + $0x188] sm:$0xff] }
 0xb81   : > { %8663 = vmatpush.bf16.msrb.mxu3 %v12766_v26  ;;  %8676 = vmatpush.bf16.msrb.mxu0 %v12774_v48  ;;  %v12821_v26 = vld [vmem:[%s18269_s14 + $0x1d8] sm:$0xff]  ;;  %v12812_v48 = vld [vmem:[%s18269_s14 + $0x190] sm:$0xff] }
 0xb84   : > { %11698 = vmatmul.msk.bf16.vlgmr.msra.gmra.mxu3 %vm7697_vm2, %v11679_v19  ;;  %11699 = vmatmul.msk.bf16.vlgmr.msra.gmra.mxu0 %vm7697_vm2, %v11680_v46  ;;  %v12805_v19 = vld [vmem:[%s18269_s14 + $0x158] sm:$0xff] }
 0xb85   : > { %8664 = vmatpush.bf16.msrb.mxu3 %v12765_v24  ;;  %8677 = vmatpush.bf16.msrb.mxu0 %v12773_v49 }
 0xb86   : > { %8702 = vmatpush.bf16.msrb.mxu2 %v12790_v59  ;;  %8689 = vmatpush.bf16.msra.mxu1 %v12782_v63  ;;  %v12832_v63 = vld [vmem:[%s18269_s14 + $0x230] sm:$0xff] }
 0xb87   : > { %11700 = vmatmul.msk.bf16.vlgmr.msrb.gmra.mxu1 %vm7697_vm2, %v11681_v27  ;;  %11701 = vmatmul.msk.bf16.vlgmr.msra.gmra.mxu2 %vm7697_vm2, %v11677_v17  ;;  %v12822_v27 = vld [vmem:[%s18269_s14 + $0x1e0] sm:$0xff] }
 0xb89   : > { %8665 = vmatpush.bf16.msrb.mxu3 %v12764_v40  ;;  %8678 = vmatpush.bf16.msrb.mxu0 %v12772_v2  ;;  %v12802_v40 = vld [vmem:[%s18269_s14 + $0x140] sm:$0xff] }
 0xb8a   : > { %8703 = vmatpush.bf16.msrb.mxu2 %v12789_v34  ;;  %8690 = vmatpush.bf16.msra.mxu1 %v12781_v13  ;;  %v12810_v13 = vld [vmem:[%s18269_s14 + $0x180] sm:$0xff] }
 0xb8d   : > { %8666 = vmatpush.bf16.msrb.mxu3 %v12763_v4  ;;  %8679 = vmatpush.bf16.msrb.mxu0 %v12771_v58  ;;  %v12820_v4 = vld [vmem:[%s18269_s14 + $0x1d0] sm:$0xff] }
 0xb8e   : > { %8704 = vmatpush.bf16.msrb.mxu2 %v12788_v52  ;;  %8691 = vmatpush.bf16.msra.mxu1 %v12780_v31  ;;  %v12831_v52 = vld [vmem:[%s18269_s14 + $0x228] sm:$0xff] }
 0xb91   : > { %8667 = vmatpush.bf16.msrb.mxu3 %v12762_v6  ;;  %8680 = vmatpush.bf16.msrb.mxu0 %v12770_v20  ;;  %v12819_v6 = vld [vmem:[%s18269_s14 + $0x1c8] sm:$0xff] }
 0xb92   : > { %8705 = vmatpush.bf16.msrb.mxu2 %v12787_v18  ;;  %8692 = vmatpush.bf16.msra.mxu1 %v12779_v47 }
 0xb95   : > { %8712 = vmatpush.bf16.msra.mxu3 %v12801_v30  ;;  %8725 = vmatpush.bf16.msra.mxu0 %v12809_v57 }
 0xb96   : > { %8706 = vmatpush.bf16.msrb.mxu2 %v12786_v38  ;;  %8693 = vmatpush.bf16.msra.mxu1 %v12778_v39 }
 0xb99   : > { %8713 = vmatpush.bf16.msra.mxu3 %v12800_v51  ;;  %8726 = vmatpush.bf16.msra.mxu0 %v12808_v9 }
 0xb9a   : > { %8751 = vmatpush.bf16.msra.mxu2 %v12825_v14  ;;  %8738 = vmatpush.bf16.msrb.mxu1 %v12817_v62  ;;  %v12828_v62 = vld [vmem:[%s18269_s14 + $0x210] sm:$0xff] }
 0xb9d   : > { %8714 = vmatpush.bf16.msra.mxu3 %v12799_v32  ;;  %8727 = vmatpush.bf16.msra.mxu0 %v12807_v60 }
 0xb9e   : > { %8752 = vmatpush.bf16.msra.mxu2 %v12824_v37  ;;  %8739 = vmatpush.bf16.msrb.mxu1 %v12816_v28 }
 0xba1   : > { %8715 = vmatpush.bf16.msra.mxu3 %v12798_v8  ;;  %8728 = vmatpush.bf16.msra.mxu0 %v12806_v25 }
 0xba2   : > { %8753 = vmatpush.bf16.msra.mxu2 %v12823_v29  ;;  %8740 = vmatpush.bf16.msrb.mxu1 %v12815_v11 }
 0xba5   : > { %8716 = vmatpush.bf16.msra.mxu3 %v12797_v45  ;;  %8729 = vmatpush.bf16.msra.mxu0 %v12805_v19 }
 0xba6   : > { %8754 = vmatpush.bf16.msra.mxu2 %v12822_v27  ;;  %8741 = vmatpush.bf16.msrb.mxu1 %v12814_v43 }
 0xba9   : > { %8717 = vmatpush.bf16.msra.mxu3 %v12796_v42  ;;  %8730 = vmatpush.bf16.msra.mxu0 %v12804_v7 }
 0xbaa   : > { %8755 = vmatpush.bf16.msra.mxu2 %v12821_v26  ;;  %8742 = vmatpush.bf16.msrb.mxu1 %v12813_v0 }
 0xbad   : > { %8718 = vmatpush.bf16.msra.mxu3 %v12795_v36  ;;  %8731 = vmatpush.bf16.msra.mxu0 %v12803_v50 }
 0xbae   : > { %8756 = vmatpush.bf16.msra.mxu2 %v12820_v4  ;;  %8743 = vmatpush.bf16.msrb.mxu1 %v12812_v48 }
 0xbb1   : > { %8719 = vmatpush.bf16.msra.mxu3 %v12794_v35  ;;  %8732 = vmatpush.bf16.msra.mxu0 %v12802_v40 }
 0xbb2   : > { %8757 = vmatpush.bf16.msra.mxu2 %v12819_v6  ;;  %8744 = vmatpush.bf16.msrb.mxu1 %v12811_v15 }
 0xbb6   : > { %8758 = vmatpush.bf16.msra.mxu2 %v12818_v1  ;;  %8745 = vmatpush.bf16.msrb.mxu1 %v12810_v13  ;;  %v12835_v13 = vld [vmem:[%s18270_s15 + $0x8] sm:$0xff] }
 0xbc1   : > { %v17563_v23 = vpop.f32.mrf.mxu0 }
 0xbc2   : > { %v7731_v45 = vpack.c.bf16 %v17563_v23, %v17563_v23  ;;  %v12830_v23 = vld [vmem:[%s18269_s14 + $0x220] sm:$0xff] }
 0xbc4   : > { %v17565_v53 = vpop.f32.mrf.mxu1 }
 0xbc5   : > { %v7748_v29 = vpack.c.bf16 %v17565_v53, %v17565_v53 }
 0xbc7   : > { %v17579_v21 = vpop.f32.mrf.mxu3 }
 0xbc8   : > { %v7714_v51 = vpack.c.bf16 %v17579_v21, %v17579_v21 }
 0xbc9   : > { %v7729_v16 = vpop.f32.mrf.mxu0 }
 0xbca   : > { %v17584_v10 = vpop.f32.mrf.mxu2  ;;  %v12829_v16 = vld [vmem:[%s18269_s14 + $0x218] sm:$0xff] }
 0xbcb   : > { %v7765_v60 = vpack.c.bf16 %v17584_v10, %v17584_v10 }
 0xbcc   : > { %v7746_v12 = vpop.f32.mrf.mxu1 }
 0xbcf   : > { %v7712_v17 = vpop.f32.mrf.mxu3 }
 0xbd1   : > { %v17616_v55 = vpop.f32.mrf.mxu0 }
 0xbd2   : > { %v7763_v46 = vpop.f32.mrf.mxu2  ;;  %v7799_v28 = vpack.c.bf16 %v17616_v55, %v17616_v55  ;;  %v12826_v55 = vld [vmem:[%s18269_s14 + $0x200] sm:$0xff] }
 0xbd4   : > { %v17621_v61 = vpop.f32.mrf.mxu1 }
 0xbd7   : > { %v17629_v33 = vpop.f32.mrf.mxu3 }
 0xbd8   : > { %v7782_v38 = vpack.c.bf16 %v17629_v33, %v17629_v33  ;;  %v12827_v33 = vld [vmem:[%s18269_s14 + $0x208] sm:$0xff] }
 0xbd9   : > { %v7797_v54 = vpop.f32.mrf.mxu0 }
 0xbda   : > { %v17637_v22 = vpop.f32.mrf.mxu2 }
 0xbdb   : > { %v7833_v40 = vpack.c.bf16 %v17637_v22, %v17637_v22  ;;  %v7816_v22 = vpack.c.bf16 %v17621_v61, %v17621_v61  ;;  %v12839_v61 = vld [vmem:[%s18270_s15 + $0x28] sm:$0xff] }
 0xbdc   : > { %v7814_v24 = vpop.f32.mrf.mxu1 }
 0xbdf   : > { %v7780_v44 = vpop.f32.mrf.mxu3 }
 0xbe1   : > { %v17657_v30 = vpop.f32.mrf.mxu0 }
 0xbe2   : > { %v7831_v3 = vpop.f32.mrf.mxu2 }
 0xbe4   : > { %v7885_v41 = vpop.f32.mrf.mxu1 }
 0xbe5   : > { %v7889_v5 = vpack.c.bf16 %v7885_v41, %v7885_v41 }
 0xbe7   : > { %v8030_v49 = vrot.slane %v7889_v5, 6  ;;  %v17671_v2 = vpop.f32.mrf.mxu3 }
 0xbe8   : > { %v7850_v4 = vpack.c.bf16 %v17671_v2, %v17671_v2 }
 0xbe9   : > { %v8042_v32 = vsel %vm8039_vm3, %v7714_v51, %v8030_v49  ;;  %v7868_v8 = vpop.f32.mrf.mxu0 }
 0xbea   : > { %8668 = vmatmul.bf16.vlgmr.msrb.gmra.mxu3 %v8042_v32  ;;  %v7899_v59 = vpop.f32.mrf.mxu2  ;;  %v12841_v8 = vld [vmem:[%s18270_s15 + $0x38] sm:$0xff] }
 0xbeb   : > { %8764 = vmatpush.bf16.msrb.mxu3 %v12833_v56  ;;  %v7903_v34 = vpack.c.bf16 %v7899_v59, %v7899_v59 }
 0xbec   : > { %v7887_v58 = vpop.f32.mrf.mxu1 }
 0xbed   : > { %v8031_v20 = vrot.slane %v7903_v34, 6  ;;  %v12837_v34 = vld [vmem:[%s18270_s15 + $0x18] sm:$0xff] }
 0xbef   : > { %8765 = vmatpush.bf16.msrb.mxu3 %v12832_v63  ;;  %v8046_v57 = vsel %vm8039_vm3, %v7731_v45, %v8031_v20  ;;  %v7848_v42 = vpop.f32.mrf.mxu3  ;;  %v12840_v63 = vld [vmem:[%s18270_s15 + $0x30] sm:$0xff] }
 0xbf0   : > { %8681 = vmatmul.bf16.vlgmr.msrb.gmra.mxu0 %v8046_v57  ;;  %v12836_v20 = vld [vmem:[%s18270_s15 + $0x10] sm:$0xff] }
 0xbf1   : > { %v7927_v18 = vpop.f32.mrf.mxu0  ;;  %8844 = vmatpush.bf16.msrb.mxu0 %v12841_v8 }
 0xbf2   : > { %v7901_v9 = vpop.f32.mrf.mxu2  ;;  %v7931_v36 = vpack.c.bf16 %v7927_v18, %v7927_v18  ;;  %v12080_v18 = vld [vmem:[%s18273_s18 + $0x70] sm:$0xf] }
 0xbf3   : > { %8766 = vmatpush.bf16.msrb.mxu3 %v12831_v52  ;;  %v12987_v52 = vld [vmem:[%s18271_s16 + $0x1] ss:$0 sm:$0xff] }
 0xbf4   : > { %v7941_v31 = vpop.f32.mrf.mxu1  ;;  %v8033_v47 = vrot.slane %v7931_v36, 6  ;;  %v12834_v9 = vld [vmem:[%s18270_s15] sm:$0xff]  ;;  %v12856_v36 = vld [vmem:[%s18273_s18 + $0x74] sm:$0xf] }
 0xbf5   : > { %v7945_v21 = vpack.c.bf16 %v7941_v31, %v7941_v31  ;;  %8845 = vmatpush.bf16.msrb.mxu0 %v12840_v63 }
 0xbf6   : > { %v8054_v35 = vsel %vm8039_vm3, %v7765_v60, %v8033_v47  ;;  %v12072_v60 = vld [vmem:[%s18273_s18 + $0x60] sm:$0xf]  ;;  %v12855_v47 = vld [vmem:[%s18273_s18 + $0x64] sm:$0xf0] }
 0xbf7   : > { %v8034_v14 = vrot.slane %v7945_v21, 6  ;;  %8767 = vmatpush.bf16.msrb.mxu3 %v12830_v23  ;;  %v7913_v37 = vpop.f32.mrf.mxu3  ;;  %8707 = vmatmul.bf16.vlgmr.msrb.gmra.mxu2 %v8054_v35  ;;  %v12857_v23 = vld [vmem:[%s18273_s18 + $0x74] sm:$0xf0]  ;;  %v12082_v21 = vld [vmem:[%s18273_s18 + $0x78] sm:$0xf0] }
 0xbf8   : > { %v7917_v25 = vpack.c.bf16 %v7913_v37, %v7913_v37  ;;  %v12081_v31 = vor.u32 %v12857_v23, %v12080_v18  ;;  %v12074_v35 = vld [vmem:[%s18273_s18 + $0x68] sm:$0xf0]  ;;  %v12844_v18 = vld [vmem:[%s18273_s18 + $0x14] sm:$0xf] }
 0xbf9   : > { %v8058_v12 = vsel %vm8039_vm3, %v7782_v38, %v8034_v14  ;;  %v7929_v10 = vpop.f32.mrf.mxu0  ;;  %8846 = vmatpush.bf16.msrb.mxu0 %v12839_v61  ;;  %v12085_v14 = vor.u32 %v12856_v36, %v12082_v21  ;;  %v12034_v36 = vld [vmem:[%s18273_s18 + $0x18] sm:$0xf0]  ;;  %v12024_v21 = vld [vmem:[%s18273_s18] sm:$0xf] }
 0xbfa   : > { %8720 = vmatmul.bf16.vlgmr.msra.gmra.mxu3 %v8058_v12  ;;  %v7955_v39 = vpop.f32.mrf.mxu2  ;;  %v8032_v19 = vrot.slane %v7917_v25, 6  ;;  %v12073_v12 = vor.u32 %v12855_v47, %v12072_v60  ;;  %v12064_v25 = vld [vmem:[%s18273_s18 + $0x50] sm:$0xf]  ;;  %v12843_v60 = vld [vmem:[%s18273_s18 + $0x4] sm:$0xf0] }
 0xbfb   : > { %8768 = vmatpush.bf16.msrb.mxu3 %v12829_v16  ;;  %v7959_v17 = vpack.c.bf16 %v7955_v39, %v7955_v39  ;;  %v12854_v16 = vld [vmem:[%s18273_s18 + $0x64] sm:$0xf]  ;;  %8973 = vmatpush.bf16.msrb.mxu2 %v12085_v14  ;;  %v12853_v39 = vld [vmem:[%s18273_s18 + $0x54] sm:$0xf0]  ;;  %v12026_v14 = vld [vmem:[%s18273_s18 + $0x8] sm:$0xf0] }
 0xbfc   : > { %v7943_v46 = vpop.f32.mrf.mxu1  ;;  %v8050_v27 = vsel %vm8039_vm3, %v7748_v29, %v8032_v19  ;;  %v12077_v37 = vor.u32 %v12854_v16, %v12074_v35  ;;  %v12066_v29 = vld [vmem:[%s18273_s18 + $0x58] sm:$0xf0]  ;;  %v12842_v47 = vld [vmem:[%s18273_s18 + $0x4] sm:$0xf]  ;;  %v12988_v35 = vld [vmem:[%s18271_s16 + $0x3] ss:$0 sm:$0xff] }
 0xbfd   : > { %v8035_v7 = vrot.slane %v7959_v17, 6  ;;  %8694 = vmatmul.bf16.vlgmr.msra.gmra.mxu1 %v8050_v27  ;;  %v12852_v17 = vld [vmem:[%s18273_s18 + $0x54] sm:$0xf]  ;;  %v12029_v16 = vor.u32 %v12842_v47, %v12026_v14  ;;  %v12886_v47 = vld [vmem:[%s18274_s19 + $0xe0] sm:$0xff] }
 0xbfe   : > { %8960 = vmatpush.bf16.msra.mxu1 %v12081_v31  ;;  %v12037_v31 = vor.u32 %v12844_v18, %v12034_v36  ;;  %v12869_v18 = vld [vmem:[%s18274_s19 + $0x58] sm:$0xff]  ;;  %v12887_v36 = vld [vmem:[%s18274_s19 + $0xe8] sm:$0xff]  ;;  %v12878_v14 = vld [vmem:[%s18274_s19 + $0xa0] sm:$0xff] }
 0xbff   : > { %8769 = vmatpush.bf16.msrb.mxu3 %v12828_v62  ;;  %v8062_v11 = vsel %vm8039_vm3, %v7799_v28, %v8035_v7  ;;  %v7915_v50 = vpop.f32.mrf.mxu3  ;;  %v12065_v7 = vor.u32 %v12853_v39, %v12064_v25  ;;  %8974 = vmatpush.bf16.msrb.mxu2 %v12077_v37 }
 0xc00   : > { %8733 = vmatmul.bf16.vlgmr.msra.gmra.mxu0 %v8062_v11  ;;  %v12056_v11 = vld [vmem:[%s18273_s18 + $0x40] sm:$0xf]  ;;  %v12851_v50 = vld [vmem:[%s18273_s18 + $0x44] sm:$0xf0] }
 0xc01   : > { %v7983_v53 = vpop.f32.mrf.mxu0 }
 0xc02   : > { %v7957_v54 = vpop.f32.mrf.mxu2  ;;  %v7987_v26 = vpack.c.bf16 %v7983_v53, %v7983_v53  ;;  %8961 = vmatpush.bf16.msra.mxu1 %v12073_v12  ;;  %v12058_v53 = vld [vmem:[%s18273_s18 + $0x48] sm:$0xf0]  ;;  %v12989_v12 = vld [vmem:[%s18271_s16 + $0x2] ss:$0 sm:$0xff] }
 0xc03   : > { %8770 = vmatpush.bf16.msrb.mxu3 %v12827_v33  ;;  %v12069_v33 = vor.u32 %v12852_v17, %v12066_v29  ;;  %v12850_v54 = vld [vmem:[%s18273_s18 + $0x44] sm:$0xf] }
 0xc04   : > { %v7997_v24 = vpop.f32.mrf.mxu1  ;;  %v8037_v0 = vrot.slane %v7987_v26, 6 }
 0xc05   : > { %v8001_v43 = vpack.c.bf16 %v7997_v24, %v7997_v24  ;;  %8975 = vmatpush.bf16.msrb.mxu2 %v12069_v33  ;;  %v12061_v24 = vor.u32 %v12850_v54, %v12058_v53 }
 0xc06   : > { %v8070_v6 = vsel %vm8039_vm3, %v7833_v40, %v8037_v0  ;;  %8962 = vmatpush.bf16.msra.mxu1 %v12065_v7  ;;  %v12849_v40 = vld [vmem:[%s18273_s18 + $0x34] sm:$0xf0] }
 0xc07   : > { %v8038_v44 = vrot.slane %v8001_v43, 6  ;;  %8771 = vmatpush.bf16.msrb.mxu3 %v12826_v55  ;;  %v7969_v48 = vpop.f32.mrf.mxu3  ;;  %8759 = vmatmul.bf16.vlgmr.msra.gmra.mxu2 %v8070_v6  ;;  %v12057_v55 = vor.u32 %v12851_v50, %v12056_v11  ;;  %v12048_v43 = vld [vmem:[%s18273_s18 + $0x30] sm:$0xf]  ;;  %v12050_v6 = vld [vmem:[%s18273_s18 + $0x38] sm:$0xf0] }
 0xc08   : > { %v7973_v41 = vpack.c.bf16 %v7969_v48, %v7969_v48 }
 0xc09   : > { %v8074_v3 = vsel %vm8039_vm3, %v7850_v4, %v8038_v44  ;;  %v7985_v49 = vpop.f32.mrf.mxu0  ;;  %v12848_v44 = vld [vmem:[%s18273_s18 + $0x34] sm:$0xf]  ;;  %8976 = vmatpush.bf16.msrb.mxu2 %v12061_v24  ;;  %v12087_v24 = vld [vmem:[%s18277_s22 + $0x2] sm:$0x1] }
 0xc0a   : > { %8772 = vmatmul.bf16.vlgmr.msrb.gmra.mxu3 %v8074_v3  ;;  %v8017_v5 = vpop.f32.mrf.mxu2  ;;  %v8036_v56 = vrot.slane %v7973_v41, 6  ;;  %8963 = vmatpush.bf16.msra.mxu1 %v12057_v55  ;;  %v12049_v41 = vor.u32 %v12849_v40, %v12048_v43  ;;  %v12040_v49 = vld [vmem:[%s18273_s18 + $0x20] sm:$0xf] }
 0xc0b   : > { %v8077_v51 = vrot.slane %v8017_v5, 4  ;;  %v8991_v55 = vld [vmem:[%s18277_s22] sm:$0x1]  ;;  %v12088_v43 = vld [vmem:[%s18277_s22 + $0x3] sm:$0x1] }
 0xc0c   : > { %v7999_v1 = vpop.f32.mrf.mxu1  ;;  %v8066_v2 = vsel %vm8039_vm3, %v7816_v22, %v8036_v56  ;;  %v12847_v22 = vld [vmem:[%s18273_s18 + $0x24] sm:$0xf0]  ;;  %v12846_v56 = vld [vmem:[%s18273_s18 + $0x24] sm:$0xf] }
 0xc0d   : > { %v17724_v32 = vsel %vm8079_vm4, %v17657_v30, %v8077_v51  ;;  %8746 = vmatmul.bf16.vlgmr.msrb.gmra.mxu1 %v8066_v2  ;;  %v12838_v30 = vld [vmem:[%s18270_s15 + $0x20] sm:$0xff]  ;;  %v12053_v51 = vor.u32 %v12848_v44, %v12050_v6  ;;  %v12042_v1 = vld [vmem:[%s18273_s18 + $0x28] sm:$0xf0]  ;;  %v12041_v2 = vor.u32 %v12847_v22, %v12040_v49  ;;  %v12093_v49 = vld [vmem:[%s18277_s22 + $0x8] sm:$0x1] }
 0xc0e   : > { %8847 = vmatpush.bf16.msrb.mxu0 %v12838_v30  ;;  %8964 = vmatpush.bf16.msra.mxu1 %v12049_v41  ;;  %v8082_v25 = vadd.f32 %v12988_v35, %v17724_v32  ;;  %v12089_v6 = vld [vmem:[%s18277_s22 + $0x4] sm:$0x1]  ;;  %v12092_v41 = vld [vmem:[%s18277_s22 + $0x7] sm:$0x1]  ;;  %v12867_v35 = vld [vmem:[%s18274_s19 + $0x48] sm:$0xff] }
 0xc0f   : > { %v7971_v15 = vpop.f32.mrf.mxu3  ;;  %8977 = vmatpush.bf16.msrb.mxu2 %v12053_v51 }
 0xc12   : > { %v8019_v59 = vpop.f32.mrf.mxu2  ;;  %8848 = vmatpush.bf16.msrb.mxu0 %v12837_v34  ;;  %8965 = vmatpush.bf16.msra.mxu1 %v12041_v2  ;;  %v12864_v2 = vld [vmem:[%s18274_s19 + $0x30] sm:$0xff] }
 0xc13   : > { %v12045_v59 = vor.u32 %v12846_v56, %v12042_v1  ;;  %v12865_v1 = vld [vmem:[%s18274_s19 + $0x38] sm:$0xff] }
 0xc15   : > { %8978 = vmatpush.bf16.msrb.mxu2 %v12045_v59  ;;  %v12862_v59 = vld [vmem:[%s18274_s19 + $0x20] sm:$0xff] }
 0xc16   : > { %8849 = vmatpush.bf16.msrb.mxu0 %v12836_v20 }
 0xc19   : > { %8979 = vmatpush.bf16.msrb.mxu2 %v12037_v31  ;;  %v12895_v31 = vld [vmem:[%s18274_s19 + $0x128] sm:$0xff] }
 0xc1a   : > { %8850 = vmatpush.bf16.msrb.mxu0 %v12835_v13 }
 0xc1d   : > { %8980 = vmatpush.bf16.msrb.mxu2 %v12029_v16  ;;  %v12885_v16 = vld [vmem:[%s18274_s19 + $0xd8] sm:$0xff] }
 0xc1e   : > { %8851 = vmatpush.bf16.msrb.mxu0 %v12834_v9  ;;  %v12845_v9 = vld [vmem:[%s18273_s18 + $0x14] sm:$0xf0] }
 0xc6d   : > { %v8669_v58 = vpop.f32.mrf.mxu3  ;;  %v8682_v45 = vpop.f32.mrf.mxu0 }
 0xc6e   : > { %v8670_v38 = vadd.f32 %v12987_v52, %v8669_v58 }
 0xc70   : > { %v8683_v19 = vadd.f32 %v8682_v45, %v8670_v38  ;;  %v12025_v38 = vor.u32 %v12843_v60, %v12024_v21  ;;  %v12868_v21 = vld [vmem:[%s18274_s19 + $0x50] sm:$0xff]  ;;  %v12879_v60 = vld [vmem:[%s18274_s19 + $0xa8] sm:$0xff] }
 0xc75   : > { %v8671_v57 = vpop.f32.mrf.mxu3  ;;  %v8684_v42 = vpop.f32.mrf.mxu0 }
 0xc76   : > { %v12032_v42 = vld [vmem:[%s18273_s18 + $0x10] sm:$0xf] }
 0xc77   : > { %v12033_v23 = vor.u32 %v12845_v9, %v12032_v42  ;;  %v12888_v42 = vld [vmem:[%s18274_s19 + $0xf0] sm:$0xff] }
 0xc78   : > { %v12896_v9 = vld [vmem:[%s18274_s19 + $0x130] sm:$0xff] }
 0xc79   : > { %8966 = vmatpush.bf16.msra.mxu1 %v12033_v23  ;;  %v12880_v23 = vld [vmem:[%s18274_s19 + $0xb0] sm:$0xff] }
 0xc7a   : > { %v8695_v10 = vpop.f32.mrf.mxu1  ;;  %v8708_v62 = vpop.f32.mrf.mxu2 }
 0xc7b   : > { %v8696_v27 = vadd.f32 %v8695_v10, %v8683_v19  ;;  %v12990_v19 = vld [vmem:[%s18276_s21] ss:$0 sm:$0xff] }
 0xc7d   : > { %v8721_v46 = vpop.f32.mrf.mxu3  ;;  %v8734_v28 = vpop.f32.mrf.mxu0  ;;  %v8709_v26 = vadd.f32 %v8708_v62, %v8696_v27  ;;  %8967 = vmatpush.bf16.msra.mxu1 %v12025_v38  ;;  %v12894_v38 = vld [vmem:[%s18274_s19 + $0x120] sm:$0xff] }
 0xc7f   : > { %v8722_v5 = vadd.f32 %v8721_v46, %v8709_v26  ;;  %v12086_v26 = vld [vmem:[%s18277_s22 + $0x1] sm:$0x1] }
 0xc81   : > { %v8735_v15 = vadd.f32 %v8734_v28, %v8722_v5 }
 0xc82   : > { %v8697_v0 = vpop.f32.mrf.mxu1  ;;  %v8710_v4 = vpop.f32.mrf.mxu2 }
 0xc85   : > { %v8723_v3 = vpop.f32.mrf.mxu3  ;;  %v8736_v48 = vpop.f32.mrf.mxu0 }
 0xc86   : > { %v12090_v3 = vld [vmem:[%s18277_s22 + $0x5] sm:$0x1]  ;;  %v12091_v48 = vld [vmem:[%s18277_s22 + $0x6] sm:$0x1] }
 0xc8a   : > { %v8747_v8 = vpop.f32.mrf.mxu1  ;;  %v8760_v63 = vpop.f32.mrf.mxu2 }
 0xc8b   : > { %v8748_v61 = vadd.f32 %v8747_v8, %v8735_v15  ;;  %v12863_v15 = vld [vmem:[%s18274_s19 + $0x28] sm:$0xff]  ;;  %v12861_v8 = vld [vmem:[%s18274_s19 + $0x18] sm:$0xff] }
 0xc8d   : > { %v8773_v30 = vpop.f32.mrf.mxu3  ;;  %v8761_v34 = vadd.f32 %v8760_v63, %v8748_v61  ;;  %v12873_v63 = vld [vmem:[%s18274_s19 + $0x78] sm:$0xff]  ;;  %v12860_v61 = vld [vmem:[%s18274_s19 + $0x10] sm:$0xff] }
 0xc8f   : > { %v8774_v58 = vadd.f32 %v8773_v30, %v8761_v34  ;;  %v12872_v30 = vld [vmem:[%s18274_s19 + $0x70] sm:$0xff]  ;;  %v12859_v34 = vld [vmem:[%s18274_s19 + $0x8] sm:$0xff] }
 0xc91   : > { %v8777_v45 = vmax.f32 %v8774_v58, 0.0  ;;  %v12889_v58 = vld [vmem:[%s18274_s19 + $0xf8] sm:$0xff] }
 0xc92   : > { %v8749_v20 = vpop.f32.mrf.mxu1  ;;  %v8762_v13 = vpop.f32.mrf.mxu2 }
 0xc93   : > { %v8778_v52 = vpack.c.bf16 %v8777_v45, %v8777_v45  ;;  %v12858_v45 = vld [vmem:[%s18274_s19] sm:$0xff]  ;;  %v12871_v20 = vld [vmem:[%s18274_s19 + $0x68] sm:$0xff]  ;;  %v12897_v13 = vld [vmem:[%s18274_s19 + $0x138] sm:$0xff] }
 0xc95   : > { %v8775_v57 = vpop.f32.mrf.mxu3  ;;  %8852 = vmatmul.bf16.vlgmr.msrb.gmra.mxu0 %v8778_v52  ;;  %v12870_v52 = vld [vmem:[%s18274_s19 + $0x60] sm:$0xff] }
 0xc96   : > { %v12881_v57 = vld [vmem:[%s18274_s19 + $0xb8] sm:$0xff] }
 0xd12   : > { %v8853_v37 = vpop.f32.mrf.mxu0 }
 0xd13   : > { %v8854_v39 = vadd.f32 %v12989_v12, %v8853_v37  ;;  %v12893_v12 = vld [vmem:[%s18274_s19 + $0x118] sm:$0xff]  ;;  %v12866_v37 = vld [vmem:[%s18274_s19 + $0x40] sm:$0xff] }
 0xd15   : > { %v8857_v10 = vadd.f32 %v8854_v39, %v8082_v25  ;;  %v12877_v25 = vld [vmem:[%s18274_s19 + $0x98] sm:$0xff]  ;;  %v12884_v39 = vld [vmem:[%s18274_s19 + $0xd0] sm:$0xff] }
 0xd17   : > { %v8858_v62 = vmax.f32 %v8857_v10, 0.0  ;;  %v12905_v10 = vld [vmem:[%s18274_s19 + $0x178] sm:$0xff] }
 0xd19   : > { %v8859_v17 = vpack.c.bf16 %v8858_v62, %v8858_v62  ;;  %v12892_v62 = vld [vmem:[%s18274_s19 + $0x110] sm:$0xff] }
 0xd1a   : > { %v8855_v29 = vpop.f32.mrf.mxu0 }
 0xd1b   : > { %8968 = vmatmul.bf16.vlgmr.msra.gmra.mxu1 %v8859_v17  ;;  %8981 = vmatmul.bf16.vlgmr.msrb.gmra.mxu2 %v8859_v17 }
 0xd98   : > { %v8969_v46 = vpop.f32.mrf.mxu1 }
 0xd99   : > { %v8987_v28 = vadd.f32 %v12990_v19, %v8969_v46  ;;  %v12904_v19 = vld [vmem:[%s18274_s19 + $0x170] sm:$0xff]  ;;  %v12883_v46 = vld [vmem:[%s18274_s19 + $0xc8] sm:$0xff] }
 0xd9b   : > { %v8988_v7 = vmax.f32 %v8987_v28, 0.0  ;;  %v12891_v28 = vld [vmem:[%s18274_s19 + $0x108] sm:$0xff] }
 0xd9d   : > { %v8989_v27 = vpack.c.bf16 %v8988_v7, %v8988_v7  ;;  %v12876_v7 = vld [vmem:[%s18274_s19 + $0x90] sm:$0xff] }
 0xd9e   : > { %v8982_v33 = vpop.f32.mrf.mxu2 }
 0xd9f   : > { %v9013_v11 = vsel %vm8039_vm3, %v8989_v27, 0  ;;  %v9182_v50 = vunpack.c.l.b16 %v8989_v27  ;;  %v8990_v53 = vpack.c.bf16 %v8982_v33, %v8982_v33  ;;  %v12903_v33 = vld [vmem:[%s18274_s19 + $0x168] sm:$0xff] }
 0xda0   : > { %v8971_v32 = vpop.f32.mrf.mxu1  ;;  %9022 = vmatpush.bf16.msra.mxu3 %v9013_v11  ;;  %9039 = vmatpush.bf16.msra.mxu0 %v9013_v11 }
 0xda1   : > { %v9183_v54 = vpack.c.b16 %v9182_v50, %v9182_v50  ;;  %9056 = vmatpush.bf16.msrb.mxu1 %v9013_v11  ;;  %9073 = vmatpush.bf16.msra.mxu2 %v9013_v11  ;;  %v9166_v4 = vsel %vm8039_vm3, %v8990_v53, 0  ;;  %v9315_v5 = vunpack.c.l.b16 %v8990_v53  ;;  %v12875_v50 = vld [vmem:[%s18274_s19 + $0x88] sm:$0xff]  ;;  %v12882_v32 = vld [vmem:[%s18274_s19 + $0xc0] sm:$0xff] }
 0xda3   : > { %v9184_v40 = vrot.slane %v9183_v54, 2  ;;  %12094 = vmatmul.msk.bf16.vlgmr.msra.gmra.mxu3 %vm9008_vm5, %v8991_v55  ;;  %12095 = vmatmul.msk.bf16.vlgmr.msra.gmra.mxu0 %vm9008_vm5, %v12086_v26  ;;  %v9316_v51 = vpack.c.b16 %v9315_v5, %v9315_v5  ;;  %v12921_v54 = vld [vmem:[%s18274_s19 + $0x1f8] sm:$0xff] }
 0xda4   : > { %9090 = vmatpush.bf16.msrb.mxu3 %v9013_v11  ;;  %9107 = vmatpush.bf16.msrb.mxu0 %v9013_v11 }
 0xda5   : > { %9124 = vmatpush.bf16.msra.mxu1 %v9013_v11  ;;  %9141 = vmatpush.bf16.msrb.mxu2 %v9013_v11  ;;  %v9186_v0 = vsel %vm8039_vm3, %v9184_v40, 0  ;;  %v9317_v22 = vrot.slane %v9316_v51, 2  ;;  %v12874_v40 = vld [vmem:[%s18274_s19 + $0x80] sm:$0xff]  ;;  %v12900_v51 = vld [vmem:[%s18274_s19 + $0x150] sm:$0xff] }
 0xda6   : > { %12096 = vmatmul.msk.bf16.vlgmr.msrb.gmra.mxu1 %vm9008_vm5, %v12087_v24  ;;  %12097 = vmatmul.msk.bf16.vlgmr.msra.gmra.mxu2 %vm9008_vm5, %v12088_v43  ;;  %v8984_v44 = vpop.f32.mrf.mxu2 }
 0xda7   : > { %v9319_v56 = vsel %vm8039_vm3, %v9317_v22, 0  ;;  %v12919_v44 = vld [vmem:[%s18274_s19 + $0x1e8] sm:$0xff] }
 0xda8   : > { %9158 = vmatpush.bf16.msra.mxu3 %v9013_v11  ;;  %9175 = vmatpush.bf16.msra.mxu0 %v9166_v4 }
 0xda9   : > { %9195 = vmatpush.bf16.msrb.mxu1 %v9186_v0  ;;  %9209 = vmatpush.bf16.msra.mxu2 %v9186_v0 }
 0xdb3   : > { %12098 = vmatmul.msk.bf16.vlgmr.msrb.gmra.mxu3 %vm9008_vm5, %v12089_v6  ;;  %12099 = vmatmul.msk.bf16.vlgmr.msrb.gmra.mxu0 %vm9008_vm5, %v12090_v3 }
 0xdb4   : > { %9223 = vmatpush.bf16.msrb.mxu3 %v9186_v0  ;;  %9237 = vmatpush.bf16.msrb.mxu0 %v9186_v0 }
 0xdb6   : > { %12100 = vmatmul.msk.bf16.vlgmr.msra.gmra.mxu1 %vm9008_vm5, %v12091_v48  ;;  %12101 = vmatmul.msk.bf16.vlgmr.msrb.gmra.mxu2 %vm9008_vm5, %v12092_v41 }
 0xdb7   : > { %9251 = vmatpush.bf16.msra.mxu1 %v9186_v0  ;;  %9265 = vmatpush.bf16.msrb.mxu2 %v9186_v0 }
 0xdc3   : > { %12102 = vmatmul.msk.bf16.vlgmr.msra.gmra.mxu3 %vm9008_vm5, %v12093_v49  ;;  %12103 = vmatmul.msk.bf16.vlgmr.msra.gmra.mxu0 %vm9008_vm5, %v12089_v6 }
 0xdc4   : > { %9279 = vmatpush.bf16.msra.mxu3 %v9186_v0  ;;  %9293 = vmatpush.bf16.msra.mxu0 %v9186_v0 }
 0xdc6   : > { %12104 = vmatmul.msk.bf16.vlgmr.msrb.gmra.mxu1 %vm9008_vm5, %v8991_v55  ;;  %12105 = vmatmul.msk.bf16.vlgmr.msra.gmra.mxu2 %vm9008_vm5, %v12086_v26  ;;  %v12890_v55 = vld [vmem:[%s18274_s19 + $0x100] sm:$0xff] }
 0xdc7   : > { %9307 = vmatpush.bf16.msrb.mxu1 %v9186_v0  ;;  %9328 = vmatpush.bf16.msra.mxu2 %v9319_v56  ;;  %v12913_v0 = vld [vmem:[%s18274_s19 + $0x1b8] sm:$0xff]  ;;  %v12911_v56 = vld [vmem:[%s18274_s19 + $0x1a8] sm:$0xff] }
 0xdd3   : > { %12106 = vmatmul.msk.bf16.vlgmr.msrb.gmra.mxu3 %vm9008_vm5, %v12087_v24  ;;  %12107 = vmatmul.msk.bf16.vlgmr.msrb.gmra.mxu0 %vm9008_vm5, %v12088_v43  ;;  %v12920_v24 = vld [vmem:[%s18274_s19 + $0x1f0] sm:$0xff]  ;;  %v12902_v43 = vld [vmem:[%s18274_s19 + $0x160] sm:$0xff] }
 0xdd4   : > { %9966 = vmatpush.bf16.msrb.mxu3 %v12865_v1  ;;  %9979 = vmatpush.bf16.msrb.mxu0 %v12873_v63  ;;  %v12899_v1 = vld [vmem:[%s18274_s19 + $0x148] sm:$0xff]  ;;  %v12910_v63 = vld [vmem:[%s18274_s19 + $0x1a0] sm:$0xff] }
 0xdd6   : > { %12108 = vmatmul.msk.bf16.vlgmr.msra.gmra.mxu1 %vm9008_vm5, %v12089_v6  ;;  %12109 = vmatmul.msk.bf16.vlgmr.msrb.gmra.mxu2 %vm9008_vm5, %v12090_v3 }
 0xdd7   : > { %10005 = vmatpush.bf16.msrb.mxu2 %v12889_v58  ;;  %9992 = vmatpush.bf16.msra.mxu1 %v12881_v57 }
 0xdd8   : > { %9967 = vmatpush.bf16.msrb.mxu3 %v12864_v2  ;;  %9980 = vmatpush.bf16.msrb.mxu0 %v12872_v30  ;;  %v12909_v30 = vld [vmem:[%s18274_s19 + $0x198] sm:$0xff] }
 0xddb   : > { %10006 = vmatpush.bf16.msrb.mxu2 %v12888_v42  ;;  %9993 = vmatpush.bf16.msra.mxu1 %v12880_v23 }
 0xddc   : > { %9968 = vmatpush.bf16.msrb.mxu3 %v12863_v15  ;;  %9981 = vmatpush.bf16.msrb.mxu0 %v12871_v20 }
 0xddf   : > { %10007 = vmatpush.bf16.msrb.mxu2 %v12887_v36  ;;  %9994 = vmatpush.bf16.msra.mxu1 %v12879_v60  ;;  %v12929_v36 = vld [vmem:[%s18274_s19 + $0x238] sm:$0xff] }
 0xde0   : > { %9969 = vmatpush.bf16.msrb.mxu3 %v12862_v59  ;;  %9982 = vmatpush.bf16.msrb.mxu0 %v12870_v52  ;;  %v12917_v59 = vld [vmem:[%s18274_s19 + $0x1d8] sm:$0xff]  ;;  %v12908_v52 = vld [vmem:[%s18274_s19 + $0x190] sm:$0xff] }
 0xde3   : > { %12110 = vmatmul.msk.bf16.vlgmr.msra.gmra.mxu3 %vm9008_vm5, %v12091_v48  ;;  %12111 = vmatmul.msk.bf16.vlgmr.msra.gmra.mxu0 %vm9008_vm5, %v12092_v41  ;;  %v12912_v41 = vld [vmem:[%s18274_s19 + $0x1b0] sm:$0xff] }
 0xde4   : > { %9970 = vmatpush.bf16.msrb.mxu3 %v12861_v8  ;;  %9983 = vmatpush.bf16.msrb.mxu0 %v12869_v18 }
 0xde5   : > { %10008 = vmatpush.bf16.msrb.mxu2 %v12886_v47  ;;  %9995 = vmatpush.bf16.msra.mxu1 %v12878_v14  ;;  %v12907_v47 = vld [vmem:[%s18274_s19 + $0x188] sm:$0xff] }
 0xde6   : > { %12112 = vmatmul.msk.bf16.vlgmr.msrb.gmra.mxu1 %vm9008_vm5, %v12093_v49  ;;  %12113 = vmatmul.msk.bf16.vlgmr.msra.gmra.mxu2 %vm9008_vm5, %v12089_v6  ;;  %v12901_v6 = vld [vmem:[%s18274_s19 + $0x158] sm:$0xff]  ;;  %v12918_v49 = vld [vmem:[%s18274_s19 + $0x1e0] sm:$0xff] }
 0xde8   : > { %9971 = vmatpush.bf16.msrb.mxu3 %v12860_v61  ;;  %9984 = vmatpush.bf16.msrb.mxu0 %v12868_v21  ;;  %v12898_v61 = vld [vmem:[%s18274_s19 + $0x140] sm:$0xff] }
 0xde9   : > { %10009 = vmatpush.bf16.msrb.mxu2 %v12885_v16  ;;  %9996 = vmatpush.bf16.msra.mxu1 %v12877_v25  ;;  %v12928_v16 = vld [vmem:[%s18274_s19 + $0x230] sm:$0xff] }
 0xdec   : > { %9972 = vmatpush.bf16.msrb.mxu3 %v12859_v34  ;;  %9985 = vmatpush.bf16.msrb.mxu0 %v12867_v35  ;;  %v12916_v34 = vld [vmem:[%s18274_s19 + $0x1d0] sm:$0xff] }
 0xded   : > { %10010 = vmatpush.bf16.msrb.mxu2 %v12884_v39  ;;  %9997 = vmatpush.bf16.msra.mxu1 %v12876_v7  ;;  %v12906_v39 = vld [vmem:[%s18274_s19 + $0x180] sm:$0xff] }
 0xdf0   : > { %9973 = vmatpush.bf16.msrb.mxu3 %v12858_v45  ;;  %9986 = vmatpush.bf16.msrb.mxu0 %v12866_v37  ;;  %v12915_v45 = vld [vmem:[%s18274_s19 + $0x1c8] sm:$0xff] }
 0xdf1   : > { %10011 = vmatpush.bf16.msrb.mxu2 %v12883_v46  ;;  %9998 = vmatpush.bf16.msra.mxu1 %v12875_v50 }
 0xdf4   : > { %10018 = vmatpush.bf16.msra.mxu3 %v12897_v13  ;;  %10031 = vmatpush.bf16.msra.mxu0 %v12905_v10  ;;  %v12927_v10 = vld [vmem:[%s18274_s19 + $0x228] sm:$0xff] }
 0xdf5   : > { %10012 = vmatpush.bf16.msrb.mxu2 %v12882_v32  ;;  %9999 = vmatpush.bf16.msra.mxu1 %v12874_v40 }
 0xdf8   : > { %10019 = vmatpush.bf16.msra.mxu3 %v12896_v9  ;;  %10032 = vmatpush.bf16.msra.mxu0 %v12904_v19  ;;  %v12934_v9 = vld [vmem:[%s18275_s20 + $0x20] sm:$0xff] }
 0xdf9   : > { %10057 = vmatpush.bf16.msra.mxu2 %v12921_v54  ;;  %10044 = vmatpush.bf16.msrb.mxu1 %v12913_v0 }
 0xdfc   : > { %10020 = vmatpush.bf16.msra.mxu3 %v12895_v31  ;;  %10033 = vmatpush.bf16.msra.mxu0 %v12903_v33  ;;  %v12914_v31 = vld [vmem:[%s18274_s19 + $0x1c0] sm:$0xff] }
 0xdfd   : > { %10058 = vmatpush.bf16.msra.mxu2 %v12920_v24  ;;  %10045 = vmatpush.bf16.msrb.mxu1 %v12912_v41 }
 0xe00   : > { %10021 = vmatpush.bf16.msra.mxu3 %v12894_v38  ;;  %10034 = vmatpush.bf16.msra.mxu0 %v12902_v43 }
 0xe01   : > { %10059 = vmatpush.bf16.msra.mxu2 %v12919_v44  ;;  %10046 = vmatpush.bf16.msrb.mxu1 %v12911_v56  ;;  %v12923_v56 = vld [vmem:[%s18274_s19 + $0x208] sm:$0xff] }
 0xe04   : > { %10022 = vmatpush.bf16.msra.mxu3 %v12893_v12  ;;  %10035 = vmatpush.bf16.msra.mxu0 %v12901_v6 }
 0xe05   : > { %10060 = vmatpush.bf16.msra.mxu2 %v12918_v49  ;;  %10047 = vmatpush.bf16.msrb.mxu1 %v12910_v63 }
 0xe08   : > { %10023 = vmatpush.bf16.msra.mxu3 %v12892_v62  ;;  %10036 = vmatpush.bf16.msra.mxu0 %v12900_v51 }
 0xe09   : > { %10061 = vmatpush.bf16.msra.mxu2 %v12917_v59  ;;  %10048 = vmatpush.bf16.msrb.mxu1 %v12909_v30 }
 0xe0c   : > { %10024 = vmatpush.bf16.msra.mxu3 %v12891_v28  ;;  %10037 = vmatpush.bf16.msra.mxu0 %v12899_v1 }
 0xe0d   : > { %10062 = vmatpush.bf16.msra.mxu2 %v12916_v34  ;;  %10049 = vmatpush.bf16.msrb.mxu1 %v12908_v52 }
 0xe10   : > { %10025 = vmatpush.bf16.msra.mxu3 %v12890_v55  ;;  %10038 = vmatpush.bf16.msra.mxu0 %v12898_v61  ;;  %v12925_v55 = vld [vmem:[%s18274_s19 + $0x218] sm:$0xff] }
 0xe11   : > { %10063 = vmatpush.bf16.msra.mxu2 %v12915_v45  ;;  %10050 = vmatpush.bf16.msrb.mxu1 %v12907_v47 }
 0xe15   : > { %10064 = vmatpush.bf16.msra.mxu2 %v12914_v31  ;;  %10051 = vmatpush.bf16.msrb.mxu1 %v12906_v39  ;;  %v12931_v39 = vld [vmem:[%s18275_s20 + $0x8] sm:$0xff] }
 0xe20   : > { %v18013_v17 = vpop.f32.mrf.mxu0 }
 0xe21   : > { %v9045_v37 = vpack.c.bf16 %v18013_v17, %v18013_v17  ;;  %v12926_v17 = vld [vmem:[%s18274_s19 + $0x220] sm:$0xff] }
 0xe23   : > { %v18015_v29 = vpop.f32.mrf.mxu1 }
 0xe24   : > { %v9062_v6 = vpack.c.bf16 %v18015_v29, %v18015_v29 }
 0xe26   : > { %v18029_v27 = vpop.f32.mrf.mxu3 }
 0xe27   : > { %v9028_v18 = vpack.c.bf16 %v18029_v27, %v18029_v27 }
 0xe28   : > { %v9043_v53 = vpop.f32.mrf.mxu0 }
 0xe29   : > { %v18034_v11 = vpop.f32.mrf.mxu2 }
 0xe2a   : > { %v9079_v50 = vpack.c.bf16 %v18034_v11, %v18034_v11 }
 0xe2b   : > { %v9060_v26 = vpop.f32.mrf.mxu1 }
 0xe2e   : > { %v9026_v4 = vpop.f32.mrf.mxu3 }
 0xe2f   : > { %v12924_v4 = vld [vmem:[%s18274_s19 + $0x210] sm:$0xff] }
 0xe30   : > { %v18066_v48 = vpop.f32.mrf.mxu0 }
 0xe31   : > { %v9077_v3 = vpop.f32.mrf.mxu2  ;;  %v9113_v51 = vpack.c.bf16 %v18066_v48, %v18066_v48  ;;  %v12922_v48 = vld [vmem:[%s18274_s19 + $0x200] sm:$0xff] }
 0xe33   : > { %v18071_v5 = vpop.f32.mrf.mxu1 }
 0xe36   : > { %v18079_v22 = vpop.f32.mrf.mxu3 }
 0xe37   : > { %v9096_v54 = vpack.c.bf16 %v18079_v22, %v18079_v22 }
 0xe38   : > { %v9111_v15 = vpop.f32.mrf.mxu0 }
 0xe39   : > { %v18087_v2 = vpop.f32.mrf.mxu2 }
 0xe3a   : > { %v9147_v30 = vpack.c.bf16 %v18087_v2, %v18087_v2  ;;  %v9130_v2 = vpack.c.bf16 %v18071_v5, %v18071_v5  ;;  %v12936_v5 = vld [vmem:[%s18275_s20 + $0x30] sm:$0xff] }
 0xe3b   : > { %v9128_v8 = vpop.f32.mrf.mxu1 }
 0xe3e   : > { %v9094_v58 = vpop.f32.mrf.mxu3 }
 0xe40   : > { %v18107_v13 = vpop.f32.mrf.mxu0 }
 0xe41   : > { %v9145_v20 = vpop.f32.mrf.mxu2 }
 0xe43   : > { %v9197_v57 = vpop.f32.mrf.mxu1 }
 0xe44   : > { %v9201_v42 = vpack.c.bf16 %v9197_v57, %v9197_v57 }
 0xe46   : > { %v9335_v23 = vshll.u32 %v9201_v42, 16  ;;  %v18127_v60 = vpop.f32.mrf.mxu3 }
 0xe47   : > { %v9164_v58 = vpack.c.bf16 %v18127_v60, %v18127_v60 }
 0xe48   : > { %v9373_v21 = vsel %vm18113_vm8, %v9028_v18, %v9335_v23  ;;  %v9179_v14 = vpop.f32.mrf.mxu0 }
 0xe49   : > { %9974 = vmatmul.bf16.vlgmr.msrb.gmra.mxu3 %v9373_v21  ;;  %v9211_v38 = vpop.f32.mrf.mxu2 }
 0xe4a   : > { %10070 = vmatpush.bf16.msrb.mxu3 %v12929_v36  ;;  %v9215_v35 = vpack.c.bf16 %v9211_v38, %v9211_v38 }
 0xe4b   : > { %v9199_v12 = vpop.f32.mrf.mxu1 }
 0xe4c   : > { %v9338_v25 = vshll.u32 %v9215_v35, 16  ;;  %v12933_v35 = vld [vmem:[%s18275_s20 + $0x18] sm:$0xff] }
 0xe4e   : > { %10071 = vmatpush.bf16.msrb.mxu3 %v12928_v16  ;;  %v9374_v62 = vsel %vm18113_vm8, %v9045_v37, %v9338_v25  ;;  %v9162_v19 = vpop.f32.mrf.mxu3  ;;  %v12937_v16 = vld [vmem:[%s18275_s20 + $0x38] sm:$0xff]  ;;  %v12932_v25 = vld [vmem:[%s18275_s20 + $0x10] sm:$0xff] }
 0xe4f   : > { %9987 = vmatmul.bf16.vlgmr.msrb.gmra.mxu0 %v9374_v62 }
 0xe50   : > { %v9239_v28 = vpop.f32.mrf.mxu0  ;;  %10150 = vmatpush.bf16.msrb.mxu0 %v12937_v16 }
 0xe51   : > { %v9213_v46 = vpop.f32.mrf.mxu2  ;;  %v9243_v7 = vpack.c.bf16 %v9239_v28, %v9239_v28 }
 0xe52   : > { %10072 = vmatpush.bf16.msrb.mxu3 %v12927_v10  ;;  %v12991_v10 = vld [vmem:[%s18276_s21 + $0x1] ss:$0 sm:$0xff] }
 0xe53   : > { %v9253_v27 = vpop.f32.mrf.mxu1  ;;  %v9344_v32 = vshll.u32 %v9243_v7, 16  ;;  %v12930_v46 = vld [vmem:[%s18275_s20] sm:$0xff] }
 0xe54   : > { %v9257_v33 = vpack.c.bf16 %v9253_v27, %v9253_v27  ;;  %10151 = vmatpush.bf16.msrb.mxu0 %v12936_v5 }
 0xe55   : > { %v9376_v26 = vsel %vm18113_vm8, %v9079_v50, %v9344_v32 }
 0xe56   : > { %v9347_v53 = vshll.u32 %v9257_v33, 16  ;;  %10073 = vmatpush.bf16.msrb.mxu3 %v12926_v17  ;;  %v9225_v43 = vpop.f32.mrf.mxu3  ;;  %10013 = vmatmul.bf16.vlgmr.msrb.gmra.mxu2 %v9376_v26 }
 0xe57   : > { %v9229_v40 = vpack.c.bf16 %v9225_v43, %v9225_v43 }
 0xe58   : > { %v9377_v24 = vsel %vm18113_vm8, %v9096_v54, %v9347_v53  ;;  %v9241_v0 = vpop.f32.mrf.mxu0 }
 0xe59   : > { %10026 = vmatmul.bf16.vlgmr.msra.gmra.mxu3 %v9377_v24  ;;  %v9267_v11 = vpop.f32.mrf.mxu2  ;;  %v9341_v3 = vshll.u32 %v9229_v40, 16 }
 0xe5a   : > { %10074 = vmatpush.bf16.msrb.mxu3 %v12925_v55  ;;  %v9271_v44 = vpack.c.bf16 %v9267_v11, %v9267_v11 }
 0xe5b   : > { %v9255_v41 = vpop.f32.mrf.mxu1  ;;  %v9375_v22 = vsel %vm18113_vm8, %v9062_v6, %v9341_v3 }
 0xe5c   : > { %v9350_v49 = vshll.u32 %v9271_v44, 16  ;;  %10000 = vmatmul.bf16.vlgmr.msra.gmra.mxu1 %v9375_v22 }
 0xe5e   : > { %10075 = vmatpush.bf16.msrb.mxu3 %v12924_v4  ;;  %v9378_v1 = vsel %vm18113_vm8, %v9113_v51, %v9350_v49  ;;  %v9227_v29 = vpop.f32.mrf.mxu3 }
 0xe5f   : > { %10039 = vmatmul.bf16.vlgmr.msra.gmra.mxu0 %v9378_v1  ;;  %v12992_v1 = vld [vmem:[%s18276_s21 + $0x3] ss:$0 sm:$0xff]  ;;  %v12993_v29 = vld [vmem:[%s18276_s21 + $0x2] ss:$0 sm:$0xff] }
 0xe60   : > { %v9295_v59 = vpop.f32.mrf.mxu0 }
 0xe61   : > { %v9269_v15 = vpop.f32.mrf.mxu2  ;;  %v9299_v8 = vpack.c.bf16 %v9295_v59, %v9295_v59 }
 0xe62   : > { %10076 = vmatpush.bf16.msrb.mxu3 %v12923_v56 }
 0xe63   : > { %v9309_v63 = vpop.f32.mrf.mxu1  ;;  %v9356_v34 = vshll.u32 %v9299_v8, 16 }
 0xe64   : > { %v9313_v61 = vpack.c.bf16 %v9309_v63, %v9309_v63 }
 0xe65   : > { %v9380_v20 = vsel %vm18113_vm8, %v9147_v30, %v9356_v34 }
 0xe66   : > { %v9359_v45 = vshll.u32 %v9313_v61, 16  ;;  %10077 = vmatpush.bf16.msrb.mxu3 %v12922_v48  ;;  %v9281_v57 = vpop.f32.mrf.mxu3  ;;  %10065 = vmatmul.bf16.vlgmr.msra.gmra.mxu2 %v9380_v20 }
 0xe67   : > { %v9285_v42 = vpack.c.bf16 %v9281_v57, %v9281_v57 }
 0xe68   : > { %v9381_v52 = vsel %vm18113_vm8, %v9164_v58, %v9359_v45  ;;  %v9297_v36 = vpop.f32.mrf.mxu0 }
 0xe69   : > { %10078 = vmatmul.bf16.vlgmr.msrb.gmra.mxu3 %v9381_v52  ;;  %v9330_v18 = vpop.f32.mrf.mxu2  ;;  %v9353_v31 = vshll.u32 %v9285_v42, 16 }
 0xe6a   : > { %v9383_v23 = vrot.slane %v9330_v18, 7 }
 0xe6b   : > { %v9311_v21 = vpop.f32.mrf.mxu1  ;;  %v9379_v47 = vsel %vm18113_vm8, %v9130_v2, %v9353_v31 }
 0xe6c   : > { %v9386_v60 = vsel %vm9370_vm6, %v18107_v13, %v9383_v23  ;;  %10052 = vmatmul.bf16.vlgmr.msrb.gmra.mxu1 %v9379_v47  ;;  %v12935_v13 = vld [vmem:[%s18275_s20 + $0x28] sm:$0xff] }
 0xe6d   : > { %10152 = vmatpush.bf16.msrb.mxu0 %v12935_v13  ;;  %v9388_v59 = vadd.f32 %v12992_v1, %v9386_v60 }
 0xe6e   : > { %v9283_v38 = vpop.f32.mrf.mxu3 }
 0xe71   : > { %v9332_v14 = vpop.f32.mrf.mxu2  ;;  %10153 = vmatpush.bf16.msrb.mxu0 %v12934_v9 }
 0xe75   : > { %10154 = vmatpush.bf16.msrb.mxu0 %v12933_v35 }
 0xe79   : > { %10155 = vmatpush.bf16.msrb.mxu0 %v12932_v25 }
 0xe7d   : > { %10156 = vmatpush.bf16.msrb.mxu0 %v12931_v39 }
 0xe81   : > { %10157 = vmatpush.bf16.msrb.mxu0 %v12930_v46 }
 0xecc   : > { %v9975_v12 = vpop.f32.mrf.mxu3  ;;  %v9988_v37 = vpop.f32.mrf.mxu0 }
 0xecd   : > { %v9976_v28 = vadd.f32 %v12991_v10, %v9975_v12 }
 0xecf   : > { %v9989_v27 = vadd.f32 %v9988_v37, %v9976_v28 }
 0xed4   : > { %v9977_v62 = vpop.f32.mrf.mxu3  ;;  %v9990_v19 = vpop.f32.mrf.mxu0 }
 0xed9   : > { %v10001_v17 = vpop.f32.mrf.mxu1  ;;  %v10014_v7 = vpop.f32.mrf.mxu2 }
 0xeda   : > { %v10002_v32 = vadd.f32 %v10001_v17, %v9989_v27 }
 0xedc   : > { %v10027_v33 = vpop.f32.mrf.mxu3  ;;  %v10040_v50 = vpop.f32.mrf.mxu0  ;;  %v10015_v54 = vadd.f32 %v10014_v7, %v10002_v32 }
 0xede   : > { %v10028_v43 = vadd.f32 %v10027_v33, %v10015_v54 }
 0xee0   : > { %v10041_v40 = vadd.f32 %v10040_v50, %v10028_v43 }
 0xee1   : > { %v10003_v53 = vpop.f32.mrf.mxu1  ;;  %v10016_v55 = vpop.f32.mrf.mxu2 }
 0xee4   : > { %v10029_v26 = vpop.f32.mrf.mxu3  ;;  %v10042_v24 = vpop.f32.mrf.mxu0 }
 0xee9   : > { %v10053_v11 = vpop.f32.mrf.mxu1  ;;  %v10066_v0 = vpop.f32.mrf.mxu2 }
 0xeea   : > { %v10054_v4 = vadd.f32 %v10053_v11, %v10041_v40 }
 0xeec   : > { %v10079_v44 = vpop.f32.mrf.mxu3  ;;  %v10067_v6 = vadd.f32 %v10066_v0, %v10054_v4 }
 0xeee   : > { %v10080_v3 = vadd.f32 %v10079_v44, %v10067_v6 }
 0xef0   : > { %v10083_v41 = vmax.f32 %v10080_v3, 0.0 }
 0xef1   : > { %v10055_v51 = vpop.f32.mrf.mxu1  ;;  %v10068_v49 = vpop.f32.mrf.mxu2 }
 0xef2   : > { %v10084_v22 = vpack.c.bf16 %v10083_v41, %v10083_v41 }
 0xef4   : > { %v10081_v56 = vpop.f32.mrf.mxu3  ;;  %10158 = vmatmul.bf16.vlgmr.msrb.gmra.mxu0 %v10084_v22 }
 0xf71   : > { %v10159_v15 = vpop.f32.mrf.mxu0 }
 0xf72   : > { %v10160_v48 = vadd.f32 %v12993_v29, %v10159_v15 }
 0xf74   : > { %v10163_v8 = vadd.f32 %v10160_v48, %v9388_v59 }
 0xf76   : > { %v10164_v63 = vmax.f32 %v10163_v8, 0.0 }
 0xf78   : > { %v10165_v61 = vpack.c.bf16 %v10164_v63, %v10164_v63 }
 0xf79   : > { %v10161_v30 = vpop.f32.mrf.mxu0 }
 0xf7a   : > { %v10166_v34 = vunpack.c.l.bf16 %v10165_v61 }
 0xf7c   : > { %10167 = vst [vmem:[%s703_s8] sm:$0x3] %v10166_v34 }
 0xf7d   : > { %13025 = shalt.err (!%p13022_p3)
}
 0xf7e   : > { %12938 = dma.vmem_to_hbm [thread:$0]  (%p13220_p5), %s10182_s4, 32, %s10184_s25, %s10169_s24  }
 0xf7f PF: > { %s19226_s8 = sld [smem:[#allocation7_spill]] }
 0xf80   : > { %s19227_s1 = sld [smem:[#allocation5_spill]] }
 0xf85   : > { %p12944_p4 = scmp.ge.s32.totalorder %s19226_s8, 2 }
 0xf86   : > { %s10195_s10 = sand.u32 1, %s19227_s1  }
 0xf87   : > { %p12941_p7 = pnand %p12944_p4, %p13224_p6  ;;  %s10196_s27 = scalar_lea.sflag [#allocation3], %s10195_s10 }
 0xf89   : > { %p12942_p8 = pneg %p12941_p7 }
 0xf8b   : > { %13043 = dma.done.wait (%p12942_p8), %s10196_s27, 32  }
 0xf8c   : > { %13045 = vsyncadd (%p12942_p8), %s10196_s27, 4294967264  ;;  %s19229_s25 = sld [smem:[#allocation8_spill]]  ;;  %s19232_s4 = smov %s13052_s30 }
 0xf8d   : > { %s19230_s5 = sld [smem:[#allocation6_spill]] }
 0xf8e   : > { %s19231_s24 = sld [smem:[#allocation9_spill]] }
 0xf92   : > { %p33_p9 = scmp.ge.s32.totalorder %s19229_s25, 4  }
 0xf93   : > { %s19233_s30 = smov %s19230_s5 }
 0xf94   :  { %35 = sbr.rel (!%p33_p9) target bundleno = 15 (0xf), region = 179 }
 0xf99   :  { %10202 = vsyncpa [#allocation3], 1 }
 0xf9a   :  { %10204 = vsyncpa [#allocation3 + $0x1], 1 }

</bundles_post_ra>
